<compile_context>
chip_gen: v5e
topology: v5e:2x2
jax: 0.10.0
libtpu: 0.0.40
codegen_flags: <defaults>
</compile_context>

<pallas_src>
import jax
import jax.numpy as jnp
from jax import lax
from jax.experimental import pallas as pl
from jax.experimental.pallas import tpu as pltpu

EPS = 1e-5


# ---------------------------------------------------------------------------
# Chip-adaptive sizing helpers
# ---------------------------------------------------------------------------
def _vmem_limit_bytes():
    """~75% of this chip's VMEM (96 MiB on v5e/v6e, 48 MiB on v7x), clamped."""
    try:
        cap = int(pltpu.get_tpu_info().vmem_capacity_bytes)
        return max(32 * 1024 * 1024, min(cap * 3 // 4, 96 * 1024 * 1024))
    except Exception:
        return 48 * 1024 * 1024


def _per_image_vmem_bytes(H, W, cin, c1, cout):
    """Conservative per-image VMEM footprint of the busiest phases (1 & 2)."""
    hw = H * W
    cf = c1 + cout
    return (hw * cin * 4 * 2            # x tile f32, double-buffered
            + hw * cf * 2 * 2           # fused y1/ys bf16 outputs, double-buffered
            + hw * cf * 4               # fused f32 matmul result value
            + hw * c1 * 2 * 2           # y2 bf16 output, double-buffered
            + (H + 2) * (W + 2) * c1 * 4    # f32 padded scratch
            + hw * c1 * 4 * 2)          # conv2 f32 accumulator + tap staging


def _pick_tn(N, H, W, per_image_bytes, vmem_budget):
    """Largest divisor of N that fits the VMEM budget, capped so a single grid
    step stays around a few MXU passes (keeps >1 step for pipelining/megacore
    on realistic batch sizes)."""
    cap_mem = max(1, vmem_budget // max(per_image_bytes, 1))
    cap_rows = max(1, 4096 // (H * W))
    cap = max(1, min(cap_mem, cap_rows))
    tn = 1
    for d in range(1, N + 1):
        if N % d == 0 and d <= cap:
            tn = d
    return tn


def _compiler_params(vmem_limit):
    # TODO(synk): pltpu.CORE_PARALLEL on v7x for explicit 2-TC sharding.
    return pltpu.CompilerParams(
        dimension_semantics=("parallel",),
        vmem_limit_bytes=int(vmem_limit),
    )


# ---------------------------------------------------------------------------
# Phase kernels
# ---------------------------------------------------------------------------
def _stats(y, c):
    """Partial BN stats for one tile (f32): concat(sum, sumsq) -> (1, 1, 2C)."""
    s = jnp.sum(y, axis=0, keepdims=True)
    q = jnp.sum(y * y, axis=0, keepdims=True)
    return jnp.concatenate([s, q], axis=1).reshape(1, 1, 2 * c)


def _phase1_kernel(x_ref, wf_ref, y1_ref, ys_ref, st1_ref, sts_ref):
    """Fused conv1 (1x1) + shortcut conv (1x1) as ONE matmul, bf16 outputs,
    f32 partial BN stats."""
    TN, H, W, Cin = x_ref.shape
    C1 = y1_ref.shape[-1]
    Cout = ys_ref.shape[-1]
    M = TN * H * W

    x = x_ref[...].reshape(M, Cin).astype(jnp.bfloat16)
    yf = jnp.dot(x, wf_ref[...], preferred_element_type=jnp.float32)  # (M, C1+Cout)
    y1 = yf[:, :C1]
    ys = yf[:, C1:]

    y1_ref[...] = y1.astype(jnp.bfloat16).reshape(TN, H, W, C1)
    ys_ref[...] = ys.astype(jnp.bfloat16).reshape(TN, H, W, Cout)
    st1_ref[...] = _stats(y1, C1)
    sts_ref[...] = _stats(ys, Cout)


def _phase2_kernel(y1_ref, s1_ref, b1_ref, w2_ref, y2_ref, st2_ref, pad_ref):
    """BN1 (folded scale/bias) + ReLU + 3x3 conv as 9 accumulated shifted
    matmuls over a 1-px zero-halo padded scratch."""
    TN, H, W, C1 = y1_ref.shape
    M = TN * H * W

    a1 = jnp.maximum(
        y1_ref[...].astype(jnp.float32).reshape(M, C1) * s1_ref[...]
        + b1_ref[...], 0.0)

    # Zero only the 1-px halo, then write the interior.  Re-zeroed every step
    # on purpose: hoisting behind pl.when(program_id == 0) is unsafe when the
    # "parallel" batch axis is sharded across cores (each core has its own
    # scratch and only one of them sees step 0).
    zrow = jnp.zeros((TN, 1, W + 2, C1), jnp.float32)
    zcol = jnp.zeros((TN, H, 1, C1), jnp.float32)
    pad_ref[:, 0:1, :, :] = zrow
    pad_ref[:, H + 1:H + 2, :, :] = zrow
    pad_ref[:, 1:H + 1, 0:1, :] = zcol
    pad_ref[:, 1:H + 1, W + 1:W + 2, :] = zcol
    pad_ref[:, 1:H + 1, 1:W + 1, :] = a1.reshape(TN, H, W, C1)

    # 3x3 conv: 9 shifted (M, C1) x (C1, C1) MXU matmuls accumulated in f32.
    acc = None
    for t in range(9):
        dy, dx = divmod(t, 3)
        tap = pad_ref[:, dy:dy + H, dx:dx + W, :].reshape(M, C1)
        part = jnp.dot(tap.astype(jnp.bfloat16), w2_ref[t],
                       preferred_element_type=jnp.float32)
        acc = part if acc is None else acc + part

    y2_ref[...] = acc.astype(jnp.bfloat16).reshape(TN, H, W, C1)
    st2_ref[...] = _stats(acc, C1)


def _phase3_kernel(y2_ref, s2_ref, b2_ref, w3_ref, y3_ref, st3_ref):
    """BN2 + ReLU + conv3 (1x1), bf16 output + f32 partial BN stats."""
    TN, H, W, C1 = y2_ref.shape
    Cout = w3_ref.shape[1]
    M = TN * H * W

    a2 = jnp.maximum(
        y2_ref[...].astype(jnp.float32).reshape(M, C1) * s2_ref[...]
        + b2_ref[...], 0.0).astype(jnp.bfloat16)
    y3 = jnp.dot(a2, w3_ref[...], preferred_element_type=jnp.float32)
    y3_ref[...] = y3.astype(jnp.bfloat16).reshape(TN, H, W, Cout)
    st3_ref[...] = _stats(y3, Cout)


def _phase4_kernel(y3_ref, ys_ref, s3_ref, b3_ref, ss_ref, bs_ref, o_ref):
    """BN3 + BN_shortcut + residual add + final ReLU (bf16 in, f32 out)."""
    TN, H, W, Cout = y3_ref.shape
    M = TN * H * W
    y3 = y3_ref[...].astype(jnp.float32).reshape(M, Cout) * s3_ref[...] + b3_ref[...]
    ys = ys_ref[...].astype(jnp.float32).reshape(M, Cout) * ss_ref[...] + bs_ref[...]
    o_ref[...] = jnp.maximum(y3 + ys, 0.0).reshape(TN, H, W, Cout)


# ---------------------------------------------------------------------------
# Host-side glue
# ---------------------------------------------------------------------------
def _fold_bn(stats, gamma, beta, m_total):
    """Reduce per-tile (sum, sumsq) -> folded BN scale/bias (train-mode stats).
    NOTE: E[x^2]-E[x]^2 in f32; acceptable here since conv outputs are zero-ish
    mean (no bias, ~N(0,1) inputs)."""
    c = gamma.shape[-1]
    tot = jnp.sum(stats[:, 0, :], axis=0)             # (2C,)
    mean = tot[:c] / m_total
    var = tot[c:] / m_total - mean * mean             # biased variance
    scale = gamma.reshape(c) * lax.rsqrt(var + EPS)
    bias = beta.reshape(c) - mean * scale
    return scale.reshape(1, c), bias.reshape(1, c)


@jax.jit
def bottleneck_forward_nhwc(x_nhwc, params):
    """x_nhwc: (N, H, W, Cin) f32 -> (N, H, W, 4*out_channels) f32."""
    N, H, W, Cin = x_nhwc.shape
    w1, w2, w3, ws = params["w1"], params["w2"], params["w3"], params["ws"]
    C1 = w1.shape[1]
    Cout = w3.shape[1]

    # Pre-cast / pre-pack weights to bf16 once (outside the grid loops):
    #   wf  : fused [conv1 | shortcut] 1x1 weight -> one MXU pass over x.
    #   w2t : 3x3 weight as 9 (C1, C1) taps for the accumulated-matmul conv.
    wf = jnp.concatenate([w1, ws], axis=1).astype(jnp.bfloat16)   # (Cin, C1+Cout)
    w2t = w2.reshape(9, C1, C1).astype(jnp.bfloat16)
    w3b = w3.astype(jnp.bfloat16)

    vmem_limit = _vmem_limit_bytes()
    TN = _pick_tn(N, H, W, _per_image_vmem_bytes(H, W, Cin, C1, Cout),
                  vmem_limit // 2)
    G = N // TN
    assert TN * G == N, "batch tile must divide N exactly (BN statistics)"
    grid = (G,)
    m_total = float(N * H * W)
    cparams = _compiler_params(vmem_limit)

    act_spec = lambda C: pl.BlockSpec((TN, H, W, C), lambda i: (i, 0, 0, 0))
    stat_spec = lambda C: pl.BlockSpec((1, 1, 2 * C), lambda i: (i, 0, 0))

    def full_spec(shape):
        nd = len(shape)
        return pl.BlockSpec(shape, lambda i: (0,) * nd)

    # --- phase 1: fused conv1 + shortcut conv (one matmul) + partial BN stats
    y1_raw, ys_raw, st1, sts = pl.pallas_call(
        _phase1_kernel,
        grid=grid,
        in_specs=[act_spec(Cin), full_spec(wf.shape)],
        out_specs=(act_spec(C1), act_spec(Cout), stat_spec(C1), stat_spec(Cout)),
        out_shape=(jax.ShapeDtypeStruct((N, H, W, C1), jnp.bfloat16),
                   jax.ShapeDtypeStruct((N, H, W, Cout), jnp.bfloat16),
                   jax.ShapeDtypeStruct((G, 1, 2 * C1), jnp.float32),
                   jax.ShapeDtypeStruct((G, 1, 2 * Cout), jnp.float32)),
        compiler_params=cparams,
    )(x_nhwc, wf)
    scale1, bias1 = _fold_bn(st1, params["g1"], params["b1"], m_total)
    scale_s, bias_s = _fold_bn(sts, params["gs"], params["bs"], m_total)

    # --- phase 2: BN1 + ReLU + 3x3 conv (9 accumulated shifted matmuls) ------
    y2_raw, st2 = pl.pallas_call(
        _phase2_kernel,
        grid=grid,
        in_specs=[act_spec(C1), full_spec((1, C1)), full_spec((1, C1)),
                  full_spec((9, C1, C1))],
        out_specs=(act_spec(C1), stat_spec(C1)),
        out_shape=(jax.ShapeDtypeStruct((N, H, W, C1), jnp.bfloat16),
                   jax.ShapeDtypeStruct((G, 1, 2 * C1), jnp.float32)),
        scratch_shapes=[pltpu.VMEM((TN, H + 2, W + 2, C1), jnp.float32)],
        compiler_params=cparams,
    )(y1_raw, scale1, bias1, w2t)
    scale2, bias2 = _fold_bn(st2, params["g2"], params["b2"], m_total)

    # --- phase 3: BN2 + ReLU + conv3 (1x1) -----------------------------------
    y3_raw, st3 = pl.pallas_call(
        _phase3_kernel,
        grid=grid,
        in_specs=[act_spec(C1), full_spec((1, C1)), full_spec((1, C1)),
                  full_spec((C1, Cout))],
        out_specs=(act_spec(Cout), stat_spec(Cout)),
        out_shape=(jax.ShapeDtypeStruct((N, H, W, Cout), jnp.bfloat16),
                   jax.ShapeDtypeStruct((G, 1, 2 * Cout), jnp.float32)),
        compiler_params=cparams,
    )(y2_raw, scale2, bias2, w3b)
    scale3, bias3 = _fold_bn(st3, params["g3"], params["b3"], m_total)

    # --- phase 4: BN3 + BN_shortcut + add + ReLU (f32 out for torch parity) --
    out = pl.pallas_call(
        _phase4_kernel,
        grid=grid,
        in_specs=[act_spec(Cout), act_spec(Cout),
                  full_spec((1, Cout)), full_spec((1, Cout)),
                  full_spec((1, Cout)), full_spec((1, Cout))],
        out_specs=act_spec(Cout),
        out_shape=jax.ShapeDtypeStruct((N, H, W, Cout), jnp.float32),
        compiler_params=cparams,
    )(y3_raw, ys_raw, scale3, bias3, scale_s, bias_s)
    return out


def bottleneck_forward(x_nchw, params):
    """Thin NCHW compatibility wrapper (torch layout). Prefer the NHWC entry."""
    x_nhwc = jnp.transpose(x_nchw, (0, 2, 3, 1))
    out = bottleneck_forward_nhwc(x_nhwc, params)
    return jnp.transpose(out, (0, 3, 1, 2))


# ---------------------------------------------------------------------------
# Pure-JAX reference (f32) for a silent correctness check.
# ---------------------------------------------------------------------------
def _ref_forward_nhwc(x, params):
    def bn(y, g, b):
        mean = jnp.mean(y, axis=(0, 1, 2), keepdims=True)
        var = jnp.mean((y - mean) ** 2, axis=(0, 1, 2), keepdims=True)
        return (y - mean) * lax.rsqrt(var + EPS) * g + b

    def conv1x1(y, w):
        return jnp.einsum("nhwc,cd->nhwd", y, w)

    y = jnp.maximum(bn(conv1x1(x, params["w1"]), params["g1"], params["b1"]), 0.0)
    y = lax.conv_general_dilated(
        y, params["w2"], window_strides=(1, 1), padding="SAME",
        dimension_numbers=("NHWC", "HWIO", "NHWC"))
    y = jnp.maximum(bn(y, params["g2"], params["b2"]), 0.0)
    y = bn(conv1x1(y, params["w3"]), params["g3"], params["b3"])
    s = bn(conv1x1(x, params["ws"]), params["gs"], params["bs"])
    return jnp.maximum(y + s, 0.0)


def make_params(key, in_channels, out_channels):
    """residual_function: 1x1(in->out), 3x3(out->out), 1x1(out->4*out);
    shortcut: 1x1(in->4*out).  BN gamma=1, beta=0 (torch defaults)."""
    c1 = out_channels
    cout = out_channels * 4  # BottleNeck.expansion
    k1, k2, k3, k4 = jax.random.split(key, 4)
    return {
        "w1": 0.1 * jax.random.normal(k1, (in_channels, c1), jnp.float32),
        "w2": 0.1 * jax.random.normal(k2, (3, 3, c1, c1), jnp.float32),  # HWIO
        "w3": 0.1 * jax.random.normal(k3, (c1, cout), jnp.float32),
        "ws": 0.1 * jax.random.normal(k4, (in_channels, cout), jnp.float32),
        "g1": jnp.ones((1, c1), jnp.float32), "b1": jnp.zeros((1, c1), jnp.float32),
        "g2": jnp.ones((1, c1), jnp.float32), "b2": jnp.zeros((1, c1), jnp.float32),
        "g3": jnp.ones((1, cout), jnp.float32), "b3": jnp.zeros((1, cout), jnp.float32),
        "gs": jnp.ones((1, cout), jnp.float32), "bs": jnp.zeros((1, cout), jnp.float32),
    }


if __name__ == "__main__":
    key = jax.random.PRNGKey(0)
    kx, kp = jax.random.split(key)

    N, Cin, H, W = 2, 4, 16, 16
    out_channels = 4                    # -> Cout = 16 (expansion 4), stride = 1
    params = make_params(kp, Cin, out_channels)

    # Torch layout input (NCHW); the wrapper transposes once to the NHWC-native
    # kernel path.
    x_nchw = jax.random.normal(kx, (N, Cin, H, W), jnp.float32)

    out_nchw = jax.block_until_ready(bottleneck_forward(x_nchw, params))
    assert out_nchw.shape == (N, out_channels * 4, H, W)

    x_nhwc = jnp.transpose(x_nchw, (0, 2, 3, 1))
    ref_nhwc = jax.block_until_ready(_ref_forward_nhwc(x_nhwc, params))
    ref_nchw = jnp.transpose(ref_nhwc, (0, 3, 1, 2))

    rel_err = float(jnp.linalg.norm(out_nchw - ref_nchw) /
                    (jnp.linalg.norm(ref_nchw) + 1e-12))
    # bf16 MXU operands + bf16 inter-phase intermediates (f32 accumulation and
    # f32 BN statistics) -> loosened tolerance vs the f32 reference.
    assert rel_err < 5e-2, rel_err

    print("KERNEL_OK")
</pallas_src>

<mosaic_0001>
module attributes {stable_mosaic.version = 11 : i64} {
  func.func @_phase1_kernel(%arg0: i32, %arg1: memref<2x16x16x4xf32, #tpu.memory_space<vmem>>, %arg2: memref<4x20xbf16, #tpu.memory_space<vmem>>, %arg3: memref<2x16x16x4xbf16, #tpu.memory_space<vmem>>, %arg4: memref<2x16x16x16xbf16, #tpu.memory_space<vmem>>, %arg5: memref<1x1x8xf32, #tpu.memory_space<vmem>>, %arg6: memref<1x1x32xf32, #tpu.memory_space<vmem>>) attributes {dimension_semantics = [#tpu.dimension_semantics<parallel>], iteration_bounds = array<i64: 1>, scalar_prefetch = 0 : i64, scratch_operands = 0 : i64, tpu.core_type = #tpu.core_type<tc>, window_params = [{transform_indices = @transform_0, window_bounds = array<i64: 2, 16, 16, 4>}, {pipeline_mode = #tpu.pipeline_mode<synchronous>, transform_indices = @transform_1, window_bounds = array<i64: 4, 20>}, {transform_indices = @transform_2, window_bounds = array<i64: 2, 16, 16, 4>}, {transform_indices = @transform_3, window_bounds = array<i64: 2, 16, 16, 16>}, {transform_indices = @transform_4, window_bounds = array<i64: 1, 1, 8>}, {transform_indices = @transform_5, window_bounds = array<i64: 1, 1, 32>}]} {
    %c0 = arith.constant 0 : index
    %c0_0 = arith.constant 0 : index
    %c0_1 = arith.constant 0 : index
    %c0_2 = arith.constant 0 : index
    %0 = vector.load %arg1[%c0, %c0_0, %c0_1, %c0_2] : memref<2x16x16x4xf32, #tpu.memory_space<vmem>>, vector<2x16x16x4xf32>
    %1 = vector.shape_cast %0 : vector<2x16x16x4xf32> to vector<512x4xf32>
    %2 = arith.truncf %1 : vector<512x4xf32> to vector<512x4xbf16>
    %c0_3 = arith.constant 0 : index
    %c0_4 = arith.constant 0 : index
    %3 = vector.load %arg2[%c0_3, %c0_4] : memref<4x20xbf16, #tpu.memory_space<vmem>>, vector<4x20xbf16>
    %cst = arith.constant dense<0.000000e+00> : vector<512x20xf32>
    %4 = tpu.matmul %2, %3, %cst {dimension_numbers = #tpu.dot_dimension_numbers<[1], [0], [0], [1], [0, 0, 1, 1], [], []>} : vector<512x4xbf16>, vector<4x20xbf16>, vector<512x20xf32> -> vector<512x20xf32>
    %5 = vector.extract_strided_slice %4 {offsets = [0, 0], sizes = [512, 4], strides = [1, 1]} : vector<512x20xf32> to vector<512x4xf32>
    %6 = vector.extract_strided_slice %4 {offsets = [0, 4], sizes = [512, 16], strides = [1, 1]} : vector<512x20xf32> to vector<512x16xf32>
    %7 = arith.truncf %5 : vector<512x4xf32> to vector<512x4xbf16>
    %8 = vector.shape_cast %7 : vector<512x4xbf16> to vector<2x16x16x4xbf16>
    %c0_5 = arith.constant 0 : index
    %c0_6 = arith.constant 0 : index
    %c0_7 = arith.constant 0 : index
    %c0_8 = arith.constant 0 : index
    %9 = vector.load %arg3[%c0_5, %c0_6, %c0_7, %c0_8] : memref<2x16x16x4xbf16, #tpu.memory_space<vmem>>, vector<2x16x16x4xbf16>
    tpu.vector_store %arg3[%c0_5, %c0_6, %c0_7, %c0_8], %8 {strides = array<i32>} : memref<2x16x16x4xbf16, #tpu.memory_space<vmem>>, vector<2x16x16x4xbf16>,
    %10 = arith.truncf %6 : vector<512x16xf32> to vector<512x16xbf16>
    %11 = vector.shape_cast %10 : vector<512x16xbf16> to vector<2x16x16x16xbf16>
    %c0_9 = arith.constant 0 : index
    %c0_10 = arith.constant 0 : index
    %c0_11 = arith.constant 0 : index
    %c0_12 = arith.constant 0 : index
    %12 = vector.load %arg4[%c0_9, %c0_10, %c0_11, %c0_12] : memref<2x16x16x16xbf16, #tpu.memory_space<vmem>>, vector<2x16x16x16xbf16>
    tpu.vector_store %arg4[%c0_9, %c0_10, %c0_11, %c0_12], %11 {strides = array<i32>} : memref<2x16x16x16xbf16, #tpu.memory_space<vmem>>, vector<2x16x16x16xbf16>,
    %cst_13 = arith.constant dense<0.000000e+00> : vector<4xf32>
    %13 = vector.multi_reduction <add>, %5, %cst_13 [0] : vector<512x4xf32> to vector<4xf32>
    %14 = vector.shape_cast %13 : vector<4xf32> to vector<1x4xf32>
    %15 = arith.mulf %5, %5 : vector<512x4xf32>
    %cst_14 = arith.constant dense<0.000000e+00> : vector<4xf32>
    %16 = vector.multi_reduction <add>, %15, %cst_14 [0] : vector<512x4xf32> to vector<4xf32>
    %17 = vector.shape_cast %16 : vector<4xf32> to vector<1x4xf32>
    %18 = tpu.concatenate %14, %17 in 1 : vector<1x4xf32>, vector<1x4xf32> -> vector<1x8xf32>
    %19 = vector.shape_cast %18 : vector<1x8xf32> to vector<1x1x8xf32>
    %c0_15 = arith.constant 0 : index
    %c0_16 = arith.constant 0 : index
    %c0_17 = arith.constant 0 : index
    %20 = vector.load %arg5[%c0_15, %c0_16, %c0_17] : memref<1x1x8xf32, #tpu.memory_space<vmem>>, vector<1x1x8xf32>
    tpu.vector_store %arg5[%c0_15, %c0_16, %c0_17], %19 {strides = array<i32>} : memref<1x1x8xf32, #tpu.memory_space<vmem>>, vector<1x1x8xf32>,
    %cst_18 = arith.constant dense<0.000000e+00> : vector<16xf32>
    %21 = vector.multi_reduction <add>, %6, %cst_18 [0] : vector<512x16xf32> to vector<16xf32>
    %22 = vector.shape_cast %21 : vector<16xf32> to vector<1x16xf32>
    %23 = arith.mulf %6, %6 : vector<512x16xf32>
    %cst_19 = arith.constant dense<0.000000e+00> : vector<16xf32>
    %24 = vector.multi_reduction <add>, %23, %cst_19 [0] : vector<512x16xf32> to vector<16xf32>
    %25 = vector.shape_cast %24 : vector<16xf32> to vector<1x16xf32>
    %26 = tpu.concatenate %22, %25 in 1 : vector<1x16xf32>, vector<1x16xf32> -> vector<1x32xf32>
    %27 = vector.shape_cast %26 : vector<1x32xf32> to vector<1x1x32xf32>
    %c0_20 = arith.constant 0 : index
    %c0_21 = arith.constant 0 : index
    %c0_22 = arith.constant 0 : index
    %28 = vector.load %arg6[%c0_20, %c0_21, %c0_22] : memref<1x1x32xf32, #tpu.memory_space<vmem>>, vector<1x1x32xf32>
    tpu.vector_store %arg6[%c0_20, %c0_21, %c0_22], %27 {strides = array<i32>} : memref<1x1x32xf32, #tpu.memory_space<vmem>>, vector<1x1x32xf32>,
    return
  }
  func.func @transform_0(%arg0: i32) -> (i32, i32, i32, i32) {
    %c0_i32 = arith.constant 0 : i32
    %c0_i32_0 = arith.constant 0 : i32
    %c0_i32_1 = arith.constant 0 : i32
    %c0_i32_2 = arith.constant 0 : i32
    return %arg0, %c0_i32, %c0_i32_0, %c0_i32_1 : i32, i32, i32, i32
  }
  func.func @transform_1(%arg0: i32) -> (i32, i32) {
    %c0_i32 = arith.constant 0 : i32
    %c0_i32_0 = arith.constant 0 : i32
    %c0_i32_1 = arith.constant 0 : i32
    return %c0_i32, %c0_i32_0 : i32, i32
  }
  func.func @transform_2(%arg0: i32) -> (i32, i32, i32, i32) {
    %c0_i32 = arith.constant 0 : i32
    %c0_i32_0 = arith.constant 0 : i32
    %c0_i32_1 = arith.constant 0 : i32
    %c0_i32_2 = arith.constant 0 : i32
    return %arg0, %c0_i32, %c0_i32_0, %c0_i32_1 : i32, i32, i32, i32
  }
  func.func @transform_3(%arg0: i32) -> (i32, i32, i32, i32) {
    %c0_i32 = arith.constant 0 : i32
    %c0_i32_0 = arith.constant 0 : i32
    %c0_i32_1 = arith.constant 0 : i32
    %c0_i32_2 = arith.constant 0 : i32
    return %arg0, %c0_i32, %c0_i32_0, %c0_i32_1 : i32, i32, i32, i32
  }
  func.func @transform_4(%arg0: i32) -> (i32, i32, i32) {
    %c0_i32 = arith.constant 0 : i32
    %c0_i32_0 = arith.constant 0 : i32
    %c0_i32_1 = arith.constant 0 : i32
    return %arg0, %c0_i32, %c0_i32_0 : i32, i32, i32
  }
  func.func @transform_5(%arg0: i32) -> (i32, i32, i32) {
    %c0_i32 = arith.constant 0 : i32
    %c0_i32_0 = arith.constant 0 : i32
    %c0_i32_1 = arith.constant 0 : i32
    return %arg0, %c0_i32, %c0_i32_0 : i32, i32, i32
  }
}

module attributes {stable_mosaic.version = 11 : i64} {
  func.func @_phase3_kernel(%arg0: i32, %arg1: memref<2x16x16x4xbf16, #tpu.memory_space<vmem>>, %arg2: memref<1x4xf32, #tpu.memory_space<vmem>>, %arg3: memref<1x4xf32, #tpu.memory_space<vmem>>, %arg4: memref<4x16xbf16, #tpu.memory_space<vmem>>, %arg5: memref<2x16x16x16xbf16, #tpu.memory_space<vmem>>, %arg6: memref<1x1x32xf32, #tpu.memory_space<vmem>>) attributes {dimension_semantics = [#tpu.dimension_semantics<parallel>], iteration_bounds = array<i64: 1>, scalar_prefetch = 0 : i64, scratch_operands = 0 : i64, tpu.core_type = #tpu.core_type<tc>, window_params = [{transform_indices = @transform_0, window_bounds = array<i64: 2, 16, 16, 4>}, {pipeline_mode = #tpu.pipeline_mode<synchronous>, transform_indices = @transform_1, window_bounds = array<i64: 1, 4>}, {pipeline_mode = #tpu.pipeline_mode<synchronous>, transform_indices = @transform_2, window_bounds = array<i64: 1, 4>}, {pipeline_mode = #tpu.pipeline_mode<synchronous>, transform_indices = @transform_3, window_bounds = array<i64: 4, 16>}, {transform_indices = @transform_4, window_bounds = array<i64: 2, 16, 16, 16>}, {transform_indices = @transform_5, window_bounds = array<i64: 1, 1, 32>}]} {
    %c0 = arith.constant 0 : index
    %c0_0 = arith.constant 0 : index
    %c0_1 = arith.constant 0 : index
    %c0_2 = arith.constant 0 : index
    %0 = vector.load %arg1[%c0, %c0_0, %c0_1, %c0_2] : memref<2x16x16x4xbf16, #tpu.memory_space<vmem>>, vector<2x16x16x4xbf16>
    %1 = arith.extf %0 : vector<2x16x16x4xbf16> to vector<2x16x16x4xf32>
    %2 = vector.shape_cast %1 : vector<2x16x16x4xf32> to vector<512x4xf32>
    %c0_3 = arith.constant 0 : index
    %c0_4 = arith.constant 0 : index
    %3 = vector.load %arg2[%c0_3, %c0_4] : memref<1x4xf32, #tpu.memory_space<vmem>>, vector<1x4xf32>
    %4 = vector.broadcast %3 : vector<1x4xf32> to vector<512x4xf32>
    %5 = arith.mulf %2, %4 : vector<512x4xf32>
    %c0_5 = arith.constant 0 : index
    %c0_6 = arith.constant 0 : index
    %6 = vector.load %arg3[%c0_5, %c0_6] : memref<1x4xf32, #tpu.memory_space<vmem>>, vector<1x4xf32>
    %7 = vector.broadcast %6 : vector<1x4xf32> to vector<512x4xf32>
    %8 = arith.addf %5, %7 : vector<512x4xf32>
    %cst = arith.constant 0.000000e+00 : f32
    %9 = vector.broadcast %cst : f32 to vector<512x4xf32>
    %10 = arith.maximumf %8, %9 : vector<512x4xf32>
    %11 = arith.truncf %10 : vector<512x4xf32> to vector<512x4xbf16>
    %c0_7 = arith.constant 0 : index
    %c0_8 = arith.constant 0 : index
    %12 = vector.load %arg4[%c0_7, %c0_8] : memref<4x16xbf16, #tpu.memory_space<vmem>>, vector<4x16xbf16>
    %cst_9 = arith.constant dense<0.000000e+00> : vector<512x16xf32>
    %13 = tpu.matmul %11, %12, %cst_9 {dimension_numbers = #tpu.dot_dimension_numbers<[1], [0], [0], [1], [0, 0, 1, 1], [], []>} : vector<512x4xbf16>, vector<4x16xbf16>, vector<512x16xf32> -> vector<512x16xf32>
    %14 = arith.truncf %13 : vector<512x16xf32> to vector<512x16xbf16>
    %15 = vector.shape_cast %14 : vector<512x16xbf16> to vector<2x16x16x16xbf16>
    %c0_10 = arith.constant 0 : index
    %c0_11 = arith.constant 0 : index
    %c0_12 = arith.constant 0 : index
    %c0_13 = arith.constant 0 : index
    %16 = vector.load %arg5[%c0_10, %c0_11, %c0_12, %c0_13] : memref<2x16x16x16xbf16, #tpu.memory_space<vmem>>, vector<2x16x16x16xbf16>
    tpu.vector_store %arg5[%c0_10, %c0_11, %c0_12, %c0_13], %15 {strides = array<i32>} : memref<2x16x16x16xbf16, #tpu.memory_space<vmem>>, vector<2x16x16x16xbf16>,
    %cst_14 = arith.constant dense<0.000000e+00> : vector<16xf32>
    %17 = vector.multi_reduction <add>, %13, %cst_14 [0] : vector<512x16xf32> to vector<16xf32>
    %18 = vector.shape_cast %17 : vector<16xf32> to vector<1x16xf32>
    %19 = arith.mulf %13, %13 : vector<512x16xf32>
    %cst_15 = arith.constant dense<0.000000e+00> : vector<16xf32>
    %20 = vector.multi_reduction <add>, %19, %cst_15 [0] : vector<512x16xf32> to vector<16xf32>
    %21 = vector.shape_cast %20 : vector<16xf32> to vector<1x16xf32>
    %22 = tpu.concatenate %18, %21 in 1 : vector<1x16xf32>, vector<1x16xf32> -> vector<1x32xf32>
    %23 = vector.shape_cast %22 : vector<1x32xf32> to vector<1x1x32xf32>
    %c0_16 = arith.constant 0 : index
    %c0_17 = arith.constant 0 : index
    %c0_18 = arith.constant 0 : index
    %24 = vector.load %arg6[%c0_16, %c0_17, %c0_18] : memref<1x1x32xf32, #tpu.memory_space<vmem>>, vector<1x1x32xf32>
    tpu.vector_store %arg6[%c0_16, %c0_17, %c0_18], %23 {strides = array<i32>} : memref<1x1x32xf32, #tpu.memory_space<vmem>>, vector<1x1x32xf32>,
    return
  }
  func.func @transform_0(%arg0: i32) -> (i32, i32, i32, i32) {
    %c0_i32 = arith.constant 0 : i32
    %c0_i32_0 = arith.constant 0 : i32
    %c0_i32_1 = arith.constant 0 : i32
    %c0_i32_2 = arith.constant 0 : i32
    return %arg0, %c0_i32, %c0_i32_0, %c0_i32_1 : i32, i32, i32, i32
  }
  func.func @transform_1(%arg0: i32) -> (i32, i32) {
    %c0_i32 = arith.constant 0 : i32
    %c0_i32_0 = arith.constant 0 : i32
    %c0_i32_1 = arith.constant 0 : i32
    return %c0_i32, %c0_i32_0 : i32, i32
  }
  func.func @transform_2(%arg0: i32) -> (i32, i32) {
    %c0_i32 = arith.constant 0 : i32
    %c0_i32_0 = arith.constant 0 : i32
    %c0_i32_1 = arith.constant 0 : i32
    return %c0_i32, %c0_i32_0 : i32, i32
  }
  func.func @transform_3(%arg0: i32) -> (i32, i32) {
    %c0_i32 = arith.constant 0 : i32
    %c0_i32_0 = arith.constant 0 : i32
    %c0_i32_1 = arith.constant 0 : i32
    return %c0_i32, %c0_i32_0 : i32, i32
  }
  func.func @transform_4(%arg0: i32) -> (i32, i32, i32, i32) {
    %c0_i32 = arith.constant 0 : i32
    %c0_i32_0 = arith.constant 0 : i32
    %c0_i32_1 = arith.constant 0 : i32
    %c0_i32_2 = arith.constant 0 : i32
    return %arg0, %c0_i32, %c0_i32_0, %c0_i32_1 : i32, i32, i32, i32
  }
  func.func @transform_5(%arg0: i32) -> (i32, i32, i32) {
    %c0_i32 = arith.constant 0 : i32
    %c0_i32_0 = arith.constant 0 : i32
    %c0_i32_1 = arith.constant 0 : i32
    return %arg0, %c0_i32, %c0_i32_0 : i32, i32, i32
  }
}

module attributes {stable_mosaic.version = 11 : i64} {
  func.func @_phase2_kernel(%arg0: i32, %arg1: memref<2x16x16x4xbf16, #tpu.memory_space<vmem>>, %arg2: memref<1x4xf32, #tpu.memory_space<vmem>>, %arg3: memref<1x4xf32, #tpu.memory_space<vmem>>, %arg4: memref<9x4x4xbf16, #tpu.memory_space<vmem>>, %arg5: memref<2x16x16x4xbf16, #tpu.memory_space<vmem>>, %arg6: memref<1x1x8xf32, #tpu.memory_space<vmem>>, %arg7: memref<2x18x18x4xf32, #tpu.memory_space<vmem>>) attributes {dimension_semantics = [#tpu.dimension_semantics<parallel>], iteration_bounds = array<i64: 1>, scalar_prefetch = 0 : i64, scratch_operands = 1 : i64, tpu.core_type = #tpu.core_type<tc>, window_params = [{transform_indices = @transform_0, window_bounds = array<i64: 2, 16, 16, 4>}, {pipeline_mode = #tpu.pipeline_mode<synchronous>, transform_indices = @transform_1, window_bounds = array<i64: 1, 4>}, {pipeline_mode = #tpu.pipeline_mode<synchronous>, transform_indices = @transform_2, window_bounds = array<i64: 1, 4>}, {pipeline_mode = #tpu.pipeline_mode<synchronous>, transform_indices = @transform_3, window_bounds = array<i64: 9, 4, 4>}, {transform_indices = @transform_4, window_bounds = array<i64: 2, 16, 16, 4>}, {transform_indices = @transform_5, window_bounds = array<i64: 1, 1, 8>}]} {
    %c0 = arith.constant 0 : index
    %c0_0 = arith.constant 0 : index
    %c0_1 = arith.constant 0 : index
    %c0_2 = arith.constant 0 : index
    %0 = vector.load %arg1[%c0, %c0_0, %c0_1, %c0_2] : memref<2x16x16x4xbf16, #tpu.memory_space<vmem>>, vector<2x16x16x4xbf16>
    %1 = arith.extf %0 : vector<2x16x16x4xbf16> to vector<2x16x16x4xf32>
    %2 = vector.shape_cast %1 : vector<2x16x16x4xf32> to vector<512x4xf32>
    %c0_3 = arith.constant 0 : index
    %c0_4 = arith.constant 0 : index
    %3 = vector.load %arg2[%c0_3, %c0_4] : memref<1x4xf32, #tpu.memory_space<vmem>>, vector<1x4xf32>
    %4 = vector.broadcast %3 : vector<1x4xf32> to vector<512x4xf32>
    %5 = arith.mulf %2, %4 : vector<512x4xf32>
    %c0_5 = arith.constant 0 : index
    %c0_6 = arith.constant 0 : index
    %6 = vector.load %arg3[%c0_5, %c0_6] : memref<1x4xf32, #tpu.memory_space<vmem>>, vector<1x4xf32>
    %7 = vector.broadcast %6 : vector<1x4xf32> to vector<512x4xf32>
    %8 = arith.addf %5, %7 : vector<512x4xf32>
    %cst = arith.constant 0.000000e+00 : f32
    %9 = vector.broadcast %cst : f32 to vector<512x4xf32>
    %10 = arith.maximumf %8, %9 : vector<512x4xf32>
    %cst_7 = arith.constant 0.000000e+00 : f32
    %11 = vector.broadcast %cst_7 : f32 to vector<2x1x18x4xf32>
    %cst_8 = arith.constant 0.000000e+00 : f32
    %12 = vector.broadcast %cst_8 : f32 to vector<2x16x1x4xf32>
    %c0_9 = arith.constant 0 : index
    %c0_10 = arith.constant 0 : index
    %c0_11 = arith.constant 0 : index
    %c0_12 = arith.constant 0 : index
    %13 = vector.load %arg7[%c0_9, %c0_10, %c0_11, %c0_12] : memref<2x18x18x4xf32, #tpu.memory_space<vmem>>, vector<2x1x18x4xf32>
    tpu.vector_store %arg7[%c0_9, %c0_10, %c0_11, %c0_12], %11 {strides = array<i32>} : memref<2x18x18x4xf32, #tpu.memory_space<vmem>>, vector<2x1x18x4xf32>,
    %c0_13 = arith.constant 0 : index
    %c17 = arith.constant 17 : index
    %c0_14 = arith.constant 0 : index
    %c0_15 = arith.constant 0 : index
    %14 = vector.load %arg7[%c0_13, %c17, %c0_14, %c0_15] : memref<2x18x18x4xf32, #tpu.memory_space<vmem>>, vector<2x1x18x4xf32>
    tpu.vector_store %arg7[%c0_13, %c17, %c0_14, %c0_15], %11 {strides = array<i32>} : memref<2x18x18x4xf32, #tpu.memory_space<vmem>>, vector<2x1x18x4xf32>,
    %c0_16 = arith.constant 0 : index
    %c1 = arith.constant 1 : index
    %c0_17 = arith.constant 0 : index
    %c0_18 = arith.constant 0 : index
    %15 = vector.load %arg7[%c0_16, %c1, %c0_17, %c0_18] : memref<2x18x18x4xf32, #tpu.memory_space<vmem>>, vector<2x16x1x4xf32>
    tpu.vector_store %arg7[%c0_16, %c1, %c0_17, %c0_18], %12 {strides = array<i32>} : memref<2x18x18x4xf32, #tpu.memory_space<vmem>>, vector<2x16x1x4xf32>,
    %c0_19 = arith.constant 0 : index
    %c1_20 = arith.constant 1 : index
    %c17_21 = arith.constant 17 : index
    %c0_22 = arith.constant 0 : index
    %16 = vector.load %arg7[%c0_19, %c1_20, %c17_21, %c0_22] : memref<2x18x18x4xf32, #tpu.memory_space<vmem>>, vector<2x16x1x4xf32>
    tpu.vector_store %arg7[%c0_19, %c1_20, %c17_21, %c0_22], %12 {strides = array<i32>} : memref<2x18x18x4xf32, #tpu.memory_space<vmem>>, vector<2x16x1x4xf32>,
    %17 = vector.shape_cast %10 : vector<512x4xf32> to vector<2x16x16x4xf32>
    %c0_23 = arith.constant 0 : index
    %c1_24 = arith.constant 1 : index
    %c1_25 = arith.constant 1 : index
    %c0_26 = arith.constant 0 : index
    %18 = vector.load %arg7[%c0_23, %c1_24, %c1_25, %c0_26] : memref<2x18x18x4xf32, #tpu.memory_space<vmem>>, vector<2x16x16x4xf32>
    tpu.vector_store %arg7[%c0_23, %c1_24, %c1_25, %c0_26], %17 {strides = array<i32>} : memref<2x18x18x4xf32, #tpu.memory_space<vmem>>, vector<2x16x16x4xf32>,
    %c0_27 = arith.constant 0 : index
    %c0_28 = arith.constant 0 : index
    %c0_29 = arith.constant 0 : index
    %c0_30 = arith.constant 0 : index
    %19 = vector.load %arg7[%c0_27, %c0_28, %c0_29, %c0_30] : memref<2x18x18x4xf32, #tpu.memory_space<vmem>>, vector<2x16x16x4xf32>
    %20 = vector.shape_cast %19 : vector<2x16x16x4xf32> to vector<512x4xf32>
    %21 = arith.truncf %20 : vector<512x4xf32> to vector<512x4xbf16>
    %c0_31 = arith.constant 0 : index
    %c0_32 = arith.constant 0 : index
    %c0_33 = arith.constant 0 : index
    %22 = vector.load %arg4[%c0_31, %c0_32, %c0_33] : memref<9x4x4xbf16, #tpu.memory_space<vmem>>, vector<1x4x4xbf16>
    %23 = vector.shape_cast %22 : vector<1x4x4xbf16> to vector<4x4xbf16>
    %cst_34 = arith.constant dense<0.000000e+00> : vector<512x4xf32>
    %24 = tpu.matmul %21, %23, %cst_34 {dimension_numbers = #tpu.dot_dimension_numbers<[1], [0], [0], [1], [0, 0, 1, 1], [], []>} : vector<512x4xbf16>, vector<4x4xbf16>, vector<512x4xf32> -> vector<512x4xf32>
    %c0_35 = arith.constant 0 : index
    %c0_36 = arith.constant 0 : index
    %c1_37 = arith.constant 1 : index
    %c0_38 = arith.constant 0 : index
    %25 = vector.load %arg7[%c0_35, %c0_36, %c1_37, %c0_38] : memref<2x18x18x4xf32, #tpu.memory_space<vmem>>, vector<2x16x16x4xf32>
    %26 = vector.shape_cast %25 : vector<2x16x16x4xf32> to vector<512x4xf32>
    %27 = arith.truncf %26 : vector<512x4xf32> to vector<512x4xbf16>
    %c1_39 = arith.constant 1 : index
    %c0_40 = arith.constant 0 : index
    %c0_41 = arith.constant 0 : index
    %28 = vector.load %arg4[%c1_39, %c0_40, %c0_41] : memref<9x4x4xbf16, #tpu.memory_space<vmem>>, vector<1x4x4xbf16>
    %29 = vector.shape_cast %28 : vector<1x4x4xbf16> to vector<4x4xbf16>
    %cst_42 = arith.constant dense<0.000000e+00> : vector<512x4xf32>
    %30 = tpu.matmul %27, %29, %cst_42 {dimension_numbers = #tpu.dot_dimension_numbers<[1], [0], [0], [1], [0, 0, 1, 1], [], []>} : vector<512x4xbf16>, vector<4x4xbf16>, vector<512x4xf32> -> vector<512x4xf32>
    %31 = arith.addf %24, %30 : vector<512x4xf32>
    %c0_43 = arith.constant 0 : index
    %c0_44 = arith.constant 0 : index
    %c2 = arith.constant 2 : index
    %c0_45 = arith.constant 0 : index
    %32 = vector.load %arg7[%c0_43, %c0_44, %c2, %c0_45] : memref<2x18x18x4xf32, #tpu.memory_space<vmem>>, vector<2x16x16x4xf32>
    %33 = vector.shape_cast %32 : vector<2x16x16x4xf32> to vector<512x4xf32>
    %34 = arith.truncf %33 : vector<512x4xf32> to vector<512x4xbf16>
    %c2_46 = arith.constant 2 : index
    %c0_47 = arith.constant 0 : index
    %c0_48 = arith.constant 0 : index
    %35 = vector.load %arg4[%c2_46, %c0_47, %c0_48] : memref<9x4x4xbf16, #tpu.memory_space<vmem>>, vector<1x4x4xbf16>
    %36 = vector.shape_cast %35 : vector<1x4x4xbf16> to vector<4x4xbf16>
    %cst_49 = arith.constant dense<0.000000e+00> : vector<512x4xf32>
    %37 = tpu.matmul %34, %36, %cst_49 {dimension_numbers = #tpu.dot_dimension_numbers<[1], [0], [0], [1], [0, 0, 1, 1], [], []>} : vector<512x4xbf16>, vector<4x4xbf16>, vector<512x4xf32> -> vector<512x4xf32>
    %38 = arith.addf %31, %37 : vector<512x4xf32>
    %c0_50 = arith.constant 0 : index
    %c1_51 = arith.constant 1 : index
    %c0_52 = arith.constant 0 : index
    %c0_53 = arith.constant 0 : index
    %39 = vector.load %arg7[%c0_50, %c1_51, %c0_52, %c0_53] : memref<2x18x18x4xf32, #tpu.memory_space<vmem>>, vector<2x16x16x4xf32>
    %40 = vector.shape_cast %39 : vector<2x16x16x4xf32> to vector<512x4xf32>
    %41 = arith.truncf %40 : vector<512x4xf32> to vector<512x4xbf16>
    %c3 = arith.constant 3 : index
    %c0_54 = arith.constant 0 : index
    %c0_55 = arith.constant 0 : index
    %42 = vector.load %arg4[%c3, %c0_54, %c0_55] : memref<9x4x4xbf16, #tpu.memory_space<vmem>>, vector<1x4x4xbf16>
    %43 = vector.shape_cast %42 : vector<1x4x4xbf16> to vector<4x4xbf16>
    %cst_56 = arith.constant dense<0.000000e+00> : vector<512x4xf32>
    %44 = tpu.matmul %41, %43, %cst_56 {dimension_numbers = #tpu.dot_dimension_numbers<[1], [0], [0], [1], [0, 0, 1, 1], [], []>} : vector<512x4xbf16>, vector<4x4xbf16>, vector<512x4xf32> -> vector<512x4xf32>
    %45 = arith.addf %38, %44 : vector<512x4xf32>
    %c0_57 = arith.constant 0 : index
    %c1_58 = arith.constant 1 : index
    %c1_59 = arith.constant 1 : index
    %c0_60 = arith.constant 0 : index
    %46 = vector.load %arg7[%c0_57, %c1_58, %c1_59, %c0_60] : memref<2x18x18x4xf32, #tpu.memory_space<vmem>>, vector<2x16x16x4xf32>
    %47 = vector.shape_cast %46 : vector<2x16x16x4xf32> to vector<512x4xf32>
    %48 = arith.truncf %47 : vector<512x4xf32> to vector<512x4xbf16>
    %c4 = arith.constant 4 : index
    %c0_61 = arith.constant 0 : index
    %c0_62 = arith.constant 0 : index
    %49 = vector.load %arg4[%c4, %c0_61, %c0_62] : memref<9x4x4xbf16, #tpu.memory_space<vmem>>, vector<1x4x4xbf16>
    %50 = vector.shape_cast %49 : vector<1x4x4xbf16> to vector<4x4xbf16>
    %cst_63 = arith.constant dense<0.000000e+00> : vector<512x4xf32>
    %51 = tpu.matmul %48, %50, %cst_63 {dimension_numbers = #tpu.dot_dimension_numbers<[1], [0], [0], [1], [0, 0, 1, 1], [], []>} : vector<512x4xbf16>, vector<4x4xbf16>, vector<512x4xf32> -> vector<512x4xf32>
    %52 = arith.addf %45, %51 : vector<512x4xf32>
    %c0_64 = arith.constant 0 : index
    %c1_65 = arith.constant 1 : index
    %c2_66 = arith.constant 2 : index
    %c0_67 = arith.constant 0 : index
    %53 = vector.load %arg7[%c0_64, %c1_65, %c2_66, %c0_67] : memref<2x18x18x4xf32, #tpu.memory_space<vmem>>, vector<2x16x16x4xf32>
    %54 = vector.shape_cast %53 : vector<2x16x16x4xf32> to vector<512x4xf32>
    %55 = arith.truncf %54 : vector<512x4xf32> to vector<512x4xbf16>
    %c5 = arith.constant 5 : index
    %c0_68 = arith.constant 0 : index
    %c0_69 = arith.constant 0 : index
    %56 = vector.load %arg4[%c5, %c0_68, %c0_69] : memref<9x4x4xbf16, #tpu.memory_space<vmem>>, vector<1x4x4xbf16>
    %57 = vector.shape_cast %56 : vector<1x4x4xbf16> to vector<4x4xbf16>
    %cst_70 = arith.constant dense<0.000000e+00> : vector<512x4xf32>
    %58 = tpu.matmul %55, %57, %cst_70 {dimension_numbers = #tpu.dot_dimension_numbers<[1], [0], [0], [1], [0, 0, 1, 1], [], []>} : vector<512x4xbf16>, vector<4x4xbf16>, vector<512x4xf32> -> vector<512x4xf32>
    %59 = arith.addf %52, %58 : vector<512x4xf32>
    %c0_71 = arith.constant 0 : index
    %c2_72 = arith.constant 2 : index
    %c0_73 = arith.constant 0 : index
    %c0_74 = arith.constant 0 : index
    %60 = vector.load %arg7[%c0_71, %c2_72, %c0_73, %c0_74] : memref<2x18x18x4xf32, #tpu.memory_space<vmem>>, vector<2x16x16x4xf32>
    %61 = vector.shape_cast %60 : vector<2x16x16x4xf32> to vector<512x4xf32>
    %62 = arith.truncf %61 : vector<512x4xf32> to vector<512x4xbf16>
    %c6 = arith.constant 6 : index
    %c0_75 = arith.constant 0 : index
    %c0_76 = arith.constant 0 : index
    %63 = vector.load %arg4[%c6, %c0_75, %c0_76] : memref<9x4x4xbf16, #tpu.memory_space<vmem>>, vector<1x4x4xbf16>
    %64 = vector.shape_cast %63 : vector<1x4x4xbf16> to vector<4x4xbf16>
    %cst_77 = arith.constant dense<0.000000e+00> : vector<512x4xf32>
    %65 = tpu.matmul %62, %64, %cst_77 {dimension_numbers = #tpu.dot_dimension_numbers<[1], [0], [0], [1], [0, 0, 1, 1], [], []>} : vector<512x4xbf16>, vector<4x4xbf16>, vector<512x4xf32> -> vector<512x4xf32>
    %66 = arith.addf %59, %65 : vector<512x4xf32>
    %c0_78 = arith.constant 0 : index
    %c2_79 = arith.constant 2 : index
    %c1_80 = arith.constant 1 : index
    %c0_81 = arith.constant 0 : index
    %67 = vector.load %arg7[%c0_78, %c2_79, %c1_80, %c0_81] : memref<2x18x18x4xf32, #tpu.memory_space<vmem>>, vector<2x16x16x4xf32>
    %68 = vector.shape_cast %67 : vector<2x16x16x4xf32> to vector<512x4xf32>
    %69 = arith.truncf %68 : vector<512x4xf32> to vector<512x4xbf16>
    %c7 = arith.constant 7 : index
    %c0_82 = arith.constant 0 : index
    %c0_83 = arith.constant 0 : index
    %70 = vector.load %arg4[%c7, %c0_82, %c0_83] : memref<9x4x4xbf16, #tpu.memory_space<vmem>>, vector<1x4x4xbf16>
    %71 = vector.shape_cast %70 : vector<1x4x4xbf16> to vector<4x4xbf16>
    %cst_84 = arith.constant dense<0.000000e+00> : vector<512x4xf32>
    %72 = tpu.matmul %69, %71, %cst_84 {dimension_numbers = #tpu.dot_dimension_numbers<[1], [0], [0], [1], [0, 0, 1, 1], [], []>} : vector<512x4xbf16>, vector<4x4xbf16>, vector<512x4xf32> -> vector<512x4xf32>
    %73 = arith.addf %66, %72 : vector<512x4xf32>
    %c0_85 = arith.constant 0 : index
    %c2_86 = arith.constant 2 : index
    %c2_87 = arith.constant 2 : index
    %c0_88 = arith.constant 0 : index
    %74 = vector.load %arg7[%c0_85, %c2_86, %c2_87, %c0_88] : memref<2x18x18x4xf32, #tpu.memory_space<vmem>>, vector<2x16x16x4xf32>
    %75 = vector.shape_cast %74 : vector<2x16x16x4xf32> to vector<512x4xf32>
    %76 = arith.truncf %75 : vector<512x4xf32> to vector<512x4xbf16>
    %c8 = arith.constant 8 : index
    %c0_89 = arith.constant 0 : index
    %c0_90 = arith.constant 0 : index
    %77 = vector.load %arg4[%c8, %c0_89, %c0_90] : memref<9x4x4xbf16, #tpu.memory_space<vmem>>, vector<1x4x4xbf16>
    %78 = vector.shape_cast %77 : vector<1x4x4xbf16> to vector<4x4xbf16>
    %cst_91 = arith.constant dense<0.000000e+00> : vector<512x4xf32>
    %79 = tpu.matmul %76, %78, %cst_91 {dimension_numbers = #tpu.dot_dimension_numbers<[1], [0], [0], [1], [0, 0, 1, 1], [], []>} : vector<512x4xbf16>, vector<4x4xbf16>, vector<512x4xf32> -> vector<512x4xf32>
    %80 = arith.addf %73, %79 : vector<512x4xf32>
    %81 = arith.truncf %80 : vector<512x4xf32> to vector<512x4xbf16>
    %82 = vector.shape_cast %81 : vector<512x4xbf16> to vector<2x16x16x4xbf16>
    %c0_92 = arith.constant 0 : index
    %c0_93 = arith.constant 0 : index
    %c0_94 = arith.constant 0 : index
    %c0_95 = arith.constant 0 : index
    %83 = vector.load %arg5[%c0_92, %c0_93, %c0_94, %c0_95] : memref<2x16x16x4xbf16, #tpu.memory_space<vmem>>, vector<2x16x16x4xbf16>
    tpu.vector_store %arg5[%c0_92, %c0_93, %c0_94, %c0_95], %82 {strides = array<i32>} : memref<2x16x16x4xbf16, #tpu.memory_space<vmem>>, vector<2x16x16x4xbf16>,
    %cst_96 = arith.constant dense<0.000000e+00> : vector<4xf32>
    %84 = vector.multi_reduction <add>, %80, %cst_96 [0] : vector<512x4xf32> to vector<4xf32>
    %85 = vector.shape_cast %84 : vector<4xf32> to vector<1x4xf32>
    %86 = arith.mulf %80, %80 : vector<512x4xf32>
    %cst_97 = arith.constant dense<0.000000e+00> : vector<4xf32>
    %87 = vector.multi_reduction <add>, %86, %cst_97 [0] : vector<512x4xf32> to vector<4xf32>
    %88 = vector.shape_cast %87 : vector<4xf32> to vector<1x4xf32>
    %89 = tpu.concatenate %85, %88 in 1 : vector<1x4xf32>, vector<1x4xf32> -> vector<1x8xf32>
    %90 = vector.shape_cast %89 : vector<1x8xf32> to vector<1x1x8xf32>
    %c0_98 = arith.constant 0 : index
    %c0_99 = arith.constant 0 : index
    %c0_100 = arith.constant 0 : index
    %91 = vector.load %arg6[%c0_98, %c0_99, %c0_100] : memref<1x1x8xf32, #tpu.memory_space<vmem>>, vector<1x1x8xf32>
    tpu.vector_store %arg6[%c0_98, %c0_99, %c0_100], %90 {strides = array<i32>} : memref<1x1x8xf32, #tpu.memory_space<vmem>>, vector<1x1x8xf32>,
    return
  }
  func.func @transform_0(%arg0: i32) -> (i32, i32, i32, i32) {
    %c0_i32 = arith.constant 0 : i32
    %c0_i32_0 = arith.constant 0 : i32
    %c0_i32_1 = arith.constant 0 : i32
    %c0_i32_2 = arith.constant 0 : i32
    return %arg0, %c0_i32, %c0_i32_0, %c0_i32_1 : i32, i32, i32, i32
  }
  func.func @transform_1(%arg0: i32) -> (i32, i32) {
    %c0_i32 = arith.constant 0 : i32
    %c0_i32_0 = arith.constant 0 : i32
    %c0_i32_1 = arith.constant 0 : i32
    return %c0_i32, %c0_i32_0 : i32, i32
  }
  func.func @transform_2(%arg0: i32) -> (i32, i32) {
    %c0_i32 = arith.constant 0 : i32
    %c0_i32_0 = arith.constant 0 : i32
    %c0_i32_1 = arith.constant 0 : i32
    return %c0_i32, %c0_i32_0 : i32, i32
  }
  func.func @transform_3(%arg0: i32) -> (i32, i32, i32) {
    %c0_i32 = arith.constant 0 : i32
    %c0_i32_0 = arith.constant 0 : i32
    %c0_i32_1 = arith.constant 0 : i32
    %c0_i32_2 = arith.constant 0 : i32
    return %c0_i32, %c0_i32_0, %c0_i32_1 : i32, i32, i32
  }
  func.func @transform_4(%arg0: i32) -> (i32, i32, i32, i32) {
    %c0_i32 = arith.constant 0 : i32
    %c0_i32_0 = arith.constant 0 : i32
    %c0_i32_1 = arith.constant 0 : i32
    %c0_i32_2 = arith.constant 0 : i32
    return %arg0, %c0_i32, %c0_i32_0, %c0_i32_1 : i32, i32, i32, i32
  }
  func.func @transform_5(%arg0: i32) -> (i32, i32, i32) {
    %c0_i32 = arith.constant 0 : i32
    %c0_i32_0 = arith.constant 0 : i32
    %c0_i32_1 = arith.constant 0 : i32
    return %arg0, %c0_i32, %c0_i32_0 : i32, i32, i32
  }
}

module attributes {stable_mosaic.version = 11 : i64} {
  func.func @_phase4_kernel(%arg0: i32, %arg1: memref<2x16x16x16xbf16, #tpu.memory_space<vmem>>, %arg2: memref<2x16x16x16xbf16, #tpu.memory_space<vmem>>, %arg3: memref<1x16xf32, #tpu.memory_space<vmem>>, %arg4: memref<1x16xf32, #tpu.memory_space<vmem>>, %arg5: memref<1x16xf32, #tpu.memory_space<vmem>>, %arg6: memref<1x16xf32, #tpu.memory_space<vmem>>, %arg7: memref<2x16x16x16xf32, #tpu.memory_space<vmem>>) attributes {dimension_semantics = [#tpu.dimension_semantics<parallel>], iteration_bounds = array<i64: 1>, scalar_prefetch = 0 : i64, scratch_operands = 0 : i64, tpu.core_type = #tpu.core_type<tc>, window_params = [{transform_indices = @transform_0, window_bounds = array<i64: 2, 16, 16, 16>}, {transform_indices = @transform_1, window_bounds = array<i64: 2, 16, 16, 16>}, {pipeline_mode = #tpu.pipeline_mode<synchronous>, transform_indices = @transform_2, window_bounds = array<i64: 1, 16>}, {pipeline_mode = #tpu.pipeline_mode<synchronous>, transform_indices = @transform_3, window_bounds = array<i64: 1, 16>}, {pipeline_mode = #tpu.pipeline_mode<synchronous>, transform_indices = @transform_4, window_bounds = array<i64: 1, 16>}, {pipeline_mode = #tpu.pipeline_mode<synchronous>, transform_indices = @transform_5, window_bounds = array<i64: 1, 16>}, {transform_indices = @transform_6, window_bounds = array<i64: 2, 16, 16, 16>}]} {
    %c0 = arith.constant 0 : index
    %c0_0 = arith.constant 0 : index
    %c0_1 = arith.constant 0 : index
    %c0_2 = arith.constant 0 : index
    %0 = vector.load %arg1[%c0, %c0_0, %c0_1, %c0_2] : memref<2x16x16x16xbf16, #tpu.memory_space<vmem>>, vector<2x16x16x16xbf16>
    %1 = arith.extf %0 : vector<2x16x16x16xbf16> to vector<2x16x16x16xf32>
    %2 = vector.shape_cast %1 : vector<2x16x16x16xf32> to vector<512x16xf32>
    %c0_3 = arith.constant 0 : index
    %c0_4 = arith.constant 0 : index
    %3 = vector.load %arg3[%c0_3, %c0_4] : memref<1x16xf32, #tpu.memory_space<vmem>>, vector<1x16xf32>
    %4 = vector.broadcast %3 : vector<1x16xf32> to vector<512x16xf32>
    %5 = arith.mulf %2, %4 : vector<512x16xf32>
    %c0_5 = arith.constant 0 : index
    %c0_6 = arith.constant 0 : index
    %6 = vector.load %arg4[%c0_5, %c0_6] : memref<1x16xf32, #tpu.memory_space<vmem>>, vector<1x16xf32>
    %7 = vector.broadcast %6 : vector<1x16xf32> to vector<512x16xf32>
    %8 = arith.addf %5, %7 : vector<512x16xf32>
    %c0_7 = arith.constant 0 : index
    %c0_8 = arith.constant 0 : index
    %c0_9 = arith.constant 0 : index
    %c0_10 = arith.constant 0 : index
    %9 = vector.load %arg2[%c0_7, %c0_8, %c0_9, %c0_10] : memref<2x16x16x16xbf16, #tpu.memory_space<vmem>>, vector<2x16x16x16xbf16>
    %10 = arith.extf %9 : vector<2x16x16x16xbf16> to vector<2x16x16x16xf32>
    %11 = vector.shape_cast %10 : vector<2x16x16x16xf32> to vector<512x16xf32>
    %c0_11 = arith.constant 0 : index
    %c0_12 = arith.constant 0 : index
    %12 = vector.load %arg5[%c0_11, %c0_12] : memref<1x16xf32, #tpu.memory_space<vmem>>, vector<1x16xf32>
    %13 = vector.broadcast %12 : vector<1x16xf32> to vector<512x16xf32>
    %14 = arith.mulf %11, %13 : vector<512x16xf32>
    %c0_13 = arith.constant 0 : index
    %c0_14 = arith.constant 0 : index
    %15 = vector.load %arg6[%c0_13, %c0_14] : memref<1x16xf32, #tpu.memory_space<vmem>>, vector<1x16xf32>
    %16 = vector.broadcast %15 : vector<1x16xf32> to vector<512x16xf32>
    %17 = arith.addf %14, %16 : vector<512x16xf32>
    %18 = arith.addf %8, %17 : vector<512x16xf32>
    %cst = arith.constant 0.000000e+00 : f32
    %19 = vector.broadcast %cst : f32 to vector<512x16xf32>
    %20 = arith.maximumf %18, %19 : vector<512x16xf32>
    %21 = vector.shape_cast %20 : vector<512x16xf32> to vector<2x16x16x16xf32>
    %c0_15 = arith.constant 0 : index
    %c0_16 = arith.constant 0 : index
    %c0_17 = arith.constant 0 : index
    %c0_18 = arith.constant 0 : index
    %22 = vector.load %arg7[%c0_15, %c0_16, %c0_17, %c0_18] : memref<2x16x16x16xf32, #tpu.memory_space<vmem>>, vector<2x16x16x16xf32>
    tpu.vector_store %arg7[%c0_15, %c0_16, %c0_17, %c0_18], %21 {strides = array<i32>} : memref<2x16x16x16xf32, #tpu.memory_space<vmem>>, vector<2x16x16x16xf32>,
    return
  }
  func.func @transform_0(%arg0: i32) -> (i32, i32, i32, i32) {
    %c0_i32 = arith.constant 0 : i32
    %c0_i32_0 = arith.constant 0 : i32
    %c0_i32_1 = arith.constant 0 : i32
    %c0_i32_2 = arith.constant 0 : i32
    return %arg0, %c0_i32, %c0_i32_0, %c0_i32_1 : i32, i32, i32, i32
  }
  func.func @transform_1(%arg0: i32) -> (i32, i32, i32, i32) {
    %c0_i32 = arith.constant 0 : i32
    %c0_i32_0 = arith.constant 0 : i32
    %c0_i32_1 = arith.constant 0 : i32
    %c0_i32_2 = arith.constant 0 : i32
    return %arg0, %c0_i32, %c0_i32_0, %c0_i32_1 : i32, i32, i32, i32
  }
  func.func @transform_2(%arg0: i32) -> (i32, i32) {
    %c0_i32 = arith.constant 0 : i32
    %c0_i32_0 = arith.constant 0 : i32
    %c0_i32_1 = arith.constant 0 : i32
    return %c0_i32, %c0_i32_0 : i32, i32
  }
  func.func @transform_3(%arg0: i32) -> (i32, i32) {
    %c0_i32 = arith.constant 0 : i32
    %c0_i32_0 = arith.constant 0 : i32
    %c0_i32_1 = arith.constant 0 : i32
    return %c0_i32, %c0_i32_0 : i32, i32
  }
  func.func @transform_4(%arg0: i32) -> (i32, i32) {
    %c0_i32 = arith.constant 0 : i32
    %c0_i32_0 = arith.constant 0 : i32
    %c0_i32_1 = arith.constant 0 : i32
    return %c0_i32, %c0_i32_0 : i32, i32
  }
  func.func @transform_5(%arg0: i32) -> (i32, i32) {
    %c0_i32 = arith.constant 0 : i32
    %c0_i32_0 = arith.constant 0 : i32
    %c0_i32_1 = arith.constant 0 : i32
    return %c0_i32, %c0_i32_0 : i32, i32
  }
  func.func @transform_6(%arg0: i32) -> (i32, i32, i32, i32) {
    %c0_i32 = arith.constant 0 : i32
    %c0_i32_0 = arith.constant 0 : i32
    %c0_i32_1 = arith.constant 0 : i32
    %c0_i32_2 = arith.constant 0 : i32
    return %arg0, %c0_i32, %c0_i32_0, %c0_i32_1 : i32, i32, i32, i32
  }
}

</mosaic_0001>

<bundles_post_ra>
// kernel: bottleneck_forward_nhwc.7
= control target key start
LH: loop header
LB: loop body
LE: loop exit
PB: predicated region body
PF: predicated region fallthrough
CT: control target
= control target key end

     0   :  { %vm680_vm0 = vcmask 130048   ;;  %s1711_s0 = inlined_call_operand.vmem [shape: bf16[2,16,16,16], index: 0, kind: input, shape index: {}]   ;;  %s1712_s1 = inlined_call_operand.vmem [shape: bf16[2,16,16,16], index: 1, kind: input, shape index: {}]   ;;  %s1713_s2 = inlined_call_operand.vmem [shape: f32[1,16], index: 2, kind: input, shape index: {}]   ;;  %s1714_s3 = inlined_call_operand.vmem [shape: f32[1,16], index: 3, kind: input, shape index: {}]   ;;  %s1715_s4 = inlined_call_operand.vmem [shape: f32[1,16], index: 4, kind: input, shape index: {}]   ;;  %s1716_s5 = inlined_call_operand.vmem [shape: f32[1,16], index: 5, kind: input, shape index: {}]   ;;  %s1717_s6 = inlined_call_operand.hbm [shape: f32[2,16,16,16], index: 6, kind: output, shape index: {}]  }
   0x1   :  { %v764_v0 = vld [vmem:[%s1711_s0] sm:$0xff]   ;;  %v1019_v12 = vld [vmem:[%s1711_s0 + $0x8] sm:$0xff]   ;;  %v1020_v18 = vld [vmem:[%s1711_s0 + $0x10] sm:$0xff]  }
   0x2   :  { %v1162_v1 = vld [vmem:[%s1713_s2] ss:$0 sm:$0xff]  ;;  %v765_v2 = vunpack.c.l.bf16 %v764_v0  ;;  %v766_v5 = vunpack.c.h.bf16 %v764_v0  ;;  %v1050_v13 = vld [vmem:[%s1712_s1 + $0x8] sm:$0xff]   ;;  %v769_v16 = vunpack.c.l.bf16 %v1019_v12  ;;  %v1051_v19 = vld [vmem:[%s1712_s1 + $0x10] sm:$0xff]   ;;  %v770_v22 = vunpack.c.h.bf16 %v1019_v12 }
   0x3   :  { %v1167_v3 = vld [vmem:[%s1714_s3] ss:$0 sm:$0xff]  ;;  %v897_v17 = vunpack.c.l.bf16 %v1050_v13  ;;  %v898_v23 = vunpack.c.h.bf16 %v1050_v13  ;;  %v773_v30 = vunpack.c.l.bf16 %v1020_v18  ;;  %v901_v31 = vunpack.c.l.bf16 %v1051_v19  ;;  %v1021_v40 = vld [vmem:[%s1711_s0 + $0x18] sm:$0xff]  }
   0x4   :  { %v892_v4 = vld [vmem:[%s1712_s1] sm:$0xff]   ;;  %v156_v9 = vmul.f32 %v1162_v1, %v765_v2  ;;  %v157_v11 = vmul.f32 %v1162_v1, %v766_v5  ;;  %v158_v26 = vmul.f32 %v1162_v1, %v769_v16  ;;  %v159_v28 = vmul.f32 %v1162_v1, %v770_v22  ;;  %v1052_v41 = vld [vmem:[%s1712_s1 + $0x18] sm:$0xff]  }
   0x5   :  { %v893_v6 = vunpack.c.l.bf16 %v892_v4  ;;  %v1175_v7 = vld [vmem:[%s1715_s4] ss:$0 sm:$0xff]  ;;  %v894_v8 = vunpack.c.h.bf16 %v892_v4  ;;  %v160_v38 = vmul.f32 %v1162_v1, %v773_v30  ;;  %v774_v45 = vunpack.c.h.bf16 %v1020_v18 }
   0x6   :  { %v1181_v10 = vld [vmem:[%s1716_s5] ss:$0 sm:$0xff]  ;;  %v224_v20 = vadd.f32 %v1167_v3, %v156_v9  ;;  %v225_v21 = vadd.f32 %v1167_v3, %v157_v11  ;;  %v422_v27 = vmul.f32 %v1175_v7, %v897_v17  ;;  %v423_v29 = vmul.f32 %v1175_v7, %v898_v23 }
   0x7   :  { %v420_v14 = vmul.f32 %v1175_v7, %v893_v6  ;;  %v421_v15 = vmul.f32 %v1175_v7, %v894_v8  ;;  %v226_v34 = vadd.f32 %v1167_v3, %v158_v26  ;;  %v227_v36 = vadd.f32 %v1167_v3, %v159_v28 }
   0x8   :  { %v490_v35 = vadd.f32 %v1181_v10, %v422_v27  ;;  %v491_v37 = vadd.f32 %v1181_v10, %v423_v29  ;;  %v424_v39 = vmul.f32 %v1175_v7, %v901_v31 }
   0x9   :  { %v488_v24 = vadd.f32 %v1181_v10, %v420_v14  ;;  %v489_v25 = vadd.f32 %v1181_v10, %v421_v15 }
   0xa   :  { %v554_v44 = vadd.f32 %v490_v35, %v226_v34 }
   0xb   :  { %v552_v32 = vadd.f32 %v488_v24, %v224_v20  ;;  %v553_v33 = vadd.f32 %v489_v25, %v225_v21 }
   0xd   :  { %v616_v42 = vmax.f32 %v552_v32, 0.0  ;;  %v617_v43 = vmax.f32 %v553_v33, 0.0 }
   0xe   :  { %11 = vsyncpa [#allocation3], 0  ;;  %v555_v46 = vadd.f32 %v491_v37, %v227_v36  ;;  %v228_v47 = vadd.f32 %v1167_v3, %v160_v38  ;;  %v492_v48 = vadd.f32 %v1181_v10, %v424_v39  ;;  %v902_v49 = vunpack.c.h.bf16 %v1051_v19  ;;  %v1022_v54 = vld [vmem:[%s1711_s0 + $0x20] sm:$0xff]   ;;  %v1023_v12 = vld [vmem:[%s1711_s0 + $0x28] sm:$0xff]   ;;  %s751_s19 = sshll.u32 %s1717_s6, 4  ;;  %s1119_s20 = smov 128   ;;  %s752_s19 = int_to_ptr.hbm [resolvable:$true] %s751_s19 }
   0xf   :  { %681 = vst.msk [vmem:[#allocation2] sm:$0xff] %vm680_vm0, %v616_v42  ;;  %v618_v50 = vmax.f32 %v554_v44, 0.0  ;;  %v161_v51 = vmul.f32 %v1162_v1, %v774_v45  ;;  %v777_v52 = vunpack.c.l.bf16 %v1021_v40  ;;  %v905_v53 = vunpack.c.l.bf16 %v1052_v41  ;;  %v1053_v59 = vld [vmem:[%s1712_s1 + $0x20] sm:$0xff]   ;;  %v1054_v21 = vld [vmem:[%s1712_s1 + $0x28] sm:$0xff]   ;;  %v1024_v30 = vld [vmem:[%s1711_s0 + $0x30] sm:$0xff]   ;;  %s1120_s21 = smov 8  }
  0x10   :  { %682 = vst.msk [vmem:[#allocation2 + $0x8] sm:$0xff] %vm680_vm0, %v617_v43  ;;  %v619_v55 = vmax.f32 %v555_v46, 0.0  ;;  %v556_v56 = vadd.f32 %v492_v48, %v228_v47  ;;  %v425_v57 = vmul.f32 %v1175_v7, %v902_v49  ;;  %v778_v58 = vunpack.c.h.bf16 %v1021_v40  ;;  %v1055_v35 = vld [vmem:[%s1712_s1 + $0x30] sm:$0xff]   ;;  %v1025_v48 = vld [vmem:[%s1711_s0 + $0x38] sm:$0xff]  }
  0x11   :  { %683 = vst.msk [vmem:[#allocation2 + $0x10] sm:$0xff] %vm680_vm0, %v618_v50  ;;  %v229_v60 = vadd.f32 %v1167_v3, %v161_v51  ;;  %v162_v61 = vmul.f32 %v1162_v1, %v777_v52  ;;  %v426_v62 = vmul.f32 %v1175_v7, %v905_v53  ;;  %v906_v63 = vunpack.c.h.bf16 %v1052_v41  ;;  %v1056_v53 = vld [vmem:[%s1712_s1 + $0x38] sm:$0xff]  }
  0x12   :  { %684 = vst.msk [vmem:[#allocation2 + $0x18] sm:$0xff] %vm680_vm0, %v619_v55  ;;  %v620_v0 = vmax.f32 %v556_v56, 0.0  ;;  %v493_v2 = vadd.f32 %v1181_v10, %v425_v57  ;;  %v163_v4 = vmul.f32 %v1162_v1, %v778_v58  ;;  %v781_v5 = vunpack.c.l.bf16 %v1022_v54 }
  0x13   :  { %v230_v6 = vadd.f32 %v1167_v3, %v162_v61  ;;  %v494_v8 = vadd.f32 %v1181_v10, %v426_v62  ;;  %v427_v9 = vmul.f32 %v1175_v7, %v906_v63  ;;  %v909_v11 = vunpack.c.l.bf16 %v1053_v59 }
  0x14   :  { %685 = vst.msk [vmem:[#allocation2 + $0x20] sm:$0xff] %vm680_vm0, %v620_v0  ;;  %v557_v13 = vadd.f32 %v493_v2, %v229_v60  ;;  %v231_v14 = vadd.f32 %v1167_v3, %v163_v4  ;;  %v164_v15 = vmul.f32 %v1162_v1, %v781_v5  ;;  %v782_v16 = vunpack.c.h.bf16 %v1022_v54  ;;  %v1026_v4 = vld [vmem:[%s1711_s0 + $0x40] sm:$0xff]  }
  0x15   :  { %v558_v17 = vadd.f32 %v494_v8, %v230_v6  ;;  %v495_v18 = vadd.f32 %v1181_v10, %v427_v9  ;;  %v428_v19 = vmul.f32 %v1175_v7, %v909_v11  ;;  %v910_v20 = vunpack.c.h.bf16 %v1053_v59  ;;  %v1057_v11 = vld [vmem:[%s1712_s1 + $0x40] sm:$0xff]  }
  0x16   :  { %v621_v22 = vmax.f32 %v557_v13, 0.0  ;;  %v232_v23 = vadd.f32 %v1167_v3, %v164_v15  ;;  %v165_v24 = vmul.f32 %v1162_v1, %v782_v16  ;;  %v785_v25 = vunpack.c.l.bf16 %v1023_v12 }
  0x17   :  { %v622_v26 = vmax.f32 %v558_v17, 0.0  ;;  %v559_v27 = vadd.f32 %v495_v18, %v231_v14  ;;  %v496_v28 = vadd.f32 %v1181_v10, %v428_v19  ;;  %v429_v29 = vmul.f32 %v1175_v7, %v910_v20 }
  0x18   :  { %686 = vst.msk [vmem:[#allocation2 + $0x28] sm:$0xff] %vm680_vm0, %v621_v22  ;;  %v233_v31 = vadd.f32 %v1167_v3, %v165_v24  ;;  %v166_v32 = vmul.f32 %v1162_v1, %v785_v25  ;;  %v913_v33 = vunpack.c.l.bf16 %v1054_v21  ;;  %v786_v34 = vunpack.c.h.bf16 %v1023_v12  ;;  %v1027_v24 = vld [vmem:[%s1711_s0 + $0x48] sm:$0xff]  }
  0x19   :  { %687 = vst.msk [vmem:[#allocation2 + $0x30] sm:$0xff] %vm680_vm0, %v622_v26  ;;  %v623_v36 = vmax.f32 %v559_v27, 0.0  ;;  %v560_v37 = vadd.f32 %v496_v28, %v232_v23  ;;  %v497_v38 = vadd.f32 %v1181_v10, %v429_v29  ;;  %v914_v39 = vunpack.c.h.bf16 %v1054_v21  ;;  %v1058_v29 = vld [vmem:[%s1712_s1 + $0x48] sm:$0xff]  }
  0x1a   :  { %v234_v40 = vadd.f32 %v1167_v3, %v166_v32  ;;  %v430_v41 = vmul.f32 %v1175_v7, %v913_v33  ;;  %v167_v42 = vmul.f32 %v1162_v1, %v786_v34  ;;  %v789_v43 = vunpack.c.l.bf16 %v1024_v30 }
  0x1b   :  { %688 = vst.msk [vmem:[#allocation2 + $0x38] sm:$0xff] %vm680_vm0, %v623_v36  ;;  %v624_v44 = vmax.f32 %v560_v37, 0.0  ;;  %v561_v45 = vadd.f32 %v497_v38, %v233_v31  ;;  %v431_v46 = vmul.f32 %v1175_v7, %v914_v39  ;;  %v917_v47 = vunpack.c.l.bf16 %v1055_v35 }
  0x1c   :  { %v498_v49 = vadd.f32 %v1181_v10, %v430_v41  ;;  %v235_v50 = vadd.f32 %v1167_v3, %v167_v42  ;;  %v168_v51 = vmul.f32 %v1162_v1, %v789_v43  ;;  %v790_v52 = vunpack.c.h.bf16 %v1024_v30  ;;  %v1028_v42 = vld [vmem:[%s1711_s0 + $0x50] sm:$0xff]  }
  0x1d   :  { %689 = vst.msk [vmem:[#allocation2 + $0x40] sm:$0xff] %vm680_vm0, %v624_v44  ;;  %v625_v54 = vmax.f32 %v561_v45, 0.0  ;;  %v499_v55 = vadd.f32 %v1181_v10, %v431_v46  ;;  %v432_v56 = vmul.f32 %v1175_v7, %v917_v47  ;;  %v918_v57 = vunpack.c.h.bf16 %v1055_v35 }
  0x1e   :  { %v562_v58 = vadd.f32 %v498_v49, %v234_v40  ;;  %v236_v59 = vadd.f32 %v1167_v3, %v168_v51  ;;  %v169_v60 = vmul.f32 %v1162_v1, %v790_v52  ;;  %v793_v61 = vunpack.c.l.bf16 %v1025_v48  ;;  %v1059_v51 = vld [vmem:[%s1712_s1 + $0x50] sm:$0xff]  }
  0x1f   :  { %690 = vst.msk [vmem:[#allocation2 + $0x48] sm:$0xff] %vm680_vm0, %v625_v54  ;;  %v563_v62 = vadd.f32 %v499_v55, %v235_v50  ;;  %v500_v63 = vadd.f32 %v1181_v10, %v432_v56  ;;  %v433_v0 = vmul.f32 %v1175_v7, %v918_v57  ;;  %v921_v2 = vunpack.c.l.bf16 %v1056_v53 }
  0x20   :  { %v626_v5 = vmax.f32 %v562_v58, 0.0  ;;  %v237_v6 = vadd.f32 %v1167_v3, %v169_v60  ;;  %v170_v8 = vmul.f32 %v1162_v1, %v793_v61  ;;  %v794_v9 = vunpack.c.h.bf16 %v1025_v48  ;;  %v1029_v60 = vld [vmem:[%s1711_s0 + $0x58] sm:$0xff]  }
  0x21   :  { %v627_v12 = vmax.f32 %v563_v62, 0.0  ;;  %v564_v13 = vadd.f32 %v500_v63, %v236_v59  ;;  %v501_v14 = vadd.f32 %v1181_v10, %v433_v0  ;;  %v434_v15 = vmul.f32 %v1175_v7, %v921_v2  ;;  %v1060_v2 = vld [vmem:[%s1712_s1 + $0x58] sm:$0xff]  }
  0x22   :  { %691 = vst.msk [vmem:[#allocation2 + $0x50] sm:$0xff] %vm680_vm0, %v626_v5  ;;  %v238_v16 = vadd.f32 %v1167_v3, %v170_v8  ;;  %v171_v17 = vmul.f32 %v1162_v1, %v794_v9  ;;  %v922_v18 = vunpack.c.h.bf16 %v1056_v53  ;;  %v797_v19 = vunpack.c.l.bf16 %v1026_v4 }
  0x23   :  { %692 = vst.msk [vmem:[#allocation2 + $0x58] sm:$0xff] %vm680_vm0, %v627_v12  ;;  %v628_v20 = vmax.f32 %v564_v13, 0.0  ;;  %v565_v21 = vadd.f32 %v501_v14, %v237_v6  ;;  %v502_v22 = vadd.f32 %v1181_v10, %v434_v15  ;;  %v925_v23 = vunpack.c.l.bf16 %v1057_v11 }
  0x24   :  { %v239_v25 = vadd.f32 %v1167_v3, %v171_v17  ;;  %v435_v26 = vmul.f32 %v1175_v7, %v922_v18  ;;  %v172_v27 = vmul.f32 %v1162_v1, %v797_v19  ;;  %v798_v28 = vunpack.c.h.bf16 %v1026_v4  ;;  %v1030_v18 = vld [vmem:[%s1711_s0 + $0x60] sm:$0xff]  }
  0x25   :  { %693 = vst.msk [vmem:[#allocation2 + $0x60] sm:$0xff] %vm680_vm0, %v628_v20  ;;  %v629_v30 = vmax.f32 %v565_v21, 0.0  ;;  %v566_v31 = vadd.f32 %v502_v22, %v238_v16  ;;  %v436_v32 = vmul.f32 %v1175_v7, %v925_v23  ;;  %v926_v33 = vunpack.c.h.bf16 %v1057_v11  ;;  %v1061_v23 = vld [vmem:[%s1712_s1 + $0x60] sm:$0xff]  }
  0x26   :  { %v503_v34 = vadd.f32 %v1181_v10, %v435_v26  ;;  %v240_v35 = vadd.f32 %v1167_v3, %v172_v27  ;;  %v173_v36 = vmul.f32 %v1162_v1, %v798_v28  ;;  %v801_v37 = vunpack.c.l.bf16 %v1027_v24 }
  0x27   :  { %694 = vst.msk [vmem:[#allocation2 + $0x68] sm:$0xff] %vm680_vm0, %v629_v30  ;;  %v630_v38 = vmax.f32 %v566_v31, 0.0  ;;  %v504_v39 = vadd.f32 %v1181_v10, %v436_v32  ;;  %v437_v40 = vmul.f32 %v1175_v7, %v926_v33  ;;  %v929_v41 = vunpack.c.l.bf16 %v1058_v29 }
  0x28   :  { %v567_v43 = vadd.f32 %v503_v34, %v239_v25  ;;  %v241_v44 = vadd.f32 %v1167_v3, %v173_v36  ;;  %v174_v45 = vmul.f32 %v1162_v1, %v801_v37  ;;  %v802_v46 = vunpack.c.h.bf16 %v1027_v24  ;;  %v1031_v36 = vld [vmem:[%s1711_s0 + $0x68] sm:$0xff]  }
  0x29   :  { %695 = vst.msk [vmem:[#allocation2 + $0x70] sm:$0xff] %vm680_vm0, %v630_v38  ;;  %v568_v47 = vadd.f32 %v504_v39, %v240_v35  ;;  %v505_v48 = vadd.f32 %v1181_v10, %v437_v40  ;;  %v438_v49 = vmul.f32 %v1175_v7, %v929_v41  ;;  %v930_v50 = vunpack.c.h.bf16 %v1058_v29  ;;  %v1062_v41 = vld [vmem:[%s1712_s1 + $0x68] sm:$0xff]  }
  0x2a   :  { %v631_v52 = vmax.f32 %v567_v43, 0.0  ;;  %v242_v53 = vadd.f32 %v1167_v3, %v174_v45  ;;  %v175_v54 = vmul.f32 %v1162_v1, %v802_v46  ;;  %v805_v55 = vunpack.c.l.bf16 %v1028_v42 }
  0x2b   :  { %v632_v56 = vmax.f32 %v568_v47, 0.0  ;;  %v569_v57 = vadd.f32 %v505_v48, %v241_v44  ;;  %v506_v58 = vadd.f32 %v1181_v10, %v438_v49  ;;  %v439_v59 = vmul.f32 %v1175_v7, %v930_v50 }
  0x2c   :  { %696 = vst.msk [vmem:[#allocation2 + $0x78] sm:$0xff] %vm680_vm0, %v631_v52  ;;  %v243_v61 = vadd.f32 %v1167_v3, %v175_v54  ;;  %v176_v62 = vmul.f32 %v1162_v1, %v805_v55  ;;  %v933_v63 = vunpack.c.l.bf16 %v1059_v51  ;;  %v806_v0 = vunpack.c.h.bf16 %v1028_v42  ;;  %v1032_v54 = vld [vmem:[%s1711_s0 + $0x70] sm:$0xff]  }
  0x2d   :  { %697 = vst.msk [vmem:[#allocation2 + $0x80] sm:$0xff] %vm680_vm0, %v632_v56  ;;  %v633_v4 = vmax.f32 %v569_v57, 0.0  ;;  %v570_v5 = vadd.f32 %v506_v58, %v242_v53  ;;  %v507_v6 = vadd.f32 %v1181_v10, %v439_v59  ;;  %v934_v8 = vunpack.c.h.bf16 %v1059_v51  ;;  %v1063_v59 = vld [vmem:[%s1712_s1 + $0x70] sm:$0xff]  }
  0x2e   :  { %v244_v9 = vadd.f32 %v1167_v3, %v176_v62  ;;  %v440_v11 = vmul.f32 %v1175_v7, %v933_v63  ;;  %v177_v12 = vmul.f32 %v1162_v1, %v806_v0  ;;  %v809_v13 = vunpack.c.l.bf16 %v1029_v60 }
  0x2f   :  { %698 = vst.msk [vmem:[#allocation2 + $0x88] sm:$0xff] %vm680_vm0, %v633_v4  ;;  %v634_v14 = vmax.f32 %v570_v5, 0.0  ;;  %v571_v15 = vadd.f32 %v507_v6, %v243_v61  ;;  %v441_v16 = vmul.f32 %v1175_v7, %v934_v8  ;;  %v937_v17 = vunpack.c.l.bf16 %v1060_v2 }
  0x30   :  { %v508_v19 = vadd.f32 %v1181_v10, %v440_v11  ;;  %v245_v20 = vadd.f32 %v1167_v3, %v177_v12  ;;  %v178_v21 = vmul.f32 %v1162_v1, %v809_v13  ;;  %v810_v22 = vunpack.c.h.bf16 %v1029_v60  ;;  %v1033_v12 = vld [vmem:[%s1711_s0 + $0x78] sm:$0xff]  }
  0x31   :  { %699 = vst.msk [vmem:[#allocation2 + $0x90] sm:$0xff] %vm680_vm0, %v634_v14  ;;  %v635_v24 = vmax.f32 %v571_v15, 0.0  ;;  %v509_v25 = vadd.f32 %v1181_v10, %v441_v16  ;;  %v442_v26 = vmul.f32 %v1175_v7, %v937_v17  ;;  %v938_v27 = vunpack.c.h.bf16 %v1060_v2 }
  0x32   :  { %v572_v28 = vadd.f32 %v508_v19, %v244_v9  ;;  %v246_v29 = vadd.f32 %v1167_v3, %v178_v21  ;;  %v179_v30 = vmul.f32 %v1162_v1, %v810_v22  ;;  %v813_v31 = vunpack.c.l.bf16 %v1030_v18  ;;  %v1064_v21 = vld [vmem:[%s1712_s1 + $0x78] sm:$0xff]  }
  0x33   :  { %700 = vst.msk [vmem:[#allocation2 + $0x98] sm:$0xff] %vm680_vm0, %v635_v24  ;;  %v573_v32 = vadd.f32 %v509_v25, %v245_v20  ;;  %v510_v33 = vadd.f32 %v1181_v10, %v442_v26  ;;  %v443_v34 = vmul.f32 %v1175_v7, %v938_v27  ;;  %v941_v35 = vunpack.c.l.bf16 %v1061_v23 }
  0x34   :  { %v636_v37 = vmax.f32 %v572_v28, 0.0  ;;  %v247_v38 = vadd.f32 %v1167_v3, %v179_v30  ;;  %v180_v39 = vmul.f32 %v1162_v1, %v813_v31  ;;  %v814_v40 = vunpack.c.h.bf16 %v1030_v18  ;;  %v1034_v30 = vld [vmem:[%s1711_s0 + $0x80] sm:$0xff]  }
  0x35   :  { %v637_v42 = vmax.f32 %v573_v32, 0.0  ;;  %v574_v43 = vadd.f32 %v510_v33, %v246_v29  ;;  %v511_v44 = vadd.f32 %v1181_v10, %v443_v34  ;;  %v444_v45 = vmul.f32 %v1175_v7, %v941_v35  ;;  %v1065_v35 = vld [vmem:[%s1712_s1 + $0x80] sm:$0xff]  }
  0x36   :  { %701 = vst.msk [vmem:[#allocation2 + $0xa0] sm:$0xff] %vm680_vm0, %v636_v37  ;;  %v248_v46 = vadd.f32 %v1167_v3, %v180_v39  ;;  %v181_v47 = vmul.f32 %v1162_v1, %v814_v40  ;;  %v942_v48 = vunpack.c.h.bf16 %v1061_v23  ;;  %v817_v49 = vunpack.c.l.bf16 %v1031_v36 }
  0x37   :  { %702 = vst.msk [vmem:[#allocation2 + $0xa8] sm:$0xff] %vm680_vm0, %v637_v42  ;;  %v638_v50 = vmax.f32 %v574_v43, 0.0  ;;  %v575_v51 = vadd.f32 %v511_v44, %v247_v38  ;;  %v512_v52 = vadd.f32 %v1181_v10, %v444_v45  ;;  %v945_v53 = vunpack.c.l.bf16 %v1062_v41 }
  0x38   :  { %v249_v55 = vadd.f32 %v1167_v3, %v181_v47  ;;  %v445_v56 = vmul.f32 %v1175_v7, %v942_v48  ;;  %v182_v57 = vmul.f32 %v1162_v1, %v817_v49  ;;  %v818_v58 = vunpack.c.h.bf16 %v1031_v36  ;;  %v1035_v48 = vld [vmem:[%s1711_s0 + $0x88] sm:$0xff]  }
  0x39   :  { %703 = vst.msk [vmem:[#allocation2 + $0xb0] sm:$0xff] %vm680_vm0, %v638_v50  ;;  %v639_v60 = vmax.f32 %v575_v51, 0.0  ;;  %v576_v61 = vadd.f32 %v512_v52, %v248_v46  ;;  %v446_v62 = vmul.f32 %v1175_v7, %v945_v53  ;;  %v946_v63 = vunpack.c.h.bf16 %v1062_v41  ;;  %v1066_v53 = vld [vmem:[%s1712_s1 + $0x88] sm:$0xff]  }
  0x3a   :  { %v513_v0 = vadd.f32 %v1181_v10, %v445_v56  ;;  %v250_v2 = vadd.f32 %v1167_v3, %v182_v57  ;;  %v183_v4 = vmul.f32 %v1162_v1, %v818_v58  ;;  %v821_v5 = vunpack.c.l.bf16 %v1032_v54 }
  0x3b   :  { %704 = vst.msk [vmem:[#allocation2 + $0xb8] sm:$0xff] %vm680_vm0, %v639_v60  ;;  %v640_v6 = vmax.f32 %v576_v61, 0.0  ;;  %v514_v8 = vadd.f32 %v1181_v10, %v446_v62  ;;  %v447_v9 = vmul.f32 %v1175_v7, %v946_v63  ;;  %v949_v11 = vunpack.c.l.bf16 %v1063_v59 }
  0x3c   :  { %v577_v13 = vadd.f32 %v513_v0, %v249_v55  ;;  %v251_v14 = vadd.f32 %v1167_v3, %v183_v4  ;;  %v184_v15 = vmul.f32 %v1162_v1, %v821_v5  ;;  %v822_v16 = vunpack.c.h.bf16 %v1032_v54  ;;  %v1036_v4 = vld [vmem:[%s1711_s0 + $0x90] sm:$0xff]  }
  0x3d   :  { %705 = vst.msk [vmem:[#allocation2 + $0xc0] sm:$0xff] %vm680_vm0, %v640_v6  ;;  %v578_v17 = vadd.f32 %v514_v8, %v250_v2  ;;  %v515_v18 = vadd.f32 %v1181_v10, %v447_v9  ;;  %v448_v19 = vmul.f32 %v1175_v7, %v949_v11  ;;  %v950_v20 = vunpack.c.h.bf16 %v1063_v59  ;;  %v1067_v11 = vld [vmem:[%s1712_s1 + $0x90] sm:$0xff]  }
  0x3e   :  { %v641_v22 = vmax.f32 %v577_v13, 0.0  ;;  %v252_v23 = vadd.f32 %v1167_v3, %v184_v15  ;;  %v185_v24 = vmul.f32 %v1162_v1, %v822_v16  ;;  %v825_v25 = vunpack.c.l.bf16 %v1033_v12 }
  0x3f   :  { %v642_v26 = vmax.f32 %v578_v17, 0.0  ;;  %v579_v27 = vadd.f32 %v515_v18, %v251_v14  ;;  %v516_v28 = vadd.f32 %v1181_v10, %v448_v19  ;;  %v449_v29 = vmul.f32 %v1175_v7, %v950_v20 }
  0x40   :  { %706 = vst.msk [vmem:[#allocation2 + $0xc8] sm:$0xff] %vm680_vm0, %v641_v22  ;;  %v253_v31 = vadd.f32 %v1167_v3, %v185_v24  ;;  %v186_v32 = vmul.f32 %v1162_v1, %v825_v25  ;;  %v953_v33 = vunpack.c.l.bf16 %v1064_v21  ;;  %v826_v34 = vunpack.c.h.bf16 %v1033_v12  ;;  %v1037_v24 = vld [vmem:[%s1711_s0 + $0x98] sm:$0xff]  }
  0x41   :  { %707 = vst.msk [vmem:[#allocation2 + $0xd0] sm:$0xff] %vm680_vm0, %v642_v26  ;;  %v643_v36 = vmax.f32 %v579_v27, 0.0  ;;  %v580_v37 = vadd.f32 %v516_v28, %v252_v23  ;;  %v517_v38 = vadd.f32 %v1181_v10, %v449_v29  ;;  %v954_v39 = vunpack.c.h.bf16 %v1064_v21  ;;  %v1068_v29 = vld [vmem:[%s1712_s1 + $0x98] sm:$0xff]  }
  0x42   :  { %v254_v40 = vadd.f32 %v1167_v3, %v186_v32  ;;  %v450_v41 = vmul.f32 %v1175_v7, %v953_v33  ;;  %v187_v42 = vmul.f32 %v1162_v1, %v826_v34  ;;  %v829_v43 = vunpack.c.l.bf16 %v1034_v30 }
  0x43   :  { %708 = vst.msk [vmem:[#allocation2 + $0xd8] sm:$0xff] %vm680_vm0, %v643_v36  ;;  %v644_v44 = vmax.f32 %v580_v37, 0.0  ;;  %v581_v45 = vadd.f32 %v517_v38, %v253_v31  ;;  %v451_v46 = vmul.f32 %v1175_v7, %v954_v39  ;;  %v957_v47 = vunpack.c.l.bf16 %v1065_v35 }
  0x44   :  { %v518_v49 = vadd.f32 %v1181_v10, %v450_v41  ;;  %v255_v50 = vadd.f32 %v1167_v3, %v187_v42  ;;  %v188_v51 = vmul.f32 %v1162_v1, %v829_v43  ;;  %v830_v52 = vunpack.c.h.bf16 %v1034_v30  ;;  %v1038_v42 = vld [vmem:[%s1711_s0 + $0xa0] sm:$0xff]  }
  0x45   :  { %709 = vst.msk [vmem:[#allocation2 + $0xe0] sm:$0xff] %vm680_vm0, %v644_v44  ;;  %v645_v54 = vmax.f32 %v581_v45, 0.0  ;;  %v519_v55 = vadd.f32 %v1181_v10, %v451_v46  ;;  %v452_v56 = vmul.f32 %v1175_v7, %v957_v47  ;;  %v958_v57 = vunpack.c.h.bf16 %v1065_v35 }
  0x46   :  { %v582_v58 = vadd.f32 %v518_v49, %v254_v40  ;;  %v256_v59 = vadd.f32 %v1167_v3, %v188_v51  ;;  %v189_v60 = vmul.f32 %v1162_v1, %v830_v52  ;;  %v833_v61 = vunpack.c.l.bf16 %v1035_v48  ;;  %v1069_v51 = vld [vmem:[%s1712_s1 + $0xa0] sm:$0xff]  }
  0x47   :  { %710 = vst.msk [vmem:[#allocation2 + $0xe8] sm:$0xff] %vm680_vm0, %v645_v54  ;;  %v583_v62 = vadd.f32 %v519_v55, %v255_v50  ;;  %v520_v63 = vadd.f32 %v1181_v10, %v452_v56  ;;  %v453_v0 = vmul.f32 %v1175_v7, %v958_v57  ;;  %v961_v2 = vunpack.c.l.bf16 %v1066_v53 }
  0x48   :  { %v646_v5 = vmax.f32 %v582_v58, 0.0  ;;  %v257_v6 = vadd.f32 %v1167_v3, %v189_v60  ;;  %v190_v8 = vmul.f32 %v1162_v1, %v833_v61  ;;  %v834_v9 = vunpack.c.h.bf16 %v1035_v48  ;;  %v1039_v60 = vld [vmem:[%s1711_s0 + $0xa8] sm:$0xff]  }
  0x49   :  { %v647_v12 = vmax.f32 %v583_v62, 0.0  ;;  %v584_v13 = vadd.f32 %v520_v63, %v256_v59  ;;  %v521_v14 = vadd.f32 %v1181_v10, %v453_v0  ;;  %v454_v15 = vmul.f32 %v1175_v7, %v961_v2  ;;  %v1070_v2 = vld [vmem:[%s1712_s1 + $0xa8] sm:$0xff]  }
  0x4a   :  { %711 = vst.msk [vmem:[#allocation2 + $0xf0] sm:$0xff] %vm680_vm0, %v646_v5  ;;  %v258_v16 = vadd.f32 %v1167_v3, %v190_v8  ;;  %v191_v17 = vmul.f32 %v1162_v1, %v834_v9  ;;  %v962_v18 = vunpack.c.h.bf16 %v1066_v53  ;;  %v837_v19 = vunpack.c.l.bf16 %v1036_v4 }
  0x4b   :  { %712 = vst.msk [vmem:[#allocation2 + $0xf8] sm:$0xff] %vm680_vm0, %v647_v12  ;;  %v648_v20 = vmax.f32 %v584_v13, 0.0  ;;  %v585_v21 = vadd.f32 %v521_v14, %v257_v6  ;;  %v522_v22 = vadd.f32 %v1181_v10, %v454_v15  ;;  %v965_v23 = vunpack.c.l.bf16 %v1067_v11 }
  0x4c   :  { %v259_v25 = vadd.f32 %v1167_v3, %v191_v17  ;;  %v455_v26 = vmul.f32 %v1175_v7, %v962_v18  ;;  %v192_v27 = vmul.f32 %v1162_v1, %v837_v19  ;;  %v838_v28 = vunpack.c.h.bf16 %v1036_v4  ;;  %v1040_v18 = vld [vmem:[%s1711_s0 + $0xb0] sm:$0xff]  }
  0x4d   :  { %713 = vst.msk [vmem:[#allocation2 + $0x100] sm:$0xff] %vm680_vm0, %v648_v20  ;;  %v649_v30 = vmax.f32 %v585_v21, 0.0  ;;  %v586_v31 = vadd.f32 %v522_v22, %v258_v16  ;;  %v456_v32 = vmul.f32 %v1175_v7, %v965_v23  ;;  %v966_v33 = vunpack.c.h.bf16 %v1067_v11  ;;  %v1071_v23 = vld [vmem:[%s1712_s1 + $0xb0] sm:$0xff]  }
  0x4e   :  { %v523_v34 = vadd.f32 %v1181_v10, %v455_v26  ;;  %v260_v35 = vadd.f32 %v1167_v3, %v192_v27  ;;  %v193_v36 = vmul.f32 %v1162_v1, %v838_v28  ;;  %v841_v37 = vunpack.c.l.bf16 %v1037_v24 }
  0x4f   :  { %714 = vst.msk [vmem:[#allocation2 + $0x108] sm:$0xff] %vm680_vm0, %v649_v30  ;;  %v650_v38 = vmax.f32 %v586_v31, 0.0  ;;  %v524_v39 = vadd.f32 %v1181_v10, %v456_v32  ;;  %v457_v40 = vmul.f32 %v1175_v7, %v966_v33  ;;  %v969_v41 = vunpack.c.l.bf16 %v1068_v29 }
  0x50   :  { %v587_v43 = vadd.f32 %v523_v34, %v259_v25  ;;  %v261_v44 = vadd.f32 %v1167_v3, %v193_v36  ;;  %v194_v45 = vmul.f32 %v1162_v1, %v841_v37  ;;  %v842_v46 = vunpack.c.h.bf16 %v1037_v24  ;;  %v1041_v36 = vld [vmem:[%s1711_s0 + $0xb8] sm:$0xff]  }
  0x51   :  { %715 = vst.msk [vmem:[#allocation2 + $0x110] sm:$0xff] %vm680_vm0, %v650_v38  ;;  %v588_v47 = vadd.f32 %v524_v39, %v260_v35  ;;  %v525_v48 = vadd.f32 %v1181_v10, %v457_v40  ;;  %v458_v49 = vmul.f32 %v1175_v7, %v969_v41  ;;  %v970_v50 = vunpack.c.h.bf16 %v1068_v29  ;;  %v1072_v41 = vld [vmem:[%s1712_s1 + $0xb8] sm:$0xff]  }
  0x52   :  { %v651_v52 = vmax.f32 %v587_v43, 0.0  ;;  %v262_v53 = vadd.f32 %v1167_v3, %v194_v45  ;;  %v195_v54 = vmul.f32 %v1162_v1, %v842_v46  ;;  %v845_v55 = vunpack.c.l.bf16 %v1038_v42 }
  0x53   :  { %v652_v56 = vmax.f32 %v588_v47, 0.0  ;;  %v589_v57 = vadd.f32 %v525_v48, %v261_v44  ;;  %v526_v58 = vadd.f32 %v1181_v10, %v458_v49  ;;  %v459_v59 = vmul.f32 %v1175_v7, %v970_v50 }
  0x54   :  { %716 = vst.msk [vmem:[#allocation2 + $0x118] sm:$0xff] %vm680_vm0, %v651_v52  ;;  %v263_v61 = vadd.f32 %v1167_v3, %v195_v54  ;;  %v196_v62 = vmul.f32 %v1162_v1, %v845_v55  ;;  %v973_v63 = vunpack.c.l.bf16 %v1069_v51  ;;  %v846_v0 = vunpack.c.h.bf16 %v1038_v42  ;;  %v1042_v54 = vld [vmem:[%s1711_s0 + $0xc0] sm:$0xff]  }
  0x55   :  { %717 = vst.msk [vmem:[#allocation2 + $0x120] sm:$0xff] %vm680_vm0, %v652_v56  ;;  %v653_v4 = vmax.f32 %v589_v57, 0.0  ;;  %v590_v5 = vadd.f32 %v526_v58, %v262_v53  ;;  %v527_v6 = vadd.f32 %v1181_v10, %v459_v59  ;;  %v974_v8 = vunpack.c.h.bf16 %v1069_v51  ;;  %v1073_v59 = vld [vmem:[%s1712_s1 + $0xc0] sm:$0xff]  }
  0x56   :  { %v264_v9 = vadd.f32 %v1167_v3, %v196_v62  ;;  %v460_v11 = vmul.f32 %v1175_v7, %v973_v63  ;;  %v197_v12 = vmul.f32 %v1162_v1, %v846_v0  ;;  %v849_v13 = vunpack.c.l.bf16 %v1039_v60 }
  0x57   :  { %718 = vst.msk [vmem:[#allocation2 + $0x128] sm:$0xff] %vm680_vm0, %v653_v4  ;;  %v654_v14 = vmax.f32 %v590_v5, 0.0  ;;  %v591_v15 = vadd.f32 %v527_v6, %v263_v61  ;;  %v461_v16 = vmul.f32 %v1175_v7, %v974_v8  ;;  %v977_v17 = vunpack.c.l.bf16 %v1070_v2 }
  0x58   :  { %v528_v19 = vadd.f32 %v1181_v10, %v460_v11  ;;  %v265_v20 = vadd.f32 %v1167_v3, %v197_v12  ;;  %v198_v21 = vmul.f32 %v1162_v1, %v849_v13  ;;  %v850_v22 = vunpack.c.h.bf16 %v1039_v60  ;;  %v1043_v12 = vld [vmem:[%s1711_s0 + $0xc8] sm:$0xff]  }
  0x59   :  { %719 = vst.msk [vmem:[#allocation2 + $0x130] sm:$0xff] %vm680_vm0, %v654_v14  ;;  %v655_v24 = vmax.f32 %v591_v15, 0.0  ;;  %v529_v25 = vadd.f32 %v1181_v10, %v461_v16  ;;  %v462_v26 = vmul.f32 %v1175_v7, %v977_v17  ;;  %v978_v27 = vunpack.c.h.bf16 %v1070_v2 }
  0x5a   :  { %v592_v28 = vadd.f32 %v528_v19, %v264_v9  ;;  %v266_v29 = vadd.f32 %v1167_v3, %v198_v21  ;;  %v199_v30 = vmul.f32 %v1162_v1, %v850_v22  ;;  %v853_v31 = vunpack.c.l.bf16 %v1040_v18  ;;  %v1074_v21 = vld [vmem:[%s1712_s1 + $0xc8] sm:$0xff]  }
  0x5b   :  { %720 = vst.msk [vmem:[#allocation2 + $0x138] sm:$0xff] %vm680_vm0, %v655_v24  ;;  %v593_v32 = vadd.f32 %v529_v25, %v265_v20  ;;  %v530_v33 = vadd.f32 %v1181_v10, %v462_v26  ;;  %v463_v34 = vmul.f32 %v1175_v7, %v978_v27  ;;  %v981_v35 = vunpack.c.l.bf16 %v1071_v23 }
  0x5c   :  { %v656_v37 = vmax.f32 %v592_v28, 0.0  ;;  %v267_v38 = vadd.f32 %v1167_v3, %v199_v30  ;;  %v200_v39 = vmul.f32 %v1162_v1, %v853_v31  ;;  %v854_v40 = vunpack.c.h.bf16 %v1040_v18  ;;  %v1044_v30 = vld [vmem:[%s1711_s0 + $0xd0] sm:$0xff]  }
  0x5d   :  { %v657_v42 = vmax.f32 %v593_v32, 0.0  ;;  %v594_v43 = vadd.f32 %v530_v33, %v266_v29  ;;  %v531_v44 = vadd.f32 %v1181_v10, %v463_v34  ;;  %v464_v45 = vmul.f32 %v1175_v7, %v981_v35  ;;  %v1075_v35 = vld [vmem:[%s1712_s1 + $0xd0] sm:$0xff]  }
  0x5e   :  { %721 = vst.msk [vmem:[#allocation2 + $0x140] sm:$0xff] %vm680_vm0, %v656_v37  ;;  %v268_v46 = vadd.f32 %v1167_v3, %v200_v39  ;;  %v201_v47 = vmul.f32 %v1162_v1, %v854_v40  ;;  %v982_v48 = vunpack.c.h.bf16 %v1071_v23  ;;  %v857_v49 = vunpack.c.l.bf16 %v1041_v36 }
  0x5f   :  { %722 = vst.msk [vmem:[#allocation2 + $0x148] sm:$0xff] %vm680_vm0, %v657_v42  ;;  %v658_v50 = vmax.f32 %v594_v43, 0.0  ;;  %v595_v51 = vadd.f32 %v531_v44, %v267_v38  ;;  %v532_v52 = vadd.f32 %v1181_v10, %v464_v45  ;;  %v985_v53 = vunpack.c.l.bf16 %v1072_v41 }
  0x60   :  { %v269_v55 = vadd.f32 %v1167_v3, %v201_v47  ;;  %v465_v56 = vmul.f32 %v1175_v7, %v982_v48  ;;  %v202_v57 = vmul.f32 %v1162_v1, %v857_v49  ;;  %v858_v58 = vunpack.c.h.bf16 %v1041_v36  ;;  %v1603_v49 = vld [vmem:[%s1714_s3] ss:$0 sm:$0xff] }
  0x61   :  { %723 = vst.msk [vmem:[#allocation2 + $0x150] sm:$0xff] %vm680_vm0, %v658_v50  ;;  %v659_v60 = vmax.f32 %v595_v51, 0.0  ;;  %v596_v61 = vadd.f32 %v532_v52, %v268_v46  ;;  %v466_v62 = vmul.f32 %v1175_v7, %v985_v53  ;;  %v986_v63 = vunpack.c.h.bf16 %v1072_v41 }
  0x62   :  { %v533_v0 = vadd.f32 %v1181_v10, %v465_v56  ;;  %v270_v2 = vadd.f32 %v1167_v3, %v202_v57  ;;  %v203_v4 = vmul.f32 %v1162_v1, %v858_v58  ;;  %v861_v5 = vunpack.c.l.bf16 %v1042_v54 }
  0x63   :  { %724 = vst.msk [vmem:[#allocation2 + $0x158] sm:$0xff] %vm680_vm0, %v659_v60  ;;  %v660_v6 = vmax.f32 %v596_v61, 0.0  ;;  %v534_v8 = vadd.f32 %v1181_v10, %v466_v62  ;;  %v467_v9 = vmul.f32 %v1175_v7, %v986_v63  ;;  %v989_v11 = vunpack.c.l.bf16 %v1073_v59 }
  0x64   :  { %v597_v13 = vadd.f32 %v533_v0, %v269_v55  ;;  %v271_v14 = vadd.f32 %v1167_v3, %v203_v4  ;;  %v204_v15 = vmul.f32 %v1162_v1, %v861_v5  ;;  %v862_v16 = vunpack.c.h.bf16 %v1042_v54  ;;  %v1620_v55 = vld [vmem:[%s1715_s4] ss:$0 sm:$0xff] }
  0x65   :  { %725 = vst.msk [vmem:[#allocation2 + $0x160] sm:$0xff] %vm680_vm0, %v660_v6  ;;  %v598_v17 = vadd.f32 %v534_v8, %v270_v2  ;;  %v535_v18 = vadd.f32 %v1181_v10, %v467_v9  ;;  %v468_v19 = vmul.f32 %v1175_v7, %v989_v11  ;;  %v990_v20 = vunpack.c.h.bf16 %v1073_v59  ;;  %v1046_v4 = vld [vmem:[%s1711_s0 + $0xe0] sm:$0xff]  }
  0x66   :  { %v661_v22 = vmax.f32 %v597_v13, 0.0  ;;  %v272_v23 = vadd.f32 %v1167_v3, %v204_v15  ;;  %v205_v24 = vmul.f32 %v1162_v1, %v862_v16  ;;  %v865_v25 = vunpack.c.l.bf16 %v1043_v12  ;;  %v1077_v11 = vld [vmem:[%s1712_s1 + $0xe0] sm:$0xff]  }
  0x67   :  { %v662_v26 = vmax.f32 %v598_v17, 0.0  ;;  %v599_v27 = vadd.f32 %v535_v18, %v271_v14  ;;  %v536_v28 = vadd.f32 %v1181_v10, %v468_v19  ;;  %v469_v29 = vmul.f32 %v1175_v7, %v990_v20 }
  0x68   :  { %726 = vst.msk [vmem:[#allocation2 + $0x168] sm:$0xff] %vm680_vm0, %v661_v22  ;;  %v273_v31 = vadd.f32 %v1167_v3, %v205_v24  ;;  %v206_v32 = vmul.f32 %v1162_v1, %v865_v25  ;;  %v993_v33 = vunpack.c.l.bf16 %v1074_v21  ;;  %v866_v34 = vunpack.c.h.bf16 %v1043_v12  ;;  %v1591_v1 = vld [vmem:[%s1713_s2] ss:$0 sm:$0xff]  ;;  %v1047_v24 = vld [vmem:[%s1711_s0 + $0xe8] sm:$0xff]  }
  0x69   :  { %727 = vst.msk [vmem:[#allocation2 + $0x170] sm:$0xff] %vm680_vm0, %v662_v26  ;;  %v663_v36 = vmax.f32 %v599_v27, 0.0  ;;  %v600_v37 = vadd.f32 %v536_v28, %v272_v23  ;;  %v537_v38 = vadd.f32 %v1181_v10, %v469_v29  ;;  %v994_v39 = vunpack.c.h.bf16 %v1074_v21  ;;  %v1078_v29 = vld [vmem:[%s1712_s1 + $0xe8] sm:$0xff]  }
  0x6a   :  { %v274_v40 = vadd.f32 %v1167_v3, %v206_v32  ;;  %v470_v41 = vmul.f32 %v1175_v7, %v993_v33  ;;  %v207_v42 = vmul.f32 %v1591_v1, %v866_v34  ;;  %v869_v43 = vunpack.c.l.bf16 %v1044_v30  ;;  %v1045_v3 = vld [vmem:[%s1711_s0 + $0xd8] sm:$0xff]  }
  0x6b   :  { %728 = vst.msk [vmem:[#allocation2 + $0x178] sm:$0xff] %vm680_vm0, %v663_v36  ;;  %v664_v44 = vmax.f32 %v600_v37, 0.0  ;;  %v601_v45 = vadd.f32 %v537_v38, %v273_v31  ;;  %v471_v46 = vmul.f32 %v1175_v7, %v994_v39  ;;  %v997_v47 = vunpack.c.l.bf16 %v1075_v35  ;;  %v1076_v7 = vld [vmem:[%s1712_s1 + $0xd8] sm:$0xff]  }
  0x6c   :  { %v538_v48 = vadd.f32 %v1181_v10, %v470_v41  ;;  %v275_v50 = vadd.f32 %v1603_v49, %v207_v42  ;;  %v208_v51 = vmul.f32 %v1591_v1, %v869_v43  ;;  %v870_v52 = vunpack.c.h.bf16 %v1044_v30  ;;  %v1614_v10 = vld [vmem:[%s1716_s5] ss:$0 sm:$0xff]  ;;  %v1048_v42 = vld [vmem:[%s1711_s0 + $0xf0] sm:$0xff]  }
  0x6d   :  { %729 = vst.msk [vmem:[#allocation2 + $0x180] sm:$0xff] %vm680_vm0, %v664_v44  ;;  %v665_v53 = vmax.f32 %v601_v45, 0.0  ;;  %v539_v54 = vadd.f32 %v1614_v10, %v471_v46  ;;  %v472_v56 = vmul.f32 %v1620_v55, %v997_v47  ;;  %v998_v57 = vunpack.c.h.bf16 %v1075_v35 }
  0x6e   :  { %v602_v58 = vadd.f32 %v538_v48, %v274_v40  ;;  %v276_v59 = vadd.f32 %v1603_v49, %v208_v51  ;;  %v209_v60 = vmul.f32 %v1591_v1, %v870_v52  ;;  %v873_v61 = vunpack.c.l.bf16 %v1045_v3  ;;  %v1079_v51 = vld [vmem:[%s1712_s1 + $0xf0] sm:$0xff]  }
  0x6f   :  { %730 = vst.msk [vmem:[#allocation2 + $0x188] sm:$0xff] %vm680_vm0, %v665_v53  ;;  %v603_v62 = vadd.f32 %v539_v54, %v275_v50  ;;  %v540_v63 = vadd.f32 %v1614_v10, %v472_v56  ;;  %v473_v0 = vmul.f32 %v1620_v55, %v998_v57  ;;  %v1001_v2 = vunpack.c.l.bf16 %v1076_v7 }
  0x70   :  { %v666_v5 = vmax.f32 %v602_v58, 0.0  ;;  %v277_v6 = vadd.f32 %v1603_v49, %v209_v60  ;;  %v210_v8 = vmul.f32 %v1591_v1, %v873_v61  ;;  %v874_v9 = vunpack.c.h.bf16 %v1045_v3  ;;  %v1049_v60 = vld [vmem:[%s1711_s0 + $0xf8] sm:$0xff]   ;;  %s1118_s0 = smov [#allocation2]  }
  0x71   :  { %v667_v12 = vmax.f32 %v603_v62, 0.0  ;;  %v604_v13 = vadd.f32 %v540_v63, %v276_v59  ;;  %v541_v14 = vadd.f32 %v1614_v10, %v473_v0  ;;  %v474_v15 = vmul.f32 %v1620_v55, %v1001_v2  ;;  %v1080_v2 = vld [vmem:[%s1712_s1 + $0xf8] sm:$0xff]   ;;  %s749_s1 = sshll.u32 %s1118_s0, 4  ;;  %s750_s1 = int_to_ptr.vmem [resolvable:$true] %s749_s1 }
  0x72   :  { %731 = vst.msk [vmem:[#allocation2 + $0x190] sm:$0xff] %vm680_vm0, %v666_v5  ;;  %v278_v16 = vadd.f32 %v1603_v49, %v210_v8  ;;  %v211_v17 = vmul.f32 %v1591_v1, %v874_v9  ;;  %v1002_v18 = vunpack.c.h.bf16 %v1076_v7  ;;  %v877_v19 = vunpack.c.l.bf16 %v1046_v4 }
  0x73   :  { %732 = vst.msk [vmem:[#allocation2 + $0x198] sm:$0xff] %vm680_vm0, %v667_v12  ;;  %v668_v20 = vmax.f32 %v604_v13, 0.0  ;;  %v605_v21 = vadd.f32 %v541_v14, %v277_v6  ;;  %v542_v22 = vadd.f32 %v1614_v10, %v474_v15  ;;  %v1005_v23 = vunpack.c.l.bf16 %v1077_v11 }
  0x74   :  { %v279_v25 = vadd.f32 %v1603_v49, %v211_v17  ;;  %v475_v26 = vmul.f32 %v1620_v55, %v1002_v18  ;;  %v212_v27 = vmul.f32 %v1591_v1, %v877_v19  ;;  %v878_v28 = vunpack.c.h.bf16 %v1046_v4 }
  0x75   :  { %733 = vst.msk [vmem:[#allocation2 + $0x1a0] sm:$0xff] %vm680_vm0, %v668_v20  ;;  %v669_v30 = vmax.f32 %v605_v21, 0.0  ;;  %v606_v31 = vadd.f32 %v542_v22, %v278_v16  ;;  %v476_v32 = vmul.f32 %v1620_v55, %v1005_v23  ;;  %v1006_v33 = vunpack.c.h.bf16 %v1077_v11 }
  0x76   :  { %v543_v34 = vadd.f32 %v1614_v10, %v475_v26  ;;  %v280_v35 = vadd.f32 %v1603_v49, %v212_v27  ;;  %v213_v36 = vmul.f32 %v1591_v1, %v878_v28  ;;  %v881_v37 = vunpack.c.l.bf16 %v1047_v24 }
  0x77   :  { %734 = vst.msk [vmem:[#allocation2 + $0x1a8] sm:$0xff] %vm680_vm0, %v669_v30  ;;  %v670_v38 = vmax.f32 %v606_v31, 0.0  ;;  %v544_v39 = vadd.f32 %v1614_v10, %v476_v32  ;;  %v477_v40 = vmul.f32 %v1620_v55, %v1006_v33  ;;  %v1009_v41 = vunpack.c.l.bf16 %v1078_v29 }
  0x78   :  { %v607_v43 = vadd.f32 %v543_v34, %v279_v25  ;;  %v281_v44 = vadd.f32 %v1603_v49, %v213_v36  ;;  %v214_v45 = vmul.f32 %v1591_v1, %v881_v37  ;;  %v882_v46 = vunpack.c.h.bf16 %v1047_v24 }
  0x79   :  { %735 = vst.msk [vmem:[#allocation2 + $0x1b0] sm:$0xff] %vm680_vm0, %v670_v38  ;;  %v608_v47 = vadd.f32 %v544_v39, %v280_v35  ;;  %v545_v3 = vadd.f32 %v1614_v10, %v477_v40  ;;  %v478_v48 = vmul.f32 %v1620_v55, %v1009_v41  ;;  %v1010_v50 = vunpack.c.h.bf16 %v1078_v29 }
  0x7a   :  { %v671_v52 = vmax.f32 %v607_v43, 0.0  ;;  %v282_v7 = vadd.f32 %v1603_v49, %v214_v45  ;;  %v215_v53 = vmul.f32 %v1591_v1, %v882_v46  ;;  %v885_v54 = vunpack.c.l.bf16 %v1048_v42 }
  0x7b   :  { %v672_v56 = vmax.f32 %v608_v47, 0.0  ;;  %v609_v57 = vadd.f32 %v545_v3, %v281_v44  ;;  %v546_v58 = vadd.f32 %v1614_v10, %v478_v48  ;;  %v479_v59 = vmul.f32 %v1620_v55, %v1010_v50 }
  0x7c   :  { %736 = vst.msk [vmem:[#allocation2 + $0x1b8] sm:$0xff] %vm680_vm0, %v671_v52  ;;  %v283_v61 = vadd.f32 %v1603_v49, %v215_v53  ;;  %v216_v62 = vmul.f32 %v1591_v1, %v885_v54  ;;  %v1013_v63 = vunpack.c.l.bf16 %v1079_v51  ;;  %v886_v0 = vunpack.c.h.bf16 %v1048_v42 }
  0x7d   :  { %737 = vst.msk [vmem:[#allocation2 + $0x1c0] sm:$0xff] %vm680_vm0, %v672_v56  ;;  %v673_v4 = vmax.f32 %v609_v57, 0.0  ;;  %v610_v5 = vadd.f32 %v546_v58, %v282_v7  ;;  %v547_v6 = vadd.f32 %v1614_v10, %v479_v59  ;;  %v1014_v8 = vunpack.c.h.bf16 %v1079_v51 }
  0x7e   :  { %v284_v9 = vadd.f32 %v1603_v49, %v216_v62  ;;  %v480_v11 = vmul.f32 %v1620_v55, %v1013_v63  ;;  %v217_v12 = vmul.f32 %v1591_v1, %v886_v0  ;;  %v889_v13 = vunpack.c.l.bf16 %v1049_v60 }
  0x7f   :  { %738 = vst.msk [vmem:[#allocation2 + $0x1c8] sm:$0xff] %vm680_vm0, %v673_v4  ;;  %v674_v14 = vmax.f32 %v610_v5, 0.0  ;;  %v611_v15 = vadd.f32 %v547_v6, %v283_v61  ;;  %v481_v16 = vmul.f32 %v1620_v55, %v1014_v8  ;;  %v1017_v17 = vunpack.c.l.bf16 %v1080_v2 }
  0x80   :  { %v548_v18 = vadd.f32 %v1614_v10, %v480_v11  ;;  %v285_v19 = vadd.f32 %v1603_v49, %v217_v12  ;;  %v218_v20 = vmul.f32 %v1591_v1, %v889_v13  ;;  %v890_v21 = vunpack.c.h.bf16 %v1049_v60 }
  0x81   :  { %739 = vst.msk [vmem:[#allocation2 + $0x1d0] sm:$0xff] %vm680_vm0, %v674_v14  ;;  %v675_v22 = vmax.f32 %v611_v15, 0.0  ;;  %v549_v23 = vadd.f32 %v1614_v10, %v481_v16  ;;  %v482_v24 = vmul.f32 %v1620_v55, %v1017_v17  ;;  %v1018_v25 = vunpack.c.h.bf16 %v1080_v2 }
  0x82   :  { %v612_v26 = vadd.f32 %v548_v18, %v284_v9  ;;  %v286_v27 = vadd.f32 %v1603_v49, %v218_v20  ;;  %v219_v28 = vmul.f32 %v1591_v1, %v890_v21 }
  0x83   :  { %740 = vst.msk [vmem:[#allocation2 + $0x1d8] sm:$0xff] %vm680_vm0, %v675_v22  ;;  %v613_v29 = vadd.f32 %v549_v23, %v285_v19  ;;  %v550_v30 = vadd.f32 %v1614_v10, %v482_v24  ;;  %v483_v31 = vmul.f32 %v1620_v55, %v1018_v25 }
  0x84   :  { %v676_v32 = vmax.f32 %v612_v26, 0.0  ;;  %v287_v33 = vadd.f32 %v1603_v49, %v219_v28 }
  0x85   :  { %v677_v34 = vmax.f32 %v613_v29, 0.0  ;;  %v614_v35 = vadd.f32 %v550_v30, %v286_v27  ;;  %v551_v36 = vadd.f32 %v1614_v10, %v483_v31 }
  0x86   :  { %741 = vst.msk [vmem:[#allocation2 + $0x1e0] sm:$0xff] %vm680_vm0, %v676_v32 }
  0x87   :  { %742 = vst.msk [vmem:[#allocation2 + $0x1e8] sm:$0xff] %vm680_vm0, %v677_v34  ;;  %v678_v1 = vmax.f32 %v614_v35, 0.0  ;;  %v615_v37 = vadd.f32 %v551_v36, %v287_v33 }
  0x89   :  { %743 = vst.msk [vmem:[#allocation2 + $0x1f0] sm:$0xff] %vm680_vm0, %v678_v1  ;;  %v679_v49 = vmax.f32 %v615_v37, 0.0 }
  0x8b   :  { %744 = vst.msk [vmem:[#allocation2 + $0x1f8] sm:$0xff] %vm680_vm0, %v679_v49 }
  0x8c   :  { %757 = dma.vmem_to_hbm [thread:$0]  %s750_s1, 8192, %s752_s19, [#allocation3], %s1119_s20, %s1119_s20, %s1120_s21  }
  0x8d   :  { %1116 = dma.done.wait [#allocation3], 8192  }
  0x8e   :  { %1117 = vsyncadd [#allocation3], 4294959104 }
  0x8f   :  { %762 = vsyncpa [#allocation3], 1 }

// kernel: bottleneck_forward_nhwc.6
= control target key start
LH: loop header
LB: loop body
LE: loop exit
PB: predicated region body
PF: predicated region fallthrough
CT: control target
= control target key end

     0   :  { %vm478_vm0 = vcmask 1041408   ;;  %vm381_vm1 = vcmask 31744   ;;  %vm715_vm2 = vcmask 125952   ;;  %vm780_vm3 = vcmask 130048   ;;  %s2385_s3 = inlined_call_operand.vmem [shape: bf16[4,16], index: 3, kind: input, shape index: {}]   ;;  %s2386_s0 = inlined_call_operand.vmem [shape: bf16[2,16,16,4], index: 0, kind: input, shape index: {}]   ;;  %s2387_s1 = inlined_call_operand.vmem [shape: f32[1,4], index: 1, kind: input, shape index: {}]   ;;  %s2388_s2 = inlined_call_operand.vmem [shape: f32[1,4], index: 2, kind: input, shape index: {}]   ;;  %s2389_s4 = inlined_call_operand.vmem [shape: bf16[2,16,16,16], index: 4, kind: output, shape index: {0}]   ;;  %s2390_s5 = inlined_call_operand.vmem [shape: f32[1,1,32], index: 5, kind: output, shape index: {1}]  }
   0x1   :  { %v380_v0 = vld [vmem:[%s2385_s3] sm:$0x3]  ;;  %v1286_v10 = vld [vmem:[%s2386_s0 + $0x8] sm:$0xff]   ;;  %v1287_v41 = vld [vmem:[%s2386_s0 + $0x10] sm:$0xff]   ;;  %vm1116_vm4 = vcmask 253952  }
   0x2   :  { %v1159_v1 = vld [vmem:[%s2386_s0] sm:$0xff]   ;;  %v480_v2 = vsel %vm478_vm0, %v380_v0, 0  ;;  %v1164_v17 = vunpack.c.l.bf16 %v1286_v10  ;;  %v1165_v18 = vunpack.c.h.bf16 %v1286_v10  ;;  %v1294_v23 = vld [vmem:[%s2386_s0 + $0x48] sm:$0xff]   ;;  %v1168_v48 = vunpack.c.l.bf16 %v1287_v41  ;;  %v1295_v54 = vld [vmem:[%s2386_s0 + $0x50] sm:$0xff]  }
   0x3   :  { %v1160_v3 = vunpack.c.l.bf16 %v1159_v1  ;;  %v1161_v4 = vunpack.c.h.bf16 %v1159_v1  ;;  %v1363_v5 = vld [vmem:[%s2387_s1] ss:$0 sm:$0xff]  ;;  %489 = vmatpush.bf16.msra.mxu0 %v480_v2  ;;  %1317 = vmatpush.bf16.msra.mxu1 %v480_v2  ;;  %v1196_v27 = vunpack.c.l.bf16 %v1294_v23  ;;  %v1197_v28 = vunpack.c.h.bf16 %v1294_v23 }
   0x4   :  { %v1368_v6 = vld [vmem:[%s2388_s2] ss:$0 sm:$0xff]  ;;  %1318 = vmatpush.bf16.msra.mxu2 %v480_v2  ;;  %1319 = vmatpush.bf16.msra.mxu3 %v480_v2  ;;  %v154_v29 = vmul.f32 %v1363_v5, %v1164_v17  ;;  %v155_v30 = vmul.f32 %v1363_v5, %v1165_v18  ;;  %v1169_v50 = vunpack.c.h.bf16 %v1287_v41  ;;  %v1200_v57 = vunpack.c.l.bf16 %v1295_v54 }
   0x5   :  { %v1293_v7 = vld [vmem:[%s2386_s0 + $0x40] sm:$0xff]   ;;  %v152_v8 = vmul.f32 %v1363_v5, %v1160_v3  ;;  %v153_v9 = vmul.f32 %v1363_v5, %v1161_v4  ;;  %v170_v32 = vmul.f32 %v1363_v5, %v1196_v27  ;;  %v171_v33 = vmul.f32 %v1363_v5, %v1197_v28  ;;  %v1302_v4 = vld [vmem:[%s2386_s0 + $0x88] sm:$0xff]  }
   0x6   :  { %v1192_v11 = vunpack.c.l.bf16 %v1293_v7  ;;  %v1193_v12 = vunpack.c.h.bf16 %v1293_v7  ;;  %v222_v34 = vadd.f32 %v1368_v6, %v154_v29  ;;  %v223_v35 = vadd.f32 %v1368_v6, %v155_v30  ;;  %v1301_v38 = vld [vmem:[%s2386_s0 + $0x80] sm:$0xff]  }
   0x7   :  { %v220_v13 = vadd.f32 %v1368_v6, %v152_v8  ;;  %v221_v14 = vadd.f32 %v1368_v6, %v153_v9  ;;  %v238_v36 = vadd.f32 %v1368_v6, %v170_v32  ;;  %v239_v37 = vadd.f32 %v1368_v6, %v171_v33  ;;  %v1288_v9 = vld [vmem:[%s2386_s0 + $0x18] sm:$0xff]  }
   0x8   :  { %v168_v15 = vmul.f32 %v1363_v5, %v1192_v11  ;;  %v169_v16 = vmul.f32 %v1363_v5, %v1193_v12  ;;  %v286_v39 = vmax.f32 %v222_v34, 0.0  ;;  %v287_v40 = vmax.f32 %v223_v35, 0.0 }
   0x9   :  { %v284_v19 = vmax.f32 %v220_v13, 0.0  ;;  %v285_v20 = vmax.f32 %v221_v14, 0.0  ;;  %v1224_v42 = vunpack.c.l.bf16 %v1301_v38  ;;  %v1225_v43 = vunpack.c.h.bf16 %v1301_v38  ;;  %v1303_v38 = vld [vmem:[%s2386_s0 + $0x90] sm:$0xff]  }
   0xa   :  { %v236_v21 = vadd.f32 %v1368_v6, %v168_v15  ;;  %v237_v22 = vadd.f32 %v1368_v6, %v169_v16  ;;  %v302_v44 = vmax.f32 %v238_v36, 0.0  ;;  %v303_v45 = vmax.f32 %v239_v37, 0.0 }
   0xb   :  { %v348_v24 = vpack.c.bf16 %v285_v20, %v284_v19  ;;  %v184_v46 = vmul.f32 %v1363_v5, %v1224_v42  ;;  %v185_v47 = vmul.f32 %v1363_v5, %v1225_v43  ;;  %v349_v49 = vpack.c.bf16 %v287_v40, %v286_v39  ;;  %v1309_v39 = vld [vmem:[%s2386_s0 + $0xc0] sm:$0xff]  }
   0xc   :  { %v300_v25 = vmax.f32 %v236_v21, 0.0  ;;  %v301_v26 = vmax.f32 %v237_v22, 0.0  ;;  %v357_v53 = vpack.c.bf16 %v303_v45, %v302_v44  ;;  %v1201_v58 = vunpack.c.h.bf16 %v1295_v54  ;;  %v1296_v22 = vld [vmem:[%s2386_s0 + $0x58] sm:$0xff]   ;;  %v1289_v40 = vld [vmem:[%s2386_s0 + $0x20] sm:$0xff]  }
   0xd   :  { %1126 = vmatmul.msk.bf16.vlgmr.msra.gmra.mxu0 %vm381_vm1, %v348_v24  ;;  %v252_v51 = vadd.f32 %v1368_v6, %v184_v46  ;;  %v253_v52 = vadd.f32 %v1368_v6, %v185_v47  ;;  %v156_v59 = vmul.f32 %v1363_v5, %v1168_v48  ;;  %v157_v60 = vmul.f32 %v1363_v5, %v1169_v50 }
   0xe   :  { %v356_v31 = vpack.c.bf16 %v301_v26, %v300_v25  ;;  %v172_v62 = vmul.f32 %v1363_v5, %v1200_v57  ;;  %v173_v63 = vmul.f32 %v1363_v5, %v1201_v58  ;;  %v1228_v10 = vunpack.c.l.bf16 %v1302_v4 }
   0xf   :  { %v316_v55 = vmax.f32 %v252_v51, 0.0  ;;  %v317_v56 = vmax.f32 %v253_v52, 0.0  ;;  %v224_v0 = vadd.f32 %v1368_v6, %v156_v59  ;;  %v225_v1 = vadd.f32 %v1368_v6, %v157_v60  ;;  %v1297_v59 = vld [vmem:[%s2386_s0 + $0x60] sm:$0xff]  }
  0x10   :  { %1134 = vmatmul.msk.bf16.vlgmr.msra.gmra.mxu1 %vm381_vm1, %v356_v31  ;;  %v240_v2 = vadd.f32 %v1368_v6, %v172_v62  ;;  %v241_v3 = vadd.f32 %v1368_v6, %v173_v63  ;;  %v1229_v11 = vunpack.c.h.bf16 %v1302_v4  ;;  %v186_v14 = vmul.f32 %v1363_v5, %v1228_v10 }
  0x11   :  { %v364_v61 = vpack.c.bf16 %v317_v56, %v316_v55  ;;  %v288_v7 = vmax.f32 %v224_v0, 0.0  ;;  %v289_v8 = vmax.f32 %v225_v1, 0.0  ;;  %v1172_v16 = vunpack.c.l.bf16 %v1288_v9 }
  0x12   :  { %v304_v12 = vmax.f32 %v240_v2, 0.0  ;;  %v305_v13 = vmax.f32 %v241_v3, 0.0  ;;  %v187_v15 = vmul.f32 %v1363_v5, %v1229_v11  ;;  %v1173_v17 = vunpack.c.h.bf16 %v1288_v9 }
  0x13   :  { %1142 = vmatmul.msk.bf16.vlgmr.msra.gmra.mxu2 %vm381_vm1, %v364_v61  ;;  %v350_v18 = vpack.c.bf16 %v289_v8, %v288_v7  ;;  %v254_v19 = vadd.f32 %v1368_v6, %v186_v14  ;;  %v1204_v25 = vunpack.c.l.bf16 %v1296_v22  ;;  %v1205_v26 = vunpack.c.h.bf16 %v1296_v22 }
  0x14   :  { %v255_v20 = vadd.f32 %v1368_v6, %v187_v15  ;;  %v358_v21 = vpack.c.bf16 %v305_v13, %v304_v12  ;;  %v158_v27 = vmul.f32 %v1363_v5, %v1172_v16  ;;  %v159_v28 = vmul.f32 %v1363_v5, %v1173_v17  ;;  %v1304_v16 = vld [vmem:[%s2386_s0 + $0x98] sm:$0xff]   ;;  %v1310_v17 = vld [vmem:[%s2386_s0 + $0xc8] sm:$0xff]  }
  0x15   :  { %v318_v23 = vmax.f32 %v254_v19, 0.0  ;;  %v174_v30 = vmul.f32 %v1363_v5, %v1204_v25  ;;  %v175_v31 = vmul.f32 %v1363_v5, %v1205_v26  ;;  %v1232_v41 = vunpack.c.l.bf16 %v1303_v38 }
  0x16   :  { %v319_v24 = vmax.f32 %v255_v20, 0.0  ;;  %v226_v32 = vadd.f32 %v1368_v6, %v158_v27  ;;  %v227_v33 = vadd.f32 %v1368_v6, %v159_v28  ;;  %v1233_v42 = vunpack.c.h.bf16 %v1303_v38 }
  0x17   :  { %v242_v34 = vadd.f32 %v1368_v6, %v174_v30  ;;  %v243_v35 = vadd.f32 %v1368_v6, %v175_v31  ;;  %v1256_v43 = vunpack.c.l.bf16 %v1309_v39  ;;  %v1257_v44 = vunpack.c.h.bf16 %v1309_v39 }
  0x18   :  { %v365_v29 = vpack.c.bf16 %v319_v24, %v318_v23  ;;  %v290_v36 = vmax.f32 %v226_v32, 0.0  ;;  %v291_v37 = vmax.f32 %v227_v33, 0.0  ;;  %v188_v47 = vmul.f32 %v1363_v5, %v1232_v41 }
  0x19   :  { %v306_v45 = vmax.f32 %v242_v34, 0.0  ;;  %v307_v46 = vmax.f32 %v243_v35, 0.0  ;;  %v189_v48 = vmul.f32 %v1363_v5, %v1233_v42  ;;  %v201_v50 = vmul.f32 %v1363_v5, %v1257_v44 }
  0x1a   :  { %v351_v51 = vpack.c.bf16 %v291_v37, %v290_v36  ;;  %v1176_v52 = vunpack.c.l.bf16 %v1289_v40  ;;  %v256_v54 = vadd.f32 %v1368_v6, %v188_v47  ;;  %v1208_v2 = vunpack.c.l.bf16 %v1297_v59  ;;  %v1298_v37 = vld [vmem:[%s2386_s0 + $0x68] sm:$0xff]  }
  0x1b   :  { %v257_v55 = vadd.f32 %v1368_v6, %v189_v48  ;;  %v269_v57 = vadd.f32 %v1368_v6, %v201_v50  ;;  %v359_v58 = vpack.c.bf16 %v307_v46, %v306_v45  ;;  %v1209_v3 = vunpack.c.h.bf16 %v1297_v59 }
  0x1c   :  { %v320_v60 = vmax.f32 %v256_v54, 0.0  ;;  %v160_v0 = vmul.f32 %v1363_v5, %v1176_v52  ;;  %v176_v8 = vmul.f32 %v1363_v5, %v1208_v2  ;;  %v1236_v19 = vunpack.c.l.bf16 %v1304_v16 }
  0x1d   :  { %1127 = vmatmul.msk.bf16.gmra.mxu0 %vm381_vm1, %v349_v49  ;;  %v200_v49 = vmul.f32 %v1363_v5, %v1256_v43  ;;  %v321_v61 = vmax.f32 %v257_v55, 0.0  ;;  %v333_v63 = vmax.f32 %v269_v57, 0.0  ;;  %v177_v9 = vmul.f32 %v1363_v5, %v1209_v3  ;;  %v1311_v57 = vld [vmem:[%s2386_s0 + $0xd0] sm:$0xff]  }
  0x1e   :  { %v228_v10 = vadd.f32 %v1368_v6, %v160_v0  ;;  %v244_v12 = vadd.f32 %v1368_v6, %v176_v8  ;;  %v1237_v20 = vunpack.c.h.bf16 %v1304_v16  ;;  %v1261_v22 = vunpack.c.h.bf16 %v1310_v17 }
  0x1f   :  { %v268_v56 = vadd.f32 %v1368_v6, %v200_v49  ;;  %v366_v4 = vpack.c.bf16 %v321_v61, %v320_v60  ;;  %v245_v13 = vadd.f32 %v1368_v6, %v177_v9  ;;  %v190_v25 = vmul.f32 %v1363_v5, %v1236_v19 }
  0x20   :  { %1135 = vmatmul.msk.bf16.gmra.mxu1 %vm381_vm1, %v357_v53  ;;  %v1177_v53 = vunpack.c.h.bf16 %v1289_v40  ;;  %v292_v14 = vmax.f32 %v228_v10, 0.0  ;;  %v308_v23 = vmax.f32 %v244_v12, 0.0  ;;  %v191_v26 = vmul.f32 %v1363_v5, %v1237_v20 }
  0x21   :  { %v332_v62 = vmax.f32 %v268_v56, 0.0  ;;  %v309_v24 = vmax.f32 %v245_v13, 0.0  ;;  %v203_v28 = vmul.f32 %v1363_v5, %v1261_v22  ;;  %v258_v32 = vadd.f32 %v1368_v6, %v190_v25  ;;  %v1305_v56 = vld [vmem:[%s2386_s0 + $0xa0] sm:$0xff]  }
  0x22   :  { %v161_v1 = vmul.f32 %v1363_v5, %v1177_v53  ;;  %v259_v33 = vadd.f32 %v1368_v6, %v191_v26  ;;  %v1212_v44 = vunpack.c.l.bf16 %v1298_v37  ;;  %v1213_v45 = vunpack.c.h.bf16 %v1298_v37 }
  0x23   :  { %1143 = vmatmul.msk.bf16.gmra.mxu2 %vm381_vm1, %v365_v29  ;;  %v372_v7 = vpack.c.bf16 %v333_v63, %v332_v62  ;;  %v271_v35 = vadd.f32 %v1368_v6, %v203_v28  ;;  %v360_v36 = vpack.c.bf16 %v309_v24, %v308_v23  ;;  %v322_v38 = vmax.f32 %v258_v32, 0.0  ;;  %v1292_v32 = vld [vmem:[%s2386_s0 + $0x38] sm:$0xff]  }
  0x24   :  { %v229_v11 = vadd.f32 %v1368_v6, %v161_v1  ;;  %v323_v39 = vmax.f32 %v259_v33, 0.0  ;;  %v178_v48 = vmul.f32 %v1363_v5, %v1212_v44  ;;  %v179_v49 = vmul.f32 %v1363_v5, %v1213_v45 }
  0x25   :  { %1150 = vmatmul.msk.bf16.vlgmr.msra.gmra.mxu3 %vm381_vm1, %v372_v7  ;;  %v335_v41 = vmax.f32 %v271_v35, 0.0  ;;  %v1240_v59 = vunpack.c.l.bf16 %v1305_v56  ;;  %v1241_v60 = vunpack.c.h.bf16 %v1305_v56  ;;  %v1264_v61 = vunpack.c.l.bf16 %v1311_v57  ;;  %v1306_v35 = vld [vmem:[%s2386_s0 + $0xa8] sm:$0xff]  }
  0x26   :  { %v293_v15 = vmax.f32 %v229_v11, 0.0  ;;  %v367_v46 = vpack.c.bf16 %v323_v39, %v322_v38  ;;  %v246_v52 = vadd.f32 %v1368_v6, %v178_v48  ;;  %v247_v53 = vadd.f32 %v1368_v6, %v179_v49 }
  0x27   :  { %v1265_v62 = vunpack.c.h.bf16 %v1311_v57  ;;  %v192_v1 = vmul.f32 %v1363_v5, %v1240_v59  ;;  %v193_v2 = vmul.f32 %v1363_v5, %v1241_v60  ;;  %v204_v3 = vmul.f32 %v1363_v5, %v1264_v61 }
  0x28   :  { %v352_v29 = vpack.c.bf16 %v293_v15, %v292_v14  ;;  %v310_v63 = vmax.f32 %v246_v52, 0.0  ;;  %v311_v0 = vmax.f32 %v247_v53, 0.0  ;;  %v1299_v15 = vld [vmem:[%s2386_s0 + $0x70] sm:$0xff]   ;;  %v1244_v37 = vunpack.c.l.bf16 %v1306_v35 }
  0x29   :  { %v260_v10 = vadd.f32 %v1368_v6, %v192_v1  ;;  %v261_v11 = vadd.f32 %v1368_v6, %v193_v2  ;;  %v272_v12 = vadd.f32 %v1368_v6, %v204_v3  ;;  %v1216_v22 = vunpack.c.l.bf16 %v1299_v15 }
  0x2a   :  { %v361_v14 = vpack.c.bf16 %v311_v0, %v310_v63  ;;  %v1217_v23 = vunpack.c.h.bf16 %v1299_v15  ;;  %v1245_v38 = vunpack.c.h.bf16 %v1306_v35  ;;  %v194_v44 = vmul.f32 %v1363_v5, %v1244_v37  ;;  %v1314_v37 = vld [vmem:[%s2386_s0 + $0xe8] sm:$0xff]  }
  0x2b   :  { %v324_v16 = vmax.f32 %v260_v10, 0.0  ;;  %v180_v26 = vmul.f32 %v1363_v5, %v1216_v22  ;;  %v1189_v49 = vunpack.c.h.bf16 %v1292_v32 }
  0x2c   :  { %v195_v45 = vmul.f32 %v1363_v5, %v1245_v38 }
  0x2d   :  { %1128 = vmatmul.msk.bf16.gmra.mxu0 %vm381_vm1, %v350_v18  ;;  %v1290_v18 = vld [vmem:[%s2386_s0 + $0x28] sm:$0xff]   ;;  %v167_v60 = vmul.f32 %v1363_v5, %v1189_v49 }
  0x2e   :  { %v1180_v30 = vunpack.c.l.bf16 %v1290_v18  ;;  %v1181_v31 = vunpack.c.h.bf16 %v1290_v18  ;;  %v336_v18 = vmax.f32 %v272_v12, 0.0  ;;  %v1307_v12 = vld [vmem:[%s2386_s0 + $0xb0] sm:$0xff]  }
  0x2f   :  { %v1249_v15 = vunpack.c.h.bf16 %v1307_v12 }
  0x30   :  { %1136 = vmatmul.msk.bf16.gmra.mxu1 %vm381_vm1, %v358_v21  ;;  %v1260_v21 = vunpack.c.l.bf16 %v1310_v17  ;;  %v162_v42 = vmul.f32 %v1363_v5, %v1180_v30  ;;  %v163_v43 = vmul.f32 %v1363_v5, %v1181_v31  ;;  %v325_v17 = vmax.f32 %v261_v11, 0.0 }
  0x31   :  { %v248_v30 = vadd.f32 %v1368_v6, %v180_v26 }
  0x32   :  { %v202_v27 = vmul.f32 %v1363_v5, %v1260_v21  ;;  %v230_v50 = vadd.f32 %v1368_v6, %v162_v42  ;;  %v368_v24 = vpack.c.bf16 %v325_v17, %v324_v16 }
  0x33   :  { %1144 = vmatmul.msk.bf16.gmra.mxu2 %vm381_vm1, %v366_v4  ;;  %v205_v4 = vmul.f32 %v1363_v5, %v1265_v62  ;;  %v312_v42 = vmax.f32 %v248_v30, 0.0 }
  0x34   :  { %v270_v34 = vadd.f32 %v1368_v6, %v202_v27  ;;  %v294_v54 = vmax.f32 %v230_v50, 0.0  ;;  %v181_v27 = vmul.f32 %v1363_v5, %v1217_v23  ;;  %v262_v50 = vadd.f32 %v1368_v6, %v194_v44 }
  0x35   :  { %v273_v13 = vadd.f32 %v1368_v6, %v205_v4 }
  0x36   :  { %v334_v40 = vmax.f32 %v270_v34, 0.0  ;;  %v249_v31 = vadd.f32 %v1368_v6, %v181_v27  ;;  %v326_v57 = vmax.f32 %v262_v50, 0.0 }
  0x37   :  { %v337_v19 = vmax.f32 %v273_v13, 0.0  ;;  %v1313_v13 = vld [vmem:[%s2386_s0 + $0xe0] sm:$0xff]  }
  0x38   :  { %v373_v47 = vpack.c.bf16 %v335_v41, %v334_v40  ;;  %v1188_v41 = vunpack.c.l.bf16 %v1292_v32  ;;  %v1272_v16 = vunpack.c.l.bf16 %v1313_v13  ;;  %v1273_v17 = vunpack.c.h.bf16 %v1313_v13 }
  0x39   :  { %v374_v25 = vpack.c.bf16 %v337_v19, %v336_v18 }
  0x3a   :  { %1151 = vmatmul.msk.bf16.gmra.mxu3 %vm381_vm1, %v373_v47  ;;  %v208_v22 = vmul.f32 %v1363_v5, %v1272_v16  ;;  %v209_v23 = vmul.f32 %v1363_v5, %v1273_v17 }
  0x3c   :  { %v276_v27 = vadd.f32 %v1368_v6, %v208_v22 }
  0x3d   :  { %1129 = vmatmul.msk.bf16.gmra.mxu0 %vm381_vm1, %v351_v51  ;;  %v231_v51 = vadd.f32 %v1368_v6, %v163_v43  ;;  %v313_v43 = vmax.f32 %v249_v31, 0.0 }
  0x3e   :  { %v340_v32 = vmax.f32 %v276_v27, 0.0 }
  0x3f   :  { %v295_v55 = vmax.f32 %v231_v51, 0.0  ;;  %v263_v51 = vadd.f32 %v1368_v6, %v195_v45  ;;  %v362_v56 = vpack.c.bf16 %v313_v43, %v312_v42 }
  0x40   :  { %1137 = vmatmul.msk.bf16.gmra.mxu1 %vm381_vm1, %v359_v58  ;;  %v1291_v58 = vld [vmem:[%s2386_s0 + $0x30] sm:$0xff]  }
  0x41   :  { %v353_v7 = vpack.c.bf16 %v295_v55, %v294_v54  ;;  %v1184_v8 = vunpack.c.l.bf16 %v1291_v58  ;;  %v1185_v9 = vunpack.c.h.bf16 %v1291_v58  ;;  %v166_v54 = vmul.f32 %v1363_v5, %v1188_v41  ;;  %v1300_v55 = vld [vmem:[%s2386_s0 + $0x78] sm:$0xff]  }
  0x42   :  { %v327_v58 = vmax.f32 %v263_v51, 0.0  ;;  %v1220_v62 = vunpack.c.l.bf16 %v1300_v55  ;;  %v1221_v63 = vunpack.c.h.bf16 %v1300_v55  ;;  %v1277_v41 = vunpack.c.h.bf16 %v1314_v37 }
  0x43   :  { %1145 = vmatmul.msk.bf16.gmra.mxu2 %vm381_vm1, %v367_v46  ;;  %v164_v20 = vmul.f32 %v1363_v5, %v1184_v8  ;;  %v165_v21 = vmul.f32 %v1363_v5, %v1185_v9  ;;  %v234_v4 = vadd.f32 %v1368_v6, %v166_v54 }
  0x44   :  { %v369_v0 = vpack.c.bf16 %v327_v58, %v326_v57  ;;  %v182_v2 = vmul.f32 %v1363_v5, %v1220_v62  ;;  %v183_v3 = vmul.f32 %v1363_v5, %v1221_v63  ;;  %v211_v45 = vmul.f32 %v1363_v5, %v1277_v41 }
  0x45   :  { %v232_v28 = vadd.f32 %v1368_v6, %v164_v20  ;;  %v298_v10 = vmax.f32 %v234_v4, 0.0  ;;  %v1315_v4 = vld [vmem:[%s2386_s0 + $0xf0] sm:$0xff]  }
  0x46   :  { %v250_v8 = vadd.f32 %v1368_v6, %v182_v2  ;;  %v251_v9 = vadd.f32 %v1368_v6, %v183_v3  ;;  %v279_v49 = vadd.f32 %v1368_v6, %v211_v45 }
  0x47   :  { %v296_v33 = vmax.f32 %v232_v28, 0.0  ;;  %v277_v28 = vadd.f32 %v1368_v6, %v209_v23 }
  0x48   :  { %v314_v18 = vmax.f32 %v250_v8, 0.0  ;;  %v315_v19 = vmax.f32 %v251_v9, 0.0 }
  0x4a   :  { %1152 = vmatmul.msk.bf16.gmra.mxu3 %vm381_vm1, %v374_v25 }
  0x4d   :  { %1130 = vmatmul.msk.bf16.gmra.mxu0 %vm381_vm1, %v352_v29  ;;  %v233_v29 = vadd.f32 %v1368_v6, %v165_v21  ;;  %v197_v21 = vmul.f32 %v1363_v5, %v1249_v15 }
  0x4f   :  { %v297_v34 = vmax.f32 %v233_v29, 0.0  ;;  %v265_v26 = vadd.f32 %v1368_v6, %v197_v21  ;;  %v363_v29 = vpack.c.bf16 %v315_v19, %v314_v18 }
  0x50   :  { %1138 = vmatmul.msk.bf16.gmra.mxu1 %vm381_vm1, %v360_v36  ;;  %v1312_v36 = vld [vmem:[%s2386_s0 + $0xd8] sm:$0xff]  }
  0x51   :  { %v1268_v39 = vunpack.c.l.bf16 %v1312_v36  ;;  %v1269_v40 = vunpack.c.h.bf16 %v1312_v36  ;;  %v354_v48 = vpack.c.bf16 %v297_v34, %v296_v33  ;;  %v329_v31 = vmax.f32 %v265_v26, 0.0  ;;  %v1308_v36 = vld [vmem:[%s2386_s0 + $0xb8] sm:$0xff]  }
  0x52   :  { %v341_v33 = vmax.f32 %v277_v28, 0.0  ;;  %v1252_v38 = vunpack.c.l.bf16 %v1308_v36 }
  0x53   :  { %1146 = vmatmul.msk.bf16.gmra.mxu2 %vm381_vm1, %v368_v24  ;;  %v206_v46 = vmul.f32 %v1363_v5, %v1268_v39  ;;  %v207_v47 = vmul.f32 %v1363_v5, %v1269_v40  ;;  %v1253_v39 = vunpack.c.h.bf16 %v1308_v36  ;;  %v1276_v40 = vunpack.c.l.bf16 %v1314_v37  ;;  %v1316_v36 = vld [vmem:[%s2386_s0 + $0xf8] sm:$0xff]  }
  0x54   :  { %v376_v35 = vpack.c.bf16 %v341_v33, %v340_v32  ;;  %v198_v42 = vmul.f32 %v1363_v5, %v1252_v38  ;;  %v1284_v41 = vunpack.c.l.bf16 %v1316_v36 }
  0x55   :  { %v274_v52 = vadd.f32 %v1368_v6, %v206_v46  ;;  %v275_v53 = vadd.f32 %v1368_v6, %v207_v47  ;;  %v199_v43 = vmul.f32 %v1363_v5, %v1253_v39  ;;  %v210_v44 = vmul.f32 %v1363_v5, %v1276_v40 }
  0x56   :  { %v266_v46 = vadd.f32 %v1368_v6, %v198_v42  ;;  %v1285_v42 = vunpack.c.h.bf16 %v1316_v36 }
  0x57   :  { %v338_v59 = vmax.f32 %v274_v52, 0.0  ;;  %v339_v61 = vmax.f32 %v275_v53, 0.0  ;;  %v267_v47 = vadd.f32 %v1368_v6, %v199_v43  ;;  %v214_v43 = vmul.f32 %v1363_v5, %v1284_v41 }
  0x58   :  { %v330_v52 = vmax.f32 %v266_v46, 0.0  ;;  %v215_v46 = vmul.f32 %v1363_v5, %v1285_v42 }
  0x59   :  { %v375_v1 = vpack.c.bf16 %v339_v61, %v338_v59  ;;  %v331_v54 = vmax.f32 %v267_v47, 0.0 }
  0x5b   :  { %1153 = vmatmul.msk.bf16.gmra.mxu3 %vm381_vm1, %v375_v1  ;;  %v371_v58 = vpack.c.bf16 %v331_v54, %v330_v52  ;;  %v282_v54 = vadd.f32 %v1368_v6, %v214_v43 }
  0x5d   :  { %1131 = vmatmul.msk.bf16.gmra.mxu0 %vm381_vm1, %v353_v7  ;;  %v235_v7 = vadd.f32 %v1368_v6, %v167_v60 }
  0x5f   :  { %v299_v11 = vmax.f32 %v235_v7, 0.0 }
  0x60   :  { %1139 = vmatmul.msk.bf16.gmra.mxu1 %vm381_vm1, %v361_v14  ;;  %v1248_v14 = vunpack.c.l.bf16 %v1307_v12  ;;  %v1281_v12 = vunpack.c.h.bf16 %v1315_v4 }
  0x61   :  { %v355_v24 = vpack.c.bf16 %v299_v11, %v298_v10  ;;  %v1280_v11 = vunpack.c.l.bf16 %v1315_v4 }
  0x62   :  { %v196_v20 = vmul.f32 %v1363_v5, %v1248_v14  ;;  %v213_v14 = vmul.f32 %v1363_v5, %v1281_v12 }
  0x63   :  { %1147 = vmatmul.msk.bf16.gmra.mxu2 %vm381_vm1, %v369_v0  ;;  %v212_v13 = vmul.f32 %v1363_v5, %v1280_v11 }
  0x64   :  { %v264_v25 = vadd.f32 %v1368_v6, %v196_v20  ;;  %v281_v17 = vadd.f32 %v1368_v6, %v213_v14 }
  0x65   :  { %v280_v16 = vadd.f32 %v1368_v6, %v212_v13 }
  0x66   :  { %v328_v30 = vmax.f32 %v264_v25, 0.0 }
  0x67   :  { %v344_v23 = vmax.f32 %v280_v16, 0.0 }
  0x68   :  { %v370_v34 = vpack.c.bf16 %v329_v31, %v328_v30 }
  0x6b   :  { %1154 = vmatmul.msk.bf16.gmra.mxu3 %vm381_vm1, %v376_v35 }
  0x6d   :  { %1132 = vmatmul.msk.bf16.gmra.mxu0 %vm381_vm1, %v354_v48  ;;  %v278_v48 = vadd.f32 %v1368_v6, %v210_v44 }
  0x6f   :  { %v342_v55 = vmax.f32 %v278_v48, 0.0 }
  0x70   :  { %1140 = vmatmul.msk.bf16.gmra.mxu1 %vm381_vm1, %v362_v56  ;;  %v343_v56 = vmax.f32 %v279_v49, 0.0 }
  0x72   :  { %v377_v59 = vpack.c.bf16 %v343_v56, %v342_v55 }
  0x73   :  { %1148 = vmatmul.msk.bf16.gmra.mxu2 %vm381_vm1, %v370_v34 }
  0x7b   :  { %1155 = vmatmul.msk.bf16.gmra.mxu3 %vm381_vm1, %v377_v59 }
  0x7d   :  { %1133 = vmatmul.msk.bf16.gmra.mxu0 %vm381_vm1, %v355_v24  ;;  %v345_v24 = vmax.f32 %v281_v17, 0.0 }
  0x7f   :  { %v378_v28 = vpack.c.bf16 %v345_v24, %v344_v23 }
  0x80   :  { %1141 = vmatmul.msk.bf16.gmra.mxu1 %vm381_vm1, %v363_v29 }
  0x83   :  { %1149 = vmatmul.msk.bf16.gmra.mxu2 %vm381_vm1, %v371_v58  ;;  %v346_v58 = vmax.f32 %v282_v54, 0.0 }
  0x8a   :  { %v491_v50 = vpop.f32.mrf.mxu0 }
  0x8b   :  { %v651_v51 = vpack.c.bf16 %v491_v50, %v491_v50  ;;  %v914_v60 = vmul.f32 %v491_v50, %v491_v50  ;;  %v781_v62 = vsel %vm780_vm3, %v491_v50, 0.0  ;;  %1156 = vmatmul.msk.bf16.gmra.mxu3 %vm381_vm1, %v378_v28 }
  0x8d   :  { %v1605_v53 = vpop.f32.mrf.mxu1  ;;  %716 = vst.msk [vmem:[%s2389_s4] sm:$0xf] %vm715_vm2, %v651_v51  ;;  %v978_v7 = vsel %vm780_vm3, %v914_v60, 0.0 }
  0x8e   :  { %v667_v57 = vpack.c.bf16 %v1605_v53, %v1605_v53 }
  0x90   :  { %732 = vst.msk [vmem:[%s2389_s4 + $0x40] sm:$0xf] %vm715_vm2, %v667_v57  ;;  %v283_v57 = vadd.f32 %v1368_v6, %v215_v46 }
  0x92   :  { %v493_v61 = vpop.f32.mrf.mxu0  ;;  %v347_v59 = vmax.f32 %v283_v57, 0.0 }
  0x93   :  { %v652_v63 = vpack.c.bf16 %v493_v61, %v493_v61  ;;  %v782_v0 = vsel %vm780_vm3, %v493_v61, 0.0  ;;  %v915_v1 = vmul.f32 %v493_v61, %v493_v61 }
  0x94   :  { %v783_v2 = vadd.f32 %v782_v0, %v781_v62  ;;  %v379_v61 = vpack.c.bf16 %v347_v59, %v346_v58 }
  0x95   :  { %v1621_v3 = vpop.f32.mrf.mxu1  ;;  %717 = vst.msk [vmem:[%s2389_s4 + $0x4] sm:$0xf] %vm715_vm2, %v652_v63  ;;  %v979_v8 = vsel %vm780_vm3, %v915_v1, 0.0 }
  0x96   :  { %v668_v9 = vpack.c.bf16 %v1621_v3, %v1621_v3  ;;  %v980_v10 = vadd.f32 %v979_v8, %v978_v7  ;;  %v1657_v30 = vpop.f32.mrf.mxu2 }
  0x97   :  { %v683_v40 = vpack.c.bf16 %v1657_v30, %v1657_v30 }
  0x98   :  { %733 = vst.msk [vmem:[%s2389_s4 + $0x44] sm:$0xf] %vm715_vm2, %v668_v9 }
  0x99   :  { %748 = vst.msk [vmem:[%s2389_s4 + $0x80] sm:$0xf] %vm715_vm2, %v683_v40 }
  0x9a   :  { %v496_v15 = vpop.f32.mrf.mxu0 }
  0x9b   :  { %v653_v18 = vpack.c.bf16 %v496_v15, %v496_v15  ;;  %v784_v19 = vsel %vm780_vm3, %v496_v15, 0.0  ;;  %v916_v20 = vmul.f32 %v496_v15, %v496_v15  ;;  %1157 = vmatmul.msk.bf16.gmra.mxu3 %vm381_vm1, %v379_v61 }
  0x9c   :  { %v785_v21 = vadd.f32 %v784_v19, %v783_v2 }
  0x9d   :  { %v1643_v22 = vpop.f32.mrf.mxu1  ;;  %718 = vst.msk [vmem:[%s2389_s4 + $0x8] sm:$0xf] %vm715_vm2, %v653_v18  ;;  %v981_v25 = vsel %vm780_vm3, %v916_v20, 0.0 }
  0x9e   :  { %v669_v26 = vpack.c.bf16 %v1643_v22, %v1643_v22  ;;  %v982_v27 = vadd.f32 %v981_v25, %v980_v10  ;;  %v1683_v45 = vpop.f32.mrf.mxu2 }
  0x9f   :  { %v684_v50 = vpack.c.bf16 %v1683_v45, %v1683_v45 }
  0xa0   :  { %734 = vst.msk [vmem:[%s2389_s4 + $0x48] sm:$0xf] %vm715_vm2, %v669_v26 }
  0xa1   :  { %749 = vst.msk [vmem:[%s2389_s4 + $0x84] sm:$0xf] %vm715_vm2, %v684_v50 }
  0xa2   :  { %v498_v29 = vpop.f32.mrf.mxu0 }
  0xa3   :  { %v654_v31 = vpack.c.bf16 %v498_v29, %v498_v29  ;;  %v786_v32 = vsel %vm780_vm3, %v498_v29, 0.0  ;;  %v917_v33 = vmul.f32 %v498_v29, %v498_v29 }
  0xa4   :  { %v787_v34 = vadd.f32 %v786_v32, %v785_v21 }
  0xa5   :  { %v1660_v35 = vpop.f32.mrf.mxu1  ;;  %719 = vst.msk [vmem:[%s2389_s4 + $0xc] sm:$0xf] %vm715_vm2, %v654_v31  ;;  %v983_v37 = vsel %vm780_vm3, %v917_v33, 0.0 }
  0xa6   :  { %v670_v38 = vpack.c.bf16 %v1660_v35, %v1660_v35  ;;  %v984_v39 = vadd.f32 %v983_v37, %v982_v27  ;;  %v1712_v62 = vpop.f32.mrf.mxu2 }
  0xa7   :  { %v685_v4 = vpack.c.bf16 %v1712_v62, %v1712_v62 }
  0xa8   :  { %735 = vst.msk [vmem:[%s2389_s4 + $0x4c] sm:$0xf] %vm715_vm2, %v670_v38  ;;  %v1771_v19 = vpop.f32.mrf.mxu3 }
  0xa9   :  { %750 = vst.msk [vmem:[%s2389_s4 + $0x88] sm:$0xf] %vm715_vm2, %v685_v4  ;;  %v699_v25 = vpack.c.bf16 %v1771_v19, %v1771_v19 }
  0xaa   :  { %v501_v44 = vpop.f32.mrf.mxu0 }
  0xab   :  { %v655_v47 = vpack.c.bf16 %v501_v44, %v501_v44  ;;  %v788_v48 = vsel %vm780_vm3, %v501_v44, 0.0  ;;  %v918_v49 = vmul.f32 %v501_v44, %v501_v44  ;;  %764 = vst.msk [vmem:[%s2389_s4 + $0xc0] sm:$0xf] %vm715_vm2, %v699_v25 }
  0xac   :  { %v789_v51 = vadd.f32 %v788_v48, %v787_v34 }
  0xad   :  { %v1689_v52 = vpop.f32.mrf.mxu1  ;;  %720 = vst.msk [vmem:[%s2389_s4 + $0x10] sm:$0xf] %vm715_vm2, %v655_v47  ;;  %v985_v55 = vsel %vm780_vm3, %v918_v49, 0.0 }
  0xae   :  { %v671_v5 = vpack.c.bf16 %v1689_v52, %v1689_v52  ;;  %v1699_v56 = vadd.f32 %v985_v55, %v984_v39  ;;  %v1739_v8 = vpop.f32.mrf.mxu2 }
  0xaf   :  { %v686_v11 = vpack.c.bf16 %v1739_v8, %v1739_v8 }
  0xb0   :  { %736 = vst.msk [vmem:[%s2389_s4 + $0x50] sm:$0xf] %vm715_vm2, %v671_v5  ;;  %v1807_v32 = vpop.f32.mrf.mxu3 }
  0xb1   :  { %751 = vst.msk [vmem:[%s2389_s4 + $0x8c] sm:$0xf] %vm715_vm2, %v686_v11  ;;  %v700_v36 = vpack.c.bf16 %v1807_v32, %v1807_v32 }
  0xb2   :  { %v1710_v60 = vpop.f32.mrf.mxu0 }
  0xb3   :  { %v656_v63 = vpack.c.bf16 %v1710_v60, %v1710_v60  ;;  %v790_v0 = vsel %vm780_vm3, %v1710_v60, 0.0  ;;  %765 = vst.msk [vmem:[%s2389_s4 + $0xc4] sm:$0xf] %vm715_vm2, %v700_v36 }
  0xb4   :  { %v791_v1 = vadd.f32 %v790_v0, %v789_v51 }
  0xb5   :  { %v1718_v6 = vpop.f32.mrf.mxu1  ;;  %721 = vst.msk [vmem:[%s2389_s4 + $0x14] sm:$0xf] %vm715_vm2, %v656_v63 }
  0xb6   :  { %v672_v2 = vpack.c.bf16 %v1718_v6, %v1718_v6  ;;  %v1765_v16 = vpop.f32.mrf.mxu2 }
  0xb7   :  { %v687_v24 = vpack.c.bf16 %v1765_v16, %v1765_v16 }
  0xb8   :  { %737 = vst.msk [vmem:[%s2389_s4 + $0x54] sm:$0xf] %vm715_vm2, %v672_v2 }
  0xb9   :  { %752 = vst.msk [vmem:[%s2389_s4 + $0x90] sm:$0xf] %vm715_vm2, %v687_v24 }
  0xba   :  { %v1737_v7 = vpop.f32.mrf.mxu0 }
  0xbb   :  { %v657_v9 = vpack.c.bf16 %v1737_v7, %v1737_v7  ;;  %v792_v10 = vsel %vm780_vm3, %v1737_v7, 0.0 }
  0xbc   :  { %v793_v12 = vadd.f32 %v792_v10, %v791_v1 }
  0xbd   :  { %v1747_v13 = vpop.f32.mrf.mxu1  ;;  %722 = vst.msk [vmem:[%s2389_s4 + $0x18] sm:$0xf] %vm715_vm2, %v657_v9  ;;  %v1839_v42 = vpop.f32.mrf.mxu3 }
  0xbe   :  { %v673_v14 = vpack.c.bf16 %v1747_v13, %v1747_v13  ;;  %v1799_v27 = vpop.f32.mrf.mxu2  ;;  %v701_v48 = vpack.c.bf16 %v1839_v42, %v1839_v42 }
  0xbf   :  { %v688_v31 = vpack.c.bf16 %v1799_v27, %v1799_v27 }
  0xc0   :  { %738 = vst.msk [vmem:[%s2389_s4 + $0x58] sm:$0xf] %vm715_vm2, %v673_v14 }
  0xc1   :  { %753 = vst.msk [vmem:[%s2389_s4 + $0x94] sm:$0xf] %vm715_vm2, %v688_v31  ;;  %v920_v31 = vmul.f32 %v1737_v7, %v1737_v7 }
  0xc2   :  { %v1763_v15 = vpop.f32.mrf.mxu0  ;;  %766 = vst.msk [vmem:[%s2389_s4 + $0xc8] sm:$0xf] %vm715_vm2, %v701_v48 }
  0xc3   :  { %v658_v17 = vpack.c.bf16 %v1763_v15, %v1763_v15  ;;  %v794_v18 = vsel %vm780_vm3, %v1763_v15, 0.0  ;;  %v921_v36 = vmul.f32 %v1763_v15, %v1763_v15 }
  0xc4   :  { %v795_v20 = vadd.f32 %v794_v18, %v793_v12 }
  0xc5   :  { %v1773_v21 = vpop.f32.mrf.mxu1  ;;  %723 = vst.msk [vmem:[%s2389_s4 + $0x1c] sm:$0xf] %vm715_vm2, %v658_v17  ;;  %v1870_v5 = vpop.f32.mrf.mxu3  ;;  %v919_v17 = vmul.f32 %v1710_v60, %v1710_v60 }
  0xc6   :  { %v674_v23 = vpack.c.bf16 %v1773_v21, %v1773_v21  ;;  %v1833_v39 = vpop.f32.mrf.mxu2  ;;  %v702_v59 = vpack.c.bf16 %v1870_v5, %v1870_v5 }
  0xc7   :  { %v689_v47 = vpack.c.bf16 %v1833_v39, %v1833_v39 }
  0xc8   :  { %739 = vst.msk [vmem:[%s2389_s4 + $0x5c] sm:$0xf] %vm715_vm2, %v674_v23 }
  0xc9   :  { %754 = vst.msk [vmem:[%s2389_s4 + $0x98] sm:$0xf] %vm715_vm2, %v689_v47  ;;  %v991_v47 = vsel %vm780_vm3, %v921_v36, 0.0 }
  0xca   :  { %v1797_v26 = vpop.f32.mrf.mxu0  ;;  %767 = vst.msk [vmem:[%s2389_s4 + $0xcc] sm:$0xf] %vm715_vm2, %v702_v59 }
  0xcb   :  { %v659_v28 = vpack.c.bf16 %v1797_v26, %v1797_v26  ;;  %v796_v29 = vsel %vm780_vm3, %v1797_v26, 0.0  ;;  %v922_v15 = vmul.f32 %v1797_v26, %v1797_v26 }
  0xcc   :  { %v797_v33 = vadd.f32 %v796_v29, %v795_v20 }
  0xcd   :  { %v1809_v34 = vpop.f32.mrf.mxu1  ;;  %724 = vst.msk [vmem:[%s2389_s4 + $0x20] sm:$0xf] %vm715_vm2, %v659_v28  ;;  %v1897_v4 = vpop.f32.mrf.mxu3  ;;  %v993_v59 = vsel %vm780_vm3, %v922_v15, 0.0 }
  0xce   :  { %v675_v37 = vpack.c.bf16 %v1809_v34, %v1809_v34  ;;  %v1865_v50 = vpop.f32.mrf.mxu2  ;;  %v703_v29 = vpack.c.bf16 %v1897_v4, %v1897_v4 }
  0xcf   :  { %v690_v55 = vpack.c.bf16 %v1865_v50, %v1865_v50 }
  0xd0   :  { %740 = vst.msk [vmem:[%s2389_s4 + $0x60] sm:$0xf] %vm715_vm2, %v675_v37 }
  0xd1   :  { %755 = vst.msk [vmem:[%s2389_s4 + $0x9c] sm:$0xf] %vm715_vm2, %v690_v55 }
  0xd2   :  { %v1831_v38 = vpop.f32.mrf.mxu0  ;;  %768 = vst.msk [vmem:[%s2389_s4 + $0xd0] sm:$0xf] %vm715_vm2, %v703_v29 }
  0xd3   :  { %v660_v40 = vpack.c.bf16 %v1831_v38, %v1831_v38  ;;  %v798_v41 = vsel %vm780_vm3, %v1831_v38, 0.0  ;;  %v923_v26 = vmul.f32 %v1831_v38, %v1831_v38 }
  0xd4   :  { %v799_v43 = vadd.f32 %v798_v41, %v797_v33  ;;  %v987_v33 = vsel %vm780_vm3, %v919_v17, 0.0 }
  0xd5   :  { %v1841_v44 = vpop.f32.mrf.mxu1  ;;  %725 = vst.msk [vmem:[%s2389_s4 + $0x24] sm:$0xf] %vm715_vm2, %v660_v40  ;;  %v1918_v24 = vpop.f32.mrf.mxu3  ;;  %v989_v40 = vsel %vm780_vm3, %v920_v31, 0.0  ;;  %v988_v41 = vadd.f32 %v987_v33, %v1699_v56 }
  0xd6   :  { %v676_v46 = vpack.c.bf16 %v1841_v44, %v1841_v44  ;;  %v1894_v0 = vpop.f32.mrf.mxu2  ;;  %v704_v37 = vpack.c.bf16 %v1918_v24, %v1918_v24 }
  0xd7   :  { %v691_v23 = vpack.c.bf16 %v1894_v0, %v1894_v0  ;;  %v990_v55 = vadd.f32 %v989_v40, %v988_v41 }
  0xd8   :  { %741 = vst.msk [vmem:[%s2389_s4 + $0x64] sm:$0xf] %vm715_vm2, %v676_v46 }
  0xd9   :  { %756 = vst.msk [vmem:[%s2389_s4 + $0xa0] sm:$0xf] %vm715_vm2, %v691_v23 }
  0xda   :  { %v516_v49 = vpop.f32.mrf.mxu0  ;;  %769 = vst.msk [vmem:[%s2389_s4 + $0xd4] sm:$0xf] %vm715_vm2, %v704_v37 }
  0xdb   :  { %v661_v51 = vpack.c.bf16 %v516_v49, %v516_v49  ;;  %v800_v54 = vsel %vm780_vm3, %v516_v49, 0.0 }
  0xdc   :  { %v801_v57 = vadd.f32 %v800_v54, %v799_v43 }
  0xdd   :  { %v1872_v58 = vpop.f32.mrf.mxu1  ;;  %726 = vst.msk [vmem:[%s2389_s4 + $0x28] sm:$0xf] %vm715_vm2, %v661_v51 }
  0xde   :  { %v677_v61 = vpack.c.bf16 %v1872_v58, %v1872_v58  ;;  %v1911_v14 = vpop.f32.mrf.mxu2  ;;  %v1969_v54 = vpop.f32.mrf.mxu3 }
  0xdf   :  { %v692_v7 = vpack.c.bf16 %v1911_v14, %v1911_v14 }
  0xe0   :  { %742 = vst.msk [vmem:[%s2389_s4 + $0x68] sm:$0xf] %vm715_vm2, %v677_v61  ;;  %v924_v61 = vmul.f32 %v516_v49, %v516_v49 }
  0xe1   :  { %757 = vst.msk [vmem:[%s2389_s4 + $0xa4] sm:$0xf] %vm715_vm2, %v692_v7 }
  0xe2   :  { %v518_v63 = vpop.f32.mrf.mxu0  ;;  %v997_v49 = vsel %vm780_vm3, %v924_v61, 0.0 }
  0xe3   :  { %v662_v1 = vpack.c.bf16 %v518_v63, %v518_v63  ;;  %v802_v2 = vsel %vm780_vm3, %v518_v63, 0.0 }
  0xe4   :  { %v803_v9 = vadd.f32 %v802_v2, %v801_v57  ;;  %v925_v2 = vmul.f32 %v518_v63, %v518_v63 }
  0xe5   :  { %v1899_v10 = vpop.f32.mrf.mxu1  ;;  %727 = vst.msk [vmem:[%s2389_s4 + $0x2c] sm:$0xf] %vm715_vm2, %v662_v1  ;;  %v992_v1 = vadd.f32 %v991_v47, %v990_v55 }
  0xe6   :  { %v678_v11 = vpack.c.bf16 %v1899_v10, %v1899_v10  ;;  %v1963_v46 = vpop.f32.mrf.mxu2  ;;  %v1992_v33 = vpop.f32.mrf.mxu3 }
  0xe8   :  { %743 = vst.msk [vmem:[%s2389_s4 + $0x6c] sm:$0xf] %vm715_vm2, %v678_v11  ;;  %v994_v11 = vadd.f32 %v993_v59, %v992_v1 }
  0xea   :  { %v521_v12 = vpop.f32.mrf.mxu0 }
  0xeb   :  { %v663_v18 = vpack.c.bf16 %v521_v12, %v521_v12  ;;  %v804_v20 = vsel %vm780_vm3, %v521_v12, 0.0  ;;  %v926_v17 = vmul.f32 %v521_v12, %v521_v12  ;;  %v705_v12 = vpack.c.bf16 %v1969_v54, %v1969_v54 }
  0xec   :  { %v805_v25 = vadd.f32 %v804_v20, %v803_v9  ;;  %v995_v9 = vsel %vm780_vm3, %v923_v26, 0.0  ;;  %v999_v20 = vsel %vm780_vm3, %v925_v2, 0.0 }
  0xed   :  { %v1920_v28 = vpop.f32.mrf.mxu1  ;;  %728 = vst.msk [vmem:[%s2389_s4 + $0x30] sm:$0xf] %vm715_vm2, %v663_v18  ;;  %v996_v18 = vadd.f32 %v995_v9, %v994_v11  ;;  %v1001_v40 = vsel %vm780_vm3, %v926_v17, 0.0 }
  0xee   :  { %v679_v60 = vpack.c.bf16 %v1920_v28, %v1920_v28  ;;  %770 = vst.msk [vmem:[%s2389_s4 + $0xd8] sm:$0xf] %vm715_vm2, %v705_v12  ;;  %v2036_v11 = vpop.f32.mrf.mxu3 }
  0xef   :  { %v998_v36 = vadd.f32 %v997_v49, %v996_v18 }
  0xf0   :  { %744 = vst.msk [vmem:[%s2389_s4 + $0x70] sm:$0xf] %vm715_vm2, %v679_v60  ;;  %v693_v60 = vpack.c.bf16 %v1963_v46, %v1963_v46 }
  0xf2   :  { %v523_v43 = vpop.f32.mrf.mxu0  ;;  %758 = vst.msk [vmem:[%s2389_s4 + $0xa8] sm:$0xf] %vm715_vm2, %v693_v60 }
  0xf3   :  { %v664_v48 = vpack.c.bf16 %v523_v43, %v523_v43  ;;  %v806_v51 = vsel %vm780_vm3, %v523_v43, 0.0  ;;  %v927_v29 = vmul.f32 %v523_v43, %v523_v43  ;;  %v1000_v43 = vadd.f32 %v999_v20, %v998_v36 }
  0xf4   :  { %v807_v56 = vadd.f32 %v806_v51, %v805_v25  ;;  %v1987_v25 = vpop.f32.mrf.mxu2  ;;  %v706_v51 = vpack.c.bf16 %v1992_v33, %v1992_v33  ;;  %v812_v20 = vsel %vm780_vm3, %v1605_v53, 0.0 }
  0xf5   :  { %v1971_v57 = vpop.f32.mrf.mxu1  ;;  %729 = vst.msk [vmem:[%s2389_s4 + $0x34] sm:$0xf] %vm715_vm2, %v664_v48  ;;  %v1003_v47 = vsel %vm780_vm3, %v927_v29, 0.0  ;;  %v694_v26 = vpack.c.bf16 %v1987_v25, %v1987_v25  ;;  %v1002_v48 = vadd.f32 %v1001_v40, %v1000_v43  ;;  %v933_v43 = vmul.f32 %v1660_v35, %v1660_v35 }
  0xf6   :  { %v680_v38 = vpack.c.bf16 %v1971_v57, %v1971_v57  ;;  %771 = vst.msk [vmem:[%s2389_s4 + $0xdc] sm:$0xf] %vm715_vm2, %v706_v51  ;;  %v818_v51 = vsel %vm780_vm3, %v1660_v35, 0.0  ;;  %v935_v35 = vmul.f32 %v1718_v6, %v1718_v6 }
  0xf7   :  { %759 = vst.msk [vmem:[%s2389_s4 + $0xac] sm:$0xf] %vm715_vm2, %v694_v26 }
  0xf8   :  { %745 = vst.msk [vmem:[%s2389_s4 + $0x74] sm:$0xf] %vm715_vm2, %v680_v38  ;;  %v930_v38 = vmul.f32 %v1605_v53, %v1605_v53 }
  0xfa   :  { %v526_v23 = vpop.f32.mrf.mxu0  ;;  %v1009_v53 = vsel %vm780_vm3, %v930_v38, 0.0 }
  0xfb   :  { %v665_v31 = vpack.c.bf16 %v526_v23, %v526_v23  ;;  %v808_v63 = vsel %vm780_vm3, %v526_v23, 0.0  ;;  %v928_v15 = vmul.f32 %v526_v23, %v526_v23  ;;  %v931_v23 = vmul.f32 %v1621_v3, %v1621_v3 }
  0xfc   :  { %v809_v7 = vadd.f32 %v808_v63, %v807_v56  ;;  %v1004_v56 = vadd.f32 %v1003_v47, %v1002_v48  ;;  %v2031_v61 = vpop.f32.mrf.mxu2  ;;  %v932_v63 = vmul.f32 %v1643_v22, %v1643_v22 }
  0xfd   :  { %v1994_v37 = vpop.f32.mrf.mxu1  ;;  %730 = vst.msk [vmem:[%s2389_s4 + $0x38] sm:$0xf] %vm715_vm2, %v665_v31  ;;  %v1005_v55 = vsel %vm780_vm3, %v928_v15, 0.0  ;;  %v1011_v15 = vsel %vm780_vm3, %v931_v23, 0.0 }
  0xfe   :  { %v681_v41 = vpack.c.bf16 %v1994_v37, %v1994_v37  ;;  %v1006_v49 = vadd.f32 %v1005_v55, %v1004_v56  ;;  %v1013_v47 = vsel %vm780_vm3, %v932_v63, 0.0  ;;  %v934_v55 = vmul.f32 %v1689_v52, %v1689_v52 }
  0xff   :  { %v695_v56 = vpack.c.bf16 %v2031_v61, %v2031_v61 }
 0x100   :  { %746 = vst.msk [vmem:[%s2389_s4 + $0x78] sm:$0xf] %vm715_vm2, %v681_v41  ;;  %v816_v41 = vsel %vm780_vm3, %v1643_v22, 0.0  ;;  %v707_v22 = vpack.c.bf16 %v2036_v11, %v2036_v11  ;;  %v1017_v23 = vsel %vm780_vm3, %v934_v55, 0.0  ;;  %v939_v55 = vmul.f32 %v1841_v44, %v1841_v44 }
 0x101   :  { %760 = vst.msk [vmem:[%s2389_s4 + $0xb0] sm:$0xf] %vm715_vm2, %v695_v56 }
 0x102   :  { %v528_v59 = vpop.f32.mrf.mxu0  ;;  %772 = vst.msk [vmem:[%s2389_s4 + $0xe0] sm:$0xf] %vm715_vm2, %v707_v22 }
 0x103   :  { %v666_v1 = vpack.c.bf16 %v528_v59, %v528_v59  ;;  %v810_v2 = vsel %vm780_vm3, %v528_v59, 0.0  ;;  %v929_v9 = vmul.f32 %v528_v59, %v528_v59  ;;  %v2076_v59 = vpop.f32.mrf.mxu3 }
 0x104   :  { %v811_v17 = vadd.f32 %v810_v2, %v809_v7  ;;  %v814_v7 = vsel %vm780_vm3, %v1621_v3, 0.0  ;;  %v2066_v3 = vpop.f32.mrf.mxu2  ;;  %v1015_v2 = vsel %vm780_vm3, %v933_v43, 0.0 }
 0x105   :  { %v2038_v18 = vpop.f32.mrf.mxu1  ;;  %731 = vst.msk [vmem:[%s2389_s4 + $0x3c] sm:$0xf] %vm715_vm2, %v666_v1  ;;  %v1007_v29 = vsel %vm780_vm3, %v929_v9, 0.0  ;;  %v820_v9 = vsel %vm780_vm3, %v1689_v52, 0.0  ;;  %v708_v52 = vpack.c.bf16 %v2076_v59, %v2076_v59 }
 0x106   :  { %v682_v31 = vpack.c.bf16 %v2038_v18, %v2038_v18  ;;  %v813_v60 = vadd.f32 %v812_v20, %v811_v17  ;;  %v1008_v36 = vadd.f32 %v1007_v29, %v1006_v49  ;;  %v696_v49 = vpack.c.bf16 %v2066_v3, %v2066_v3 }
 0x107   :  { %v822_v29 = vsel %vm780_vm3, %v1718_v6, 0.0  ;;  %773 = vst.msk [vmem:[%s2389_s4 + $0xe4] sm:$0xf] %vm715_vm2, %v708_v52  ;;  %v824_v6 = vsel %vm780_vm3, %v1747_v13, 0.0 }
 0x108   :  { %747 = vst.msk [vmem:[%s2389_s4 + $0x7c] sm:$0xf] %vm715_vm2, %v682_v31  ;;  %v815_v12 = vadd.f32 %v814_v7, %v813_v60  ;;  %v1010_v40 = vadd.f32 %v1009_v53, %v1008_v36  ;;  %v936_v31 = vmul.f32 %v1747_v13, %v1747_v13  ;;  %v1019_v36 = vsel %vm780_vm3, %v935_v35, 0.0 }
 0x109   :  { %761 = vst.msk [vmem:[%s2389_s4 + $0xb4] sm:$0xf] %vm715_vm2, %v696_v49  ;;  %v937_v53 = vmul.f32 %v1773_v21, %v1773_v21  ;;  %v1027_v35 = vsel %vm780_vm3, %v939_v55, 0.0  ;;  %v941_v49 = vmul.f32 %v1899_v10, %v1899_v10  ;;  %v945_v55 = vmul.f32 %v2038_v18, %v2038_v18 }
 0x10a   :  { %v817_v26 = vadd.f32 %v816_v41, %v815_v12  ;;  %v1012_v48 = vadd.f32 %v1011_v15, %v1010_v40  ;;  %v1021_v40 = vsel %vm780_vm3, %v936_v31, 0.0  ;;  %v826_v15 = vsel %vm780_vm3, %v1773_v21, 0.0 }
 0x10b   :  { %v938_v41 = vmul.f32 %v1809_v34, %v1809_v34  ;;  %v1023_v13 = vsel %vm780_vm3, %v937_v53, 0.0  ;;  %v940_v21 = vmul.f32 %v1872_v58, %v1872_v58  ;;  %v943_v53 = vmul.f32 %v1971_v57, %v1971_v57 }
 0x10c   :  { %v819_v38 = vadd.f32 %v818_v51, %v817_v26  ;;  %v1014_v1 = vadd.f32 %v1013_v47, %v1012_v48  ;;  %v2118_v43 = vpop.f32.mrf.mxu2  ;;  %v2120_v47 = vpop.f32.mrf.mxu3  ;;  %v828_v51 = vsel %vm780_vm3, %v1809_v34, 0.0  ;;  %v832_v34 = vsel %vm780_vm3, %v1872_v58, 0.0 }
 0x10d   :  { %v709_v31 = vpack.c.bf16 %v2120_v47, %v2120_v47 }
 0x10e   :  { %v821_v17 = vadd.f32 %v820_v9, %v819_v38  ;;  %v1016_v20 = vadd.f32 %v1015_v2, %v1014_v1  ;;  %v1025_v38 = vsel %vm780_vm3, %v938_v41, 0.0  ;;  %v830_v1 = vsel %vm780_vm3, %v1841_v44, 0.0 }
 0x10f   :  { %v942_v44 = vmul.f32 %v1920_v28, %v1920_v28  ;;  %774 = vst.msk [vmem:[%s2389_s4 + $0xe8] sm:$0xf] %vm715_vm2, %v709_v31  ;;  %v838_v41 = vsel %vm780_vm3, %v1971_v57, 0.0  ;;  %v840_v57 = vsel %vm780_vm3, %v1994_v37, 0.0 }
 0x110   :  { %v823_v63 = vadd.f32 %v822_v29, %v821_v17  ;;  %v1018_v60 = vadd.f32 %v1017_v23, %v1016_v20  ;;  %v1029_v17 = vsel %vm780_vm3, %v940_v21, 0.0  ;;  %v834_v23 = vsel %vm780_vm3, %v1899_v10, 0.0 }
 0x111   :  { %v697_v29 = vpack.c.bf16 %v2118_v43, %v2118_v43  ;;  %v836_v10 = vsel %vm780_vm3, %v1920_v28, 0.0 }
 0x112   :  { %v1020_v7 = vadd.f32 %v1019_v36, %v1018_v60  ;;  %v825_v12 = vadd.f32 %v824_v6, %v823_v63  ;;  %v1031_v6 = vsel %vm780_vm3, %v941_v49, 0.0  ;;  %v1039_v49 = vsel %vm780_vm3, %v945_v55, 0.0 }
 0x113   :  { %762 = vst.msk [vmem:[%s2389_s4 + $0xb8] sm:$0xf] %vm715_vm2, %v697_v29 }
 0x114   :  { %v827_v26 = vadd.f32 %v826_v15, %v825_v12  ;;  %v1022_v48 = vadd.f32 %v1021_v40, %v1020_v7  ;;  %v2146_v58 = vpop.f32.mrf.mxu2  ;;  %v2148_v63 = vpop.f32.mrf.mxu3  ;;  %v1033_v15 = vsel %vm780_vm3, %v942_v44, 0.0 }
 0x115   :  { %v698_v7 = vpack.c.bf16 %v2146_v58, %v2146_v58  ;;  %v710_v28 = vpack.c.bf16 %v2148_v63, %v2148_v63 }
 0x116   :  { %v829_v56 = vadd.f32 %v828_v51, %v827_v26  ;;  %v1024_v22 = vadd.f32 %v1023_v13, %v1022_v48  ;;  %v944_v26 = vmul.f32 %v1994_v37, %v1994_v37  ;;  %v1035_v51 = vsel %vm780_vm3, %v943_v53, 0.0 }
 0x117   :  { %763 = vst.msk [vmem:[%s2389_s4 + $0xbc] sm:$0xf] %vm715_vm2, %v698_v7  ;;  %v844_v37 = vsel %vm780_vm3, %v1657_v30, 0.0  ;;  %v950_v53 = vmul.f32 %v1765_v16, %v1765_v16 }
 0x118   :  { %v831_v2 = vadd.f32 %v830_v1, %v829_v56  ;;  %v1026_v9 = vadd.f32 %v1025_v38, %v1024_v22  ;;  %775 = vst.msk [vmem:[%s2389_s4 + $0xec] sm:$0xf] %vm715_vm2, %v710_v28  ;;  %v946_v22 = vmul.f32 %v1657_v30, %v1657_v30  ;;  %v1037_v38 = vsel %vm780_vm3, %v944_v26, 0.0 }
 0x119   :  { %v842_v1 = vsel %vm780_vm3, %v2038_v18, 0.0  ;;  %v948_v18 = vmul.f32 %v1712_v62, %v1712_v62  ;;  %v848_v30 = vsel %vm780_vm3, %v1712_v62, 0.0 }
 0x11a   :  { %v833_v20 = vadd.f32 %v832_v34, %v831_v2  ;;  %v1028_v52 = vadd.f32 %v1027_v35, %v1026_v9  ;;  %v947_v34 = vmul.f32 %v1683_v45, %v1683_v45 }
 0x11c   :  { %v835_v60 = vadd.f32 %v834_v23, %v833_v20  ;;  %v1030_v36 = vadd.f32 %v1029_v17, %v1028_v52  ;;  %v2190_v2 = vpop.f32.mrf.mxu3  ;;  %v1041_v52 = vsel %vm780_vm3, %v946_v22, 0.0  ;;  %v846_v23 = vsel %vm780_vm3, %v1683_v45, 0.0 }
 0x11d   :  { %v1043_v31 = vsel %vm780_vm3, %v947_v34, 0.0  ;;  %v850_v45 = vsel %vm780_vm3, %v1739_v8, 0.0  ;;  %v711_v7 = vpack.c.bf16 %v2190_v2, %v2190_v2  ;;  %v953_v22 = vmul.f32 %v1865_v50, %v1865_v50 }
 0x11e   :  { %v837_v12 = vadd.f32 %v836_v10, %v835_v60  ;;  %v1032_v40 = vadd.f32 %v1031_v6, %v1030_v36  ;;  %v949_v60 = vmul.f32 %v1739_v8, %v1739_v8  ;;  %v1045_v10 = vsel %vm780_vm3, %v948_v18, 0.0 }
 0x11f   :  { %v951_v8 = vmul.f32 %v1799_v27, %v1799_v27  ;;  %776 = vst.msk [vmem:[%s2389_s4 + $0xf0] sm:$0xf] %vm715_vm2, %v711_v7  ;;  %v956_v18 = vmul.f32 %v1963_v46, %v1963_v46 }
 0x120   :  { %v1034_v48 = vadd.f32 %v1033_v15, %v1032_v40  ;;  %v839_v13 = vadd.f32 %v838_v41, %v837_v12  ;;  %v1047_v15 = vsel %vm780_vm3, %v949_v60, 0.0  ;;  %v852_v41 = vsel %vm780_vm3, %v1765_v16, 0.0 }
 0x121   :  { %v854_v16 = vsel %vm780_vm3, %v1799_v27, 0.0  ;;  %v858_v27 = vsel %vm780_vm3, %v1865_v50, 0.0  ;;  %v862_v50 = vsel %vm780_vm3, %v1911_v14, 0.0  ;;  %v957_v60 = vmul.f32 %v1987_v25, %v1987_v25 }
 0x122   :  { %v1036_v21 = vadd.f32 %v1035_v51, %v1034_v48  ;;  %v841_v56 = vadd.f32 %v840_v57, %v839_v13  ;;  %v1049_v13 = vsel %vm780_vm3, %v950_v53, 0.0  ;;  %v952_v51 = vmul.f32 %v1833_v39, %v1833_v39 }
 0x124   :  { %v1038_v9 = vadd.f32 %v1037_v38, %v1036_v21  ;;  %v843_v35 = vadd.f32 %v842_v1, %v841_v56  ;;  %v2214_v12 = vpop.f32.mrf.mxu3  ;;  %v1051_v21 = vsel %vm780_vm3, %v951_v8, 0.0  ;;  %v856_v56 = vsel %vm780_vm3, %v1833_v39, 0.0 }
 0x125   :  { %v712_v28 = vpack.c.bf16 %v2214_v12, %v2214_v12  ;;  %v860_v39 = vsel %vm780_vm3, %v1894_v0, 0.0  ;;  %v870_v8 = vsel %vm780_vm3, %v2066_v3, 0.0 }
 0x126   :  { %v845_v17 = vadd.f32 %v844_v37, %v843_v35  ;;  %v1040_v20 = vadd.f32 %v1039_v49, %v1038_v9  ;;  %v1053_v9 = vsel %vm780_vm3, %v952_v51, 0.0  ;;  %v954_v35 = vmul.f32 %v1894_v0, %v1894_v0 }
 0x127   :  { %777 = vst.msk [vmem:[%s2389_s4 + $0xf4] sm:$0xf] %vm715_vm2, %v712_v28  ;;  %v1055_v49 = vsel %vm780_vm3, %v953_v22, 0.0  ;;  %v864_v0 = vsel %vm780_vm3, %v1963_v46, 0.0  ;;  %v1063_v46 = vsel %vm780_vm3, %v957_v60, 0.0  ;;  %v959_v28 = vmul.f32 %v2066_v3, %v2066_v3 }
 0x128   :  { %v847_v44 = vadd.f32 %v846_v23, %v845_v17  ;;  %v1042_v29 = vadd.f32 %v1041_v52, %v1040_v20  ;;  %v955_v17 = vmul.f32 %v1911_v14, %v1911_v14  ;;  %v1057_v23 = vsel %vm780_vm3, %v954_v35, 0.0 }
 0x129   :  { %v866_v14 = vsel %vm780_vm3, %v1987_v25, 0.0  ;;  %v1067_v51 = vsel %vm780_vm3, %v959_v28, 0.0 }
 0x12a   :  { %v849_v36 = vadd.f32 %v848_v30, %v847_v44  ;;  %v1044_v6 = vadd.f32 %v1043_v31, %v1042_v29  ;;  %v1059_v30 = vsel %vm780_vm3, %v955_v17, 0.0 }
 0x12c   :  { %v851_v40 = vadd.f32 %v850_v45, %v849_v36  ;;  %v1046_v62 = vadd.f32 %v1045_v10, %v1044_v6  ;;  %v2256_v44 = vpop.f32.mrf.mxu3  ;;  %v1061_v10 = vsel %vm780_vm3, %v956_v18, 0.0  ;;  %v958_v45 = vmul.f32 %v2031_v61, %v2031_v61 }
 0x12d   :  { %v713_v53 = vpack.c.bf16 %v2256_v44, %v2256_v44 }
 0x12e   :  { %v853_v26 = vadd.f32 %v852_v41, %v851_v40  ;;  %v1048_v48 = vadd.f32 %v1047_v15, %v1046_v62  ;;  %v868_v62 = vsel %vm780_vm3, %v2031_v61, 0.0  ;;  %v1065_v41 = vsel %vm780_vm3, %v958_v45, 0.0 }
 0x12f   :  { %778 = vst.msk [vmem:[%s2389_s4 + $0xf8] sm:$0xf] %vm715_vm2, %v713_v53  ;;  %v968_v45 = vmul.f32 %v1969_v54, %v1969_v54 }
 0x130   :  { %v855_v57 = vadd.f32 %v854_v16, %v853_v26  ;;  %v1050_v55 = vadd.f32 %v1049_v13, %v1048_v48  ;;  %v960_v26 = vmul.f32 %v2118_v43, %v2118_v43 }
 0x132   :  { %v1052_v38 = vadd.f32 %v1051_v21, %v1050_v55  ;;  %v857_v1 = vadd.f32 %v856_v56, %v855_v57  ;;  %v872_v57 = vsel %vm780_vm3, %v2118_v43, 0.0  ;;  %v961_v55 = vmul.f32 %v2146_v58, %v2146_v58 }
 0x133   :  { %v962_v56 = vmul.f32 %v1771_v19, %v1771_v19  ;;  %v1069_v22 = vsel %vm780_vm3, %v960_v26, 0.0 }
 0x134   :  { %v859_v37 = vadd.f32 %v858_v27, %v857_v1  ;;  %v1054_v34 = vadd.f32 %v1053_v9, %v1052_v38  ;;  %v2284_v48 = vpop.f32.mrf.mxu3  ;;  %v874_v38 = vsel %vm780_vm3, %v2146_v58, 0.0  ;;  %v876_v9 = vsel %vm780_vm3, %v1771_v19, 0.0 }
 0x135   :  { %v714_v16 = vpack.c.bf16 %v2284_v48, %v2284_v48  ;;  %v963_v27 = vmul.f32 %v1807_v32, %v1807_v32  ;;  %v1071_v35 = vsel %vm780_vm3, %v961_v55, 0.0  ;;  %v964_v58 = vmul.f32 %v1839_v42, %v1839_v42 }
 0x136   :  { %v861_v20 = vadd.f32 %v860_v39, %v859_v37  ;;  %v1056_v52 = vadd.f32 %v1055_v49, %v1054_v34  ;;  %v1073_v49 = vsel %vm780_vm3, %v962_v56, 0.0  ;;  %v878_v39 = vsel %vm780_vm3, %v1807_v32, 0.0 }
 0x137   :  { %779 = vst.msk [vmem:[%s2389_s4 + $0xfc] sm:$0xf] %vm715_vm2, %v714_v16  ;;  %v880_v19 = vsel %vm780_vm3, %v1839_v42, 0.0  ;;  %v882_v32 = vsel %vm780_vm3, %v1870_v5, 0.0  ;;  %v884_v42 = vsel %vm780_vm3, %v1897_v4, 0.0  ;;  %v973_v56 = vmul.f32 %v2148_v63, %v2148_v63  ;;  %s1323_s4 = smov 16  }
 0x138   :  { %v863_v29 = vadd.f32 %v862_v50, %v861_v20  ;;  %v1058_v31 = vadd.f32 %v1057_v23, %v1056_v52  ;;  %v1075_v52 = vsel %vm780_vm3, %v963_v27, 0.0  ;;  %v965_v23 = vmul.f32 %v1870_v5, %v1870_v5 }
 0x139   :  { %v886_v5 = vsel %vm780_vm3, %v1918_v24, 0.0 }
 0x13a   :  { %v865_v36 = vadd.f32 %v864_v0, %v863_v29  ;;  %v1060_v6 = vadd.f32 %v1059_v30, %v1058_v31  ;;  %v1077_v29 = vsel %vm780_vm3, %v964_v58, 0.0  ;;  %v966_v31 = vmul.f32 %v1897_v4, %v1897_v4 }
 0x13b   :  { %v1079_v60 = vsel %vm780_vm3, %v965_v23, 0.0  ;;  %v888_v4 = vsel %vm780_vm3, %v1969_v54, 0.0  ;;  %v892_v54 = vsel %vm780_vm3, %v2036_v11, 0.0  ;;  %v976_v58 = vmul.f32 %v2256_v44, %v2256_v44 }
 0x13c   :  { %v867_v7 = vadd.f32 %v866_v14, %v865_v36  ;;  %v1062_v40 = vadd.f32 %v1061_v10, %v1060_v6  ;;  %v967_v36 = vmul.f32 %v1918_v24, %v1918_v24  ;;  %v1081_v14 = vsel %vm780_vm3, %v966_v31, 0.0 }
 0x13d   :  { %v890_v24 = vsel %vm780_vm3, %v1992_v33, 0.0 }
 0x13e   :  { %v1064_v25 = vadd.f32 %v1063_v46, %v1062_v40  ;;  %v869_v15 = vadd.f32 %v868_v62, %v867_v7  ;;  %v1083_v40 = vsel %vm780_vm3, %v967_v36, 0.0  ;;  %v969_v46 = vmul.f32 %v1992_v33, %v1992_v33 }
 0x13f   :  { %v894_v33 = vsel %vm780_vm3, %v2076_v59, 0.0 }
 0x140   :  { %v1066_v61 = vadd.f32 %v1065_v41, %v1064_v25  ;;  %v871_v13 = vadd.f32 %v870_v8, %v869_v15  ;;  %v1085_v25 = vsel %vm780_vm3, %v968_v45, 0.0  ;;  %v970_v15 = vmul.f32 %v2036_v11, %v2036_v11 }
 0x141   :  { %v1087_v26 = vsel %vm780_vm3, %v969_v46, 0.0  ;;  %v896_v11 = vsel %vm780_vm3, %v2120_v47, 0.0 }
 0x142   :  { %v1068_v21 = vadd.f32 %v1067_v51, %v1066_v61  ;;  %v873_v3 = vadd.f32 %v872_v57, %v871_v13  ;;  %v971_v61 = vmul.f32 %v2076_v59, %v2076_v59  ;;  %v1089_v51 = vsel %vm780_vm3, %v970_v15, 0.0 }
 0x143   :  { %v972_v57 = vmul.f32 %v2120_v47, %v2120_v47  ;;  %v898_v59 = vsel %vm780_vm3, %v2148_v63, 0.0  ;;  %v900_v47 = vsel %vm780_vm3, %v2190_v2, 0.0  ;;  %v902_v63 = vsel %vm780_vm3, %v2214_v12, 0.0 }
 0x144   :  { %v1070_v1 = vadd.f32 %v1069_v22, %v1068_v21  ;;  %v875_v43 = vadd.f32 %v874_v38, %v873_v3  ;;  %v1091_v3 = vsel %vm780_vm3, %v971_v61, 0.0 }
 0x146   :  { %v877_v37 = vadd.f32 %v876_v9, %v875_v43  ;;  %v1072_v34 = vadd.f32 %v1071_v35, %v1070_v1  ;;  %v1093_v1 = vsel %vm780_vm3, %v972_v57, 0.0  ;;  %v974_v43 = vmul.f32 %v2190_v2, %v2190_v2 }
 0x147   :  { %v1095_v35 = vsel %vm780_vm3, %v973_v56, 0.0  ;;  %v904_v2 = vsel %vm780_vm3, %v2256_v44, 0.0 }
 0x148   :  { %v879_v17 = vadd.f32 %v878_v39, %v877_v37  ;;  %v1074_v20 = vadd.f32 %v1073_v49, %v1072_v34  ;;  %v975_v37 = vmul.f32 %v2214_v12, %v2214_v12  ;;  %v1097_v39 = vsel %vm780_vm3, %v974_v43, 0.0 }
 0x149   :  { %v906_v12 = vsel %vm780_vm3, %v2284_v48, 0.0 }
 0x14a   :  { %v881_v50 = vadd.f32 %v880_v19, %v879_v17  ;;  %v1076_v18 = vadd.f32 %v1075_v52, %v1074_v20  ;;  %v1099_v52 = vsel %vm780_vm3, %v975_v37, 0.0  ;;  %v977_v19 = vmul.f32 %v2284_v48, %v2284_v48 }
 0x14c   :  { %v883_v30 = vadd.f32 %v882_v32, %v881_v50  ;;  %v1078_v0 = vadd.f32 %v1077_v29, %v1076_v18  ;;  %v1101_v18 = vsel %vm780_vm3, %v976_v58, 0.0  ;;  %v1103_v31 = vsel %vm780_vm3, %v977_v19, 0.0 }
 0x14e   :  { %v885_v6 = vadd.f32 %v884_v42, %v883_v30  ;;  %v1080_v10 = vadd.f32 %v1079_v60, %v1078_v0 }
 0x150   :  { %v887_v53 = vadd.f32 %v886_v5, %v885_v6  ;;  %v1082_v7 = vadd.f32 %v1081_v14, %v1080_v10 }
 0x152   :  { %v1084_v62 = vadd.f32 %v1083_v40, %v1082_v7  ;;  %v889_v28 = vadd.f32 %v888_v4, %v887_v53 }
 0x154   :  { %v891_v41 = vadd.f32 %v890_v24, %v889_v28  ;;  %v1086_v8 = vadd.f32 %v1085_v25, %v1084_v62 }
 0x156   :  { %v893_v13 = vadd.f32 %v892_v54, %v891_v41  ;;  %v1088_v16 = vadd.f32 %v1087_v26, %v1086_v8 }
 0x158   :  { %v895_v55 = vadd.f32 %v894_v33, %v893_v13  ;;  %v1090_v21 = vadd.f32 %v1089_v51, %v1088_v16 }
 0x15a   :  { %v897_v22 = vadd.f32 %v896_v11, %v895_v55  ;;  %v1092_v38 = vadd.f32 %v1091_v3, %v1090_v21 }
 0x15c   :  { %v899_v9 = vadd.f32 %v898_v59, %v897_v22  ;;  %v1094_v27 = vadd.f32 %v1093_v1, %v1092_v38 }
 0x15e   :  { %v1096_v34 = vadd.f32 %v1095_v35, %v1094_v27  ;;  %v901_v49 = vadd.f32 %v900_v47, %v899_v9 }
 0x160   :  { %v1098_v17 = vadd.f32 %v1097_v39, %v1096_v34  ;;  %v903_v20 = vadd.f32 %v902_v63, %v901_v49 }
 0x162   :  { %v1100_v23 = vadd.f32 %v1099_v52, %v1098_v17  ;;  %v905_v50 = vadd.f32 %v904_v2, %v903_v20 }
 0x164   :  { %v1102_v29 = vadd.f32 %v1101_v18, %v1100_v23  ;;  %v907_v32 = vadd.f32 %v906_v12, %v905_v50 }
 0x166   :  { %v1104_v30 = vadd.f32 %v1103_v31, %v1102_v29  ;;  %v908_v10 = vrot.slane %v907_v32, 4 }
 0x168   :  { %v1105_v0 = vrot.slane %v1104_v30, 4  ;;  %v909_v14 = vadd.f32 %v908_v10, %v907_v32 }
 0x16a   :  { %v1106_v60 = vadd.f32 %v1105_v0, %v1104_v30  ;;  %v910_v5 = vrot.slane %v909_v14, 2 }
 0x16c   :  { %v1107_v42 = vrot.slane %v1106_v60, 2  ;;  %v911_v45 = vadd.f32 %v910_v5, %v909_v14 }
 0x16e   :  { %v1108_v36 = vadd.f32 %v1107_v42, %v1106_v60  ;;  %v912_v53 = vrot.slane %v911_v45, 1 }
 0x170   :  { %v1109_v44 = vrot.slane %v1108_v36, 1  ;;  %v913_v7 = vadd.f32 %v912_v53, %v911_v45 }
 0x172   :  { %v1110_v6 = vadd.f32 %v1109_v44, %v1108_v36 }
 0x174   :  { %1112 = vrot.lane.b32.xlu0 %v1110_v6, %s1323_s4 }
 0x1e6   :  { %v1113_v48 = vpop.permute.xlu0 %1112 }
 0x1e7   :  { %v1115_v40 = vsel %vm780_vm3, %v913_v7, %v1113_v48 }
 0x1e8   :  { %1117 = vst.msk [vmem:[%s2390_s5] sm:$0x1] %vm1116_vm4, %v1115_v40 }

// kernel: bottleneck_forward_nhwc.4
= control target key start
LH: loop header
LB: loop body
LE: loop exit
PB: predicated region body
PF: predicated region fallthrough
CT: control target
= control target key end

     0   :  { %vm210_vm0 = vcmask 1041408   ;;  %vm113_vm1 = vcmask 31744   ;;  %vm447_vm2 = vcmask 27648   ;;  %s1503_s14 = smov 124   ;;  %vm1170_vm3 = vcmask 162848   ;;  %s1505_s29 = smov 4   ;;  %s3333_s1 = inlined_call_operand.vmem [shape: bf16[4,20], index: 1, kind: input, shape index: {}]   ;;  %s3334_s0 = inlined_call_operand.vmem [shape: f32[2,16,16,4], index: 0, kind: input, shape index: {}]   ;;  %s3335_s2 = inlined_call_operand.vmem [shape: bf16[2,16,16,4], index: 2, kind: output, shape index: {0}]   ;;  %s3336_s3 = inlined_call_operand.vmem [shape: bf16[2,16,16,16], index: 3, kind: output, shape index: {1}]   ;;  %s3337_s5 = inlined_call_operand.vmem [shape: f32[1,1,32], index: 5, kind: output, shape index: {3}]   ;;  %s3338_s4 = inlined_call_operand.vmem [shape: f32[1,1,8], index: 4, kind: output, shape index: {2}]  }
   0x1   :  { %v112_v0 = vld [vmem:[%s3333_s1] sm:$0x3]  ;;  %v17_v2 = vld [vmem:[%s3334_s0 + $0x8] sm:$0xff]  ;;  %v18_v14 = vld [vmem:[%s3334_s0 + $0x10] sm:$0xff]  ;;  %vm768_vm4 = vcmask 125952   ;;  %vm1445_vm5 = vcmask 130048  }
   0x2   :  { %v16_v1 = vld [vmem:[%s3334_s0] sm:$0xff]  ;;  %v212_v3 = vsel %vm210_vm0, %v112_v0, 0  ;;  %v49_v6 = vld [vmem:[%s3334_s0 + $0x108] sm:$0xff]  ;;  %v19_v15 = vld [vmem:[%s3334_s0 + $0x18] sm:$0xff]  ;;  %vm1447_vm6 = vcmask 253952   ;;  %vm1168_vm7 = vcmask 57344  }
   0x3   :  { %v80_v4 = vpack.c.bf16 %v17_v2, %v16_v1  ;;  %v48_v5 = vld [vmem:[%s3334_s0 + $0x100] sm:$0xff]  ;;  %221 = vmatpush.bf16.msra.mxu0 %v212_v3  ;;  %1498 = vmatpush.bf16.msra.mxu2 %v212_v3  ;;  %v65_v9 = vld [vmem:[%s3334_s0 + $0x188] sm:$0xff]  ;;  %v50_v16 = vld [vmem:[%s3334_s0 + $0x110] sm:$0xff]  ;;  %v81_v22 = vpack.c.bf16 %v19_v15, %v18_v14 }
   0x4   :  { %v64_v7 = vld [vmem:[%s3334_s0 + $0x180] sm:$0xff]  ;;  %v96_v8 = vpack.c.bf16 %v49_v6, %v48_v5  ;;  %v33_v11 = vld [vmem:[%s3334_s0 + $0x88] sm:$0xff]  ;;  %1499 = vmatpush.bf16.msra.mxu3 %v212_v3  ;;  %1497 = vmatpush.bf16.msra.mxu1 %v212_v3  ;;  %v51_v17 = vld [vmem:[%s3334_s0 + $0x118] sm:$0xff] }
   0x5   :  { %v32_v10 = vld [vmem:[%s3334_s0 + $0x80] sm:$0xff]  ;;  %v104_v12 = vpack.c.bf16 %v65_v9, %v64_v7  ;;  %v66_v18 = vld [vmem:[%s3334_s0 + $0x190] sm:$0xff]  ;;  %v67_v19 = vld [vmem:[%s3334_s0 + $0x198] sm:$0xff]  ;;  %v97_v23 = vpack.c.bf16 %v51_v17, %v50_v16 }
   0x6   :  { %v88_v13 = vpack.c.bf16 %v33_v11, %v32_v10  ;;  %1465 = vmatmul.msk.bf16.vlgmr.msra.gmra.mxu0 %vm113_vm1, %v80_v4  ;;  %1481 = vmatmul.msk.bf16.vlgmr.msra.gmra.mxu2 %vm113_vm1, %v96_v8  ;;  %v34_v20 = vld [vmem:[%s3334_s0 + $0x90] sm:$0xff]  ;;  %v35_v21 = vld [vmem:[%s3334_s0 + $0x98] sm:$0xff]  ;;  %v105_v24 = vpack.c.bf16 %v67_v19, %v66_v18  ;;  %v20_v26 = vld [vmem:[%s3334_s0 + $0x20] sm:$0xff] }
   0x7   :  { %1489 = vmatmul.msk.bf16.vlgmr.msra.gmra.mxu3 %vm113_vm1, %v104_v12  ;;  %v89_v25 = vpack.c.bf16 %v35_v21, %v34_v20  ;;  %v21_v27 = vld [vmem:[%s3334_s0 + $0x28] sm:$0xff]  ;;  %v52_v28 = vld [vmem:[%s3334_s0 + $0x120] sm:$0xff]  ;;  %v22_v38 = vld [vmem:[%s3334_s0 + $0x30] sm:$0xff] }
   0x8   :  { %1473 = vmatmul.msk.bf16.vlgmr.msra.gmra.mxu1 %vm113_vm1, %v88_v13  ;;  %v53_v29 = vld [vmem:[%s3334_s0 + $0x128] sm:$0xff]  ;;  %v36_v30 = vld [vmem:[%s3334_s0 + $0xa0] sm:$0xff]  ;;  %v82_v34 = vpack.c.bf16 %v21_v27, %v20_v26  ;;  %v23_v39 = vld [vmem:[%s3334_s0 + $0x38] sm:$0xff] }
   0x9   :  { %v37_v31 = vld [vmem:[%s3334_s0 + $0xa8] sm:$0xff]  ;;  %v68_v32 = vld [vmem:[%s3334_s0 + $0x1a0] sm:$0xff]  ;;  %v98_v35 = vpack.c.bf16 %v53_v29, %v52_v28  ;;  %v54_v40 = vld [vmem:[%s3334_s0 + $0x130] sm:$0xff]  ;;  %v83_v46 = vpack.c.bf16 %v23_v39, %v22_v38 }
   0xa   :  { %v69_v33 = vld [vmem:[%s3334_s0 + $0x1a8] sm:$0xff]  ;;  %v90_v36 = vpack.c.bf16 %v37_v31, %v36_v30  ;;  %v55_v41 = vld [vmem:[%s3334_s0 + $0x138] sm:$0xff]  ;;  %v70_v42 = vld [vmem:[%s3334_s0 + $0x1b0] sm:$0xff] }
   0xb   :  { %v106_v37 = vpack.c.bf16 %v69_v33, %v68_v32  ;;  %v71_v43 = vld [vmem:[%s3334_s0 + $0x1b8] sm:$0xff]  ;;  %v38_v44 = vld [vmem:[%s3334_s0 + $0xb0] sm:$0xff]  ;;  %v99_v47 = vpack.c.bf16 %v55_v41, %v54_v40  ;;  %v24_v50 = vld [vmem:[%s3334_s0 + $0x40] sm:$0xff] }
   0xc   :  { %v39_v45 = vld [vmem:[%s3334_s0 + $0xb8] sm:$0xff]  ;;  %v107_v48 = vpack.c.bf16 %v71_v43, %v70_v42  ;;  %v25_v51 = vld [vmem:[%s3334_s0 + $0x48] sm:$0xff]  ;;  %v40_v52 = vld [vmem:[%s3334_s0 + $0xc0] sm:$0xff] }
   0xd   :  { %v91_v49 = vpack.c.bf16 %v39_v45, %v38_v44  ;;  %v56_v53 = vld [vmem:[%s3334_s0 + $0x140] sm:$0xff]  ;;  %v57_v54 = vld [vmem:[%s3334_s0 + $0x148] sm:$0xff]  ;;  %v84_v58 = vpack.c.bf16 %v25_v51, %v24_v50  ;;  %v26_v62 = vld [vmem:[%s3334_s0 + $0x50] sm:$0xff] }
   0xe   :  { %v41_v55 = vld [vmem:[%s3334_s0 + $0xc8] sm:$0xff]  ;;  %v72_v56 = vld [vmem:[%s3334_s0 + $0x1c0] sm:$0xff]  ;;  %v100_v59 = vpack.c.bf16 %v57_v54, %v56_v53  ;;  %v27_v63 = vld [vmem:[%s3334_s0 + $0x58] sm:$0xff] }
   0xf   :  { %v73_v57 = vld [vmem:[%s3334_s0 + $0x1c8] sm:$0xff]  ;;  %v92_v60 = vpack.c.bf16 %v41_v55, %v40_v52  ;;  %v58_v0 = vld [vmem:[%s3334_s0 + $0x150] sm:$0xff]  ;;  %v59_v1 = vld [vmem:[%s3334_s0 + $0x158] sm:$0xff]  ;;  %v85_v4 = vpack.c.bf16 %v27_v63, %v26_v62 }
  0x10   :  { %v108_v61 = vpack.c.bf16 %v73_v57, %v72_v56  ;;  %v42_v2 = vld [vmem:[%s3334_s0 + $0xd0] sm:$0xff]  ;;  %v43_v3 = vld [vmem:[%s3334_s0 + $0xd8] sm:$0xff]  ;;  %v101_v5 = vpack.c.bf16 %v59_v1, %v58_v0  ;;  %v28_v10 = vld [vmem:[%s3334_s0 + $0x60] sm:$0xff] }
  0x11   :  { %v93_v6 = vpack.c.bf16 %v43_v3, %v42_v2  ;;  %v74_v7 = vld [vmem:[%s3334_s0 + $0x1d0] sm:$0xff]  ;;  %v75_v8 = vld [vmem:[%s3334_s0 + $0x1d8] sm:$0xff]  ;;  %v29_v11 = vld [vmem:[%s3334_s0 + $0x68] sm:$0xff] }
  0x12   :  { %v109_v9 = vpack.c.bf16 %v75_v8, %v74_v7  ;;  %v44_v12 = vld [vmem:[%s3334_s0 + $0xe0] sm:$0xff]  ;;  %v45_v13 = vld [vmem:[%s3334_s0 + $0xe8] sm:$0xff]  ;;  %v86_v14 = vpack.c.bf16 %v29_v11, %v28_v10  ;;  %v62_v28 = vld [vmem:[%s3334_s0 + $0x170] sm:$0xff] }
  0x13   :  { %v94_v15 = vpack.c.bf16 %v45_v13, %v44_v12  ;;  %v60_v16 = vld [vmem:[%s3334_s0 + $0x160] sm:$0xff]  ;;  %v61_v17 = vld [vmem:[%s3334_s0 + $0x168] sm:$0xff]  ;;  %v63_v29 = vld [vmem:[%s3334_s0 + $0x178] sm:$0xff] }
  0x14   :  { %v102_v18 = vpack.c.bf16 %v61_v17, %v60_v16  ;;  %v76_v19 = vld [vmem:[%s3334_s0 + $0x1e0] sm:$0xff]  ;;  %v77_v20 = vld [vmem:[%s3334_s0 + $0x1e8] sm:$0xff]  ;;  %v103_v30 = vpack.c.bf16 %v63_v29, %v62_v28 }
  0x15   :  { %v110_v21 = vpack.c.bf16 %v77_v20, %v76_v19 }
  0x16   :  { %1466 = vmatmul.msk.bf16.gmra.mxu0 %vm113_vm1, %v81_v22  ;;  %1482 = vmatmul.msk.bf16.gmra.mxu2 %vm113_vm1, %v97_v23  ;;  %v30_v22 = vld [vmem:[%s3334_s0 + $0x70] sm:$0xff]  ;;  %v31_v23 = vld [vmem:[%s3334_s0 + $0x78] sm:$0xff] }
  0x17   :  { %1490 = vmatmul.msk.bf16.gmra.mxu3 %vm113_vm1, %v105_v24  ;;  %v46_v24 = vld [vmem:[%s3334_s0 + $0xf0] sm:$0xff]  ;;  %v87_v26 = vpack.c.bf16 %v31_v23, %v30_v22 }
  0x18   :  { %1474 = vmatmul.msk.bf16.gmra.mxu1 %vm113_vm1, %v89_v25  ;;  %v47_v25 = vld [vmem:[%s3334_s0 + $0xf8] sm:$0xff] }
  0x19   :  { %v95_v27 = vpack.c.bf16 %v47_v25, %v46_v24 }
  0x26   :  { %1467 = vmatmul.msk.bf16.gmra.mxu0 %vm113_vm1, %v82_v34  ;;  %1483 = vmatmul.msk.bf16.gmra.mxu2 %vm113_vm1, %v98_v35 }
  0x27   :  { %1491 = vmatmul.msk.bf16.gmra.mxu3 %vm113_vm1, %v106_v37 }
  0x28   :  { %1475 = vmatmul.msk.bf16.gmra.mxu1 %vm113_vm1, %v90_v36 }
  0x36   :  { %1468 = vmatmul.msk.bf16.gmra.mxu0 %vm113_vm1, %v83_v46  ;;  %1484 = vmatmul.msk.bf16.gmra.mxu2 %vm113_vm1, %v99_v47 }
  0x37   :  { %1492 = vmatmul.msk.bf16.gmra.mxu3 %vm113_vm1, %v107_v48 }
  0x38   :  { %1476 = vmatmul.msk.bf16.gmra.mxu1 %vm113_vm1, %v91_v49 }
  0x46   :  { %1469 = vmatmul.msk.bf16.gmra.mxu0 %vm113_vm1, %v84_v58  ;;  %1485 = vmatmul.msk.bf16.gmra.mxu2 %vm113_vm1, %v100_v59 }
  0x47   :  { %1493 = vmatmul.msk.bf16.gmra.mxu3 %vm113_vm1, %v108_v61 }
  0x48   :  { %1477 = vmatmul.msk.bf16.gmra.mxu1 %vm113_vm1, %v92_v60 }
  0x56   :  { %1470 = vmatmul.msk.bf16.gmra.mxu0 %vm113_vm1, %v85_v4  ;;  %1486 = vmatmul.msk.bf16.gmra.mxu2 %vm113_vm1, %v101_v5 }
  0x57   :  { %1494 = vmatmul.msk.bf16.gmra.mxu3 %vm113_vm1, %v109_v9 }
  0x58   :  { %1478 = vmatmul.msk.bf16.gmra.mxu1 %vm113_vm1, %v93_v6 }
  0x66   :  { %1471 = vmatmul.msk.bf16.gmra.mxu0 %vm113_vm1, %v86_v14  ;;  %1487 = vmatmul.msk.bf16.gmra.mxu2 %vm113_vm1, %v102_v18 }
  0x67   :  { %1495 = vmatmul.msk.bf16.gmra.mxu3 %vm113_vm1, %v110_v21 }
  0x68   :  { %1479 = vmatmul.msk.bf16.gmra.mxu1 %vm113_vm1, %v94_v15 }
  0x76   :  { %1472 = vmatmul.msk.bf16.gmra.mxu0 %vm113_vm1, %v87_v26  ;;  %1488 = vmatmul.msk.bf16.gmra.mxu2 %vm113_vm1, %v103_v30 }
  0x78   :  { %1480 = vmatmul.msk.bf16.gmra.mxu1 %vm113_vm1, %v95_v27 }
  0x83   :  { %v223_v31 = vpop.f32.mrf.mxu0 }
  0x84   :  { %v383_v32 = vpack.c.bf16 %v223_v31, %v223_v31  ;;  %v966_v35 = vmul.f32 %v223_v31, %v223_v31  ;;  %v833_v41 = vsel %vm113_vm1, %v223_v31, 0.0  ;;  %v1171_v46 = vsel %vm1170_vm3, %v223_v31, 0.0 }
  0x85   :  { %v1756_v33 = vpop.f32.mrf.mxu1 }
  0x86   :  { %v399_v34 = vpack.c.bf16 %v1756_v33, %v1756_v33  ;;  %576 = vrot.lane.b32.xlu0 %v383_v32, %s1503_s14  ;;  %448 = vst.msk [vmem:[%s3335_s2] sm:$0xf] %vm447_vm2, %v383_v32  ;;  %v1030_v45 = vsel %vm113_vm1, %v966_v35, 0.0  ;;  %v1304_v49 = vsel %vm1170_vm3, %v966_v35, 0.0 }
  0x88   :  { %608 = vrot.lane.b32.xlu1 %v399_v34, %s1503_s14  ;;  %464 = vst.msk [vmem:[%s3335_s2 + $0x40] sm:$0xf] %vm447_vm2, %v399_v34 }
  0x89   :  { %v1770_v36 = vpop.f32.mrf.mxu2 }
  0x8a   :  { %v1772_v37 = vpop.f32.mrf.mxu3  ;;  %v415_v38 = vpack.c.bf16 %v1770_v36, %v1770_v36 }
  0x8b   :  { %v225_v39 = vpop.f32.mrf.mxu0  ;;  %v431_v40 = vpack.c.bf16 %v1772_v37, %v1772_v37 }
  0x8c   :  { %v834_v42 = vsel %vm113_vm1, %v225_v39, 0.0  ;;  %v967_v43 = vmul.f32 %v225_v39, %v225_v39  ;;  %640 = vrot.lane.b32.xlu2 %v415_v38, %s1503_s14  ;;  %480 = vst.msk [vmem:[%s3335_s2 + $0x80] sm:$0xf] %vm447_vm2, %v415_v38  ;;  %v1172_v48 = vsel %vm1170_vm3, %v225_v39, 0.0  ;;  %v384_v56 = vpack.c.bf16 %v225_v39, %v225_v39 }
  0x8d   :  { %v1785_v44 = vpop.f32.mrf.mxu1  ;;  %v835_v47 = vadd.f32 %v834_v42, %v833_v41  ;;  %496 = vst.msk [vmem:[%s3335_s2 + $0xc0] sm:$0xf] %vm447_vm2, %v431_v40  ;;  %v1173_v51 = vadd.f32 %v1172_v48, %v1171_v46  ;;  %v79_v48 = vld [vmem:[%s3334_s0 + $0x1f8] sm:$0xff] }
  0x8e   :  { %v1031_v50 = vsel %vm113_vm1, %v967_v43, 0.0  ;;  %v1305_v52 = vsel %vm1170_vm3, %v967_v43, 0.0  ;;  %672 = vrot.lane.b32.xlu0 %v431_v40, %s1503_s14  ;;  %v400_v55 = vpack.c.bf16 %v1785_v44, %v1785_v44  ;;  %449 = vst.msk [vmem:[%s3335_s2 + $0x4] sm:$0xf] %vm447_vm2, %v384_v56 }
  0x8f   :  { %v1032_v53 = vadd.f32 %v1031_v50, %v1030_v45  ;;  %v1306_v54 = vadd.f32 %v1305_v52, %v1304_v49 }
  0x90   :  { %465 = vst.msk [vmem:[%s3335_s2 + $0x44] sm:$0xf] %vm447_vm2, %v400_v55 }
  0x91   :  { %v1800_v57 = vpop.f32.mrf.mxu2 }
  0x92   :  { %v1802_v58 = vpop.f32.mrf.mxu3  ;;  %v416_v59 = vpack.c.bf16 %v1800_v57, %v1800_v57 }
  0x93   :  { %v228_v60 = vpop.f32.mrf.mxu0  ;;  %v432_v61 = vpack.c.bf16 %v1802_v58, %v1802_v58 }
  0x94   :  { %v836_v62 = vsel %vm113_vm1, %v228_v60, 0.0  ;;  %v968_v63 = vmul.f32 %v228_v60, %v228_v60  ;;  %610 = vrot.lane.b32.xlu2 %v400_v55, %s1503_s14  ;;  %481 = vst.msk [vmem:[%s3335_s2 + $0x84] sm:$0xf] %vm447_vm2, %v416_v59  ;;  %v1174_v2 = vsel %vm1170_vm3, %v228_v60, 0.0  ;;  %v385_v6 = vpack.c.bf16 %v228_v60, %v228_v60 }
  0x95   :  { %v1822_v0 = vpop.f32.mrf.mxu1  ;;  %v837_v1 = vadd.f32 %v836_v62, %v835_v47  ;;  %497 = vst.msk [vmem:[%s3335_s2 + $0xc4] sm:$0xf] %vm447_vm2, %v432_v61  ;;  %674 = vrot.lane.b32.xlu1 %v432_v61, %s1503_s14  ;;  %v1175_v4 = vadd.f32 %v1174_v2, %v1173_v51  ;;  %v78_v47 = vld [vmem:[%s3334_s0 + $0x1f0] sm:$0xff]  ;;  %s1504_s0 = smov 12  }
  0x96   :  { %v1033_v3 = vsel %vm113_vm1, %v968_v63, 0.0  ;;  %v1307_v5 = vsel %vm1170_vm3, %v968_v63, 0.0  ;;  %578 = vrot.lane.b32.xlu0 %v384_v56, %s1503_s14  ;;  %450 = vst.msk [vmem:[%s3335_s2 + $0x8] sm:$0xf] %vm447_vm2, %v385_v6  ;;  %v401_v9 = vpack.c.bf16 %v1822_v0, %v1822_v0  ;;  %v111_v50 = vpack.c.bf16 %v79_v48, %v78_v47 }
  0x97   :  { %v1034_v7 = vadd.f32 %v1033_v3, %v1032_v53  ;;  %v1308_v8 = vadd.f32 %v1307_v5, %v1306_v54 }
  0x98   :  { %466 = vst.msk [vmem:[%s3335_s2 + $0x48] sm:$0xf] %vm447_vm2, %v401_v9  ;;  %1496 = vmatmul.msk.bf16.gmra.mxu3 %vm113_vm1, %v111_v50 }
  0x99   :  { %v1839_v10 = vpop.f32.mrf.mxu2 }
  0x9a   :  { %v1841_v11 = vpop.f32.mrf.mxu3  ;;  %v417_v12 = vpack.c.bf16 %v1839_v10, %v1839_v10 }
  0x9b   :  { %v230_v13 = vpop.f32.mrf.mxu0  ;;  %v433_v14 = vpack.c.bf16 %v1841_v11, %v1841_v11 }
  0x9c   :  { %v838_v15 = vsel %vm113_vm1, %v230_v13, 0.0  ;;  %v969_v16 = vmul.f32 %v230_v13, %v230_v13  ;;  %482 = vst.msk [vmem:[%s3335_s2 + $0x88] sm:$0xf] %vm447_vm2, %v417_v12  ;;  %v1176_v19 = vsel %vm1170_vm3, %v230_v13, 0.0  ;;  %v386_v25 = vpack.c.bf16 %v230_v13, %v230_v13 }
  0x9d   :  { %v1856_v17 = vpop.f32.mrf.mxu1  ;;  %v839_v18 = vadd.f32 %v838_v15, %v837_v1  ;;  %498 = vst.msk [vmem:[%s3335_s2 + $0xc8] sm:$0xf] %vm447_vm2, %v433_v14  ;;  %676 = vrot.lane.b32.xlu2 %v433_v14, %s1503_s14  ;;  %580 = vrot.lane.b32.xlu1 %v385_v6, %s1503_s14  ;;  %v1177_v21 = vadd.f32 %v1176_v19, %v1175_v4 }
  0x9e   :  { %v1035_v20 = vsel %vm113_vm1, %v969_v16, 0.0  ;;  %v1309_v22 = vsel %vm1170_vm3, %v969_v16, 0.0  ;;  %642 = vrot.lane.b32.xlu0 %v416_v59, %s1503_s14  ;;  %v402_v27 = vpack.c.bf16 %v1856_v17, %v1856_v17  ;;  %451 = vst.msk [vmem:[%s3335_s2 + $0xc] sm:$0xf] %vm447_vm2, %v386_v25 }
  0x9f   :  { %v1036_v23 = vadd.f32 %v1035_v20, %v1034_v7  ;;  %v1310_v24 = vadd.f32 %v1309_v22, %v1308_v8 }
  0xa0   :  { %467 = vst.msk [vmem:[%s3335_s2 + $0x4c] sm:$0xf] %vm447_vm2, %v402_v27 }
  0xa1   :  { %v1868_v26 = vpop.f32.mrf.mxu2 }
  0xa2   :  { %v418_v28 = vpack.c.bf16 %v1868_v26, %v1868_v26  ;;  %v1874_v29 = vpop.f32.mrf.mxu3 }
  0xa3   :  { %v233_v30 = vpop.f32.mrf.mxu0  ;;  %v434_v31 = vpack.c.bf16 %v1874_v29, %v1874_v29 }
  0xa4   :  { %v840_v32 = vsel %vm113_vm1, %v233_v30, 0.0  ;;  %v970_v34 = vmul.f32 %v233_v30, %v233_v30  ;;  %483 = vst.msk [vmem:[%s3335_s2 + $0x8c] sm:$0xf] %vm447_vm2, %v418_v28  ;;  %v1178_v39 = vsel %vm1170_vm3, %v233_v30, 0.0  ;;  %v387_v43 = vpack.c.bf16 %v233_v30, %v233_v30 }
  0xa5   :  { %v1891_v35 = vpop.f32.mrf.mxu1  ;;  %v841_v38 = vadd.f32 %v840_v32, %v839_v18  ;;  %646 = vrot.lane.b32.xlu2 %v418_v28, %s1503_s14  ;;  %644 = vrot.lane.b32.xlu1 %v417_v12, %s1503_s14  ;;  %499 = vst.msk [vmem:[%s3335_s2 + $0xcc] sm:$0xf] %vm447_vm2, %v434_v31  ;;  %v1901_v41 = vadd.f32 %v1178_v39, %v1177_v21 }
  0xa6   :  { %v1037_v40 = vsel %vm113_vm1, %v970_v34, 0.0  ;;  %v1311_v42 = vsel %vm1170_vm3, %v970_v34, 0.0  ;;  %612 = vrot.lane.b32.xlu0 %v401_v9, %s1503_s14  ;;  %452 = vst.msk [vmem:[%s3335_s2 + $0x10] sm:$0xf] %vm447_vm2, %v387_v43  ;;  %v403_v49 = vpack.c.bf16 %v1891_v35, %v1891_v35 }
  0xa7   :  { %v1905_v45 = vadd.f32 %v1037_v40, %v1036_v23  ;;  %v1907_v46 = vadd.f32 %v1311_v42, %v1310_v24 }
  0xa8   :  { %468 = vst.msk [vmem:[%s3335_s2 + $0x50] sm:$0xf] %vm447_vm2, %v403_v49 }
  0xa9   :  { %v1921_v51 = vpop.f32.mrf.mxu2 }
  0xaa   :  { %3376 = vst [vmem:[#allocation2_spill] sm:$0xff] %v1921_v51  ;;  %v419_v52 = vpack.c.bf16 %v1921_v51, %v1921_v51  ;;  %v1929_v53 = vpop.f32.mrf.mxu3 }
  0xab   :  { %3377 = vst [vmem:[#allocation3_spill] sm:$0xff] %v1929_v53  ;;  %v1932_v54 = vpop.f32.mrf.mxu0  ;;  %v435_v55 = vpack.c.bf16 %v1929_v53, %v1929_v53 }
  0xac   :  { %v842_v56 = vsel %vm113_vm1, %v1932_v54, 0.0  ;;  %484 = vst.msk [vmem:[%s3335_s2 + $0x90] sm:$0xf] %vm447_vm2, %v419_v52  ;;  %v388_v61 = vpack.c.bf16 %v1932_v54, %v1932_v54 }
  0xad   :  { %v1942_v59 = vpop.f32.mrf.mxu1  ;;  %v843_v60 = vadd.f32 %v842_v56, %v841_v38  ;;  %582 = vrot.lane.b32.xlu1 %v386_v25, %s1503_s14  ;;  %584 = vrot.lane.b32.xlu2 %v387_v43, %s1503_s14  ;;  %500 = vst.msk [vmem:[%s3335_s2 + $0xd0] sm:$0xf] %vm447_vm2, %v435_v55 }
  0xae   :  { %678 = vrot.lane.b32.xlu0 %v434_v31, %s1503_s14  ;;  %v404_v62 = vpack.c.bf16 %v1942_v59, %v1942_v59  ;;  %453 = vst.msk [vmem:[%s3335_s2 + $0x14] sm:$0xf] %vm447_vm2, %v388_v61 }
  0xb0   :  { %469 = vst.msk [vmem:[%s3335_s2 + $0x54] sm:$0xf] %vm447_vm2, %v404_v62 }
  0xb1   :  { %v1955_v63 = vpop.f32.mrf.mxu2 }
  0xb2   :  { %3378 = vst [vmem:[#allocation4_spill] sm:$0xff] %v1955_v63  ;;  %v1961_v1 = vpop.f32.mrf.mxu3  ;;  %v420_v2 = vpack.c.bf16 %v1955_v63, %v1955_v63 }
  0xb3   :  { %3379 = vst [vmem:[#allocation5_spill] sm:$0xff] %v1961_v1  ;;  %v1965_v3 = vpop.f32.mrf.mxu0  ;;  %v436_v4 = vpack.c.bf16 %v1961_v1, %v1961_v1  ;;  %v2249_v1 = vsel %vm1170_vm3, %v1785_v44, 0.0 }
  0xb4   :  { %v844_v5 = vsel %vm113_vm1, %v1965_v3, 0.0  ;;  %485 = vst.msk [vmem:[%s3335_s2 + $0x94] sm:$0xf] %vm447_vm2, %v420_v2  ;;  %v389_v8 = vpack.c.bf16 %v1965_v3, %v1965_v3 }
  0xb5   :  { %v1979_v6 = vpop.f32.mrf.mxu1  ;;  %v845_v7 = vadd.f32 %v844_v5, %v843_v60  ;;  %614 = vrot.lane.b32.xlu1 %v402_v27, %s1503_s14  ;;  %616 = vrot.lane.b32.xlu2 %v403_v49, %s1503_s14  ;;  %501 = vst.msk [vmem:[%s3335_s2 + $0xd4] sm:$0xf] %vm447_vm2, %v436_v4 }
  0xb6   :  { %648 = vrot.lane.b32.xlu0 %v419_v52, %s1503_s14  ;;  %454 = vst.msk [vmem:[%s3335_s2 + $0x18] sm:$0xf] %vm447_vm2, %v389_v8  ;;  %v405_v9 = vpack.c.bf16 %v1979_v6, %v1979_v6 }
  0xb8   :  { %470 = vst.msk [vmem:[%s3335_s2 + $0x58] sm:$0xf] %vm447_vm2, %v405_v9 }
  0xb9   :  { %v1996_v12 = vpop.f32.mrf.mxu2 }
  0xba   :  { %3380 = vst [vmem:[#allocation6_spill] sm:$0xff] %v1996_v12  ;;  %v1998_v13 = vpop.f32.mrf.mxu3  ;;  %v421_v14 = vpack.c.bf16 %v1996_v12, %v1996_v12 }
  0xbb   :  { %3381 = vst [vmem:[#allocation7_spill] sm:$0xff] %v1998_v13  ;;  %v2006_v15 = vpop.f32.mrf.mxu0  ;;  %v437_v16 = vpack.c.bf16 %v1998_v13, %v1998_v13 }
  0xbc   :  { %v846_v18 = vsel %vm113_vm1, %v2006_v15, 0.0  ;;  %486 = vst.msk [vmem:[%s3335_s2 + $0x98] sm:$0xf] %vm447_vm2, %v421_v14  ;;  %v390_v22 = vpack.c.bf16 %v2006_v15, %v2006_v15  ;;  %v973_v12 = vmul.f32 %v2006_v15, %v2006_v15 }
  0xbd   :  { %v2016_v19 = vpop.f32.mrf.mxu1  ;;  %v847_v20 = vadd.f32 %v846_v18, %v845_v7  ;;  %680 = vrot.lane.b32.xlu1 %v435_v55, %s1503_s14  ;;  %586 = vrot.lane.b32.xlu2 %v388_v61, %s1503_s14  ;;  %502 = vst.msk [vmem:[%s3335_s2 + $0xd8] sm:$0xf] %vm447_vm2, %v437_v16 }
  0xbe   :  { %618 = vrot.lane.b32.xlu0 %v404_v62, %s1503_s14  ;;  %v406_v21 = vpack.c.bf16 %v2016_v19, %v2016_v19  ;;  %455 = vst.msk [vmem:[%s3335_s2 + $0x1c] sm:$0xf] %vm447_vm2, %v390_v22 }
  0xc0   :  { %471 = vst.msk [vmem:[%s3335_s2 + $0x5c] sm:$0xf] %vm447_vm2, %v406_v21 }
  0xc1   :  { %v2029_v23 = vpop.f32.mrf.mxu2 }
  0xc2   :  { %3382 = vst [vmem:[#allocation8_spill] sm:$0xff] %v2029_v23  ;;  %v422_v24 = vpack.c.bf16 %v2029_v23, %v2029_v23  ;;  %v2037_v25 = vpop.f32.mrf.mxu3  ;;  %v2337_v23 = vsel %vm1170_vm3, %v1839_v10, 0.0 }
  0xc3   :  { %3383 = vst [vmem:[#allocation9_spill] sm:$0xff] %v2037_v25  ;;  %v2039_v27 = vpop.f32.mrf.mxu0  ;;  %v2047_v28 = vpack.c.bf16 %v2037_v25, %v2037_v25  ;;  %v1015_v25 = vmul.f32 %v1802_v58, %v1802_v58 }
  0xc4   :  { %v848_v30 = vsel %vm113_vm1, %v2039_v27, 0.0  ;;  %487 = vst.msk [vmem:[%s3335_s2 + $0x9c] sm:$0xf] %vm447_vm2, %v422_v24  ;;  %v2067_v34 = vpack.c.bf16 %v2039_v27, %v2039_v27 }
  0xc5   :  { %v2055_v31 = vpop.f32.mrf.mxu1  ;;  %v849_v32 = vadd.f32 %v848_v30, %v847_v20  ;;  %650 = vrot.lane.b32.xlu1 %v420_v2, %s1503_s14  ;;  %682 = vrot.lane.b32.xlu2 %v436_v4, %s1503_s14  ;;  %503 = vst.msk [vmem:[%s3335_s2 + $0xdc] sm:$0xf] %vm447_vm2, %v2047_v28  ;;  %v982_v4 = vmul.f32 %v1756_v33, %v1756_v33  ;;  %v2178_v20 = vsel %vm1170_vm3, %v1756_v33, 0.0  ;;  %v2193_v30 = vsel %vm113_vm1, %v1770_v36, 0.0 }
  0xc6   :  { %588 = vrot.lane.b32.xlu0 %v389_v8, %s1503_s14  ;;  %v2071_v38 = vpack.c.bf16 %v2055_v31, %v2055_v31  ;;  %456 = vst.msk [vmem:[%s3335_s2 + $0x20] sm:$0xf] %vm447_vm2, %v2067_v34 }
  0xc7   :  { %v2174_v18 = vsel %vm113_vm1, %v982_v4, 0.0  ;;  %3388 = vst [vmem:[#allocation14_spill] sm:$0xff] %v2193_v30  ;;  %v1182_v30 = vsel %vm1170_vm3, %v1965_v3, 0.0 }
  0xc8   :  { %472 = vst.msk [vmem:[%s3335_s2 + $0x60] sm:$0xf] %vm447_vm2, %v2071_v38 }
  0xc9   :  { %v2073_v39 = vpop.f32.mrf.mxu2  ;;  %3407 = vst [vmem:[#allocation33_spill] sm:$0xff] %v2337_v23  ;;  %v1180_v23 = vsel %vm1170_vm3, %v1932_v54, 0.0 }
  0xca   :  { %3384 = vst [vmem:[#allocation10_spill] sm:$0xff] %v2073_v39  ;;  %v2080_v40 = vpop.f32.mrf.mxu3  ;;  %v2084_v42 = vpack.c.bf16 %v2073_v39, %v2073_v39  ;;  %v2284_v39 = vsel %vm113_vm1, %v1802_v58, 0.0  ;;  %v1181_v63 = vadd.f32 %v1180_v23, %v1901_v41 }
  0xcb   :  { %3385 = vst [vmem:[#allocation11_spill] sm:$0xff] %v2080_v40  ;;  %v2086_v43 = vpop.f32.mrf.mxu0  ;;  %v2095_v47 = vpack.c.bf16 %v2080_v40, %v2080_v40 }
  0xcc   :  { %v850_v48 = vsel %vm113_vm1, %v2086_v43, 0.0  ;;  %488 = vst.msk [vmem:[%s3335_s2 + $0xa0] sm:$0xf] %vm447_vm2, %v2084_v42  ;;  %v2116_v52 = vpack.c.bf16 %v2086_v43, %v2086_v43 }
  0xcd   :  { %v2099_v49 = vpop.f32.mrf.mxu1  ;;  %v851_v50 = vadd.f32 %v850_v48, %v849_v32  ;;  %620 = vrot.lane.b32.xlu1 %v405_v9, %s1503_s14  ;;  %652 = vrot.lane.b32.xlu2 %v421_v14, %s1503_s14  ;;  %504 = vst.msk [vmem:[%s3335_s2 + $0xe0] sm:$0xf] %vm447_vm2, %v2095_v47  ;;  %v998_v9 = vmul.f32 %v1770_v36, %v1770_v36  ;;  %v2169_v14 = vsel %vm113_vm1, %v1756_v33, 0.0  ;;  %v2197_v32 = vsel %vm1170_vm3, %v1770_v36, 0.0 }
  0xce   :  { %684 = vrot.lane.b32.xlu0 %v437_v16, %s1503_s14  ;;  %v2120_v55 = vpack.c.bf16 %v2099_v49, %v2099_v49  ;;  %457 = vst.msk [vmem:[%s3335_s2 + $0x24] sm:$0xf] %vm447_vm2, %v2116_v52  ;;  %v1014_v16 = vmul.f32 %v1772_v37, %v1772_v37  ;;  %v983_v33 = vmul.f32 %v1785_v44, %v1785_v44 }
  0xcf   :  { %3389 = vst [vmem:[#allocation15_spill] sm:$0xff] %v2197_v32 }
  0xd0   :  { %473 = vst.msk [vmem:[%s3335_s2 + $0x64] sm:$0xf] %vm447_vm2, %v2120_v55  ;;  %v2227_v40 = vsel %vm113_vm1, %v1014_v16, 0.0 }
  0xd1   :  { %v2122_v56 = vpop.f32.mrf.mxu2  ;;  %3395 = vst [vmem:[#allocation21_spill] sm:$0xff] %v2227_v40  ;;  %v2245_v40 = vsel %vm113_vm1, %v1785_v44, 0.0  ;;  %v984_v44 = vmul.f32 %v1822_v0, %v1822_v0 }
  0xd2   :  { %3386 = vst [vmem:[#allocation12_spill] sm:$0xff] %v2122_v56  ;;  %v2129_v60 = vpop.f32.mrf.mxu3  ;;  %v2133_v61 = vpack.c.bf16 %v2122_v56, %v2122_v56  ;;  %v2276_v56 = vsel %vm113_vm1, %v1800_v57, 0.0 }
  0xd3   :  { %3387 = vst [vmem:[#allocation13_spill] sm:$0xff] %v2129_v60  ;;  %v2135_v62 = vpop.f32.mrf.mxu0  ;;  %v2144_v2 = vpack.c.bf16 %v2129_v60, %v2129_v60  ;;  %v2224_v60 = vsel %vm1170_vm3, %v998_v9, 0.0 }
  0xd4   :  { %v852_v5 = vsel %vm113_vm1, %v2135_v62, 0.0  ;;  %489 = vst.msk [vmem:[%s3335_s2 + $0xa4] sm:$0xf] %vm447_vm2, %v2133_v61 }
  0xd5   :  { %v2150_v7 = vpop.f32.mrf.mxu1  ;;  %v853_v8 = vadd.f32 %v852_v5, %v851_v50  ;;  %622 = vrot.lane.b32.xlu2 %v406_v21, %s1503_s14  ;;  %590 = vrot.lane.b32.xlu1 %v390_v22, %s1503_s14  ;;  %505 = vst.msk [vmem:[%s3335_s2 + $0xe4] sm:$0xf] %vm447_vm2, %v2144_v2  ;;  %v2186_v22 = vpack.c.bf16 %v2135_v62, %v2135_v62  ;;  %v2204_v50 = vsel %vm113_vm1, %v998_v9, 0.0  ;;  %v2212_v5 = vsel %vm1170_vm3, %v1772_v37, 0.0 }
  0xd6   :  { %654 = vrot.lane.b32.xlu0 %v422_v24, %s1503_s14  ;;  %v2182_v21 = vpack.c.bf16 %v2150_v7, %v2150_v7  ;;  %v2189_v24 = vsel %vm1170_vm3, %v982_v4, 0.0  ;;  %3391 = vst [vmem:[#allocation17_spill] sm:$0xff] %v2204_v50  ;;  %v2208_v4 = vsel %vm113_vm1, %v1772_v37, 0.0  ;;  %v999_v37 = vmul.f32 %v1800_v57, %v1800_v57 }
  0xd7   :  { %3392 = vst [vmem:[#allocation18_spill] sm:$0xff] %v2208_v4  ;;  %v2241_v9 = vsel %vm1170_vm3, %v1014_v16, 0.0  ;;  %v2261_v16 = vsel %vm113_vm1, %v983_v33, 0.0 }
  0xd8   :  { %3393 = vst [vmem:[#allocation19_spill] sm:$0xff] %v2212_v5 }
  0xd9   :  { %v2201_v48 = vpop.f32.mrf.mxu2  ;;  %474 = vst.msk [vmem:[%s3335_s2 + $0x68] sm:$0xf] %vm447_vm2, %v2182_v21 }
  0xda   :  { %3390 = vst [vmem:[#allocation16_spill] sm:$0xff] %v2201_v48  ;;  %v2221_v36 = vpack.c.bf16 %v2201_v48, %v2201_v48  ;;  %v2272_v48 = vpop.f32.mrf.mxu3 }
  0xdb   :  { %3394 = vst [vmem:[#allocation20_spill] sm:$0xff] %v2224_v60  ;;  %v2233_v13 = vpop.f32.mrf.mxu0 }
  0xdc   :  { %458 = vst.msk [vmem:[%s3335_s2 + $0x28] sm:$0xf] %vm447_vm2, %v2186_v22  ;;  %v854_v5 = vsel %vm113_vm1, %v2233_v13, 0.0 }
  0xdd   :  { %3396 = vst [vmem:[#allocation22_spill] sm:$0xff] %v2241_v9  ;;  %v2253_v4 = vpop.f32.mrf.mxu1  ;;  %v2264_v9 = vsel %vm1170_vm3, %v983_v33, 0.0  ;;  %v855_v53 = vadd.f32 %v854_v5, %v853_v8  ;;  %686 = vrot.lane.b32.xlu1 %v2047_v28, %s1503_s14  ;;  %592 = vrot.lane.b32.xlu2 %v2067_v34, %s1503_s14  ;;  %v2280_v33 = vsel %vm1170_vm3, %v1800_v57, 0.0  ;;  %v2288_v28 = vsel %vm1170_vm3, %v1802_v58, 0.0 }
  0xde   :  { %490 = vst.msk [vmem:[%s3335_s2 + $0xa8] sm:$0xf] %vm447_vm2, %v2221_v36  ;;  %624 = vrot.lane.b32.xlu0 %v2071_v38, %s1503_s14  ;;  %v2293_v34 = vsel %vm113_vm1, %v999_v37, 0.0  ;;  %v2296_v8 = vsel %vm1170_vm3, %v999_v37, 0.0  ;;  %v2299_v57 = vsel %vm113_vm1, %v1015_v25, 0.0  ;;  %v2302_v5 = vsel %vm1170_vm3, %v1015_v25, 0.0 }
  0xdf   :  { %3397 = vst [vmem:[#allocation23_spill] sm:$0xff] %v2272_v48  ;;  %v971_v58 = vmul.f32 %v1932_v54, %v1932_v54  ;;  %v2312_v38 = vpack.c.bf16 %v2272_v48, %v2272_v48  ;;  %v2316_v37 = vpack.c.bf16 %v2233_v13, %v2233_v13  ;;  %v2321_v25 = vsel %vm113_vm1, %v984_v44, 0.0 }
  0xe0   :  { %3398 = vst [vmem:[#allocation24_spill] sm:$0xff] %v2276_v56  ;;  %v2333_v48 = vsel %vm113_vm1, %v1839_v10, 0.0 }
  0xe1   :  { %3399 = vst [vmem:[#allocation25_spill] sm:$0xff] %v2280_v33  ;;  %v1313_v50 = vsel %vm1170_vm3, %v971_v58, 0.0 }
  0xe2   :  { %3400 = vst [vmem:[#allocation26_spill] sm:$0xff] %v2284_v39  ;;  %v2306_v39 = vsel %vm113_vm1, %v1822_v0, 0.0  ;;  %v2416_v23 = vpop.f32.mrf.mxu3 }
  0xe3   :  { %3401 = vst [vmem:[#allocation27_spill] sm:$0xff] %v2288_v28  ;;  %v2329_v28 = vpack.c.bf16 %v2253_v4, %v2253_v4 }
  0xe4   :  { %3402 = vst [vmem:[#allocation28_spill] sm:$0xff] %v2293_v34  ;;  %v972_v34 = vmul.f32 %v1965_v3, %v1965_v3  ;;  %v974_v3 = vmul.f32 %v2039_v27, %v2039_v27 }
  0xe5   :  { %3403 = vst [vmem:[#allocation29_spill] sm:$0xff] %v2296_v8  ;;  %v2340_v8 = vsel %vm1170_vm3, %v984_v44, 0.0  ;;  %v2357_v44 = vsel %vm1170_vm3, %v1841_v11, 0.0  ;;  %656 = vrot.lane.b32.xlu1 %v2084_v42, %s1503_s14  ;;  %688 = vrot.lane.b32.xlu2 %v2095_v47, %s1503_s14  ;;  %v1314_v47 = vadd.f32 %v1313_v50, %v1907_v46  ;;  %v1317_v50 = vsel %vm1170_vm3, %v973_v12, 0.0 }
  0xe6   :  { %3404 = vst [vmem:[#allocation30_spill] sm:$0xff] %v2299_v57  ;;  %v1000_v57 = vmul.f32 %v1839_v10, %v1839_v10  ;;  %v1016_v10 = vmul.f32 %v1841_v11, %v1841_v11  ;;  %v1041_v32 = vsel %vm113_vm1, %v972_v34, 0.0  ;;  %594 = vrot.lane.b32.xlu0 %v2116_v52, %s1503_s14  ;;  %v1184_v52 = vsel %vm1170_vm3, %v2006_v15, 0.0 }
  0xe7   :  { %3405 = vst [vmem:[#allocation31_spill] sm:$0xff] %v2302_v5  ;;  %v2325_v5 = vsel %vm1170_vm3, %v1822_v0, 0.0  ;;  %v2351_v0 = vsel %vm113_vm1, %v1841_v11, 0.0 }
  0xe8   :  { %3406 = vst [vmem:[#allocation32_spill] sm:$0xff] %v2333_v48  ;;  %v2361_v48 = vpop.f32.mrf.mxu0  ;;  %v2385_v60 = vsel %vm113_vm1, %v1000_v57, 0.0  ;;  %v2388_v33 = vsel %vm1170_vm3, %v1000_v57, 0.0  ;;  %v2401_v57 = vpop.f32.mrf.mxu2 }
  0xe9   :  { %506 = vst.msk [vmem:[%s3335_s2 + $0xe8] sm:$0xf] %vm447_vm2, %v2312_v38  ;;  %v856_v11 = vsel %vm113_vm1, %v2361_v48, 0.0  ;;  %v2382_v54 = vpack.c.bf16 %v2361_v48, %v2361_v48  ;;  %v2420_v42 = vpack.c.bf16 %v2401_v57, %v2401_v57 }
  0xea   :  { %3408 = vst [vmem:[#allocation34_spill] sm:$0xff] %v2351_v0  ;;  %v1039_v0 = vsel %vm113_vm1, %v971_v58, 0.0  ;;  %v857_v56 = vadd.f32 %v856_v11, %v855_v53  ;;  %v1315_v53 = vsel %vm1170_vm3, %v972_v34, 0.0  ;;  %v2428_v34 = vpack.c.bf16 %v2416_v23, %v2416_v23 }
  0xeb   :  { %3409 = vst [vmem:[#allocation35_spill] sm:$0xff] %v2357_v44  ;;  %v2373_v44 = vpop.f32.mrf.mxu1  ;;  %v1040_v41 = vadd.f32 %v1039_v0, %v1905_v45  ;;  %v1043_v45 = vsel %vm113_vm1, %v973_v12, 0.0  ;;  %v2431_v58 = vsel %vm113_vm1, %v1016_v10, 0.0  ;;  %v1183_v0 = vadd.f32 %v1182_v30, %v1181_v63 }
  0xec   :  { %459 = vst.msk [vmem:[%s3335_s2 + $0x2c] sm:$0xf] %vm447_vm2, %v2316_v37  ;;  %v2440_v46 = vpack.c.bf16 %v2373_v44, %v2373_v44  ;;  %v1316_v15 = vadd.f32 %v1315_v53, %v1314_v47  ;;  %v1186_v11 = vsel %vm1170_vm3, %v2039_v27, 0.0  ;;  %v1319_v53 = vsel %vm1170_vm3, %v974_v3, 0.0 }
  0xed   :  { %475 = vst.msk [vmem:[%s3335_s2 + $0x6c] sm:$0xf] %vm447_vm2, %v2329_v28  ;;  %v1185_v30 = vadd.f32 %v1184_v52, %v1183_v0  ;;  %v1188_v12 = vsel %vm1170_vm3, %v2086_v43, 0.0  ;;  %v976_v27 = vmul.f32 %v2135_v62, %v2135_v62  ;;  %626 = vrot.lane.b32.xlu1 %v2120_v55, %s1503_s14  ;;  %658 = vrot.lane.b32.xlu2 %v2133_v61, %s1503_s14 }
  0xee   :  { %3410 = vst [vmem:[#allocation36_spill] sm:$0xff] %v2385_v60  ;;  %v641_v60 = vpop.permute.xlu2 %640  ;;  %v1318_v0 = vadd.f32 %v1317_v50, %v1316_v15  ;;  %690 = vrot.lane.b32.xlu0 %v2144_v2, %s1503_s14  ;;  %v1190_v50 = vsel %vm1170_vm3, %v2135_v62, 0.0 }
  0xef   :  { %3411 = vst [vmem:[#allocation37_spill] sm:$0xff] %v2388_v33  ;;  %v977_v33 = vmul.f32 %v2233_v13, %v2233_v13  ;;  %v1049_v2 = vsel %vm113_vm1, %v976_v27, 0.0 }
  0xf0   :  { %3412 = vst [vmem:[#allocation38_spill] sm:$0xff] %v2401_v57  ;;  %v255_v47 = vpop.f32.mrf.mxu0  ;;  %v1320_v61 = vadd.f32 %v1319_v53, %v1318_v0 }
  0xf1   :  { %460 = vst.msk [vmem:[%s3335_s2 + $0x30] sm:$0xf] %vm447_vm2, %v2382_v54 }
  0xf2   :  { %801 = vst.msk [vmem:[%s3336_s3 + $0x80] sm:$0xf] %vm768_vm4, %v641_v60  ;;  %v1042_v60 = vadd.f32 %v1041_v32, %v1040_v41  ;;  %v975_v32 = vmul.f32 %v2086_v43, %v2086_v43  ;;  %v1045_v41 = vsel %vm113_vm1, %v974_v3, 0.0  ;;  %v2469_v3 = vsel %vm1170_vm3, %v1016_v10, 0.0  ;;  %v2481_v10 = vpop.f32.mrf.mxu2 }
  0xf3   :  { %3413 = vst [vmem:[#allocation39_spill] sm:$0xff] %v2416_v23  ;;  %v2464_v52 = vpop.f32.mrf.mxu1  ;;  %v1187_v23 = vadd.f32 %v1186_v11, %v1185_v30  ;;  %v1323_v11 = vsel %vm1170_vm3, %v976_v27, 0.0  ;;  %v2502_v30 = vpop.f32.mrf.mxu3  ;;  %v1192_v27 = vsel %vm1170_vm3, %v2233_v13, 0.0 }
  0xf4   :  { %3414 = vst [vmem:[#allocation40_spill] sm:$0xff] %v2431_v58  ;;  %v1044_v63 = vadd.f32 %v1043_v45, %v1042_v60  ;;  %v858_v45 = vsel %vm113_vm1, %v255_v47, 0.0  ;;  %v2466_v60 = vpack.c.bf16 %v255_v47, %v255_v47  ;;  %v1047_v43 = vsel %vm113_vm1, %v975_v32, 0.0 }
  0xf5   :  { %491 = vst.msk [vmem:[%s3335_s2 + $0xac] sm:$0xf] %vm447_vm2, %v2420_v42  ;;  %v859_v58 = vadd.f32 %v858_v45, %v857_v56  ;;  %v1321_v57 = vsel %vm1170_vm3, %v975_v32, 0.0  ;;  %v2485_v56 = vpack.c.bf16 %v2464_v52, %v2464_v52  ;;  %v1189_v15 = vadd.f32 %v1188_v12, %v1187_v23  ;;  %628 = vrot.lane.b32.xlu2 %v2182_v21, %s1503_s14 }
  0xf6   :  { %507 = vst.msk [vmem:[%s3335_s2 + $0xec] sm:$0xf] %vm447_vm2, %v2428_v34  ;;  %v611_v51 = vpop.permute.xlu2 %610  ;;  %v1046_v55 = vadd.f32 %v1045_v41, %v1044_v63  ;;  %v978_v32 = vmul.f32 %v2361_v48, %v2361_v48  ;;  %v2506_v23 = vpack.c.bf16 %v2481_v10, %v2481_v10  ;;  %v1322_v63 = vadd.f32 %v1321_v57, %v1320_v61 }
  0xf7   :  { %476 = vst.msk [vmem:[%s3335_s2 + $0x70] sm:$0xf] %vm447_vm2, %v2440_v46  ;;  %v2517_v41 = vpack.c.bf16 %v2502_v30, %v2502_v30  ;;  %v1191_v53 = vadd.f32 %v1190_v50, %v1189_v15  ;;  %v1051_v12 = vsel %vm113_vm1, %v977_v33, 0.0  ;;  %v979_v45 = vmul.f32 %v255_v47, %v255_v47  ;;  %596 = vrot.lane.b32.xlu1 %v2186_v22, %s1503_s14 }
  0xf8   :  { %3415 = vst [vmem:[#allocation41_spill] sm:$0xff] %v2469_v3  ;;  %v1048_v62 = vadd.f32 %v1047_v43, %v1046_v55  ;;  %v1324_v43 = vadd.f32 %v1323_v11, %v1322_v63  ;;  %v1325_v57 = vsel %vm1170_vm3, %v977_v33, 0.0  ;;  %v1194_v55 = vsel %vm1170_vm3, %v2361_v48, 0.0  ;;  %v258_v61 = vpop.f32.mrf.mxu0  ;;  %660 = vrot.lane.b32.xlu0 %v2221_v36, %s1503_s14 }
  0xf9   :  { %3416 = vst [vmem:[#allocation42_spill] sm:$0xff] %v2481_v10  ;;  %v1053_v13 = vsel %vm113_vm1, %v978_v32, 0.0  ;;  %v860_v15 = vsel %vm113_vm1, %v258_v61, 0.0  ;;  %v980_v50 = vmul.f32 %v258_v61, %v258_v61  ;;  %v2541_v33 = vsel %vm113_vm1, %v1856_v17, 0.0 }
  0xfa   :  { %461 = vst.msk [vmem:[%s3335_s2 + $0x34] sm:$0xf] %vm447_vm2, %v2466_v60  ;;  %v1050_v0 = vadd.f32 %v1049_v2, %v1048_v62  ;;  %v1193_v48 = vadd.f32 %v1192_v27, %v1191_v53  ;;  %v861_v11 = vadd.f32 %v860_v15, %v859_v58  ;;  %v2549_v62 = vsel %vm1170_vm3, %v1856_v17, 0.0  ;;  %v577_v27 = vpop.permute.xlu0 %576 }
  0xfb   :  { %786 = vst.msk [vmem:[%s3336_s3 + $0x44] sm:$0xf] %vm768_vm4, %v611_v51  ;;  %v985_v51 = vmul.f32 %v1856_v17, %v1856_v17  ;;  %v1327_v63 = vsel %vm1170_vm3, %v978_v32, 0.0  ;;  %v1055_v3 = vsel %vm113_vm1, %v979_v45, 0.0  ;;  %v1196_v10 = vsel %vm1170_vm3, %v255_v47, 0.0 }
  0xfc   :  { %3417 = vst [vmem:[#allocation43_spill] sm:$0xff] %v2502_v30  ;;  %v2537_v30 = vpack.c.bf16 %v258_v61, %v258_v61  ;;  %v1052_v2 = vadd.f32 %v1051_v12, %v1050_v0  ;;  %v1326_v17 = vadd.f32 %v1325_v57, %v1324_v43  ;;  %v1195_v58 = vadd.f32 %v1194_v55, %v1193_v48  ;;  %v2582_v55 = vpop.f32.mrf.mxu1 }
  0xfd   :  { %477 = vst.msk [vmem:[%s3335_s2 + $0x74] sm:$0xf] %vm447_vm2, %v2485_v56  ;;  %v2562_v21 = vsel %vm113_vm1, %v985_v51, 0.0  ;;  %v2565_v53 = vsel %vm1170_vm3, %v985_v51, 0.0  ;;  %v1329_v47 = vsel %vm1170_vm3, %v979_v45, 0.0  ;;  %v1057_v36 = vsel %vm113_vm1, %v980_v50, 0.0  ;;  %v609_v45 = vpop.permute.xlu1 %608  ;;  %598 = vrot.lane.b32.xlu2 %v2316_v37, %s1503_s14 }
  0xfe   :  { %492 = vst.msk [vmem:[%s3335_s2 + $0xb0] sm:$0xf] %vm447_vm2, %v2506_v23  ;;  %v1054_v22 = vadd.f32 %v1053_v13, %v1052_v2  ;;  %v677_v32 = vpop.permute.xlu2 %676  ;;  %v1198_v12 = vsel %vm1170_vm3, %v258_v61, 0.0  ;;  %v2576_v0 = vsel %vm113_vm1, %v1868_v26, 0.0  ;;  %v1328_v43 = vadd.f32 %v1327_v63, %v1326_v17 }
  0xff   :  { %508 = vst.msk [vmem:[%s3335_s2 + $0xf0] sm:$0xf] %vm447_vm2, %v2517_v41  ;;  %v1197_v51 = vadd.f32 %v1196_v10, %v1195_v58  ;;  %v2586_v61 = vmul.f32 %v1868_v26, %v1868_v26  ;;  %v2590_v13 = vsel %vm1170_vm3, %v1868_v26, 0.0  ;;  %v1331_v10 = vsel %vm1170_vm3, %v980_v50, 0.0  ;;  %692 = vrot.lane.b32.xlu1 %v2312_v38, %s1503_s14 }
 0x100   :  { %462 = vst.msk [vmem:[%s3335_s2 + $0x38] sm:$0xf] %vm447_vm2, %v2537_v30  ;;  %v1056_v57 = vadd.f32 %v1055_v3, %v1054_v22  ;;  %v2594_v3 = vmul.f32 %v1874_v29, %v1874_v29  ;;  %v986_v15 = vmul.f32 %v1891_v35, %v1891_v35  ;;  %v1330_v2 = vadd.f32 %v1329_v47, %v1328_v43  ;;  %v260_v48 = vpop.f32.mrf.mxu0 }
 0x101   :  { %819 = vst.msk [vmem:[%s3336_s3 + $0xc8] sm:$0xf] %vm768_vm4, %v677_v32  ;;  %v1199_v17 = vadd.f32 %v1198_v12, %v1197_v51  ;;  %v2603_v26 = vpack.c.bf16 %v260_v48, %v260_v48  ;;  %v862_v22 = vsel %vm113_vm1, %v260_v48, 0.0  ;;  %v981_v58 = vmul.f32 %v260_v48, %v260_v48  ;;  %630 = vrot.lane.b32.xlu0 %v2329_v28, %s1503_s14 }
 0x102   :  { %769 = vst.msk [vmem:[%s3336_s3] sm:$0xf] %vm768_vm4, %v577_v27  ;;  %v1058_v63 = vadd.f32 %v1057_v36, %v1056_v57  ;;  %v1200_v32 = vsel %vm1170_vm3, %v260_v48, 0.0  ;;  %v2609_v50 = vsel %vm113_vm1, %v1874_v29, 0.0  ;;  %v863_v27 = vadd.f32 %v862_v22, %v861_v11 }
 0x103   :  { %3418 = vst [vmem:[#allocation44_spill] sm:$0xff] %v2594_v3  ;;  %v1332_v3 = vadd.f32 %v1331_v10, %v1330_v2  ;;  %v872_v47 = vsel %vm113_vm1, %v1891_v35, 0.0  ;;  %v987_v36 = vmul.f32 %v1942_v59, %v1942_v59  ;;  %v1059_v11 = vsel %vm113_vm1, %v981_v58, 0.0  ;;  %v2630_v10 = vpop.f32.mrf.mxu2 }
 0x104   :  { %785 = vst.msk [vmem:[%s3336_s3 + $0x40] sm:$0xf] %vm768_vm4, %v609_v45  ;;  %v1201_v45 = vadd.f32 %v1200_v32, %v1199_v17  ;;  %v1333_v12 = vsel %vm1170_vm3, %v981_v58, 0.0  ;;  %v865_v38 = vadd.f32 %v2169_v14, %v863_v27  ;;  %v1060_v37 = vadd.f32 %v1059_v11, %v1058_v63  ;;  %v673_v14 = vpop.permute.xlu0 %672  ;;  %v2660_v27 = vpop.f32.mrf.mxu1 }
 0x105   :  { %463 = vst.msk [vmem:[%s3335_s2 + $0x3c] sm:$0xf] %vm447_vm2, %v2603_v26  ;;  %v1334_v57 = vadd.f32 %v1333_v12, %v1332_v3  ;;  %v1069_v2 = vsel %vm113_vm1, %v986_v15, 0.0  ;;  %v1210_v48 = vsel %vm1170_vm3, %v1891_v35, 0.0  ;;  %v1343_v17 = vsel %vm1170_vm3, %v986_v15, 0.0  ;;  %694 = vrot.lane.b32.xlu2 %v2428_v34, %s1503_s14 }
 0x106   :  { %v1203_v43 = vadd.f32 %v2178_v20, %v1201_v45  ;;  %v647_v51 = vpop.permute.xlu2 %646  ;;  %v988_v22 = vmul.f32 %v1979_v6, %v1979_v6  ;;  %v867_v20 = vadd.f32 %v2245_v40, %v865_v38  ;;  %v1062_v28 = vadd.f32 %v2174_v18, %v1060_v37  ;;  %817 = vst.msk [vmem:[%s3336_s3 + $0xc0] sm:$0xf] %vm768_vm4, %v673_v14 }
 0x107   :  { %804 = vst.msk [vmem:[%s3336_s3 + $0x8c] sm:$0xf] %vm768_vm4, %v647_v51  ;;  %v1336_v63 = vadd.f32 %v2189_v24, %v1334_v57  ;;  %v874_v35 = vsel %vm113_vm1, %v1942_v59, 0.0  ;;  %v1071_v15 = vsel %vm113_vm1, %v987_v36, 0.0  ;;  %v1212_v58 = vsel %vm1170_vm3, %v1942_v59, 0.0  ;;  %662 = vrot.lane.b32.xlu1 %v2420_v42, %s1503_s14  ;;  %v675_v37 = vpop.permute.xlu1 %674 }
 0x108   :  { %v1205_v3 = vadd.f32 %v2249_v1, %v1203_v43  ;;  %v1345_v40 = vsel %vm1170_vm3, %v987_v36, 0.0  ;;  %v869_v18 = vadd.f32 %v2306_v39, %v867_v20  ;;  %v1064_v1 = vadd.f32 %v2261_v16, %v1062_v28  ;;  %818 = vst.msk [vmem:[%s3336_s3 + $0xc4] sm:$0xf] %vm768_vm4, %v675_v37 }
 0x109   :  { %v1338_v32 = vadd.f32 %v2264_v9, %v1336_v63  ;;  %v876_v45 = vsel %vm113_vm1, %v1979_v6, 0.0  ;;  %v1073_v11 = vsel %vm113_vm1, %v988_v22, 0.0  ;;  %v1214_v59 = vsel %vm1170_vm3, %v1979_v6, 0.0  ;;  %600 = vrot.lane.b32.xlu0 %v2382_v54, %s1503_s14 }
 0x10a   :  { %v1207_v24 = vadd.f32 %v2325_v5, %v1205_v3  ;;  %v989_v36 = vmul.f32 %v2016_v19, %v2016_v19  ;;  %v871_v39 = vadd.f32 %v2541_v33, %v869_v18  ;;  %v1066_v16 = vadd.f32 %v2321_v25, %v1064_v1 }
 0x10b   :  { %v1340_v9 = vadd.f32 %v2340_v8, %v1338_v32  ;;  %v1347_v12 = vsel %vm1170_vm3, %v988_v22, 0.0  ;;  %v878_v38 = vsel %vm113_vm1, %v2016_v19, 0.0  ;;  %v1216_v6 = vsel %vm1170_vm3, %v2016_v19, 0.0  ;;  %v2704_v22 = vpop.f32.mrf.mxu2 }
 0x10c   :  { %v1209_v5 = vadd.f32 %v2549_v62, %v1207_v24  ;;  %v2686_v8 = vpack.c.bf16 %v2660_v27, %v2660_v27  ;;  %v873_v25 = vadd.f32 %v872_v47, %v871_v39  ;;  %v1068_v42 = vadd.f32 %v2562_v21, %v1066_v16  ;;  %v579_v21 = vpop.permute.xlu0 %578 }
 0x10d   :  { %v1342_v62 = vadd.f32 %v2565_v53, %v1340_v9  ;;  %v1075_v19 = vsel %vm113_vm1, %v989_v36, 0.0  ;;  %v1349_v57 = vsel %vm1170_vm3, %v989_v36, 0.0  ;;  %v880_v34 = vsel %vm113_vm1, %v2055_v31, 0.0  ;;  %770 = vst.msk [vmem:[%s3336_s3 + $0x4] sm:$0xf] %vm768_vm4, %v579_v21  ;;  %664 = vrot.lane.b32.xlu2 %v2506_v23, %s1503_s14 }
 0x10e   :  { %v1211_v33 = vadd.f32 %v1210_v48, %v1209_v5  ;;  %v585_v43 = vpop.permute.xlu2 %584  ;;  %v990_v54 = vmul.f32 %v2055_v31, %v2055_v31  ;;  %v875_v47 = vadd.f32 %v874_v35, %v873_v25  ;;  %v1070_v53 = vadd.f32 %v1069_v2, %v1068_v42  ;;  %479 = vst.msk [vmem:[%s3335_s2 + $0x7c] sm:$0xf] %vm447_vm2, %v2686_v8 }
 0x10f   :  { %v1344_v48 = vadd.f32 %v1343_v17, %v1342_v62  ;;  %773 = vst.msk [vmem:[%s3336_s3 + $0x10] sm:$0xf] %vm768_vm4, %v585_v43  ;;  %v1218_v14 = vsel %vm1170_vm3, %v2055_v31, 0.0  ;;  %v991_v20 = vmul.f32 %v2099_v49, %v2099_v49  ;;  %v2716_v2 = vpack.c.bf16 %v2630_v10, %v2630_v10  ;;  %632 = vrot.lane.b32.xlu1 %v2440_v46, %s1503_s14  ;;  %v581_v9 = vpop.permute.xlu1 %580 }
 0x110   :  { %v1213_v51 = vadd.f32 %v1212_v58, %v1211_v33  ;;  %v2720_v17 = vpack.c.bf16 %v2582_v55, %v2582_v55  ;;  %v877_v28 = vadd.f32 %v876_v45, %v875_v47  ;;  %v1072_v3 = vadd.f32 %v1071_v15, %v1070_v53  ;;  %771 = vst.msk [vmem:[%s3336_s3 + $0x8] sm:$0xf] %vm768_vm4, %v581_v9 }
 0x111   :  { %v1346_v31 = vadd.f32 %v1345_v40, %v1344_v48  ;;  %v1077_v35 = vsel %vm113_vm1, %v990_v54, 0.0  ;;  %v1351_v58 = vsel %vm1170_vm3, %v990_v54, 0.0  ;;  %v992_v18 = vmul.f32 %v2150_v7, %v2150_v7  ;;  %493 = vst.msk [vmem:[%s3335_s2 + $0xb4] sm:$0xf] %vm447_vm2, %v2716_v2  ;;  %696 = vrot.lane.b32.xlu0 %v2517_v41, %s1503_s14 }
 0x112   :  { %v1215_v63 = vadd.f32 %v1214_v59, %v1213_v51  ;;  %v2738_v15 = vpack.c.bf16 %v2704_v22, %v2704_v22  ;;  %v1074_v40 = vadd.f32 %v1073_v11, %v1072_v3  ;;  %v879_v24 = vadd.f32 %v878_v38, %v877_v28  ;;  %478 = vst.msk [vmem:[%s3335_s2 + $0x78] sm:$0xf] %vm447_vm2, %v2720_v17 }
 0x113   :  { %v1348_v1 = vadd.f32 %v1347_v12, %v1346_v31  ;;  %v882_v45 = vsel %vm113_vm1, %v2099_v49, 0.0  ;;  %v1079_v59 = vsel %vm113_vm1, %v991_v20, 0.0  ;;  %v1220_v36 = vsel %vm1170_vm3, %v2099_v49, 0.0 }
 0x114   :  { %v1217_v32 = vadd.f32 %v1216_v6, %v1215_v63  ;;  %v1353_v39 = vsel %vm1170_vm3, %v991_v20, 0.0  ;;  %494 = vst.msk [vmem:[%s3335_s2 + $0xb8] sm:$0xf] %vm447_vm2, %v2738_v15  ;;  %v881_v46 = vadd.f32 %v880_v34, %v879_v24  ;;  %v1076_v11 = vadd.f32 %v1075_v19, %v1074_v40  ;;  %v643_v6 = vpop.permute.xlu0 %642 }
 0x115   :  { %v1350_v5 = vadd.f32 %v1349_v57, %v1348_v1  ;;  %v884_v23 = vsel %vm113_vm1, %v2150_v7, 0.0  ;;  %v1081_v41 = vsel %vm113_vm1, %v992_v18, 0.0  ;;  %v1222_v12 = vsel %vm1170_vm3, %v2150_v7, 0.0  ;;  %802 = vst.msk [vmem:[%s3336_s3 + $0x84] sm:$0xf] %vm768_vm4, %v643_v6  ;;  %v2788_v57 = vpop.f32.mrf.mxu2  ;;  %634 = vrot.lane.b32.xlu2 %v2485_v56, %s1503_s14 }
 0x116   :  { %v1219_v16 = vadd.f32 %v1218_v14, %v1217_v32  ;;  %v617_v49 = vpop.permute.xlu2 %616  ;;  %v993_v38 = vmul.f32 %v2253_v4, %v2253_v4  ;;  %v883_v25 = vadd.f32 %v882_v45, %v881_v46  ;;  %v1078_v42 = vadd.f32 %v1077_v35, %v1076_v11 }
 0x117   :  { %v1352_v62 = vadd.f32 %v1351_v58, %v1350_v5  ;;  %789 = vst.msk [vmem:[%s3336_s3 + $0x50] sm:$0xf] %vm768_vm4, %v617_v49  ;;  %v1355_v7 = vsel %vm1170_vm3, %v992_v18, 0.0  ;;  %v886_v37 = vsel %vm113_vm1, %v2253_v4, 0.0  ;;  %v1224_v43 = vsel %vm1170_vm3, %v2253_v4, 0.0  ;;  %602 = vrot.lane.b32.xlu1 %v2466_v60, %s1503_s14  ;;  %v645_v24 = vpop.permute.xlu1 %644 }
 0x118   :  { %v1221_v33 = vadd.f32 %v1220_v36, %v1219_v16  ;;  %v994_v19 = vmul.f32 %v2373_v44, %v2373_v44  ;;  %v885_v34 = vadd.f32 %v884_v23, %v883_v25  ;;  %v1080_v54 = vadd.f32 %v1079_v59, %v1078_v42  ;;  %803 = vst.msk [vmem:[%s3336_s3 + $0x88] sm:$0xf] %vm768_vm4, %v645_v24 }
 0x119   :  { %v1354_v47 = vadd.f32 %v1353_v39, %v1352_v62  ;;  %v1083_v53 = vsel %vm113_vm1, %v993_v38, 0.0  ;;  %v1357_v51 = vsel %vm1170_vm3, %v993_v38, 0.0  ;;  %v995_v4 = vmul.f32 %v2464_v52, %v2464_v52  ;;  %666 = vrot.lane.b32.xlu0 %v2716_v2, %s1503_s14 }
 0x11a   :  { %v1223_v21 = vadd.f32 %v1222_v12, %v1221_v33  ;;  %v2796_v48 = vpack.c.bf16 %v2788_v57, %v2788_v57  ;;  %v887_v14 = vadd.f32 %v886_v37, %v885_v34  ;;  %v1082_v20 = vadd.f32 %v1081_v41, %v1080_v54 }
 0x11b   :  { %v1356_v3 = vadd.f32 %v1355_v7, %v1354_v47  ;;  %v888_v63 = vsel %vm113_vm1, %v2373_v44, 0.0  ;;  %v1085_v31 = vsel %vm113_vm1, %v994_v19, 0.0  ;;  %v1226_v35 = vsel %vm1170_vm3, %v2373_v44, 0.0 }
 0x11c   :  { %v1225_v28 = vadd.f32 %v1224_v43, %v1223_v21  ;;  %v1359_v58 = vsel %vm1170_vm3, %v994_v19, 0.0  ;;  %495 = vst.msk [vmem:[%s3335_s2 + $0xbc] sm:$0xf] %vm447_vm2, %v2796_v48  ;;  %v889_v60 = vadd.f32 %v888_v63, %v887_v14  ;;  %v1084_v18 = vadd.f32 %v1083_v53, %v1082_v20  ;;  %v613_v59 = vpop.permute.xlu0 %612  ;;  %v3419_v43 = vld [vmem:[#allocation2_spill] sm:$0xff] }
 0x11d   :  { %v1358_v1 = vadd.f32 %v1357_v51, %v1356_v3  ;;  %v890_v32 = vsel %vm113_vm1, %v2464_v52, 0.0  ;;  %v1087_v56 = vsel %vm113_vm1, %v995_v4, 0.0  ;;  %v1228_v2 = vsel %vm1170_vm3, %v2464_v52, 0.0  ;;  %787 = vst.msk [vmem:[%s3336_s3 + $0x48] sm:$0xf] %vm768_vm4, %v613_v59  ;;  %604 = vrot.lane.b32.xlu2 %v2537_v30, %s1503_s14  ;;  %v3422_v3 = vld [vmem:[#allocation4_spill] sm:$0xff] }
 0x11e   :  { %v1227_v40 = vadd.f32 %v1226_v35, %v1225_v28  ;;  %v587_v44 = vpop.permute.xlu2 %586  ;;  %v996_v45 = vmul.f32 %v2582_v55, %v2582_v55  ;;  %v1086_v36 = vadd.f32 %v1085_v31, %v1084_v18  ;;  %v891_v46 = vadd.f32 %v890_v32, %v889_v60  ;;  %v3423_v31 = vld [vmem:[#allocation24_spill] sm:$0xff] }
 0x11f   :  { %v1360_v39 = vadd.f32 %v1359_v58, %v1358_v1  ;;  %774 = vst.msk [vmem:[%s3336_s3 + $0x14] sm:$0xf] %vm768_vm4, %v587_v44  ;;  %v1361_v52 = vsel %vm1170_vm3, %v995_v4, 0.0  ;;  %v892_v16 = vsel %vm113_vm1, %v2582_v55, 0.0  ;;  %v1230_v5 = vsel %vm1170_vm3, %v2582_v55, 0.0  ;;  %668 = vrot.lane.b32.xlu1 %v2738_v15, %s1503_s14  ;;  %v3421_v15 = vld [vmem:[#allocation15_spill] sm:$0xff]  ;;  %v583_v4 = vpop.permute.xlu1 %582 }
 0x120   :  { %v1229_v11 = vadd.f32 %v1228_v2, %v1227_v40  ;;  %v997_v9 = vmul.f32 %v2660_v27, %v2660_v27  ;;  %v1088_v49 = vadd.f32 %v1087_v56, %v1086_v36  ;;  %v893_v41 = vadd.f32 %v892_v16, %v891_v46  ;;  %772 = vst.msk [vmem:[%s3336_s3 + $0xc] sm:$0xf] %vm768_vm4, %v583_v4  ;;  %v3424_v58 = vld [vmem:[#allocation17_spill] sm:$0xff]  ;;  %v3426_v40 = vld [vmem:[#allocation20_spill] sm:$0xff]  ;;  %v3427_v56 = vld [vmem:[#allocation6_spill] sm:$0xff] }
 0x121   :  { %v1362_v23 = vadd.f32 %v1361_v52, %v1360_v39  ;;  %v1089_v38 = vsel %vm113_vm1, %v996_v45, 0.0  ;;  %v1363_v6 = vsel %vm1170_vm3, %v996_v45, 0.0  ;;  %v894_v25 = vsel %vm113_vm1, %v2660_v27, 0.0  ;;  %636 = vrot.lane.b32.xlu0 %v2720_v17, %s1503_s14  ;;  %v3428_v45 = vld [vmem:[#allocation32_spill] sm:$0xff]  ;;  %v3430_v46 = vld [vmem:[#allocation33_spill] sm:$0xff] }
 0x122   :  { %v1231_v12 = vadd.f32 %v1230_v5, %v1229_v11  ;;  %v1232_v55 = vsel %vm1170_vm3, %v2660_v27, 0.0  ;;  %v895_v42 = vadd.f32 %v894_v25, %v893_v41  ;;  %v1090_v33 = vadd.f32 %v1089_v38, %v1088_v49  ;;  %v3420_v27 = vld [vmem:[#allocation14_spill] sm:$0xff]  ;;  %v3429_v36 = vld [vmem:[#allocation28_spill] sm:$0xff]  ;;  %v3431_v52 = vld [vmem:[#allocation29_spill] sm:$0xff] }
 0x123   :  { %v1364_v7 = vadd.f32 %v1363_v6, %v1362_v23  ;;  %v1099_v37 = vsel %vm113_vm1, %v2586_v61, 0.0  ;;  %v1002_v19 = vmul.f32 %v3419_v43, %v3419_v43  ;;  %v1091_v34 = vsel %vm113_vm1, %v997_v9, 0.0  ;;  %v3432_v23 = vld [vmem:[#allocation8_spill] sm:$0xff] }
 0x124   :  { %v1233_v62 = vadd.f32 %v1232_v55, %v1231_v12  ;;  %v1365_v54 = vsel %vm1170_vm3, %v997_v9, 0.0  ;;  %v897_v21 = vadd.f32 %v3420_v27, %v895_v42  ;;  %v1092_v47 = vadd.f32 %v1091_v34, %v1090_v33  ;;  %v679_v63 = vpop.permute.xlu0 %678  ;;  %v3433_v38 = vld [vmem:[#allocation36_spill] sm:$0xff]  ;;  %v3434_v55 = vld [vmem:[#allocation37_spill] sm:$0xff] }
 0x125   :  { %v1366_v51 = vadd.f32 %v1365_v54, %v1364_v7  ;;  %v1373_v20 = vsel %vm1170_vm3, %v2586_v61, 0.0  ;;  %v904_v28 = vsel %vm113_vm1, %v3419_v43, 0.0  ;;  %v1242_v30 = vsel %vm1170_vm3, %v3419_v43, 0.0  ;;  %v3425_v61 = vld [vmem:[#allocation25_spill] sm:$0xff]  ;;  %820 = vst.msk [vmem:[%s3336_s3 + $0xcc] sm:$0xf] %vm768_vm4, %v679_v63  ;;  %670 = vrot.lane.b32.xlu2 %v2796_v48, %s1503_s14 }
 0x126   :  { %v1235_v53 = vadd.f32 %v3421_v15, %v1233_v62  ;;  %v683_v14 = vpop.permute.xlu2 %682  ;;  %v1003_v17 = vmul.f32 %v3422_v3, %v3422_v3  ;;  %v899_v35 = vadd.f32 %v3423_v31, %v897_v21  ;;  %v1094_v60 = vadd.f32 %v3424_v58, %v1092_v47  ;;  %v3435_v15 = vld [vmem:[#allocation10_spill] sm:$0xff] }
 0x127   :  { %v1368_v1 = vadd.f32 %v3426_v40, %v1366_v51  ;;  %822 = vst.msk [vmem:[%s3336_s3 + $0xd4] sm:$0xf] %vm768_vm4, %v683_v14  ;;  %v1101_v24 = vsel %vm113_vm1, %v1002_v19, 0.0  ;;  %v1375_v44 = vsel %vm1170_vm3, %v1002_v19, 0.0  ;;  %v906_v32 = vsel %vm113_vm1, %v3422_v3, 0.0  ;;  %638 = vrot.lane.b32.xlu1 %v2686_v8, %s1503_s14  ;;  %v615_v34 = vpop.permute.xlu1 %614  ;;  %v3437_v40 = vld [vmem:[#allocation16_spill] sm:$0xff] }
 0x128   :  { %v1237_v18 = vadd.f32 %v3425_v61, %v1235_v53  ;;  %v1004_v2 = vmul.f32 %v3427_v56, %v3427_v56  ;;  %v901_v59 = vadd.f32 %v3428_v45, %v899_v35  ;;  %v1096_v39 = vadd.f32 %v3429_v36, %v1094_v60  ;;  %788 = vst.msk [vmem:[%s3336_s3 + $0x4c] sm:$0xf] %vm768_vm4, %v615_v34 }
 0x129   :  { %v1370_v16 = vadd.f32 %v3431_v52, %v1368_v1  ;;  %v1103_v5 = vsel %vm113_vm1, %v1003_v17, 0.0  ;;  %v1244_v9 = vsel %vm1170_vm3, %v3422_v3, 0.0  ;;  %v1377_v49 = vsel %vm1170_vm3, %v1003_v17, 0.0  ;;  %606 = vrot.lane.b32.xlu0 %v2603_v26, %s1503_s14 }
 0x12a   :  { %v1239_v11 = vadd.f32 %v3430_v46, %v1237_v18  ;;  %v1005_v41 = vmul.f32 %v3432_v23, %v3432_v23  ;;  %v903_v12 = vadd.f32 %v2576_v0, %v901_v59  ;;  %v1098_v6 = vadd.f32 %v3433_v38, %v1096_v39 }
 0x12b   :  { %v1372_v42 = vadd.f32 %v3434_v55, %v1370_v16  ;;  %v908_v33 = vsel %vm113_vm1, %v3427_v56, 0.0  ;;  %v1105_v62 = vsel %vm113_vm1, %v1004_v2, 0.0  ;;  %v1246_v7 = vsel %vm1170_vm3, %v3427_v56, 0.0 }
 0x12c   :  { %v1241_v25 = vadd.f32 %v2590_v13, %v1239_v11  ;;  %v1379_v43 = vsel %vm1170_vm3, %v1004_v2, 0.0  ;;  %v905_v0 = vadd.f32 %v904_v28, %v903_v12  ;;  %v1100_v13 = vadd.f32 %v1099_v37, %v1098_v6  ;;  %v649_v48 = vpop.permute.xlu0 %648  ;;  %v2928_v37 = vpop.f32.mrf.mxu3 }
 0x12d   :  { %v1374_v8 = vadd.f32 %v1373_v20, %v1372_v42  ;;  %v910_v27 = vsel %vm113_vm1, %v3432_v23, 0.0  ;;  %v1107_v21 = vsel %vm113_vm1, %v1005_v41, 0.0  ;;  %v1248_v47 = vsel %vm1170_vm3, %v3432_v23, 0.0  ;;  %805 = vst.msk [vmem:[%s3336_s3 + $0x90] sm:$0xf] %vm768_vm4, %v649_v48 }
 0x12e   :  { %v1243_v19 = vadd.f32 %v1242_v30, %v1241_v25  ;;  %v653_v54 = vpop.permute.xlu2 %652  ;;  %v1006_v26 = vmul.f32 %v3435_v15, %v3435_v15  ;;  %v907_v53 = vadd.f32 %v906_v32, %v905_v0  ;;  %v1102_v51 = vadd.f32 %v1101_v24, %v1100_v13  ;;  %v3436_v30 = vld [vmem:[#allocation12_spill] sm:$0xff]  ;;  %v3439_v0 = vld [vmem:[#allocation42_spill] sm:$0xff] }
 0x12f   :  { %v1376_v14 = vadd.f32 %v1375_v44, %v1374_v8  ;;  %807 = vst.msk [vmem:[%s3336_s3 + $0x98] sm:$0xf] %vm768_vm4, %v653_v54  ;;  %v1381_v20 = vsel %vm1170_vm3, %v1005_v41, 0.0  ;;  %v912_v28 = vsel %vm113_vm1, %v3435_v15, 0.0  ;;  %v1007_v3 = vmul.f32 %v3436_v30, %v3436_v30  ;;  %v681_v39 = vpop.permute.xlu1 %680  ;;  %v3438_v41 = vld [vmem:[#allocation38_spill] sm:$0xff] }
 0x130   :  { %v1245_v4 = vadd.f32 %v1244_v9, %v1243_v19  ;;  %v2945_v17 = vpack.c.bf16 %v2928_v37, %v2928_v37  ;;  %v909_v63 = vadd.f32 %v908_v33, %v907_v53  ;;  %v1104_v31 = vadd.f32 %v1103_v5, %v1102_v51  ;;  %821 = vst.msk [vmem:[%s3336_s3 + $0xd0] sm:$0xf] %vm768_vm4, %v681_v39 }
 0x131   :  { %v1378_v58 = vadd.f32 %v1377_v49, %v1376_v14  ;;  %v1109_v60 = vsel %vm113_vm1, %v1006_v26, 0.0  ;;  %v1250_v61 = vsel %vm1170_vm3, %v3435_v15, 0.0  ;;  %v1383_v18 = vsel %vm1170_vm3, %v1006_v26, 0.0 }
 0x132   :  { %v1247_v35 = vadd.f32 %v1246_v7, %v1245_v4  ;;  %v1008_v1 = vmul.f32 %v3437_v40, %v3437_v40  ;;  %509 = vst.msk [vmem:[%s3335_s2 + $0xf4] sm:$0xf] %vm447_vm2, %v2945_v17  ;;  %v1106_v24 = vadd.f32 %v1105_v62, %v1104_v31  ;;  %v911_v32 = vadd.f32 %v910_v27, %v909_v63 }
 0x133   :  { %v1380_v44 = vadd.f32 %v1379_v43, %v1378_v58  ;;  %v914_v2 = vsel %vm113_vm1, %v3436_v30, 0.0  ;;  %v1111_v45 = vsel %vm113_vm1, %v1007_v3, 0.0  ;;  %v1252_v59 = vsel %vm1170_vm3, %v3436_v30, 0.0 }
 0x134   :  { %v1249_v56 = vadd.f32 %v1248_v47, %v1247_v35  ;;  %v1385_v36 = vsel %vm1170_vm3, %v1007_v3, 0.0  ;;  %v913_v11 = vadd.f32 %v912_v28, %v911_v32  ;;  %v1108_v52 = vadd.f32 %v1107_v21, %v1106_v24  ;;  %v619_v38 = vpop.permute.xlu0 %618  ;;  %v2975_v6 = vpop.f32.mrf.mxu3 }
 0x135   :  { %v1382_v5 = vadd.f32 %v1381_v20, %v1380_v44  ;;  %v916_v9 = vsel %vm113_vm1, %v3437_v40, 0.0  ;;  %v1113_v49 = vsel %vm113_vm1, %v1008_v1, 0.0  ;;  %v1254_v23 = vsel %vm1170_vm3, %v3437_v40, 0.0  ;;  %790 = vst.msk [vmem:[%s3336_s3 + $0x54] sm:$0xf] %vm768_vm4, %v619_v38  ;;  %v3440_v38 = vld [vmem:[#allocation3_spill] sm:$0xff] }
 0x136   :  { %v623_v46 = vpop.permute.xlu2 %622  ;;  %v1251_v16 = vadd.f32 %v1250_v61, %v1249_v56  ;;  %v1009_v12 = vmul.f32 %v3438_v41, %v3438_v41  ;;  %v915_v25 = vadd.f32 %v914_v2, %v913_v11  ;;  %v1110_v55 = vadd.f32 %v1109_v60, %v1108_v52 }
 0x137   :  { %792 = vst.msk [vmem:[%s3336_s3 + $0x5c] sm:$0xf] %vm768_vm4, %v623_v46  ;;  %v1384_v33 = vadd.f32 %v1383_v18, %v1382_v5  ;;  %v1387_v62 = vsel %vm1170_vm3, %v1008_v1, 0.0  ;;  %v918_v7 = vsel %vm113_vm1, %v3438_v41, 0.0  ;;  %v1256_v43 = vsel %vm1170_vm3, %v3438_v41, 0.0  ;;  %v651_v35 = vpop.permute.xlu1 %650 }
 0x138   :  { %v1253_v42 = vadd.f32 %v1252_v59, %v1251_v16  ;;  %v1010_v13 = vmul.f32 %v3439_v0, %v3439_v0  ;;  %v917_v19 = vadd.f32 %v916_v9, %v915_v25  ;;  %v1112_v8 = vadd.f32 %v1111_v45, %v1110_v55  ;;  %806 = vst.msk [vmem:[%s3336_s3 + $0x94] sm:$0xf] %vm768_vm4, %v651_v35  ;;  %v3449_v35 = vld [vmem:[#allocation34_spill] sm:$0xff] }
 0x139   :  { %v1386_v54 = vadd.f32 %v1385_v36, %v1384_v33  ;;  %v1115_v27 = vsel %vm113_vm1, %v1009_v12, 0.0  ;;  %v1389_v21 = vsel %vm1170_vm3, %v1009_v12, 0.0  ;;  %v920_v47 = vsel %vm113_vm1, %v3439_v0, 0.0  ;;  %v3441_v33 = vld [vmem:[#allocation18_spill] sm:$0xff] }
 0x13a   :  { %v1255_v34 = vadd.f32 %v1254_v23, %v1253_v42  ;;  %v1011_v15 = vmul.f32 %v2630_v10, %v2630_v10  ;;  %v919_v26 = vadd.f32 %v918_v7, %v917_v19  ;;  %v1114_v48 = vadd.f32 %v1113_v49, %v1112_v8 }
 0x13b   :  { %v1388_v51 = vadd.f32 %v1387_v62, %v1386_v54  ;;  %v1117_v4 = vsel %vm113_vm1, %v1010_v13, 0.0  ;;  %v1258_v14 = vsel %vm1170_vm3, %v3439_v0, 0.0  ;;  %v1391_v20 = vsel %vm1170_vm3, %v1010_v13, 0.0 }
 0x13c   :  { %v1257_v53 = vadd.f32 %v1256_v43, %v1255_v34  ;;  %v922_v28 = vsel %vm113_vm1, %v2630_v10, 0.0  ;;  %v921_v30 = vadd.f32 %v920_v47, %v919_v26  ;;  %v1116_v3 = vadd.f32 %v1115_v27, %v1114_v48  ;;  %v589_v1 = vpop.permute.xlu0 %588  ;;  %v3014_v24 = vpop.f32.mrf.mxu3  ;;  %v3442_v43 = vld [vmem:[#allocation19_spill] sm:$0xff]  ;;  %v3443_v34 = vld [vmem:[#allocation44_spill] sm:$0xff]  ;;  %v3444_v47 = vld [vmem:[#allocation5_spill] sm:$0xff] }
 0x13d   :  { %v1390_v31 = vadd.f32 %v1389_v21, %v1388_v51  ;;  %v1119_v60 = vsel %vm113_vm1, %v1011_v15, 0.0  ;;  %v1260_v61 = vsel %vm1170_vm3, %v2630_v10, 0.0  ;;  %v1393_v18 = vsel %vm1170_vm3, %v1011_v15, 0.0  ;;  %775 = vst.msk [vmem:[%s3336_s3 + $0x18] sm:$0xf] %vm768_vm4, %v589_v1  ;;  %v3445_v48 = vld [vmem:[#allocation26_spill] sm:$0xff] }
 0x13e   :  { %v1259_v63 = vadd.f32 %v1258_v14, %v1257_v53  ;;  %v593_v58 = vpop.permute.xlu2 %592  ;;  %v1012_v40 = vmul.f32 %v2704_v22, %v2704_v22  ;;  %v923_v44 = vadd.f32 %v922_v28, %v921_v30  ;;  %v1118_v32 = vadd.f32 %v1117_v4, %v1116_v3  ;;  %v3446_v51 = vld [vmem:[#allocation21_spill] sm:$0xff]  ;;  %v3447_v14 = vld [vmem:[#allocation27_spill] sm:$0xff]  ;;  %v3448_v28 = vld [vmem:[#allocation22_spill] sm:$0xff] }
 0x13f   :  { %v1392_v2 = vadd.f32 %v1391_v20, %v1390_v31  ;;  %777 = vst.msk [vmem:[%s3336_s3 + $0x20] sm:$0xf] %vm768_vm4, %v593_v58  ;;  %v924_v10 = vsel %vm113_vm1, %v2704_v22, 0.0  ;;  %v1262_v45 = vsel %vm1170_vm3, %v2704_v22, 0.0  ;;  %v1013_v59 = vmul.f32 %v2788_v57, %v2788_v57  ;;  %v621_v19 = vpop.permute.xlu1 %620  ;;  %v3452_v1 = vld [vmem:[#allocation31_spill] sm:$0xff] }
 0x140   :  { %v1261_v56 = vadd.f32 %v1260_v61, %v1259_v63  ;;  %v3032_v36 = vpack.c.bf16 %v3014_v24, %v3014_v24  ;;  %v925_v39 = vadd.f32 %v924_v10, %v923_v44  ;;  %v1120_v46 = vadd.f32 %v1119_v60, %v1118_v32  ;;  %791 = vst.msk [vmem:[%s3336_s3 + $0x58] sm:$0xf] %vm768_vm4, %v621_v19  ;;  %v3450_v60 = vld [vmem:[#allocation30_spill] sm:$0xff]  ;;  %v3453_v10 = vld [vmem:[#allocation7_spill] sm:$0xff] }
 0x141   :  { %v1394_v52 = vadd.f32 %v1393_v18, %v1392_v2  ;;  %v1121_v16 = vsel %vm113_vm1, %v1012_v40, 0.0  ;;  %v1395_v22 = vsel %vm1170_vm3, %v1012_v40, 0.0  ;;  %v926_v5 = vsel %vm113_vm1, %v2788_v57, 0.0  ;;  %v3451_v18 = vld [vmem:[#allocation35_spill] sm:$0xff] }
 0x142   :  { %v1263_v11 = vadd.f32 %v1262_v45, %v1261_v56  ;;  %v1264_v9 = vsel %vm1170_vm3, %v2788_v57, 0.0  ;;  %511 = vst.msk [vmem:[%s3335_s2 + $0xfc] sm:$0xf] %vm447_vm2, %v3032_v36  ;;  %v927_v49 = vadd.f32 %v926_v5, %v925_v39  ;;  %v1122_v23 = vadd.f32 %v1121_v16, %v1120_v46  ;;  %v3454_v39 = vld [vmem:[#allocation40_spill] sm:$0xff] }
 0x143   :  { %v1396_v12 = vadd.f32 %v1395_v22, %v1394_v52  ;;  %v1018_v25 = vmul.f32 %v3440_v38, %v3440_v38  ;;  %v1123_v55 = vsel %vm113_vm1, %v1013_v59, 0.0  ;;  %v1397_v42 = vsel %vm1170_vm3, %v1013_v59, 0.0  ;;  %v3455_v52 = vld [vmem:[#allocation41_spill] sm:$0xff] }
 0x144   :  { %v1265_v41 = vadd.f32 %v1264_v9, %v1263_v11  ;;  %v3051_v57 = vpack.c.bf16 %v2975_v6, %v2975_v6  ;;  %v929_v62 = vadd.f32 %v3441_v33, %v927_v49  ;;  %v1124_v7 = vadd.f32 %v1123_v55, %v1122_v23  ;;  %v685_v26 = vpop.permute.xlu0 %684  ;;  %v3456_v49 = vld [vmem:[#allocation9_spill] sm:$0xff] }
 0x145   :  { %v1398_v13 = vadd.f32 %v1397_v42, %v1396_v12  ;;  %v1131_v54 = vsel %vm113_vm1, %v3443_v34, 0.0  ;;  %v1272_v27 = vsel %vm1170_vm3, %v1874_v29, 0.0  ;;  %v1405_v21 = vsel %vm1170_vm3, %v3443_v34, 0.0  ;;  %823 = vst.msk [vmem:[%s3336_s3 + $0xd8] sm:$0xf] %vm768_vm4, %v685_v26 }
 0x146   :  { %v1267_v0 = vadd.f32 %v3442_v43, %v1265_v41  ;;  %v689_v8 = vpop.permute.xlu2 %688  ;;  %v1019_v15 = vmul.f32 %v3444_v47, %v3444_v47  ;;  %v931_v53 = vadd.f32 %v3445_v48, %v929_v62  ;;  %v1126_v4 = vadd.f32 %v3446_v51, %v1124_v7  ;;  %510 = vst.msk [vmem:[%s3335_s2 + $0xf8] sm:$0xf] %vm447_vm2, %v3051_v57  ;;  %v3457_v7 = vld [vmem:[#allocation11_spill] sm:$0xff] }
 0x147   :  { %v1400_v29 = vadd.f32 %v3448_v28, %v1398_v13  ;;  %825 = vst.msk [vmem:[%s3336_s3 + $0xe0] sm:$0xf] %vm768_vm4, %v689_v8  ;;  %v936_v30 = vsel %vm113_vm1, %v3440_v38, 0.0  ;;  %v1133_v3 = vsel %vm113_vm1, %v1018_v25, 0.0  ;;  %v1274_v63 = vsel %vm1170_vm3, %v3440_v38, 0.0 }
 0x148   :  { %v1269_v20 = vadd.f32 %v3447_v14, %v1267_v0  ;;  %v1407_v31 = vsel %vm1170_vm3, %v1018_v25, 0.0  ;;  %v933_v58 = vadd.f32 %v3449_v35, %v931_v53  ;;  %v1128_v61 = vadd.f32 %v3450_v60, %v1126_v4  ;;  %v591_v25 = vpop.permute.xlu1 %590  ;;  %v3459_v60 = vld [vmem:[#allocation23_spill] sm:$0xff] }
 0x149   :  { %v1402_v44 = vadd.f32 %v3452_v1, %v1400_v29  ;;  %v938_v32 = vsel %vm113_vm1, %v3444_v47, 0.0  ;;  %v1135_v56 = vsel %vm113_vm1, %v1019_v15, 0.0  ;;  %v1276_v2 = vsel %vm1170_vm3, %v3444_v47, 0.0  ;;  %776 = vst.msk [vmem:[%s3336_s3 + $0x1c] sm:$0xf] %vm768_vm4, %v591_v25  ;;  %v3458_v47 = vld [vmem:[#allocation13_spill] sm:$0xff] }
 0x14a   :  { %v1271_v40 = vadd.f32 %v3451_v18, %v1269_v20  ;;  %v1020_v45 = vmul.f32 %v3453_v10, %v3453_v10  ;;  %v935_v59 = vadd.f32 %v2609_v50, %v933_v58  ;;  %v1130_v46 = vadd.f32 %v3454_v39, %v1128_v61 }
 0x14b   :  { %v1404_v16 = vadd.f32 %v3455_v52, %v1402_v44  ;;  %v1409_v22 = vsel %vm1170_vm3, %v1019_v15, 0.0  ;;  %v940_v5 = vsel %vm113_vm1, %v3453_v10, 0.0  ;;  %v1278_v9 = vsel %vm1170_vm3, %v3453_v10, 0.0 }
 0x14c   :  { %v1273_v11 = vadd.f32 %v1272_v27, %v1271_v40  ;;  %v1021_v23 = vmul.f32 %v3456_v49, %v3456_v49  ;;  %v937_v41 = vadd.f32 %v936_v30, %v935_v59  ;;  %v1132_v12 = vadd.f32 %v1131_v54, %v1130_v46  ;;  %v655_v0 = vpop.permute.xlu0 %654  ;;  %v3460_v59 = vld [vmem:[#allocation39_spill] sm:$0xff] }
 0x14d   :  { %v1406_v50 = vadd.f32 %v1405_v21, %v1404_v16  ;;  %v1137_v42 = vsel %vm113_vm1, %v1020_v45, 0.0  ;;  %v1411_v33 = vsel %vm1170_vm3, %v1020_v45, 0.0  ;;  %v942_v62 = vsel %vm113_vm1, %v3456_v49, 0.0  ;;  %808 = vst.msk [vmem:[%s3336_s3 + $0x9c] sm:$0xf] %vm768_vm4, %v655_v0 }
 0x14e   :  { %v1275_v38 = vadd.f32 %v1274_v63, %v1273_v11  ;;  %v659_v55 = vpop.permute.xlu2 %658  ;;  %v1022_v43 = vmul.f32 %v3457_v7, %v3457_v7  ;;  %v939_v13 = vadd.f32 %v938_v32, %v937_v41  ;;  %v1134_v19 = vadd.f32 %v1133_v3, %v1132_v12 }
 0x14f   :  { %v1408_v34 = vadd.f32 %v1407_v31, %v1406_v50  ;;  %810 = vst.msk [vmem:[%s3336_s3 + $0xa4] sm:$0xf] %vm768_vm4, %v659_v55  ;;  %v1139_v54 = vsel %vm113_vm1, %v1021_v23, 0.0  ;;  %v1280_v27 = vsel %vm1170_vm3, %v3456_v49, 0.0  ;;  %v1413_v21 = vsel %vm1170_vm3, %v1021_v23, 0.0  ;;  %v3461_v23 = vld [vmem:[#allocation43_spill] sm:$0xff] }
 0x150   :  { %v1277_v8 = vadd.f32 %v1276_v2, %v1275_v38  ;;  %v1023_v15 = vmul.f32 %v3458_v47, %v3458_v47  ;;  %v941_v26 = vadd.f32 %v940_v5, %v939_v13  ;;  %v1136_v48 = vadd.f32 %v1135_v56, %v1134_v19  ;;  %v687_v32 = vpop.permute.xlu1 %686 }
 0x151   :  { %v1410_v51 = vadd.f32 %v1409_v22, %v1408_v34  ;;  %v944_v4 = vsel %vm113_vm1, %v3457_v7, 0.0  ;;  %v1141_v14 = vsel %vm113_vm1, %v1022_v43, 0.0  ;;  %v1282_v20 = vsel %vm1170_vm3, %v3457_v7, 0.0  ;;  %824 = vst.msk [vmem:[%s3336_s3 + $0xdc] sm:$0xf] %vm768_vm4, %v687_v32 }
 0x152   :  { %v1279_v53 = vadd.f32 %v1278_v9, %v1277_v8  ;;  %v1415_v28 = vsel %vm1170_vm3, %v1022_v43, 0.0  ;;  %v1138_v29 = vadd.f32 %v1137_v42, %v1136_v48  ;;  %v943_v3 = vadd.f32 %v942_v62, %v941_v26 }
 0x153   :  { %v1412_v30 = vadd.f32 %v1411_v33, %v1410_v51  ;;  %v946_v31 = vsel %vm113_vm1, %v3458_v47, 0.0  ;;  %v1143_v35 = vsel %vm113_vm1, %v1023_v15, 0.0  ;;  %v1284_v58 = vsel %vm1170_vm3, %v3458_v47, 0.0 }
 0x154   :  { %v1281_v63 = vadd.f32 %v1280_v27, %v1279_v53  ;;  %v1024_v61 = vmul.f32 %v3459_v60, %v3459_v60  ;;  %v945_v18 = vadd.f32 %v944_v4, %v943_v3  ;;  %v1140_v40 = vadd.f32 %v1139_v54, %v1138_v29  ;;  %v625_v46 = vpop.permute.xlu0 %624 }
 0x155   :  { %v1414_v44 = vadd.f32 %v1413_v21, %v1412_v30  ;;  %v1417_v2 = vsel %vm1170_vm3, %v1023_v15, 0.0  ;;  %v948_v10 = vsel %vm113_vm1, %v3459_v60, 0.0  ;;  %v1286_v45 = vsel %vm1170_vm3, %v3459_v60, 0.0  ;;  %793 = vst.msk [vmem:[%s3336_s3 + $0x60] sm:$0xf] %vm768_vm4, %v625_v46 }
 0x156   :  { %v1283_v1 = vadd.f32 %v1282_v20, %v1281_v63  ;;  %v629_v56 = vpop.permute.xlu2 %628  ;;  %v1025_v39 = vmul.f32 %v3460_v59, %v3460_v59  ;;  %v947_v11 = vadd.f32 %v946_v31, %v945_v18  ;;  %v1142_v52 = vadd.f32 %v1141_v14, %v1140_v40 }
 0x157   :  { %v1416_v22 = vadd.f32 %v1415_v28, %v1414_v44  ;;  %795 = vst.msk [vmem:[%s3336_s3 + $0x68] sm:$0xf] %vm768_vm4, %v629_v56  ;;  %v1145_v5 = vsel %vm113_vm1, %v1024_v61, 0.0  ;;  %v1419_v9 = vsel %vm1170_vm3, %v1024_v61, 0.0  ;;  %v950_v49 = vsel %vm113_vm1, %v3460_v59, 0.0 }
 0x158   :  { %v1285_v16 = vadd.f32 %v1284_v58, %v1283_v1  ;;  %v1026_v41 = vmul.f32 %v3461_v23, %v3461_v23  ;;  %v949_v12 = vadd.f32 %v948_v10, %v947_v11  ;;  %v1144_v38 = vadd.f32 %v1143_v35, %v1142_v52  ;;  %v657_v26 = vpop.permute.xlu1 %656 }
 0x159   :  { %v1418_v25 = vadd.f32 %v1417_v2, %v1416_v22  ;;  %v1147_v55 = vsel %vm113_vm1, %v1025_v39, 0.0  ;;  %v1288_v42 = vsel %vm1170_vm3, %v3460_v59, 0.0  ;;  %v1421_v33 = vsel %vm1170_vm3, %v1025_v39, 0.0  ;;  %809 = vst.msk [vmem:[%s3336_s3 + $0xa0] sm:$0xf] %vm768_vm4, %v657_v26 }
 0x15a   :  { %v1287_v50 = vadd.f32 %v1286_v45, %v1285_v16  ;;  %v1027_v62 = vmul.f32 %v2928_v37, %v2928_v37  ;;  %v951_v7 = vadd.f32 %v950_v49, %v949_v12  ;;  %v1146_v43 = vadd.f32 %v1145_v5, %v1144_v38 }
 0x15b   :  { %v1420_v13 = vadd.f32 %v1419_v9, %v1418_v25  ;;  %v952_v19 = vsel %vm113_vm1, %v3461_v23, 0.0  ;;  %v1149_v8 = vsel %vm113_vm1, %v1026_v41, 0.0  ;;  %v1290_v34 = vsel %vm1170_vm3, %v3461_v23, 0.0 }
 0x15c   :  { %v1289_v0 = vadd.f32 %v1288_v42, %v1287_v50  ;;  %v1423_v54 = vsel %vm1170_vm3, %v1026_v41, 0.0  ;;  %v953_v27 = vadd.f32 %v952_v19, %v951_v7  ;;  %v1148_v21 = vadd.f32 %v1147_v55, %v1146_v43  ;;  %v595_v20 = vpop.permute.xlu0 %594 }
 0x15d   :  { %v1422_v15 = vadd.f32 %v1421_v33, %v1420_v13  ;;  %v954_v53 = vsel %vm113_vm1, %v2928_v37, 0.0  ;;  %v1151_v51 = vsel %vm113_vm1, %v1027_v62, 0.0  ;;  %v1292_v4 = vsel %vm1170_vm3, %v2928_v37, 0.0  ;;  %778 = vst.msk [vmem:[%s3336_s3 + $0x24] sm:$0xf] %vm768_vm4, %v595_v20 }
 0x15e   :  { %v1291_v47 = vadd.f32 %v1290_v34, %v1289_v0  ;;  %v599_v48 = vpop.permute.xlu2 %598  ;;  %v1028_v14 = vmul.f32 %v2975_v6, %v2975_v6  ;;  %v955_v28 = vadd.f32 %v954_v53, %v953_v27  ;;  %v1150_v29 = vadd.f32 %v1149_v8, %v1148_v21 }
 0x15f   :  { %v1424_v3 = vadd.f32 %v1423_v54, %v1422_v15  ;;  %780 = vst.msk [vmem:[%s3336_s3 + $0x2c] sm:$0xf] %vm768_vm4, %v599_v48  ;;  %v1425_v37 = vsel %vm1170_vm3, %v1027_v62, 0.0  ;;  %v956_v63 = vsel %vm113_vm1, %v2975_v6, 0.0  ;;  %v1294_v31 = vsel %vm1170_vm3, %v2975_v6, 0.0 }
 0x160   :  { %v1293_v30 = vadd.f32 %v1292_v4, %v1291_v47  ;;  %v1029_v35 = vmul.f32 %v3014_v24, %v3014_v24  ;;  %v1152_v58 = vadd.f32 %v1151_v51, %v1150_v29  ;;  %v957_v61 = vadd.f32 %v956_v63, %v955_v28  ;;  %v627_v52 = vpop.permute.xlu1 %626 }
 0x161   :  { %v1426_v60 = vadd.f32 %v1425_v37, %v1424_v3  ;;  %v1153_v40 = vsel %vm113_vm1, %v1028_v14, 0.0  ;;  %v1427_v1 = vsel %vm1170_vm3, %v1028_v14, 0.0  ;;  %v958_v44 = vsel %vm113_vm1, %v3014_v24, 0.0  ;;  %794 = vst.msk [vmem:[%s3336_s3 + $0x64] sm:$0xf] %vm768_vm4, %v627_v52 }
 0x162   :  { %v1295_v18 = vadd.f32 %v1294_v31, %v1293_v30  ;;  %v1296_v6 = vsel %vm1170_vm3, %v3014_v24, 0.0  ;;  %v3217_v32 = vadd.f32 %v958_v44, %v957_v61  ;;  %v1154_v56 = vadd.f32 %v1153_v40, %v1152_v58 }
 0x163   :  { %v1428_v10 = vadd.f32 %v1427_v1, %v1426_v60  ;;  %v1155_v45 = vsel %vm113_vm1, %v1029_v35, 0.0  ;;  %v1429_v59 = vsel %vm1170_vm3, %v1029_v35, 0.0 }
 0x164   :  { %v1297_v2 = vadd.f32 %v1296_v6, %v1295_v18  ;;  %v1156_v39 = vadd.f32 %v1155_v45, %v1154_v56  ;;  %v691_v24 = vpop.permute.xlu0 %690  ;;  %v960_v28 = vrot.slane %v3217_v32, 4 }
 0x165   :  { %v1430_v11 = vadd.f32 %v1429_v59, %v1428_v10  ;;  %826 = vst.msk [vmem:[%s3336_s3 + $0xe4] sm:$0xf] %vm768_vm4, %v691_v24 }
 0x166   :  { %v1298_v46 = vrot.slane %v1297_v2, 4  ;;  %v695_v16 = vpop.permute.xlu2 %694  ;;  %v1157_v22 = vrot.slane %v1156_v39, 4  ;;  %v961_v29 = vadd.f32 %v960_v28, %v3217_v32 }
 0x167   :  { %v1431_v9 = vrot.slane %v1430_v11, 4  ;;  %828 = vst.msk [vmem:[%s3336_s3 + $0xec] sm:$0xf] %vm768_vm4, %v695_v16 }
 0x168   :  { %v1299_v5 = vadd.f32 %v1298_v46, %v1297_v2  ;;  %v1158_v41 = vadd.f32 %v1157_v22, %v1156_v39  ;;  %v962_v3 = vrot.slane %v961_v29, 2 }
 0x169   :  { %v1432_v23 = vadd.f32 %v1431_v9, %v1430_v11  ;;  %v597_v25 = vpop.permute.xlu1 %596 }
 0x16a   :  { %v1300_v49 = vrot.slane %v1299_v5, 2  ;;  %v1159_v50 = vrot.slane %v1158_v41, 2  ;;  %779 = vst.msk [vmem:[%s3336_s3 + $0x28] sm:$0xf] %vm768_vm4, %v597_v25  ;;  %v963_v37 = vadd.f32 %v962_v3, %v961_v29 }
 0x16b   :  { %v1433_v38 = vrot.slane %v1432_v23, 2 }
 0x16c   :  { %v1301_v12 = vadd.f32 %v1300_v49, %v1299_v5  ;;  %v1160_v33 = vadd.f32 %v1159_v50, %v1158_v41  ;;  %v661_v7 = vpop.permute.xlu0 %660  ;;  %v964_v63 = vrot.slane %v963_v37, 1 }
 0x16d   :  { %v1434_v42 = vadd.f32 %v1433_v38, %v1432_v23  ;;  %811 = vst.msk [vmem:[%s3336_s3 + $0xa8] sm:$0xf] %vm768_vm4, %v661_v7 }
 0x16e   :  { %v1302_v55 = vrot.slane %v1301_v12, 1  ;;  %v665_v62 = vpop.permute.xlu2 %664  ;;  %v1161_v13 = vrot.slane %v1160_v33, 1  ;;  %v965_v58 = vadd.f32 %v964_v63, %v963_v37 }
 0x16f   :  { %813 = vst.msk [vmem:[%s3336_s3 + $0xb0] sm:$0xf] %vm768_vm4, %v665_v62  ;;  %v1435_v0 = vrot.slane %v1434_v42, 1 }
 0x170   :  { %v1303_v43 = vadd.f32 %v1302_v55, %v1301_v12  ;;  %v1162_v8 = vadd.f32 %v1161_v13, %v1160_v33 }
 0x171   :  { %v1436_v19 = vadd.f32 %v1435_v0, %v1434_v42  ;;  %v693_v34 = vpop.permute.xlu1 %692 }
 0x172   :  { %1438 = vrot.lane.b32.xlu1 %v1303_v43, %s1503_s14  ;;  %1164 = vrot.lane.b32.xlu0 %v1162_v8, %s1505_s29  ;;  %827 = vst.msk [vmem:[%s3336_s3 + $0xe8] sm:$0xf] %vm768_vm4, %v693_v34 }
 0x173   :  { %1442 = vrot.lane.b32.xlu2 %v1436_v19, %s1504_s0 }
 0x174   :  { %v631_v27 = vpop.permute.xlu0 %630 }
 0x175   :  { %796 = vst.msk [vmem:[%s3336_s3 + $0x6c] sm:$0xf] %vm768_vm4, %v631_v27 }
 0x176   :  { %v635_v54 = vpop.permute.xlu2 %634 }
 0x177   :  { %798 = vst.msk [vmem:[%s3336_s3 + $0x74] sm:$0xf] %vm768_vm4, %v635_v54 }
 0x179   :  { %v663_v21 = vpop.permute.xlu1 %662 }
 0x17a   :  { %698 = vrot.lane.b32.xlu1 %v2945_v17, %s1503_s14  ;;  %702 = vrot.lane.b32.xlu0 %v3032_v36, %s1503_s14  ;;  %812 = vst.msk [vmem:[%s3336_s3 + $0xac] sm:$0xf] %vm768_vm4, %v663_v21 }
 0x17b   :  { %700 = vrot.lane.b32.xlu2 %v3051_v57, %s1503_s14 }
 0x17c   :  { %v601_v15 = vpop.permute.xlu0 %600 }
 0x17d   :  { %781 = vst.msk [vmem:[%s3336_s3 + $0x30] sm:$0xf] %vm768_vm4, %v601_v15 }
 0x17e   :  { %v605_v47 = vpop.permute.xlu2 %604 }
 0x17f   :  { %783 = vst.msk [vmem:[%s3336_s3 + $0x38] sm:$0xf] %vm768_vm4, %v605_v47 }
 0x181   :  { %v633_v17 = vpop.permute.xlu1 %632 }
 0x182   :  { %797 = vst.msk [vmem:[%s3336_s3 + $0x70] sm:$0xf] %vm768_vm4, %v633_v17 }
 0x184   :  { %v697_v36 = vpop.permute.xlu0 %696 }
 0x185   :  { %829 = vst.msk [vmem:[%s3336_s3 + $0xf0] sm:$0xf] %vm768_vm4, %v697_v36 }
 0x186   :  { %v671_v57 = vpop.permute.xlu2 %670 }
 0x187   :  { %816 = vst.msk [vmem:[%s3336_s3 + $0xbc] sm:$0xf] %vm768_vm4, %v671_v57 }
 0x189   :  { %v603_v26 = vpop.permute.xlu1 %602 }
 0x18a   :  { %782 = vst.msk [vmem:[%s3336_s3 + $0x34] sm:$0xf] %vm768_vm4, %v603_v26 }
 0x18c   :  { %v667_v48 = vpop.permute.xlu0 %666 }
 0x18d   :  { %814 = vst.msk [vmem:[%s3336_s3 + $0xb4] sm:$0xf] %vm768_vm4, %v667_v48 }
 0x191   :  { %v669_v53 = vpop.permute.xlu1 %668 }
 0x192   :  { %815 = vst.msk [vmem:[%s3336_s3 + $0xb8] sm:$0xf] %vm768_vm4, %v669_v53 }
 0x194   :  { %v637_v51 = vpop.permute.xlu0 %636 }
 0x195   :  { %799 = vst.msk [vmem:[%s3336_s3 + $0x78] sm:$0xf] %vm768_vm4, %v637_v51 }
 0x199   :  { %v639_v4 = vpop.permute.xlu1 %638 }
 0x19a   :  { %800 = vst.msk [vmem:[%s3336_s3 + $0x7c] sm:$0xf] %vm768_vm4, %v639_v4 }
 0x19c   :  { %v607_v14 = vpop.permute.xlu0 %606 }
 0x19d   :  { %784 = vst.msk [vmem:[%s3336_s3 + $0x3c] sm:$0xf] %vm768_vm4, %v607_v14 }
 0x1cd   :  { %v1443_v20 = vpop.permute.xlu2 %1442 }
 0x1d5   :  { %v701_v30 = vpop.permute.xlu2 %700 }
 0x1d6   :  { %831 = vst.msk [vmem:[%s3336_s3 + $0xf8] sm:$0xf] %vm768_vm4, %v701_v30 }
 0x1e4   :  { %v1439_v31 = vpop.permute.xlu1 %1438  ;;  %v1165_v60 = vpop.permute.xlu0 %1164 }
 0x1e5   :  { %v1446_v35 = vsel %vm1445_vm5, %v1439_v31, %v1443_v20  ;;  %v1167_v61 = vsel %vm113_vm1, %v965_v58, %v1165_v60 }
 0x1e6   :  { %1448 = vst.msk [vmem:[%s3337_s5] sm:$0x1] %vm1447_vm6, %v1446_v35 }
 0x1e7   :  { %1169 = vst.msk [vmem:[%s3338_s4] sm:$0x1] %vm1168_vm7, %v1167_v61 }
 0x1ec   :  { %v699_v18 = vpop.permute.xlu1 %698  ;;  %v703_v40 = vpop.permute.xlu0 %702 }
 0x1ed   :  { %830 = vst.msk [vmem:[%s3336_s3 + $0xf4] sm:$0xf] %vm768_vm4, %v699_v18 }
 0x1ee   :  { %832 = vst.msk [vmem:[%s3336_s3 + $0xfc] sm:$0xf] %vm768_vm4, %v703_v40 }

// kernel: bottleneck_forward_nhwc.5
= control target key start
LH: loop header
LB: loop body
LE: loop exit
PB: predicated region body
PF: predicated region fallthrough
CT: control target
= control target key end

     0   :  { %vm784_vm0 = vcmask 1041408   ;;  %vm348_vm1 = vcmask 31744   ;;  %vm351_vm2 = vcmask 25600   ;;  %v5174_v1 = vmov 0.0   ;;  %s5175_s16 = smov 4   ;;  %s6878_s3 = inlined_call_operand.vmem [shape: bf16[9,4,4], index: 3, kind: input, shape index: {}]   ;;  %s6879_s0 = inlined_call_operand.vmem [shape: bf16[2,16,16,4], index: 0, kind: input, shape index: {}]   ;;  %s6880_s1 = inlined_call_operand.vmem [shape: f32[1,4], index: 1, kind: input, shape index: {}]   ;;  %s6881_s2 = inlined_call_operand.vmem [shape: f32[1,4], index: 2, kind: input, shape index: {}]   ;;  %s6882_s4 = inlined_call_operand.vmem [shape: bf16[2,16,16,4], index: 4, kind: output, shape index: {0}]   ;;  %s6883_s5 = inlined_call_operand.vmem [shape: f32[1,1,8], index: 5, kind: output, shape index: {1}]  }
   0x1   :  { %v4710_v0 = vld [vmem:[%s6878_s3 + $0x2] sm:$0x3]  ;;  %353 = vst.msk [vmem:[#allocation2 + $0x1b0] sm:$0xff] %vm348_vm1, %v5174_v1  ;;  %v4775_v2 = vld [vmem:[%s6878_s3 + $0x4] sm:$0x3]  ;;  %v5140_v3 = vld [vmem:[%s6879_s0 + $0x38] sm:$0xff]  }
   0x2   :  { %v786_v4 = vsel %vm784_vm0, %v4710_v0, 0  ;;  %354 = vst.msk [vmem:[#allocation2 + $0x1b8] sm:$0xff] %vm348_vm1, %v5174_v1  ;;  %v1420_v5 = vsel %vm784_vm0, %v4775_v2, 0  ;;  %v5036_v6 = vunpack.c.l.bf16 %v5140_v3  ;;  %v5037_v7 = vunpack.c.h.bf16 %v5140_v3  ;;  %v5156_v8 = vld [vmem:[%s6879_s0 + $0xb8] sm:$0xff]   ;;  %v5229_v9 = vld [vmem:[%s6880_s1] ss:$0 sm:$0xff] }
   0x3   :  { %5166 = vmatpush.bf16.msra.mxu2 %v786_v4  ;;  %355 = vst.msk [vmem:[#allocation2 + $0x1c0] sm:$0x3] %vm351_vm2, %v5174_v1  ;;  %795 = vmatpush.bf16.msra.mxu0 %v786_v4  ;;  %v5100_v10 = vunpack.c.l.bf16 %v5156_v8  ;;  %v5101_v11 = vunpack.c.h.bf16 %v5156_v8  ;;  %v5236_v12 = vld [vmem:[%s6881_s2] ss:$0 sm:$0xff]  ;;  %v4808_v13 = vld [vmem:[%s6878_s3 + $0x6] sm:$0x3] }
   0x4   :  { %349 = vst.msk [vmem:[#allocation2] sm:$0xff] %vm348_vm1, %v5174_v1  ;;  %5165 = vmatpush.bf16.msra.mxu1 %v786_v4  ;;  %5167 = vmatpush.bf16.msra.mxu3 %v786_v4  ;;  %v5149_v14 = vld [vmem:[%s6879_s0 + $0x80] sm:$0xff]   ;;  %v166_v15 = vmul.f32 %v5229_v9, %v5036_v6  ;;  %v167_v16 = vmul.f32 %v5229_v9, %v5037_v7  ;;  %v1850_v18 = vsel %vm784_vm0, %v4808_v13, 0  ;;  %v4841_v20 = vld [vmem:[%s6878_s3 + $0x8] sm:$0x3]  ;;  %vm364_vm3 = vcmask 24576  }
   0x5   :  { %350 = vst.msk [vmem:[#allocation2 + $0x8] sm:$0xff] %vm348_vm1, %v5174_v1  ;;  %v198_v17 = vmul.f32 %v5229_v9, %v5100_v10  ;;  %v589_v19 = vld [vmem:[%s6878_s3] sm:$0x3]  ;;  %v199_v21 = vmul.f32 %v5229_v9, %v5101_v11  ;;  %v5072_v23 = vunpack.c.l.bf16 %v5149_v14  ;;  %v5073_v24 = vunpack.c.h.bf16 %v5149_v14  ;;  %v5150_v50 = vld [vmem:[%s6879_s0 + $0x88] sm:$0xff]  }
   0x6   :  { %352 = vst.msk [vmem:[#allocation2 + $0x10] sm:$0x3] %vm351_vm2, %v5174_v1  ;;  %v1054_v22 = vsel %vm784_vm0, %v589_v19, 0  ;;  %v5007_v25 = vld [vmem:[%s6879_s0] sm:$0xff]   ;;  %v234_v26 = vadd.f32 %v5236_v12, %v166_v15  ;;  %v235_v27 = vadd.f32 %v5236_v12, %v167_v16  ;;  %v2280_v29 = vsel %vm784_vm0, %v4841_v20, 0  ;;  %v5134_v61 = vld [vmem:[%s6879_s0 + $0x8] sm:$0xff]  }
   0x7   :  { %1429 = vmatpush.bf16.msrb.mxu2 %v1420_v5  ;;  %357 = vst.msk [vmem:[#allocation2 + $0x198] sm:$0xff] %vm348_vm1, %v5174_v1  ;;  %v266_v28 = vadd.f32 %v5236_v12, %v198_v17  ;;  %v267_v30 = vadd.f32 %v5236_v12, %v199_v21  ;;  %v184_v31 = vmul.f32 %v5229_v9, %v5072_v23  ;;  %v5008_v33 = vunpack.c.l.bf16 %v5007_v25  ;;  %v5141_v34 = vld [vmem:[%s6879_s0 + $0x40] sm:$0xff]   ;;  %v5142_v13 = vld [vmem:[%s6879_s0 + $0x48] sm:$0xff]  }
   0x8   :  { %1859 = vmatpush.bf16.msrb.mxu3 %v1850_v18  ;;  %1063 = vmatpush.bf16.msrb.mxu1 %v1054_v22  ;;  %358 = vst.msk [vmem:[#allocation2 + $0x1a0] sm:$0xff] %vm348_vm1, %v5174_v1  ;;  %v185_v32 = vmul.f32 %v5229_v9, %v5073_v24  ;;  %v5157_v35 = vld [vmem:[%s6879_s0 + $0xc0] sm:$0xff]   ;;  %v298_v37 = vmax.f32 %v234_v26, 0.0  ;;  %v299_v38 = vmax.f32 %v235_v27, 0.0  ;;  %v5009_v40 = vunpack.c.h.bf16 %v5007_v25  ;;  %v5158_v18 = vld [vmem:[%s6879_s0 + $0xc8] sm:$0xff]  }
   0x9   :  { %2289 = vmatpush.bf16.msrb.mxu0 %v2280_v29  ;;  %v622_v36 = vld [vmem:[#allocation2 + $0x1b1] sm:$0xff]  ;;  %359 = vst.msk [vmem:[#allocation2 + $0x1a8] sm:$0x3] %vm351_vm2, %v5174_v1  ;;  %v330_v39 = vmax.f32 %v266_v28, 0.0  ;;  %v331_v42 = vmax.f32 %v267_v30, 0.0  ;;  %v252_v43 = vadd.f32 %v5236_v12, %v184_v31  ;;  %v152_v45 = vmul.f32 %v5229_v9, %v5008_v33 }
   0xa   :  { %v623_v41 = vld [vmem:[#allocation2 + $0x1b9] sm:$0xff]  ;;  %360 = vst.msk [vmem:[#allocation2 + $0x348] sm:$0xff] %vm348_vm1, %v5174_v1  ;;  %v253_v44 = vadd.f32 %v5236_v12, %v185_v32  ;;  %v153_v47 = vmul.f32 %v5229_v9, %v5009_v40  ;;  %v5040_v48 = vunpack.c.l.bf16 %v5141_v34  ;;  %v5041_v49 = vunpack.c.h.bf16 %v5141_v34 }
   0xb   :  { %v670_v46 = vpack.c.bf16 %v623_v41, %v622_v36  ;;  %361 = vst.msk [vmem:[#allocation2 + $0x350] sm:$0xff] %vm348_vm1, %v5174_v1  ;;  %v316_v52 = vmax.f32 %v252_v43, 0.0  ;;  %v220_v54 = vadd.f32 %v5236_v12, %v152_v45  ;;  %v5104_v55 = vunpack.c.l.bf16 %v5157_v35 }
   0xc   :  { %362 = vst.msk [vmem:[#allocation2 + $0x358] sm:$0x3] %vm351_vm2, %v5174_v1  ;;  %v590_v51 = vld [vmem:[#allocation2 + $0x1] sm:$0xff]  ;;  %v317_v53 = vmax.f32 %v253_v44, 0.0  ;;  %v221_v57 = vadd.f32 %v5236_v12, %v153_v47  ;;  %v168_v58 = vmul.f32 %v5229_v9, %v5040_v48  ;;  %v169_v59 = vmul.f32 %v5229_v9, %v5041_v49  ;;  %v5135_v48 = vld [vmem:[%s6879_s0 + $0x10] sm:$0xff]  }
   0xd   :  { %4727 = vmatmul.msk.bf16.vlgmr.msra.gmra.mxu2 %vm348_vm1, %v670_v46  ;;  %v591_v56 = vld [vmem:[#allocation2 + $0x9] sm:$0xff]  ;;  %443 = vst.msk [vmem:[#allocation2 + $0xc1] sm:$0xff] %vm348_vm1, %v298_v37  ;;  %v5105_v60 = vunpack.c.h.bf16 %v5157_v35  ;;  %v284_v63 = vmax.f32 %v220_v54, 0.0  ;;  %v200_v0 = vmul.f32 %v5229_v9, %v5104_v55  ;;  %v5076_v2 = vunpack.c.l.bf16 %v5150_v50 }
   0xe   :  { %v654_v62 = vpack.c.bf16 %v591_v56, %v590_v51  ;;  %444 = vst.msk [vmem:[#allocation2 + $0xc9] sm:$0xff] %vm348_vm1, %v299_v38  ;;  %v285_v3 = vmax.f32 %v221_v57, 0.0  ;;  %v236_v4 = vadd.f32 %v5236_v12, %v168_v58  ;;  %v237_v5 = vadd.f32 %v5236_v12, %v169_v59  ;;  %v5151_v37 = vld [vmem:[%s6879_s0 + $0x90] sm:$0xff]  }
   0xf   :  { %475 = vst.msk [vmem:[#allocation2 + $0x271] sm:$0xff] %vm348_vm1, %v330_v39  ;;  %v201_v6 = vmul.f32 %v5229_v9, %v5105_v60  ;;  %v268_v7 = vadd.f32 %v5236_v12, %v200_v0  ;;  %v5077_v8 = vunpack.c.h.bf16 %v5150_v50  ;;  %v186_v10 = vmul.f32 %v5229_v9, %v5076_v2  ;;  %v5143_v54 = vld [vmem:[%s6879_s0 + $0x50] sm:$0xff]  }
  0x10   :  { %4711 = vmatmul.msk.bf16.vlgmr.msra.gmra.mxu0 %vm348_vm1, %v654_v62  ;;  %476 = vst.msk [vmem:[#allocation2 + $0x279] sm:$0xff] %vm348_vm1, %v331_v42  ;;  %v5012_v11 = vunpack.c.l.bf16 %v5134_v61  ;;  %v300_v14 = vmax.f32 %v236_v4, 0.0  ;;  %v301_v15 = vmax.f32 %v237_v5, 0.0  ;;  %v5013_v17 = vunpack.c.h.bf16 %v5134_v61  ;;  %v5159_v2 = vld [vmem:[%s6879_s0 + $0xd0] sm:$0xff]  }
  0x11   :  { %461 = vst.msk [vmem:[#allocation2 + $0x1c9] sm:$0xff] %vm348_vm1, %v316_v52  ;;  %v269_v16 = vadd.f32 %v5236_v12, %v201_v6  ;;  %v332_v19 = vmax.f32 %v268_v7, 0.0  ;;  %v187_v20 = vmul.f32 %v5229_v9, %v5077_v8  ;;  %v254_v21 = vadd.f32 %v5236_v12, %v186_v10 }
  0x12   :  { %462 = vst.msk [vmem:[#allocation2 + $0x1d1] sm:$0xff] %vm348_vm1, %v317_v53  ;;  %v154_v22 = vmul.f32 %v5229_v9, %v5012_v11  ;;  %v155_v24 = vmul.f32 %v5229_v9, %v5013_v17  ;;  %v5044_v25 = vunpack.c.l.bf16 %v5142_v13  ;;  %v5045_v26 = vunpack.c.h.bf16 %v5142_v13 }
  0x13   :  { %429 = vst.msk [vmem:[#allocation2 + $0x19] sm:$0xff] %vm348_vm1, %v284_v63  ;;  %v333_v23 = vmax.f32 %v269_v16, 0.0  ;;  %v255_v28 = vadd.f32 %v5236_v12, %v187_v20  ;;  %v318_v29 = vmax.f32 %v254_v21, 0.0  ;;  %v5108_v31 = vunpack.c.l.bf16 %v5158_v18  ;;  %v5152_v21 = vld [vmem:[%s6879_s0 + $0x98] sm:$0xff]  }
  0x14   :  { %v606_v27 = vld [vmem:[#allocation2 + $0xc1] sm:$0xff]  ;;  %430 = vst.msk [vmem:[#allocation2 + $0x21] sm:$0xff] %vm348_vm1, %v285_v3  ;;  %v222_v30 = vadd.f32 %v5236_v12, %v154_v22  ;;  %v223_v33 = vadd.f32 %v5236_v12, %v155_v24  ;;  %v170_v34 = vmul.f32 %v5229_v9, %v5044_v25  ;;  %v171_v35 = vmul.f32 %v5229_v9, %v5045_v26 }
  0x15   :  { %v607_v32 = vld [vmem:[#allocation2 + $0xc9] sm:$0xff]  ;;  %445 = vst.msk [vmem:[#allocation2 + $0xd9] sm:$0xff] %vm348_vm1, %v300_v14  ;;  %v5109_v36 = vunpack.c.h.bf16 %v5158_v18  ;;  %v319_v40 = vmax.f32 %v255_v28, 0.0  ;;  %v202_v42 = vmul.f32 %v5229_v9, %v5108_v31  ;;  %v5080_v52 = vunpack.c.l.bf16 %v5151_v37 }
  0x16   :  { %v662_v38 = vpack.c.bf16 %v607_v32, %v606_v27  ;;  %v638_v39 = vld [vmem:[#allocation2 + $0x271] sm:$0xff]  ;;  %446 = vst.msk [vmem:[#allocation2 + $0xe1] sm:$0xff] %vm348_vm1, %v301_v15  ;;  %v286_v41 = vmax.f32 %v222_v30, 0.0  ;;  %v287_v44 = vmax.f32 %v223_v33, 0.0  ;;  %v238_v45 = vadd.f32 %v5236_v12, %v170_v34 }
  0x17   :  { %v639_v43 = vld [vmem:[#allocation2 + $0x279] sm:$0xff]  ;;  %477 = vst.msk [vmem:[#allocation2 + $0x289] sm:$0xff] %vm348_vm1, %v332_v19  ;;  %v239_v46 = vadd.f32 %v5236_v12, %v171_v35  ;;  %v203_v47 = vmul.f32 %v5229_v9, %v5109_v36  ;;  %v270_v51 = vadd.f32 %v5236_v12, %v202_v42  ;;  %v5081_v53 = vunpack.c.h.bf16 %v5151_v37 }
  0x18   :  { %4719 = vmatmul.msk.bf16.vlgmr.msra.gmra.mxu1 %vm348_vm1, %v662_v38  ;;  %v678_v49 = vpack.c.bf16 %v639_v43, %v638_v39  ;;  %v624_v50 = vld [vmem:[#allocation2 + $0x1c9] sm:$0xff]  ;;  %478 = vst.msk [vmem:[#allocation2 + $0x291] sm:$0xff] %vm348_vm1, %v333_v23  ;;  %v302_v56 = vmax.f32 %v238_v45, 0.0  ;;  %v5016_v59 = vunpack.c.l.bf16 %v5135_v48  ;;  %v188_v63 = vmul.f32 %v5229_v9, %v5080_v52  ;;  %v5136_v52 = vld [vmem:[%s6879_s0 + $0x18] sm:$0xff]  }
  0x19   :  { %v625_v55 = vld [vmem:[#allocation2 + $0x1d1] sm:$0xff]  ;;  %463 = vst.msk [vmem:[#allocation2 + $0x1e1] sm:$0xff] %vm348_vm1, %v318_v29  ;;  %v303_v57 = vmax.f32 %v239_v46, 0.0  ;;  %v271_v58 = vadd.f32 %v5236_v12, %v203_v47  ;;  %v334_v62 = vmax.f32 %v270_v51, 0.0  ;;  %v189_v0 = vmul.f32 %v5229_v9, %v5081_v53 }
  0x1a   :  { %4735 = vmatmul.msk.bf16.vlgmr.msra.gmra.mxu3 %vm348_vm1, %v678_v49  ;;  %v671_v60 = vpack.c.bf16 %v625_v55, %v624_v50  ;;  %v592_v61 = vld [vmem:[#allocation2 + $0x19] sm:$0xff]  ;;  %464 = vst.msk [vmem:[#allocation2 + $0x1e9] sm:$0xff] %vm348_vm1, %v319_v40  ;;  %v5017_v5 = vunpack.c.h.bf16 %v5135_v48  ;;  %v156_v6 = vmul.f32 %v5229_v9, %v5016_v59  ;;  %v5048_v7 = vunpack.c.l.bf16 %v5143_v54 }
  0x1b   :  { %v593_v3 = vld [vmem:[#allocation2 + $0x21] sm:$0xff]  ;;  %431 = vst.msk [vmem:[#allocation2 + $0x31] sm:$0xff] %vm348_vm1, %v286_v41  ;;  %v335_v4 = vmax.f32 %v271_v58, 0.0  ;;  %v256_v10 = vadd.f32 %v5236_v12, %v188_v63  ;;  %v257_v11 = vadd.f32 %v5236_v12, %v189_v0  ;;  %v5049_v13 = vunpack.c.h.bf16 %v5143_v54  ;;  %v5144_v53 = vld [vmem:[%s6879_s0 + $0x58] sm:$0xff]  }
  0x1c   :  { %v5364_v8 = vpack.c.bf16 %v593_v3, %v592_v61  ;;  %432 = vst.msk [vmem:[#allocation2 + $0x39] sm:$0xff] %vm348_vm1, %v287_v44  ;;  %v157_v14 = vmul.f32 %v5229_v9, %v5017_v5  ;;  %v224_v15 = vadd.f32 %v5236_v12, %v156_v6  ;;  %v172_v16 = vmul.f32 %v5229_v9, %v5048_v7  ;;  %v608_v29 = vld [vmem:[#allocation2 + $0xd9] sm:$0xff] }
  0x1d   :  { %4728 = vmatmul.msk.bf16.gmra.mxu2 %vm348_vm1, %v671_v60  ;;  %447 = vst.msk [vmem:[#allocation2 + $0xf1] sm:$0xff] %vm348_vm1, %v302_v56  ;;  %v5112_v17 = vunpack.c.l.bf16 %v5159_v2  ;;  %v320_v18 = vmax.f32 %v256_v10, 0.0  ;;  %v321_v19 = vmax.f32 %v257_v11, 0.0  ;;  %v173_v20 = vmul.f32 %v5229_v9, %v5049_v13  ;;  %v609_v30 = vld [vmem:[#allocation2 + $0xe1] sm:$0xff] }
  0x1e   :  { %448 = vst.msk [vmem:[#allocation2 + $0xf9] sm:$0xff] %vm348_vm1, %v303_v57  ;;  %v225_v22 = vadd.f32 %v5236_v12, %v157_v14  ;;  %v288_v23 = vmax.f32 %v224_v15, 0.0  ;;  %v240_v24 = vadd.f32 %v5236_v12, %v172_v16  ;;  %v5113_v25 = vunpack.c.h.bf16 %v5159_v2  ;;  %v640_v38 = vld [vmem:[#allocation2 + $0x289] sm:$0xff]  ;;  %v5160_v57 = vld [vmem:[%s6879_s0 + $0xd8] sm:$0xff]  }
  0x1f   :  { %479 = vst.msk [vmem:[#allocation2 + $0x2a1] sm:$0xff] %vm348_vm1, %v334_v62  ;;  %v241_v26 = vadd.f32 %v5236_v12, %v173_v20  ;;  %v204_v27 = vmul.f32 %v5229_v9, %v5112_v17  ;;  %v5084_v28 = vunpack.c.l.bf16 %v5152_v21  ;;  %v5085_v34 = vunpack.c.h.bf16 %v5152_v21  ;;  %v641_v39 = vld [vmem:[#allocation2 + $0x291] sm:$0xff] }
  0x20   :  { %4712 = vmatmul.msk.bf16.gmra.mxu0 %vm348_vm1, %v5364_v8  ;;  %480 = vst.msk [vmem:[#allocation2 + $0x2a9] sm:$0xff] %vm348_vm1, %v335_v4  ;;  %v289_v31 = vmax.f32 %v225_v22, 0.0  ;;  %v304_v32 = vmax.f32 %v240_v24, 0.0  ;;  %v205_v33 = vmul.f32 %v5229_v9, %v5113_v25  ;;  %v663_v42 = vpack.c.bf16 %v609_v30, %v608_v29  ;;  %v626_v48 = vld [vmem:[#allocation2 + $0x1e1] sm:$0xff] }
  0x21   :  { %465 = vst.msk [vmem:[#allocation2 + $0x1f9] sm:$0xff] %vm348_vm1, %v320_v18  ;;  %v305_v35 = vmax.f32 %v241_v26, 0.0  ;;  %v272_v36 = vadd.f32 %v5236_v12, %v204_v27  ;;  %v190_v37 = vmul.f32 %v5229_v9, %v5084_v28  ;;  %v191_v41 = vmul.f32 %v5229_v9, %v5085_v34  ;;  %v627_v49 = vld [vmem:[#allocation2 + $0x1e9] sm:$0xff] }
  0x22   :  { %466 = vst.msk [vmem:[#allocation2 + $0x201] sm:$0xff] %vm348_vm1, %v321_v19  ;;  %v273_v40 = vadd.f32 %v5236_v12, %v205_v33  ;;  %v679_v47 = vpack.c.bf16 %v641_v39, %v640_v38  ;;  %v5020_v54 = vunpack.c.l.bf16 %v5136_v52  ;;  %v5021_v55 = vunpack.c.h.bf16 %v5136_v52  ;;  %v594_v59 = vld [vmem:[#allocation2 + $0x31] sm:$0xff]  ;;  %v5153_v19 = vld [vmem:[%s6879_s0 + $0xa0] sm:$0xff]  }
  0x23   :  { %433 = vst.msk [vmem:[#allocation2 + $0x49] sm:$0xff] %vm348_vm1, %v288_v23  ;;  %v336_v43 = vmax.f32 %v272_v36, 0.0  ;;  %v258_v44 = vadd.f32 %v5236_v12, %v190_v37  ;;  %v259_v46 = vadd.f32 %v5236_v12, %v191_v41  ;;  %v5052_v56 = vunpack.c.l.bf16 %v5144_v53  ;;  %v595_v60 = vld [vmem:[#allocation2 + $0x39] sm:$0xff] }
  0x24   :  { %434 = vst.msk [vmem:[#allocation2 + $0x51] sm:$0xff] %vm348_vm1, %v289_v31  ;;  %v337_v45 = vmax.f32 %v273_v40, 0.0  ;;  %v672_v58 = vpack.c.bf16 %v627_v49, %v626_v48  ;;  %v5053_v61 = vunpack.c.h.bf16 %v5144_v53  ;;  %v5116_v62 = vunpack.c.l.bf16 %v5160_v57  ;;  %v610_v25 = vld [vmem:[#allocation2 + $0xf1] sm:$0xff]  ;;  %v5137_v40 = vld [vmem:[%s6879_s0 + $0x20] sm:$0xff]  }
  0x25   :  { %449 = vst.msk [vmem:[#allocation2 + $0x109] sm:$0xff] %vm348_vm1, %v304_v32  ;;  %v322_v50 = vmax.f32 %v258_v44, 0.0  ;;  %v323_v51 = vmax.f32 %v259_v46, 0.0  ;;  %v5117_v63 = vunpack.c.h.bf16 %v5160_v57  ;;  %v158_v0 = vmul.f32 %v5229_v9, %v5020_v54  ;;  %v611_v26 = vld [vmem:[#allocation2 + $0xf9] sm:$0xff] }
  0x26   :  { %450 = vst.msk [vmem:[#allocation2 + $0x111] sm:$0xff] %vm348_vm1, %v305_v35  ;;  %v159_v2 = vmul.f32 %v5229_v9, %v5021_v55  ;;  %v174_v3 = vmul.f32 %v5229_v9, %v5052_v56  ;;  %v175_v4 = vmul.f32 %v5229_v9, %v5053_v61  ;;  %v206_v5 = vmul.f32 %v5229_v9, %v5116_v62  ;;  %v642_v30 = vld [vmem:[#allocation2 + $0x2a1] sm:$0xff] }
  0x27   :  { %481 = vst.msk [vmem:[#allocation2 + $0x2b9] sm:$0xff] %vm348_vm1, %v336_v43  ;;  %v207_v6 = vmul.f32 %v5229_v9, %v5117_v63  ;;  %v5421_v7 = vpack.c.bf16 %v595_v60, %v594_v59  ;;  %v226_v10 = vadd.f32 %v5236_v12, %v158_v0  ;;  %v5088_v23 = vunpack.c.l.bf16 %v5153_v19  ;;  %v643_v31 = vld [vmem:[#allocation2 + $0x2a9] sm:$0xff]  ;;  %v5145_v41 = vld [vmem:[%s6879_s0 + $0x60] sm:$0xff]  }
  0x28   :  { %4720 = vmatmul.msk.bf16.gmra.mxu1 %vm348_vm1, %v663_v42  ;;  %482 = vst.msk [vmem:[#allocation2 + $0x2c1] sm:$0xff] %vm348_vm1, %v337_v45  ;;  %v227_v11 = vadd.f32 %v5236_v12, %v159_v2  ;;  %v242_v13 = vadd.f32 %v5236_v12, %v174_v3  ;;  %v243_v14 = vadd.f32 %v5236_v12, %v175_v4  ;;  %v5089_v24 = vunpack.c.h.bf16 %v5153_v19  ;;  %v628_v36 = vld [vmem:[#allocation2 + $0x1f9] sm:$0xff] }
  0x29   :  { %467 = vst.msk [vmem:[#allocation2 + $0x211] sm:$0xff] %vm348_vm1, %v322_v50  ;;  %v274_v15 = vadd.f32 %v5236_v12, %v206_v5  ;;  %v275_v16 = vadd.f32 %v5236_v12, %v207_v6  ;;  %v290_v17 = vmax.f32 %v226_v10, 0.0  ;;  %v192_v28 = vmul.f32 %v5229_v9, %v5088_v23  ;;  %v629_v37 = vld [vmem:[#allocation2 + $0x201] sm:$0xff] }
  0x2a   :  { %4736 = vmatmul.msk.bf16.gmra.mxu3 %vm348_vm1, %v679_v47  ;;  %468 = vst.msk [vmem:[#allocation2 + $0x219] sm:$0xff] %vm348_vm1, %v323_v51  ;;  %v291_v18 = vmax.f32 %v227_v11, 0.0  ;;  %v306_v20 = vmax.f32 %v242_v13, 0.0  ;;  %v307_v21 = vmax.f32 %v243_v14, 0.0  ;;  %v193_v29 = vmul.f32 %v5229_v9, %v5089_v24  ;;  %v596_v42 = vld [vmem:[#allocation2 + $0x49] sm:$0xff]  ;;  %v5161_v48 = vld [vmem:[%s6879_s0 + $0xe0] sm:$0xff]  }
  0x2b   :  { %435 = vst.msk [vmem:[#allocation2 + $0x61] sm:$0xff] %vm348_vm1, %v290_v17  ;;  %v338_v22 = vmax.f32 %v274_v15, 0.0  ;;  %v339_v27 = vmax.f32 %v275_v16, 0.0  ;;  %v664_v32 = vpack.c.bf16 %v611_v26, %v610_v25  ;;  %v260_v33 = vadd.f32 %v5236_v12, %v192_v28  ;;  %v597_v43 = vld [vmem:[#allocation2 + $0x51] sm:$0xff]  ;;  %v5154_v5 = vld [vmem:[%s6879_s0 + $0xa8] sm:$0xff]  }
  0x2c   :  { %436 = vst.msk [vmem:[#allocation2 + $0x69] sm:$0xff] %vm348_vm1, %v291_v18  ;;  %v261_v34 = vadd.f32 %v5236_v12, %v193_v29  ;;  %v680_v35 = vpack.c.bf16 %v643_v31, %v642_v30  ;;  %v5024_v44 = vunpack.c.l.bf16 %v5137_v40  ;;  %v5025_v45 = vunpack.c.h.bf16 %v5137_v40  ;;  %v612_v14 = vld [vmem:[#allocation2 + $0x109] sm:$0xff] }
  0x2d   :  { %4729 = vmatmul.msk.bf16.gmra.mxu2 %vm348_vm1, %v672_v58  ;;  %451 = vst.msk [vmem:[#allocation2 + $0x121] sm:$0xff] %vm348_vm1, %v306_v20  ;;  %v324_v38 = vmax.f32 %v260_v33, 0.0  ;;  %v5056_v46 = vunpack.c.l.bf16 %v5145_v41  ;;  %v5057_v47 = vunpack.c.h.bf16 %v5145_v41  ;;  %v673_v49 = vpack.c.bf16 %v629_v37, %v628_v36  ;;  %v613_v15 = vld [vmem:[#allocation2 + $0x111] sm:$0xff]  ;;  %v5138_v29 = vld [vmem:[%s6879_s0 + $0x28] sm:$0xff]  }
  0x2e   :  { %452 = vst.msk [vmem:[#allocation2 + $0x129] sm:$0xff] %vm348_vm1, %v307_v21  ;;  %v325_v39 = vmax.f32 %v261_v34, 0.0  ;;  %v5120_v50 = vunpack.c.l.bf16 %v5161_v48  ;;  %v5121_v51 = vunpack.c.h.bf16 %v5161_v48  ;;  %v160_v52 = vmul.f32 %v5229_v9, %v5024_v44  ;;  %v644_v19 = vld [vmem:[#allocation2 + $0x2b9] sm:$0xff]  ;;  %v5146_v30 = vld [vmem:[%s6879_s0 + $0x68] sm:$0xff]  }
  0x2f   :  { %483 = vst.msk [vmem:[#allocation2 + $0x2d1] sm:$0xff] %vm348_vm1, %v338_v22  ;;  %v161_v53 = vmul.f32 %v5229_v9, %v5025_v45  ;;  %v176_v54 = vmul.f32 %v5229_v9, %v5056_v46  ;;  %v177_v55 = vmul.f32 %v5229_v9, %v5057_v47  ;;  %v5462_v56 = vpack.c.bf16 %v597_v43, %v596_v42  ;;  %v645_v20 = vld [vmem:[#allocation2 + $0x2c1] sm:$0xff] }
  0x30   :  { %4713 = vmatmul.msk.bf16.gmra.mxu0 %vm348_vm1, %v5421_v7  ;;  %484 = vst.msk [vmem:[#allocation2 + $0x2d9] sm:$0xff] %vm348_vm1, %v339_v27  ;;  %v208_v57 = vmul.f32 %v5229_v9, %v5120_v50  ;;  %v209_v58 = vmul.f32 %v5229_v9, %v5121_v51  ;;  %v228_v59 = vadd.f32 %v5236_v12, %v160_v52  ;;  %v5092_v10 = vunpack.c.l.bf16 %v5154_v5  ;;  %v630_v27 = vld [vmem:[#allocation2 + $0x211] sm:$0xff]  ;;  %v5162_v37 = vld [vmem:[%s6879_s0 + $0xe8] sm:$0xff]  }
  0x31   :  { %469 = vst.msk [vmem:[#allocation2 + $0x229] sm:$0xff] %vm348_vm1, %v324_v38  ;;  %v229_v60 = vadd.f32 %v5236_v12, %v161_v53  ;;  %v244_v61 = vadd.f32 %v5236_v12, %v176_v54  ;;  %v245_v62 = vadd.f32 %v5236_v12, %v177_v55  ;;  %v5093_v11 = vunpack.c.h.bf16 %v5154_v5  ;;  %v631_v28 = vld [vmem:[#allocation2 + $0x219] sm:$0xff] }
  0x32   :  { %470 = vst.msk [vmem:[#allocation2 + $0x231] sm:$0xff] %vm348_vm1, %v325_v39  ;;  %v276_v63 = vadd.f32 %v5236_v12, %v208_v57  ;;  %v277_v0 = vadd.f32 %v5236_v12, %v209_v58  ;;  %v292_v2 = vmax.f32 %v228_v59, 0.0  ;;  %v194_v17 = vmul.f32 %v5229_v9, %v5092_v10  ;;  %v598_v31 = vld [vmem:[#allocation2 + $0x61] sm:$0xff]  ;;  %v5155_v58 = vld [vmem:[%s6879_s0 + $0xb0] sm:$0xff]  }
  0x33   :  { %v293_v3 = vmax.f32 %v229_v60, 0.0  ;;  %v308_v4 = vmax.f32 %v244_v61, 0.0  ;;  %v309_v6 = vmax.f32 %v245_v62, 0.0  ;;  %v195_v18 = vmul.f32 %v5229_v9, %v5093_v11  ;;  %365 = vst.msk [vmem:[#allocation2 + $0x18] sm:$0x1] %vm364_vm3, %v5174_v1 }
  0x34   :  { %437 = vst.msk [vmem:[#allocation2 + $0x79] sm:$0xff] %vm348_vm1, %v292_v2  ;;  %v340_v13 = vmax.f32 %v276_v63, 0.0  ;;  %v341_v16 = vmax.f32 %v277_v0, 0.0  ;;  %v262_v21 = vadd.f32 %v5236_v12, %v194_v17  ;;  %v665_v23 = vpack.c.bf16 %v613_v15, %v612_v14  ;;  %v614_v63 = vld [vmem:[#allocation2 + $0x121] sm:$0xff] }
  0x35   :  { %438 = vst.msk [vmem:[#allocation2 + $0x81] sm:$0xff] %vm348_vm1, %v293_v3  ;;  %v263_v22 = vadd.f32 %v5236_v12, %v195_v18  ;;  %v681_v26 = vpack.c.bf16 %v645_v20, %v644_v19  ;;  %v5028_v33 = vunpack.c.l.bf16 %v5138_v29  ;;  %v5029_v34 = vunpack.c.h.bf16 %v5138_v29  ;;  %v615_v0 = vld [vmem:[#allocation2 + $0x129] sm:$0xff] }
  0x36   :  { %453 = vst.msk [vmem:[#allocation2 + $0x139] sm:$0xff] %vm348_vm1, %v308_v4  ;;  %v326_v24 = vmax.f32 %v262_v21, 0.0  ;;  %v5061_v36 = vunpack.c.h.bf16 %v5146_v30  ;;  %v674_v38 = vpack.c.bf16 %v631_v28, %v630_v27  ;;  %v5124_v39 = vunpack.c.l.bf16 %v5162_v37  ;;  %v646_v5 = vld [vmem:[#allocation2 + $0x2d1] sm:$0xff] }
  0x37   :  { %454 = vst.msk [vmem:[#allocation2 + $0x141] sm:$0xff] %vm348_vm1, %v309_v6  ;;  %v327_v25 = vmax.f32 %v263_v22, 0.0  ;;  %v5125_v40 = vunpack.c.h.bf16 %v5162_v37  ;;  %v162_v41 = vmul.f32 %v5229_v9, %v5028_v33  ;;  %v163_v42 = vmul.f32 %v5229_v9, %v5029_v34  ;;  %v647_v6 = vld [vmem:[#allocation2 + $0x2d9] sm:$0xff]  ;;  %v5139_v19 = vld [vmem:[%s6879_s0 + $0x30] sm:$0xff]  }
  0x38   :  { %4721 = vmatmul.msk.bf16.gmra.mxu1 %vm348_vm1, %v664_v32  ;;  %485 = vst.msk [vmem:[#allocation2 + $0x2e9] sm:$0xff] %vm348_vm1, %v340_v13  ;;  %v599_v32 = vld [vmem:[#allocation2 + $0x69] sm:$0xff]  ;;  %v179_v44 = vmul.f32 %v5229_v9, %v5061_v36  ;;  %v210_v46 = vmul.f32 %v5229_v9, %v5124_v39  ;;  %v5096_v60 = vunpack.c.l.bf16 %v5155_v58  ;;  %v5097_v61 = vunpack.c.h.bf16 %v5155_v58 }
  0x39   :  { %486 = vst.msk [vmem:[#allocation2 + $0x2f1] sm:$0xff] %vm348_vm1, %v341_v16  ;;  %v5505_v45 = vpack.c.bf16 %v599_v32, %v598_v31  ;;  %v211_v47 = vmul.f32 %v5229_v9, %v5125_v40  ;;  %v230_v48 = vadd.f32 %v5236_v12, %v162_v41  ;;  %v666_v13 = vpack.c.bf16 %v615_v0, %v614_v63  ;;  %v632_v17 = vld [vmem:[#allocation2 + $0x229] sm:$0xff]  ;;  %v633_v18 = vld [vmem:[#allocation2 + $0x231] sm:$0xff] }
  0x3a   :  { %4737 = vmatmul.msk.bf16.gmra.mxu3 %vm348_vm1, %v680_v35  ;;  %471 = vst.msk [vmem:[#allocation2 + $0x241] sm:$0xff] %vm348_vm1, %v326_v24  ;;  %v5060_v35 = vunpack.c.l.bf16 %v5146_v30  ;;  %v247_v51 = vadd.f32 %v5236_v12, %v179_v44  ;;  %v278_v52 = vadd.f32 %v5236_v12, %v210_v46  ;;  %v196_v3 = vmul.f32 %v5229_v9, %v5096_v60  ;;  %v5147_v20 = vld [vmem:[%s6879_s0 + $0x70] sm:$0xff]  }
  0x3b   :  { %472 = vst.msk [vmem:[#allocation2 + $0x249] sm:$0xff] %vm348_vm1, %v327_v25  ;;  %v279_v53 = vadd.f32 %v5236_v12, %v211_v47  ;;  %v294_v54 = vmax.f32 %v230_v48, 0.0  ;;  %v197_v4 = vmul.f32 %v5229_v9, %v5097_v61  ;;  %v682_v16 = vpack.c.bf16 %v647_v6, %v646_v5  ;;  %v600_v21 = vld [vmem:[#allocation2 + $0x79] sm:$0xff]  ;;  %v5163_v27 = vld [vmem:[%s6879_s0 + $0xf0] sm:$0xff]  }
  0x3c   :  { %v178_v43 = vmul.f32 %v5229_v9, %v5060_v35  ;;  %v311_v59 = vmax.f32 %v247_v51, 0.0  ;;  %v342_v62 = vmax.f32 %v278_v52, 0.0  ;;  %v264_v10 = vadd.f32 %v5236_v12, %v196_v3  ;;  %v601_v22 = vld [vmem:[#allocation2 + $0x81] sm:$0xff]  ;;  %366 = vst.msk [vmem:[#allocation2 + $0x30] sm:$0x1] %vm364_vm3, %v5174_v1 }
  0x3d   :  { %4730 = vmatmul.msk.bf16.gmra.mxu2 %vm348_vm1, %v673_v49  ;;  %v231_v49 = vadd.f32 %v5236_v12, %v163_v42  ;;  %439 = vst.msk [vmem:[#allocation2 + $0x91] sm:$0xff] %vm348_vm1, %v294_v54  ;;  %v343_v2 = vmax.f32 %v279_v53, 0.0  ;;  %v265_v11 = vadd.f32 %v5236_v12, %v197_v4  ;;  %v5033_v24 = vunpack.c.h.bf16 %v5139_v19  ;;  %v4907_v4 = vld [vmem:[%s6878_s3 + $0xc] sm:$0x3] }
  0x3e   :  { %v246_v50 = vadd.f32 %v5236_v12, %v178_v43  ;;  %456 = vst.msk [vmem:[#allocation2 + $0x159] sm:$0xff] %vm348_vm1, %v311_v59  ;;  %v328_v14 = vmax.f32 %v264_v10, 0.0  ;;  %v5064_v25 = vunpack.c.l.bf16 %v5147_v20  ;;  %v675_v28 = vpack.c.bf16 %v633_v18, %v632_v17 }
  0x3f   :  { %v295_v55 = vmax.f32 %v231_v49, 0.0  ;;  %487 = vst.msk [vmem:[#allocation2 + $0x301] sm:$0xff] %vm348_vm1, %v342_v62  ;;  %v329_v15 = vmax.f32 %v265_v11, 0.0  ;;  %v5128_v29 = vunpack.c.l.bf16 %v5163_v27  ;;  %v5129_v30 = vunpack.c.h.bf16 %v5163_v27  ;;  %v616_v49 = vld [vmem:[#allocation2 + $0x139] sm:$0xff]  ;;  %v648_v52 = vld [vmem:[#allocation2 + $0x2e9] sm:$0xff] }
  0x40   :  { %4714 = vmatmul.msk.bf16.gmra.mxu0 %vm348_vm1, %v5462_v56  ;;  %v310_v57 = vmax.f32 %v246_v50, 0.0  ;;  %488 = vst.msk [vmem:[#allocation2 + $0x309] sm:$0xff] %vm348_vm1, %v343_v2  ;;  %v165_v32 = vmul.f32 %v5229_v9, %v5033_v24  ;;  %v180_v33 = vmul.f32 %v5229_v9, %v5064_v25  ;;  %v5548_v35 = vpack.c.bf16 %v601_v22, %v600_v21  ;;  %v617_v50 = vld [vmem:[#allocation2 + $0x141] sm:$0xff]  ;;  %v649_v53 = vld [vmem:[#allocation2 + $0x2f1] sm:$0xff]  ;;  %v4940_v27 = vld [vmem:[%s6878_s3 + $0xe] sm:$0x3] }
  0x41   :  { %440 = vst.msk [vmem:[#allocation2 + $0x99] sm:$0xff] %vm348_vm1, %v295_v55  ;;  %v212_v36 = vmul.f32 %v5229_v9, %v5128_v29  ;;  %v213_v37 = vmul.f32 %v5229_v9, %v5129_v30  ;;  %v683_v54 = vpack.c.bf16 %v649_v53, %v648_v52  ;;  %v634_v55 = vld [vmem:[#allocation2 + $0x241] sm:$0xff]  ;;  %v3141_v11 = vsel %vm784_vm0, %v4907_v4, 0  ;;  %v1226_v24 = vld [vmem:[#allocation2 + $0xa] sm:$0xff] }
  0x42   :  { %455 = vst.msk [vmem:[#allocation2 + $0x151] sm:$0xff] %vm348_vm1, %v310_v57  ;;  %v233_v39 = vadd.f32 %v5236_v12, %v165_v32  ;;  %v248_v40 = vadd.f32 %v5236_v12, %v180_v33  ;;  %v635_v57 = vld [vmem:[#allocation2 + $0x249] sm:$0xff]  ;;  %3150 = vmatpush.bf16.msra.mxu2 %v3141_v11  ;;  %v3571_v30 = vsel %vm784_vm0, %v4940_v27, 0  ;;  %v493_v33 = vld [vmem:[#allocation2] sm:$0xff]  ;;  %vm4300_vm4 = vcmask 27648  }
  0x43   :  { %473 = vst.msk [vmem:[#allocation2 + $0x259] sm:$0xff] %vm348_vm1, %v328_v14  ;;  %v280_v42 = vadd.f32 %v5236_v12, %v212_v36  ;;  %v281_v43 = vadd.f32 %v5236_v12, %v213_v37  ;;  %v676_v58 = vpack.c.bf16 %v635_v57, %v634_v55  ;;  %v4973_v32 = vld [vmem:[%s6878_s3 + $0x10] sm:$0x3]  ;;  %3580 = vmatpush.bf16.msra.mxu3 %v3571_v30  ;;  %v1656_v37 = vld [vmem:[#allocation2 + $0x20] sm:$0xff]  ;;  %vm4700_vm5 = vcmask 57344  }
  0x44   :  { %474 = vst.msk [vmem:[#allocation2 + $0x261] sm:$0xff] %vm348_vm1, %v329_v15  ;;  %v297_v46 = vmax.f32 %v233_v39, 0.0  ;;  %v312_v47 = vmax.f32 %v248_v40, 0.0  ;;  %v602_v59 = vld [vmem:[#allocation2 + $0x91] sm:$0xff]  ;;  %v4001_v36 = vsel %vm784_vm0, %v4973_v32, 0 }
  0x45   :  { %v345_v51 = vmax.f32 %v281_v43, 0.0  ;;  %v619_v63 = vld [vmem:[#allocation2 + $0x159] sm:$0xff]  ;;  %367 = vst.msk [vmem:[#allocation2 + $0x48] sm:$0x1] %vm364_vm3, %v5174_v1  ;;  %4010 = vmatpush.bf16.msra.mxu0 %v4001_v36 }
  0x46   :  { %442 = vst.msk [vmem:[#allocation2 + $0xb1] sm:$0xff] %vm348_vm1, %v297_v46  ;;  %v650_v0 = vld [vmem:[#allocation2 + $0x301] sm:$0xff] }
  0x47   :  { %457 = vst.msk [vmem:[#allocation2 + $0x169] sm:$0xff] %vm348_vm1, %v312_v47  ;;  %v651_v2 = vld [vmem:[#allocation2 + $0x309] sm:$0xff]  ;;  %v1664_v36 = vld [vmem:[#allocation2 + $0x80] sm:$0xff] }
  0x48   :  { %4722 = vmatmul.msk.bf16.gmra.mxu1 %vm348_vm1, %v665_v23  ;;  %v5032_v23 = vunpack.c.l.bf16 %v5139_v19  ;;  %490 = vst.msk [vmem:[#allocation2 + $0x321] sm:$0xff] %vm348_vm1, %v345_v51  ;;  %v603_v60 = vld [vmem:[#allocation2 + $0x99] sm:$0xff]  ;;  %v684_v5 = vpack.c.bf16 %v651_v2, %v650_v0  ;;  %v1660_v2 = vld [vmem:[#allocation2 + $0x50] sm:$0xff] }
  0x49   :  { %v5569_v61 = vpack.c.bf16 %v603_v60, %v602_v59  ;;  %v618_v62 = vld [vmem:[#allocation2 + $0x151] sm:$0xff]  ;;  %368 = vst.msk [vmem:[#allocation2 + $0x60] sm:$0x1] %vm364_vm3, %v5174_v1 }
  0x4a   :  { %4738 = vmatmul.msk.bf16.gmra.mxu3 %vm348_vm1, %v681_v26  ;;  %v5065_v26 = vunpack.c.h.bf16 %v5147_v20  ;;  %v164_v31 = vmul.f32 %v5229_v9, %v5032_v23  ;;  %v668_v3 = vpack.c.bf16 %v619_v63, %v618_v62  ;;  %369 = vst.msk [vmem:[#allocation2 + $0x78] sm:$0x1] %vm364_vm3, %v5174_v1  ;;  %v636_v6 = vld [vmem:[#allocation2 + $0x259] sm:$0xff]  ;;  %v1225_v23 = vld [vmem:[#allocation2 + $0x2] sm:$0xff] }
  0x4b   :  { %370 = vst.msk [vmem:[#allocation2 + $0x90] sm:$0x1] %vm364_vm3, %v5174_v1  ;;  %v637_v10 = vld [vmem:[#allocation2 + $0x261] sm:$0xff]  ;;  %v1289_v25 = vpack.c.bf16 %v1226_v24, %v1225_v23  ;;  %v1658_v51 = vld [vmem:[#allocation2 + $0x38] sm:$0xff] }
  0x4c   :  { %v181_v34 = vmul.f32 %v5229_v9, %v5065_v26  ;;  %v344_v9 = vmax.f32 %v280_v42, 0.0  ;;  %371 = vst.msk [vmem:[#allocation2 + $0xa8] sm:$0x1] %vm364_vm3, %v5174_v1  ;;  %v1227_v42 = vld [vmem:[#allocation2 + $0x1a] sm:$0xff]  ;;  %v1659_v0 = vld [vmem:[#allocation2 + $0x48] sm:$0xff] }
  0x4d   :  { %4731 = vmatmul.msk.bf16.gmra.mxu2 %vm348_vm1, %v674_v38  ;;  %v232_v38 = vadd.f32 %v5236_v12, %v164_v31  ;;  %372 = vst.msk [vmem:[#allocation2 + $0xc0] sm:$0x1] %vm364_vm3, %v5174_v1  ;;  %v605_v15 = vld [vmem:[#allocation2 + $0xb1] sm:$0xff] }
  0x4e   :  { %v249_v41 = vadd.f32 %v5236_v12, %v181_v34  ;;  %v667_v12 = vpack.c.bf16 %v617_v50, %v616_v49  ;;  %489 = vst.msk [vmem:[#allocation2 + $0x319] sm:$0xff] %vm348_vm1, %v344_v9  ;;  %v620_v17 = vld [vmem:[#allocation2 + $0x169] sm:$0xff] }
  0x4f   :  { %v296_v44 = vmax.f32 %v232_v38, 0.0  ;;  %373 = vst.msk [vmem:[#allocation2 + $0xd8] sm:$0x1] %vm364_vm3, %v5174_v1  ;;  %v653_v20 = vld [vmem:[#allocation2 + $0x321] sm:$0xff]  ;;  %v1657_v50 = vld [vmem:[#allocation2 + $0x30] sm:$0xff] }
  0x50   :  { %4715 = vmatmul.msk.bf16.gmra.mxu0 %vm348_vm1, %v5505_v45  ;;  %v313_v48 = vmax.f32 %v249_v41, 0.0  ;;  %374 = vst.msk [vmem:[#allocation2 + $0xf0] sm:$0x1] %vm364_vm3, %v5174_v1  ;;  %v494_v34 = vld [vmem:[#allocation2 + $0x8] sm:$0xff]  ;;  %v1720_v53 = vpack.c.bf16 %v1658_v51, %v1657_v50 }
  0x51   :  { %441 = vst.msk [vmem:[#allocation2 + $0xa9] sm:$0xff] %vm348_vm1, %v296_v44  ;;  %v557_v38 = vpack.c.bf16 %v494_v34, %v493_v33  ;;  %v1663_v34 = vld [vmem:[#allocation2 + $0x78] sm:$0xff] }
  0x52   :  { %458 = vst.msk [vmem:[#allocation2 + $0x171] sm:$0xff] %vm348_vm1, %v313_v48 }
  0x53   :  { %375 = vst.msk [vmem:[#allocation2 + $0x108] sm:$0x1] %vm364_vm3, %v5174_v1 }
  0x54   :  { %376 = vst.msk [vmem:[#allocation2 + $0x120] sm:$0x1] %vm364_vm3, %v5174_v1 }
  0x55   :  { %377 = vst.msk [vmem:[#allocation2 + $0x138] sm:$0x1] %vm364_vm3, %v5174_v1  ;;  %v652_v19 = vld [vmem:[#allocation2 + $0x319] sm:$0xff] }
  0x56   :  { %378 = vst.msk [vmem:[#allocation2 + $0x150] sm:$0x1] %vm364_vm3, %v5174_v1  ;;  %v685_v22 = vpack.c.bf16 %v653_v20, %v652_v19  ;;  %v1662_v19 = vld [vmem:[#allocation2 + $0x68] sm:$0xff] }
  0x57   :  { %379 = vst.msk [vmem:[#allocation2 + $0x168] sm:$0x1] %vm364_vm3, %v5174_v1 }
  0x58   :  { %4723 = vmatmul.msk.bf16.gmra.mxu1 %vm348_vm1, %v666_v13  ;;  %v677_v13 = vpack.c.bf16 %v637_v10, %v636_v6  ;;  %v604_v14 = vld [vmem:[#allocation2 + $0xa9] sm:$0xff]  ;;  %380 = vst.msk [vmem:[#allocation2 + $0x180] sm:$0x1] %vm364_vm3, %v5174_v1 }
  0x59   :  { %381 = vst.msk [vmem:[#allocation2 + $0x1c8] sm:$0x1] %vm364_vm3, %v5174_v1  ;;  %v621_v18 = vld [vmem:[#allocation2 + $0x171] sm:$0xff] }
  0x5a   :  { %4739 = vmatmul.msk.bf16.gmra.mxu3 %vm348_vm1, %v682_v16  ;;  %v5604_v16 = vpack.c.bf16 %v605_v15, %v604_v14  ;;  %382 = vst.msk [vmem:[#allocation2 + $0x1e0] sm:$0x1] %vm364_vm3, %v5174_v1  ;;  %v5625_v21 = vpack.c.bf16 %v621_v18, %v620_v17  ;;  %v1231_v10 = vld [vmem:[#allocation2 + $0x4a] sm:$0xff]  ;;  %v1661_v18 = vld [vmem:[#allocation2 + $0x60] sm:$0xff] }
  0x5b   :  { %383 = vst.msk [vmem:[#allocation2 + $0x1f8] sm:$0x1] %vm364_vm3, %v5174_v1  ;;  %v1722_v23 = vpack.c.bf16 %v1662_v19, %v1661_v18 }
  0x5c   :  { %384 = vst.msk [vmem:[#allocation2 + $0x210] sm:$0x1] %vm364_vm3, %v5174_v1 }
  0x5d   :  { %4732 = vmatmul.msk.bf16.gmra.mxu2 %vm348_vm1, %v675_v28  ;;  %385 = vst.msk [vmem:[#allocation2 + $0x228] sm:$0x1] %vm364_vm3, %v5174_v1  ;;  %v4874_v28 = vld [vmem:[%s6878_s3 + $0xa] sm:$0x3] }
  0x5e   :  { %386 = vst.msk [vmem:[#allocation2 + $0x240] sm:$0x1] %vm364_vm3, %v5174_v1  ;;  %v2710_v31 = vsel %vm784_vm0, %v4874_v28, 0 }
  0x5f   :  { %387 = vst.msk [vmem:[#allocation2 + $0x258] sm:$0x1] %vm364_vm3, %v5174_v1  ;;  %2719 = vmatpush.bf16.msra.mxu1 %v2710_v31 }
  0x60   :  { %4716 = vmatmul.msk.bf16.gmra.mxu0 %vm348_vm1, %v5548_v35  ;;  %388 = vst.msk [vmem:[#allocation2 + $0x270] sm:$0x1] %vm364_vm3, %v5174_v1 }
  0x61   :  { %389 = vst.msk [vmem:[#allocation2 + $0x288] sm:$0x1] %vm364_vm3, %v5174_v1 }
  0x62   :  { %390 = vst.msk [vmem:[#allocation2 + $0x2a0] sm:$0x1] %vm364_vm3, %v5174_v1 }
  0x63   :  { %391 = vst.msk [vmem:[#allocation2 + $0x2b8] sm:$0x1] %vm364_vm3, %v5174_v1 }
  0x64   :  { %392 = vst.msk [vmem:[#allocation2 + $0x2d0] sm:$0x1] %vm364_vm3, %v5174_v1 }
  0x65   :  { %393 = vst.msk [vmem:[#allocation2 + $0x2e8] sm:$0x1] %vm364_vm3, %v5174_v1 }
  0x66   :  { %394 = vst.msk [vmem:[#allocation2 + $0x300] sm:$0x1] %vm364_vm3, %v5174_v1 }
  0x67   :  { %395 = vst.msk [vmem:[#allocation2 + $0x318] sm:$0x1] %vm364_vm3, %v5174_v1 }
  0x68   :  { %4724 = vmatmul.msk.bf16.gmra.mxu1 %vm348_vm1, %v667_v12  ;;  %396 = vst.msk [vmem:[#allocation2 + $0x330] sm:$0x1] %vm364_vm3, %v5174_v1 }
  0x69   :  { %397 = vst.msk [vmem:[#allocation2 + $0x29] sm:$0x1] %vm364_vm3, %v5174_v1 }
  0x6a   :  { %4740 = vmatmul.msk.bf16.gmra.mxu3 %vm348_vm1, %v683_v54  ;;  %398 = vst.msk [vmem:[#allocation2 + $0x41] sm:$0x1] %vm364_vm3, %v5174_v1  ;;  %v1229_v54 = vld [vmem:[#allocation2 + $0x32] sm:$0xff] }
  0x6b   :  { %399 = vst.msk [vmem:[#allocation2 + $0x59] sm:$0x1] %vm364_vm3, %v5174_v1 }
  0x6c   :  { %400 = vst.msk [vmem:[#allocation2 + $0x71] sm:$0x1] %vm364_vm3, %v5174_v1 }
  0x6d   :  { %4733 = vmatmul.msk.bf16.gmra.mxu2 %vm348_vm1, %v676_v58  ;;  %401 = vst.msk [vmem:[#allocation2 + $0x89] sm:$0x1] %vm364_vm3, %v5174_v1 }
  0x6e   :  { %402 = vst.msk [vmem:[#allocation2 + $0xa1] sm:$0x1] %vm364_vm3, %v5174_v1 }
  0x6f   :  { %403 = vst.msk [vmem:[#allocation2 + $0xb9] sm:$0x1] %vm364_vm3, %v5174_v1 }
  0x70   :  { %4717 = vmatmul.msk.bf16.gmra.mxu0 %vm348_vm1, %v5569_v61  ;;  %404 = vst.msk [vmem:[#allocation2 + $0xd1] sm:$0x1] %vm364_vm3, %v5174_v1  ;;  %v1228_v43 = vld [vmem:[#allocation2 + $0x22] sm:$0xff] }
  0x71   :  { %405 = vst.msk [vmem:[#allocation2 + $0xe9] sm:$0x1] %vm364_vm3, %v5174_v1  ;;  %v1290_v46 = vpack.c.bf16 %v1228_v43, %v1227_v42  ;;  %v1230_v55 = vld [vmem:[#allocation2 + $0x3a] sm:$0xff] }
  0x72   :  { %406 = vst.msk [vmem:[#allocation2 + $0x101] sm:$0x1] %vm364_vm3, %v5174_v1  ;;  %v1291_v58 = vpack.c.bf16 %v1230_v55, %v1229_v54  ;;  %v1232_v11 = vld [vmem:[#allocation2 + $0x52] sm:$0xff]  ;;  %v1235_v42 = vld [vmem:[#allocation2 + $0x7a] sm:$0xff] }
  0x73   :  { %407 = vst.msk [vmem:[#allocation2 + $0x119] sm:$0x1] %vm364_vm3, %v5174_v1  ;;  %v1234_v27 = vld [vmem:[#allocation2 + $0x6a] sm:$0xff] }
  0x74   :  { %408 = vst.msk [vmem:[#allocation2 + $0x131] sm:$0x1] %vm364_vm3, %v5174_v1  ;;  %v1236_v43 = vld [vmem:[#allocation2 + $0x82] sm:$0xff]  ;;  %v1665_v55 = vld [vmem:[#allocation2 + $0x90] sm:$0xff] }
  0x75   :  { %409 = vst.msk [vmem:[#allocation2 + $0x149] sm:$0x1] %vm364_vm3, %v5174_v1  ;;  %v1294_v50 = vpack.c.bf16 %v1236_v43, %v1235_v42 }
  0x76   :  { %410 = vst.msk [vmem:[#allocation2 + $0x161] sm:$0x1] %vm364_vm3, %v5174_v1 }
  0x77   :  { %411 = vst.msk [vmem:[#allocation2 + $0x179] sm:$0x1] %vm364_vm3, %v5174_v1 }
  0x78   :  { %4725 = vmatmul.msk.bf16.gmra.mxu1 %vm348_vm1, %v668_v3  ;;  %412 = vst.msk [vmem:[#allocation2 + $0x191] sm:$0x1] %vm364_vm3, %v5174_v1 }
  0x79   :  { %413 = vst.msk [vmem:[#allocation2 + $0x1d9] sm:$0x1] %vm364_vm3, %v5174_v1 }
  0x7a   :  { %4741 = vmatmul.msk.bf16.gmra.mxu3 %vm348_vm1, %v684_v5  ;;  %414 = vst.msk [vmem:[#allocation2 + $0x1f1] sm:$0x1] %vm364_vm3, %v5174_v1  ;;  %v1721_v5 = vpack.c.bf16 %v1660_v2, %v1659_v0 }
  0x7b   :  { %415 = vst.msk [vmem:[#allocation2 + $0x209] sm:$0x1] %vm364_vm3, %v5174_v1 }
  0x7c   :  { %416 = vst.msk [vmem:[#allocation2 + $0x221] sm:$0x1] %vm364_vm3, %v5174_v1 }
  0x7d   :  { %4734 = vmatmul.msk.bf16.gmra.mxu2 %vm348_vm1, %v677_v13  ;;  %417 = vst.msk [vmem:[#allocation2 + $0x239] sm:$0x1] %vm364_vm3, %v5174_v1 }
  0x7e   :  { %418 = vst.msk [vmem:[#allocation2 + $0x251] sm:$0x1] %vm364_vm3, %v5174_v1 }
  0x7f   :  { %419 = vst.msk [vmem:[#allocation2 + $0x269] sm:$0x1] %vm364_vm3, %v5174_v1 }
  0x80   :  { %4718 = vmatmul.msk.bf16.gmra.mxu0 %vm348_vm1, %v5604_v16  ;;  %420 = vst.msk [vmem:[#allocation2 + $0x281] sm:$0x1] %vm364_vm3, %v5174_v1 }
  0x81   :  { %421 = vst.msk [vmem:[#allocation2 + $0x299] sm:$0x1] %vm364_vm3, %v5174_v1 }
  0x82   :  { %422 = vst.msk [vmem:[#allocation2 + $0x2b1] sm:$0x1] %vm364_vm3, %v5174_v1 }
  0x83   :  { %423 = vst.msk [vmem:[#allocation2 + $0x2c9] sm:$0x1] %vm364_vm3, %v5174_v1 }
  0x84   :  { %424 = vst.msk [vmem:[#allocation2 + $0x2e1] sm:$0x1] %vm364_vm3, %v5174_v1 }
  0x85   :  { %425 = vst.msk [vmem:[#allocation2 + $0x2f9] sm:$0x1] %vm364_vm3, %v5174_v1 }
  0x86   :  { %426 = vst.msk [vmem:[#allocation2 + $0x311] sm:$0x1] %vm364_vm3, %v5174_v1 }
  0x87   :  { %427 = vst.msk [vmem:[#allocation2 + $0x329] sm:$0x1] %vm364_vm3, %v5174_v1 }
  0x88   :  { %4726 = vmatmul.msk.bf16.gmra.mxu1 %vm348_vm1, %v5625_v21  ;;  %428 = vst.msk [vmem:[#allocation2 + $0x341] sm:$0x1] %vm364_vm3, %v5174_v1  ;;  %v1292_v1 = vpack.c.bf16 %v1232_v11, %v1231_v10  ;;  %v1237_v11 = vld [vmem:[#allocation2 + $0x92] sm:$0xff] }
  0x8a   :  { %4742 = vmatmul.msk.bf16.gmra.mxu3 %vm348_vm1, %v685_v22 }
  0x8d   :  { %4776 = vmatmul.msk.bf16.vlgmr.msrb.gmra.mxu2 %vm348_vm1, %v1289_v25  ;;  %v5649_v26 = vpop.f32.mrf.mxu0  ;;  %v1233_v25 = vld [vmem:[#allocation2 + $0x62] sm:$0xff] }
  0x8e   :  { %v1293_v30 = vpack.c.bf16 %v1234_v27, %v1233_v25 }
  0x90   :  { %v5663_v29 = vpop.f32.mrf.mxu2  ;;  %4842 = vmatmul.msk.bf16.vlgmr.msrb.gmra.mxu0 %vm348_vm1, %v5364_v8  ;;  %v1655_v8 = vld [vmem:[#allocation2 + $0x18] sm:$0xff] }
  0x91   :  { %v1719_v41 = vpack.c.bf16 %v1656_v37, %v1655_v8 }
  0x95   :  { %v5683_v39 = vpop.f32.mrf.mxu1  ;;  %v5687_v40 = vpop.f32.mrf.mxu0 }
  0x98   :  { %4743 = vmatmul.msk.bf16.vlgmr.msrb.gmra.mxu1 %vm348_vm1, %v557_v38  ;;  %v5696_v44 = vpop.f32.mrf.mxu2  ;;  %v1723_v38 = vpack.c.bf16 %v1664_v36, %v1663_v34  ;;  %v1668_v34 = vld [vmem:[#allocation2 + $0xb0] sm:$0xff] }
  0x9a   :  { %4809 = vmatmul.msk.bf16.vlgmr.msrb.gmra.mxu3 %vm348_vm1, %v1719_v41 }
  0x9d   :  { %v5709_v47 = vpop.f32.mrf.mxu3  ;;  %v5711_v48 = vpop.f32.mrf.mxu1  ;;  %4777 = vmatmul.msk.bf16.gmra.mxu2 %vm348_vm1, %v1290_v46 }
  0x9e   :  { %6884 = vst [vmem:[#allocation3_spill] sm:$0xff] %v5709_v47  ;;  %v5716_v9 = vpop.f32.mrf.mxu0 }
  0xa0   :  { %v5722_v49 = vpop.f32.mrf.mxu2  ;;  %4843 = vmatmul.msk.bf16.gmra.mxu0 %vm348_vm1, %v5421_v7 }
  0xa5   :  { %v5736_v52 = vpop.f32.mrf.mxu3  ;;  %v5738_v7 = vpop.f32.mrf.mxu1 }
  0xa6   :  { %6885 = vst [vmem:[#allocation4_spill] sm:$0xff] %v5736_v52  ;;  %v5742_v12 = vpop.f32.mrf.mxu0 }
  0xa8   :  { %4744 = vmatmul.msk.bf16.gmra.mxu1 %vm348_vm1, %v1719_v41  ;;  %v5749_v57 = vpop.f32.mrf.mxu2 }
  0xaa   :  { %4810 = vmatmul.msk.bf16.gmra.mxu3 %vm348_vm1, %v1720_v53 }
  0xad   :  { %v5762_v59 = vpop.f32.mrf.mxu3  ;;  %v5764_v60 = vpop.f32.mrf.mxu1  ;;  %4778 = vmatmul.msk.bf16.gmra.mxu2 %vm348_vm1, %v1291_v58  ;;  %v1666_v58 = vld [vmem:[#allocation2 + $0x98] sm:$0xff] }
  0xae   :  { %6886 = vst [vmem:[#allocation5_spill] sm:$0xff] %v5762_v59  ;;  %v5769_v62 = vpop.f32.mrf.mxu0 }
  0xb0   :  { %v5773_v63 = vpop.f32.mrf.mxu2  ;;  %4844 = vmatmul.msk.bf16.gmra.mxu0 %vm348_vm1, %v5462_v56 }
  0xb5   :  { %v5777_v3 = vpop.f32.mrf.mxu3  ;;  %v5779_v4 = vpop.f32.mrf.mxu1 }
  0xb6   :  { %6887 = vst [vmem:[#allocation6_spill] sm:$0xff] %v5777_v3  ;;  %v5781_v6 = vpop.f32.mrf.mxu0  ;;  %v1671_v3 = vld [vmem:[#allocation2 + $0xd8] sm:$0xff] }
  0xb8   :  { %4745 = vmatmul.msk.bf16.gmra.mxu1 %vm348_vm1, %v1720_v53  ;;  %v5784_v13 = vpop.f32.mrf.mxu2 }
  0xba   :  { %4811 = vmatmul.msk.bf16.gmra.mxu3 %vm348_vm1, %v1721_v5 }
  0xbd   :  { %v5787_v14 = vpop.f32.mrf.mxu3  ;;  %v5789_v56 = vpop.f32.mrf.mxu1  ;;  %4779 = vmatmul.msk.bf16.gmra.mxu2 %vm348_vm1, %v1292_v1  ;;  %v1238_v1 = vld [vmem:[#allocation2 + $0x9a] sm:$0xff] }
  0xbe   :  { %6888 = vst [vmem:[#allocation7_spill] sm:$0xff] %v5787_v14  ;;  %v5792_v15 = vpop.f32.mrf.mxu0  ;;  %v1295_v19 = vpack.c.bf16 %v1238_v1, %v1237_v11  ;;  %v2099_v1 = vld [vmem:[#allocation2 + $0xc1] sm:$0xff] }
  0xc0   :  { %v5794_v17 = vpop.f32.mrf.mxu2  ;;  %4845 = vmatmul.msk.bf16.gmra.mxu0 %vm348_vm1, %v5505_v45 }
  0xc5   :  { %v5798_v20 = vpop.f32.mrf.mxu3  ;;  %v5800_v22 = vpop.f32.mrf.mxu1 }
  0xc6   :  { %6889 = vst [vmem:[#allocation8_spill] sm:$0xff] %v5798_v20  ;;  %v5802_v24 = vpop.f32.mrf.mxu0  ;;  %v2102_v20 = vld [vmem:[#allocation2 + $0xe1] sm:$0xff] }
  0xc8   :  { %4746 = vmatmul.msk.bf16.gmra.mxu1 %vm348_vm1, %v1721_v5  ;;  %v5805_v28 = vpop.f32.mrf.mxu2  ;;  %v1724_v5 = vpack.c.bf16 %v1666_v58, %v1665_v55  ;;  %v1240_v55 = vld [vmem:[#allocation2 + $0xb2] sm:$0xff] }
  0xca   :  { %4812 = vmatmul.msk.bf16.gmra.mxu3 %vm348_vm1, %v1722_v23 }
  0xcd   :  { %v5808_v31 = vpop.f32.mrf.mxu3  ;;  %v5810_v45 = vpop.f32.mrf.mxu1  ;;  %4780 = vmatmul.msk.bf16.gmra.mxu2 %vm348_vm1, %v1293_v30  ;;  %v1667_v30 = vld [vmem:[#allocation2 + $0xa8] sm:$0xff] }
  0xce   :  { %6890 = vst [vmem:[#allocation9_spill] sm:$0xff] %v5808_v31  ;;  %v5813_v32 = vpop.f32.mrf.mxu0  ;;  %v1725_v42 = vpack.c.bf16 %v1668_v34, %v1667_v30  ;;  %v2101_v31 = vld [vmem:[#allocation2 + $0xd9] sm:$0xff] }
  0xd0   :  { %v5815_v33 = vpop.f32.mrf.mxu2  ;;  %4846 = vmatmul.msk.bf16.gmra.mxu0 %vm348_vm1, %v5548_v35 }
  0xd5   :  { %v5819_v8 = vpop.f32.mrf.mxu3  ;;  %v5821_v37 = vpop.f32.mrf.mxu1 }
  0xd6   :  { %6891 = vst [vmem:[#allocation10_spill] sm:$0xff] %v5819_v8  ;;  %v5823_v41 = vpop.f32.mrf.mxu0 }
  0xd8   :  { %4747 = vmatmul.msk.bf16.gmra.mxu1 %vm348_vm1, %v1722_v23  ;;  %v5826_v46 = vpop.f32.mrf.mxu2 }
  0xd9   :  { %6892 = vst [vmem:[#allocation11_spill] sm:$0xff] %v5826_v46 }
  0xda   :  { %4813 = vmatmul.msk.bf16.gmra.mxu3 %vm348_vm1, %v1723_v38 }
  0xdd   :  { %v5829_v51 = vpop.f32.mrf.mxu3  ;;  %v5831_v35 = vpop.f32.mrf.mxu1  ;;  %4781 = vmatmul.msk.bf16.gmra.mxu2 %vm348_vm1, %v1294_v50  ;;  %v1239_v50 = vld [vmem:[#allocation2 + $0xaa] sm:$0xff] }
  0xde   :  { %6893 = vst [vmem:[#allocation12_spill] sm:$0xff] %v5829_v51  ;;  %v5834_v53 = vpop.f32.mrf.mxu0  ;;  %v1296_v11 = vpack.c.bf16 %v1240_v55, %v1239_v50 }
  0xe0   :  { %v5836_v54 = vpop.f32.mrf.mxu2  ;;  %4847 = vmatmul.msk.bf16.gmra.mxu0 %vm348_vm1, %v5569_v61 }
  0xe1   :  { %6894 = vst [vmem:[#allocation13_spill] sm:$0xff] %v5836_v54 }
  0xe5   :  { %v5840_v0 = vpop.f32.mrf.mxu3  ;;  %v5842_v2 = vpop.f32.mrf.mxu1 }
  0xe6   :  { %6895 = vst [vmem:[#allocation14_spill] sm:$0xff] %v5840_v0  ;;  %v5844_v10 = vpop.f32.mrf.mxu0  ;;  %v1670_v0 = vld [vmem:[#allocation2 + $0xc8] sm:$0xff] }
  0xe8   :  { %4748 = vmatmul.msk.bf16.gmra.mxu1 %vm348_vm1, %v1723_v38  ;;  %v5847_v18 = vpop.f32.mrf.mxu2 }
  0xe9   :  { %6896 = vst [vmem:[#allocation15_spill] sm:$0xff] %v5847_v18 }
  0xea   :  { %4814 = vmatmul.msk.bf16.gmra.mxu3 %vm348_vm1, %v1724_v5 }
  0xed   :  { %v5850_v23 = vpop.f32.mrf.mxu3  ;;  %v5852_v61 = vpop.f32.mrf.mxu1  ;;  %4782 = vmatmul.msk.bf16.gmra.mxu2 %vm348_vm1, %v1295_v19  ;;  %v2100_v19 = vld [vmem:[#allocation2 + $0xc9] sm:$0xff] }
  0xee   :  { %6897 = vst [vmem:[#allocation16_spill] sm:$0xff] %v5850_v23  ;;  %v5855_v25 = vpop.f32.mrf.mxu0 }
  0xf0   :  { %v5857_v27 = vpop.f32.mrf.mxu2  ;;  %4848 = vmatmul.msk.bf16.gmra.mxu0 %vm348_vm1, %v5604_v16  ;;  %v2156_v16 = vpack.c.bf16 %v2100_v19, %v2099_v1  ;;  %v1241_v19 = vld [vmem:[#allocation2 + $0xc2] sm:$0xff] }
  0xf1   :  { %6898 = vst [vmem:[#allocation17_spill] sm:$0xff] %v5857_v27 }
  0xf5   :  { %v5861_v36 = vpop.f32.mrf.mxu3  ;;  %v5863_v38 = vpop.f32.mrf.mxu1 }
  0xf6   :  { %6899 = vst [vmem:[#allocation18_spill] sm:$0xff] %v5861_v36  ;;  %v5865_v43 = vpop.f32.mrf.mxu0 }
  0xf8   :  { %4749 = vmatmul.msk.bf16.gmra.mxu1 %vm348_vm1, %v1724_v5  ;;  %v5868_v58 = vpop.f32.mrf.mxu2  ;;  %v1669_v5 = vld [vmem:[#allocation2 + $0xc0] sm:$0xff] }
  0xf9   :  { %6900 = vst [vmem:[#allocation19_spill] sm:$0xff] %v5868_v58  ;;  %v1726_v51 = vpack.c.bf16 %v1670_v0, %v1669_v5  ;;  %v2104_v58 = vld [vmem:[#allocation2 + $0xf9] sm:$0xff] }
  0xfa   :  { %4815 = vmatmul.msk.bf16.gmra.mxu3 %vm348_vm1, %v1725_v42 }
  0xfd   :  { %v5871_v23 = vpop.f32.mrf.mxu3  ;;  %v5873_v36 = vpop.f32.mrf.mxu1  ;;  %4783 = vmatmul.msk.bf16.gmra.mxu2 %vm348_vm1, %v1296_v11 }
  0xfe   :  { %6901 = vst [vmem:[#allocation20_spill] sm:$0xff] %v5871_v23  ;;  %v5876_v30 = vpop.f32.mrf.mxu0  ;;  %v1242_v23 = vld [vmem:[#allocation2 + $0xca] sm:$0xff] }
  0xff   :  { %v1297_v8 = vpack.c.bf16 %v1242_v23, %v1241_v19 }
 0x100   :  { %v5878_v34 = vpop.f32.mrf.mxu2  ;;  %4849 = vmatmul.msk.bf16.gmra.mxu0 %vm348_vm1, %v2156_v16  ;;  %v2157_v16 = vpack.c.bf16 %v2102_v20, %v2101_v31  ;;  %v1243_v20 = vld [vmem:[#allocation2 + $0xda] sm:$0xff]  ;;  %v1244_v31 = vld [vmem:[#allocation2 + $0xe2] sm:$0xff] }
 0x101   :  { %6902 = vst [vmem:[#allocation21_spill] sm:$0xff] %v5878_v34  ;;  %v2103_v34 = vld [vmem:[#allocation2 + $0xf1] sm:$0xff] }
 0x105   :  { %v5881_v50 = vpop.f32.mrf.mxu3  ;;  %v5883_v55 = vpop.f32.mrf.mxu1 }
 0x106   :  { %6903 = vst [vmem:[#allocation22_spill] sm:$0xff] %v5881_v50  ;;  %v5885_v1 = vpop.f32.mrf.mxu0 }
 0x108   :  { %4750 = vmatmul.msk.bf16.gmra.mxu1 %vm348_vm1, %v1725_v42  ;;  %v5888_v11 = vpop.f32.mrf.mxu2  ;;  %v1672_v42 = vld [vmem:[#allocation2 + $0xe0] sm:$0xff] }
 0x109   :  { %6904 = vst [vmem:[#allocation23_spill] sm:$0xff] %v5888_v11  ;;  %v1727_v52 = vpack.c.bf16 %v1672_v42, %v1671_v3 }
 0x10a   :  { %4816 = vmatmul.msk.bf16.gmra.mxu3 %vm348_vm1, %v1726_v51 }
 0x10d   :  { %v5891_v14 = vpop.f32.mrf.mxu3  ;;  %v5893_v50 = vpop.f32.mrf.mxu1  ;;  %4784 = vmatmul.msk.bf16.gmra.mxu2 %vm348_vm1, %v1297_v8  ;;  %v1298_v8 = vpack.c.bf16 %v1244_v31, %v1243_v20 }
 0x10e   :  { %6905 = vst [vmem:[#allocation24_spill] sm:$0xff] %v5891_v14  ;;  %v2291_v0 = vpop.f32.mrf.mxu0 }
 0x110   :  { %v1431_v5 = vpop.f32.mrf.mxu2  ;;  %4850 = vmatmul.msk.bf16.gmra.mxu0 %vm348_vm1, %v2157_v16  ;;  %v2158_v16 = vpack.c.bf16 %v2104_v58, %v2103_v34 }
 0x115   :  { %v5897_v59 = vpop.f32.mrf.mxu3  ;;  %v1065_v23 = vpop.f32.mrf.mxu1 }
 0x116   :  { %6906 = vst [vmem:[#allocation25_spill] sm:$0xff] %v5897_v59  ;;  %v1066_v19 = vadd.f32 %v1065_v23, %v5649_v26  ;;  %v2293_v47 = vpop.f32.mrf.mxu0 }
 0x118   :  { %4751 = vmatmul.msk.bf16.gmra.mxu1 %vm348_vm1, %v1726_v51  ;;  %v1433_v14 = vpop.f32.mrf.mxu2  ;;  %v1591_v11 = vadd.f32 %v1431_v5, %v1066_v19  ;;  %v1673_v5 = vld [vmem:[#allocation2 + $0xf0] sm:$0xff]  ;;  %v1674_v19 = vld [vmem:[#allocation2 + $0xf8] sm:$0xff] }
 0x119   :  { %v1728_v34 = vpack.c.bf16 %v1674_v19, %v1673_v5 }
 0x11a   :  { %4817 = vmatmul.msk.bf16.gmra.mxu3 %vm348_vm1, %v1727_v52 }
 0x11d   :  { %v1861_v27 = vpop.f32.mrf.mxu3  ;;  %v1067_v18 = vpop.f32.mrf.mxu1  ;;  %4785 = vmatmul.msk.bf16.gmra.mxu2 %vm348_vm1, %v1298_v8  ;;  %v1245_v8 = vld [vmem:[#allocation2 + $0xf2] sm:$0xff] }
 0x11e   :  { %v2021_v59 = vadd.f32 %v1861_v27, %v1591_v11  ;;  %v1068_v26 = vadd.f32 %v1067_v18, %v5687_v40  ;;  %v2296_v3 = vpop.f32.mrf.mxu0  ;;  %v1246_v27 = vld [vmem:[#allocation2 + $0xfa] sm:$0xff] }
 0x11f   :  { %v1299_v11 = vpack.c.bf16 %v1246_v27, %v1245_v8 }
 0x120   :  { %v1436_v42 = vpop.f32.mrf.mxu2  ;;  %v1592_v23 = vadd.f32 %v1433_v14, %v1068_v26  ;;  %4851 = vmatmul.msk.bf16.gmra.mxu0 %vm348_vm1, %v2158_v16  ;;  %v5905_v51 = vadd.f32 %v2291_v0, %v2021_v59  ;;  %v2105_v59 = vld [vmem:[#allocation2 + $0x109] sm:$0xff]  ;;  %v2106_v0 = vld [vmem:[#allocation2 + $0x111] sm:$0xff] }
 0x121   :  { %v2159_v16 = vpack.c.bf16 %v2106_v0, %v2105_v59 }
 0x125   :  { %v1863_v20 = vpop.f32.mrf.mxu3  ;;  %v1070_v31 = vpop.f32.mrf.mxu1 }
 0x126   :  { %v2022_v54 = vadd.f32 %v1863_v20, %v1592_v23  ;;  %v1071_v58 = vadd.f32 %v1070_v31, %v5716_v9  ;;  %v2298_v46 = vpop.f32.mrf.mxu0 }
 0x128   :  { %4752 = vmatmul.msk.bf16.gmra.mxu1 %vm348_vm1, %v1727_v52  ;;  %v1438_v40 = vpop.f32.mrf.mxu2  ;;  %v1593_v18 = vadd.f32 %v1436_v42, %v1071_v58  ;;  %v5909_v14 = vadd.f32 %v2293_v47, %v2022_v54  ;;  %v1675_v54 = vld [vmem:[#allocation2 + $0x108] sm:$0xff]  ;;  %v1676_v42 = vld [vmem:[#allocation2 + $0x110] sm:$0xff] }
 0x129   :  { %v1729_v59 = vpack.c.bf16 %v1676_v42, %v1675_v54 }
 0x12a   :  { %4818 = vmatmul.msk.bf16.gmra.mxu3 %vm348_vm1, %v1728_v34 }
 0x12d   :  { %v1866_v26 = vpop.f32.mrf.mxu3  ;;  %v1072_v23 = vpop.f32.mrf.mxu1  ;;  %4786 = vmatmul.msk.bf16.gmra.mxu2 %vm348_vm1, %v1299_v11  ;;  %v1247_v11 = vld [vmem:[#allocation2 + $0x10a] sm:$0xff] }
 0x12e   :  { %v2023_v9 = vadd.f32 %v1866_v26, %v1593_v18  ;;  %v1073_v5 = vadd.f32 %v1072_v23, %v5742_v12  ;;  %v2301_v19 = vpop.f32.mrf.mxu0  ;;  %v1248_v18 = vld [vmem:[#allocation2 + $0x112] sm:$0xff]  ;;  %v2108_v23 = vld [vmem:[#allocation2 + $0x129] sm:$0xff] }
 0x130   :  { %v1441_v20 = vpop.f32.mrf.mxu2  ;;  %v1594_v52 = vadd.f32 %v1438_v40, %v1073_v5  ;;  %4852 = vmatmul.msk.bf16.gmra.mxu0 %vm348_vm1, %v2159_v16  ;;  %v5915_v47 = vadd.f32 %v2296_v3, %v2023_v9  ;;  %v1300_v16 = vpack.c.bf16 %v1248_v18, %v1247_v11  ;;  %v2107_v3 = vld [vmem:[#allocation2 + $0x121] sm:$0xff] }
 0x131   :  { %v2160_v9 = vpack.c.bf16 %v2108_v23, %v2107_v3 }
 0x135   :  { %v1868_v31 = vpop.f32.mrf.mxu3  ;;  %v1075_v58 = vpop.f32.mrf.mxu1 }
 0x136   :  { %v2024_v8 = vadd.f32 %v1868_v31, %v1594_v52  ;;  %v1076_v27 = vadd.f32 %v1075_v58, %v5769_v62  ;;  %v2303_v0 = vpop.f32.mrf.mxu0  ;;  %v1678_v58 = vld [vmem:[#allocation2 + $0x128] sm:$0xff] }
 0x138   :  { %4753 = vmatmul.msk.bf16.gmra.mxu1 %vm348_vm1, %v1728_v34  ;;  %v1443_v12 = vpop.f32.mrf.mxu2  ;;  %v1595_v26 = vadd.f32 %v1441_v20, %v1076_v27  ;;  %v5919_v40 = vadd.f32 %v2298_v46, %v2024_v8  ;;  %v1677_v20 = vld [vmem:[#allocation2 + $0x120] sm:$0xff] }
 0x139   :  { %v1730_v3 = vpack.c.bf16 %v1678_v58, %v1677_v20 }
 0x13a   :  { %4819 = vmatmul.msk.bf16.gmra.mxu3 %vm348_vm1, %v1729_v59 }
 0x13d   :  { %v1871_v5 = vpop.f32.mrf.mxu3  ;;  %v1077_v52 = vpop.f32.mrf.mxu1  ;;  %4787 = vmatmul.msk.bf16.gmra.mxu2 %vm348_vm1, %v1300_v16  ;;  %v1249_v16 = vld [vmem:[#allocation2 + $0x122] sm:$0xff] }
 0x13e   :  { %v2025_v62 = vadd.f32 %v1871_v5, %v1595_v26  ;;  %v1078_v54 = vadd.f32 %v1077_v52, %v5781_v6  ;;  %v2306_v42 = vpop.f32.mrf.mxu0  ;;  %v1250_v26 = vld [vmem:[#allocation2 + $0x12a] sm:$0xff]  ;;  %v2110_v52 = vld [vmem:[#allocation2 + $0x141] sm:$0xff] }
 0x140   :  { %v1446_v31 = vpop.f32.mrf.mxu2  ;;  %v1596_v34 = vadd.f32 %v1443_v12, %v1078_v54  ;;  %4853 = vmatmul.msk.bf16.gmra.mxu0 %vm348_vm1, %v2160_v9  ;;  %v5925_v46 = vadd.f32 %v2301_v19, %v2025_v62  ;;  %v1301_v9 = vpack.c.bf16 %v1250_v26, %v1249_v16  ;;  %v2109_v19 = vld [vmem:[#allocation2 + $0x139] sm:$0xff] }
 0x141   :  { %v2161_v62 = vpack.c.bf16 %v2110_v52, %v2109_v19 }
 0x145   :  { %v1873_v8 = vpop.f32.mrf.mxu3  ;;  %v1080_v27 = vpop.f32.mrf.mxu1 }
 0x146   :  { %v2026_v11 = vadd.f32 %v1873_v8, %v1596_v34  ;;  %v1081_v18 = vadd.f32 %v1080_v27, %v5792_v15  ;;  %v2308_v23 = vpop.f32.mrf.mxu0  ;;  %v1680_v27 = vld [vmem:[#allocation2 + $0x140] sm:$0xff] }
 0x148   :  { %4754 = vmatmul.msk.bf16.gmra.mxu1 %vm348_vm1, %v1729_v59  ;;  %v1448_v6 = vpop.f32.mrf.mxu2  ;;  %v1597_v5 = vadd.f32 %v1446_v31, %v1081_v18  ;;  %v5929_v12 = vadd.f32 %v2303_v0, %v2026_v11  ;;  %v1679_v31 = vld [vmem:[#allocation2 + $0x138] sm:$0xff] }
 0x149   :  { %v1731_v19 = vpack.c.bf16 %v1680_v27, %v1679_v31 }
 0x14a   :  { %4820 = vmatmul.msk.bf16.gmra.mxu3 %vm348_vm1, %v1730_v3 }
 0x14d   :  { %v1876_v54 = vpop.f32.mrf.mxu3  ;;  %v1082_v34 = vpop.f32.mrf.mxu1  ;;  %4788 = vmatmul.msk.bf16.gmra.mxu2 %vm348_vm1, %v1301_v9  ;;  %v1251_v9 = vld [vmem:[#allocation2 + $0x13a] sm:$0xff] }
 0x14e   :  { %v2027_v15 = vadd.f32 %v1876_v54, %v1597_v5  ;;  %v1083_v20 = vadd.f32 %v1082_v34, %v5802_v24  ;;  %v2311_v58 = vpop.f32.mrf.mxu0  ;;  %v1252_v5 = vld [vmem:[#allocation2 + $0x142] sm:$0xff]  ;;  %v5148_v24 = vld [vmem:[%s6879_s0 + $0x78] sm:$0xff]  }
 0x14f   :  { %v5069_v54 = vunpack.c.h.bf16 %v5148_v24  ;;  %v1302_v34 = vpack.c.bf16 %v1252_v5, %v1251_v9 }
 0x150   :  { %v1451_v8 = vpop.f32.mrf.mxu2  ;;  %v1598_v59 = vadd.f32 %v1448_v6, %v1083_v20  ;;  %4854 = vmatmul.msk.bf16.gmra.mxu0 %vm348_vm1, %v2161_v62  ;;  %v5935_v0 = vadd.f32 %v2306_v42, %v2027_v15  ;;  %v5068_v62 = vunpack.c.l.bf16 %v5148_v24  ;;  %v2111_v15 = vld [vmem:[#allocation2 + $0x151] sm:$0xff]  ;;  %v2112_v20 = vld [vmem:[#allocation2 + $0x159] sm:$0xff] }
 0x151   :  { %v2162_v27 = vpack.c.bf16 %v2112_v20, %v2111_v15 }
 0x155   :  { %v1878_v11 = vpop.f32.mrf.mxu3  ;;  %v1085_v18 = vpop.f32.mrf.mxu1 }
 0x156   :  { %v2028_v16 = vadd.f32 %v1878_v11, %v1598_v59  ;;  %v1086_v26 = vadd.f32 %v1085_v18, %v5813_v32  ;;  %v2313_v52 = vpop.f32.mrf.mxu0  ;;  %v5948_v32 = vld [vmem:[%s6880_s1] ss:$0 sm:$0xff] }
 0x157   :  { %v182_v31 = vmul.f32 %v5948_v32, %v5068_v62 }
 0x158   :  { %4755 = vmatmul.msk.bf16.gmra.mxu1 %vm348_vm1, %v1730_v3  ;;  %v1453_v6 = vpop.f32.mrf.mxu2  ;;  %v1599_v42 = vadd.f32 %v1451_v8, %v1086_v26  ;;  %v5942_v59 = vadd.f32 %v2308_v23, %v2028_v16  ;;  %v183_v3 = vmul.f32 %v5948_v32, %v5069_v54  ;;  %v5955_v8 = vld [vmem:[%s6881_s2] ss:$0 sm:$0xff] }
 0x159   :  { %v250_v23 = vadd.f32 %v5955_v8, %v182_v31  ;;  %v1681_v31 = vld [vmem:[#allocation2 + $0x150] sm:$0xff] }
 0x15a   :  { %6907 = vst [vmem:[#allocation26_spill] sm:$0xff] %v5942_v59  ;;  %4821 = vmatmul.msk.bf16.gmra.mxu3 %vm348_vm1, %v1731_v19  ;;  %v251_v11 = vadd.f32 %v5955_v8, %v183_v3  ;;  %v1682_v3 = vld [vmem:[#allocation2 + $0x158] sm:$0xff] }
 0x15b   :  { %v314_v24 = vmax.f32 %v250_v23, 0.0 }
 0x15c   :  { %v315_v62 = vmax.f32 %v251_v11, 0.0  ;;  %v1253_v11 = vld [vmem:[#allocation2 + $0x152] sm:$0xff] }
 0x15d   :  { %v1881_v18 = vpop.f32.mrf.mxu3  ;;  %v1087_v16 = vpop.f32.mrf.mxu1  ;;  %4789 = vmatmul.msk.bf16.gmra.mxu2 %vm348_vm1, %v1302_v34  ;;  %459 = vst.msk [vmem:[#allocation2 + $0x181] sm:$0xff] %vm348_vm1, %v314_v24 }
 0x15e   :  { %v2029_v26 = vadd.f32 %v1881_v18, %v1599_v42  ;;  %v1088_v9 = vadd.f32 %v1087_v16, %v5823_v41  ;;  %v2316_v5 = vpop.f32.mrf.mxu0  ;;  %460 = vst.msk [vmem:[#allocation2 + $0x189] sm:$0xff] %vm348_vm1, %v315_v62  ;;  %v1732_v18 = vpack.c.bf16 %v1682_v3, %v1681_v31  ;;  %v1254_v16 = vld [vmem:[#allocation2 + $0x15a] sm:$0xff] }
 0x160   :  { %v1456_v54 = vpop.f32.mrf.mxu2  ;;  %v1600_v15 = vadd.f32 %v1453_v6, %v1088_v9  ;;  %4855 = vmatmul.msk.bf16.gmra.mxu0 %vm348_vm1, %v2162_v27  ;;  %v5963_v20 = vadd.f32 %v2311_v58, %v2029_v26  ;;  %v1303_v58 = vpack.c.bf16 %v1254_v16, %v1253_v11 }
 0x165   :  { %v1883_v59 = vpop.f32.mrf.mxu3  ;;  %v1090_v34 = vpop.f32.mrf.mxu1 }
 0x166   :  { %v2030_v42 = vadd.f32 %v1883_v59, %v1600_v15  ;;  %v1091_v41 = vadd.f32 %v1090_v34, %v5834_v53  ;;  %v2318_v23 = vpop.f32.mrf.mxu0 }
 0x168   :  { %4756 = vmatmul.msk.bf16.gmra.mxu1 %vm348_vm1, %v1731_v19  ;;  %v1458_v6 = vpop.f32.mrf.mxu2  ;;  %v1601_v27 = vadd.f32 %v1456_v54, %v1091_v41  ;;  %v5968_v9 = vadd.f32 %v2313_v52, %v2030_v42  ;;  %v1683_v52 = vld [vmem:[#allocation2 + $0x168] sm:$0xff]  ;;  %v1684_v54 = vld [vmem:[#allocation2 + $0x170] sm:$0xff] }
 0x169   :  { %v1733_v11 = vpack.c.bf16 %v1684_v54, %v1683_v52 }
 0x16a   :  { %4822 = vmatmul.msk.bf16.gmra.mxu3 %vm348_vm1, %v1732_v18 }
 0x16d   :  { %v1886_v26 = vpop.f32.mrf.mxu3  ;;  %v1092_v24 = vpop.f32.mrf.mxu1  ;;  %4790 = vmatmul.msk.bf16.gmra.mxu2 %vm348_vm1, %v1303_v58  ;;  %v1256_v58 = vld [vmem:[#allocation2 + $0x172] sm:$0xff] }
 0x16e   :  { %v2031_v59 = vadd.f32 %v1886_v26, %v1601_v27  ;;  %v1093_v53 = vadd.f32 %v1092_v24, %v5844_v10  ;;  %v2321_v62 = vpop.f32.mrf.mxu0  ;;  %v1255_v27 = vld [vmem:[#allocation2 + $0x16a] sm:$0xff] }
 0x16f   :  { %v2116_v24 = vld [vmem:[#allocation2 + $0x189] sm:$0xff] }
 0x170   :  { %v1461_v15 = vpop.f32.mrf.mxu2  ;;  %v1602_v31 = vadd.f32 %v1458_v6, %v1093_v53  ;;  %4856 = vmatmul.msk.bf16.gmra.mxu0 %vm348_vm1, %v5625_v21  ;;  %v5975_v19 = vadd.f32 %v2316_v5, %v2031_v59  ;;  %v1304_v21 = vpack.c.bf16 %v1256_v58, %v1255_v27  ;;  %v2115_v5 = vld [vmem:[#allocation2 + $0x181] sm:$0xff] }
 0x171   :  { %v2164_v59 = vpack.c.bf16 %v2116_v24, %v2115_v5 }
 0x175   :  { %v1888_v3 = vpop.f32.mrf.mxu3  ;;  %v1095_v34 = vpop.f32.mrf.mxu1 }
 0x176   :  { %v2032_v42 = vadd.f32 %v1888_v3, %v1602_v31  ;;  %v1096_v41 = vadd.f32 %v1095_v34, %v5855_v25  ;;  %v2323_v16 = vpop.f32.mrf.mxu0  ;;  %v1686_v34 = vld [vmem:[#allocation2 + $0x188] sm:$0xff] }
 0x178   :  { %4757 = vmatmul.msk.bf16.gmra.mxu1 %vm348_vm1, %v1732_v18  ;;  %v1463_v10 = vpop.f32.mrf.mxu2  ;;  %v1603_v6 = vadd.f32 %v1461_v15, %v1096_v41  ;;  %v5979_v26 = vadd.f32 %v2318_v23, %v2032_v42  ;;  %v1685_v15 = vld [vmem:[#allocation2 + $0x180] sm:$0xff] }
 0x179   :  { %v1734_v5 = vpack.c.bf16 %v1686_v34, %v1685_v15 }
 0x17a   :  { %4823 = vmatmul.msk.bf16.gmra.mxu3 %vm348_vm1, %v1733_v11 }
 0x17d   :  { %v1891_v53 = vpop.f32.mrf.mxu3  ;;  %v1097_v31 = vpop.f32.mrf.mxu1  ;;  %4791 = vmatmul.msk.bf16.gmra.mxu2 %vm348_vm1, %v1304_v21  ;;  %v1257_v21 = vld [vmem:[#allocation2 + $0x1b2] sm:$0xff] }
 0x17e   :  { %v2033_v25 = vadd.f32 %v1891_v53, %v1603_v6  ;;  %v1098_v52 = vadd.f32 %v1097_v31, %v5865_v43  ;;  %v2326_v54 = vpop.f32.mrf.mxu0  ;;  %v1258_v6 = vld [vmem:[#allocation2 + $0x1ba] sm:$0xff]  ;;  %v2118_v31 = vld [vmem:[#allocation2 + $0x1d1] sm:$0xff] }
 0x180   :  { %v1466_v3 = vpop.f32.mrf.mxu2  ;;  %v1604_v18 = vadd.f32 %v1463_v10, %v1098_v52  ;;  %4857 = vmatmul.msk.bf16.gmra.mxu0 %vm348_vm1, %v2164_v59  ;;  %v5985_v23 = vadd.f32 %v2321_v62, %v2033_v25  ;;  %v1305_v59 = vpack.c.bf16 %v1258_v6, %v1257_v21  ;;  %v2117_v62 = vld [vmem:[#allocation2 + $0x1c9] sm:$0xff] }
 0x181   :  { %v2165_v25 = vpack.c.bf16 %v2118_v31, %v2117_v62 }
 0x185   :  { %v1893_v42 = vpop.f32.mrf.mxu3  ;;  %v1100_v41 = vpop.f32.mrf.mxu1 }
 0x186   :  { %v2034_v27 = vadd.f32 %v1893_v42, %v1604_v18  ;;  %v1101_v58 = vadd.f32 %v1100_v41, %v5876_v30  ;;  %v2328_v24 = vpop.f32.mrf.mxu0  ;;  %v526_v41 = vld [vmem:[#allocation2 + $0x1b8] sm:$0xff] }
 0x188   :  { %4758 = vmatmul.msk.bf16.gmra.mxu1 %vm348_vm1, %v1733_v11  ;;  %v1468_v43 = vpop.f32.mrf.mxu2  ;;  %v1605_v53 = vadd.f32 %v1466_v3, %v1101_v58  ;;  %v5989_v10 = vadd.f32 %v2323_v16, %v2034_v27  ;;  %v525_v3 = vld [vmem:[#allocation2 + $0x1b0] sm:$0xff]  ;;  %v1687_v27 = vld [vmem:[#allocation2 + $0x1c8] sm:$0xff] }
 0x189   :  { %v1688_v58 = vld [vmem:[#allocation2 + $0x1d0] sm:$0xff] }
 0x18a   :  { %4824 = vmatmul.msk.bf16.gmra.mxu3 %vm348_vm1, %v1734_v5  ;;  %v573_v5 = vpack.c.bf16 %v526_v41, %v525_v3 }
 0x18d   :  { %v1896_v52 = vpop.f32.mrf.mxu3  ;;  %v1102_v18 = vpop.f32.mrf.mxu1  ;;  %4792 = vmatmul.msk.bf16.gmra.mxu2 %vm348_vm1, %v1305_v59 }
 0x18e   :  { %v2035_v30 = vadd.f32 %v1896_v52, %v1605_v53  ;;  %v1103_v15 = vadd.f32 %v1102_v18, %v5885_v1  ;;  %v2331_v34 = vpop.f32.mrf.mxu0  ;;  %v1735_v53 = vpack.c.bf16 %v1688_v58, %v1687_v27  ;;  %v1259_v1 = vld [vmem:[#allocation2 + $0x1ca] sm:$0xff]  ;;  %v1260_v52 = vld [vmem:[#allocation2 + $0x1d2] sm:$0xff] }
 0x18f   :  { %v1306_v18 = vpack.c.bf16 %v1260_v52, %v1259_v1 }
 0x190   :  { %v1471_v42 = vpop.f32.mrf.mxu2  ;;  %v1606_v11 = vadd.f32 %v1468_v43, %v1103_v15  ;;  %4858 = vmatmul.msk.bf16.gmra.mxu0 %vm348_vm1, %v2165_v25  ;;  %v5995_v16 = vadd.f32 %v2326_v54, %v2035_v30  ;;  %v2119_v30 = vld [vmem:[#allocation2 + $0x1e1] sm:$0xff]  ;;  %v2120_v15 = vld [vmem:[#allocation2 + $0x1e9] sm:$0xff] }
 0x191   :  { %v2166_v3 = vpack.c.bf16 %v2120_v15, %v2119_v30 }
 0x195   :  { %v1898_v21 = vpop.f32.mrf.mxu3  ;;  %v1105_v6 = vpop.f32.mrf.mxu1 }
 0x196   :  { %v2036_v62 = vadd.f32 %v1898_v21, %v1606_v11  ;;  %v1106_v59 = vadd.f32 %v1105_v6, %v5683_v39  ;;  %v2333_v31 = vpop.f32.mrf.mxu0  ;;  %v1690_v6 = vld [vmem:[#allocation2 + $0x1e8] sm:$0xff] }
 0x198   :  { %4759 = vmatmul.msk.bf16.gmra.mxu1 %vm348_vm1, %v573_v5  ;;  %v1473_v43 = vpop.f32.mrf.mxu2  ;;  %v1607_v25 = vadd.f32 %v1471_v42, %v1106_v59  ;;  %v5999_v54 = vadd.f32 %v2328_v24, %v2036_v62  ;;  %v1689_v42 = vld [vmem:[#allocation2 + $0x1e0] sm:$0xff] }
 0x199   :  { %v1736_v30 = vpack.c.bf16 %v1690_v6, %v1689_v42 }
 0x19a   :  { %4825 = vmatmul.msk.bf16.gmra.mxu3 %vm348_vm1, %v1735_v53 }
 0x19d   :  { %v1901_v41 = vpop.f32.mrf.mxu3  ;;  %v1107_v11 = vpop.f32.mrf.mxu1  ;;  %4793 = vmatmul.msk.bf16.gmra.mxu2 %vm348_vm1, %v1306_v18  ;;  %v1261_v18 = vld [vmem:[#allocation2 + $0x1e2] sm:$0xff] }
 0x19e   :  { %v2037_v39 = vadd.f32 %v1901_v41, %v1607_v25  ;;  %v1108_v27 = vadd.f32 %v1107_v11, %v5711_v48  ;;  %v2336_v58 = vpop.f32.mrf.mxu0  ;;  %v1262_v25 = vld [vmem:[#allocation2 + $0x1ea] sm:$0xff]  ;;  %v2122_v11 = vld [vmem:[#allocation2 + $0x201] sm:$0xff] }
 0x1a0   :  { %v1476_v21 = vpop.f32.mrf.mxu2  ;;  %v1608_v5 = vadd.f32 %v1473_v43, %v1108_v27  ;;  %4859 = vmatmul.msk.bf16.gmra.mxu0 %vm348_vm1, %v2166_v3  ;;  %v6005_v24 = vadd.f32 %v2331_v34, %v2037_v39  ;;  %v1307_v3 = vpack.c.bf16 %v1262_v25, %v1261_v18  ;;  %v2121_v34 = vld [vmem:[#allocation2 + $0x1f9] sm:$0xff] }
 0x1a1   :  { %v2167_v39 = vpack.c.bf16 %v2122_v11, %v2121_v34 }
 0x1a5   :  { %v1903_v62 = vpop.f32.mrf.mxu3  ;;  %v1110_v59 = vpop.f32.mrf.mxu1 }
 0x1a6   :  { %v2038_v1 = vadd.f32 %v1903_v62, %v1608_v5  ;;  %v1111_v52 = vadd.f32 %v1110_v59, %v5738_v7  ;;  %v2338_v15 = vpop.f32.mrf.mxu0  ;;  %v1692_v59 = vld [vmem:[#allocation2 + $0x200] sm:$0xff] }
 0x1a8   :  { %4760 = vmatmul.msk.bf16.gmra.mxu1 %vm348_vm1, %v1735_v53  ;;  %v1478_v48 = vpop.f32.mrf.mxu2  ;;  %v1609_v41 = vadd.f32 %v1476_v21, %v1111_v52  ;;  %v6009_v43 = vadd.f32 %v2333_v31, %v2038_v1  ;;  %v1691_v21 = vld [vmem:[#allocation2 + $0x1f8] sm:$0xff] }
 0x1a9   :  { %v1737_v34 = vpack.c.bf16 %v1692_v59, %v1691_v21 }
 0x1aa   :  { %4826 = vmatmul.msk.bf16.gmra.mxu3 %vm348_vm1, %v1736_v30 }
 0x1ad   :  { %v1906_v27 = vpop.f32.mrf.mxu3  ;;  %v1112_v5 = vpop.f32.mrf.mxu1  ;;  %4794 = vmatmul.msk.bf16.gmra.mxu2 %vm348_vm1, %v1307_v3  ;;  %v1263_v3 = vld [vmem:[#allocation2 + $0x1fa] sm:$0xff] }
 0x1ae   :  { %v2039_v7 = vadd.f32 %v1906_v27, %v1609_v41  ;;  %v1113_v42 = vadd.f32 %v1112_v5, %v5764_v60  ;;  %v2341_v6 = vpop.f32.mrf.mxu0  ;;  %v1264_v41 = vld [vmem:[#allocation2 + $0x202] sm:$0xff]  ;;  %v2124_v5 = vld [vmem:[#allocation2 + $0x219] sm:$0xff] }
 0x1b0   :  { %v1481_v62 = vpop.f32.mrf.mxu2  ;;  %v1610_v53 = vadd.f32 %v1478_v48, %v1113_v42  ;;  %4860 = vmatmul.msk.bf16.gmra.mxu0 %vm348_vm1, %v2167_v39  ;;  %v6015_v31 = vadd.f32 %v2336_v58, %v2039_v7  ;;  %v1308_v39 = vpack.c.bf16 %v1264_v41, %v1263_v3  ;;  %v2123_v58 = vld [vmem:[#allocation2 + $0x211] sm:$0xff] }
 0x1b1   :  { %v2168_v7 = vpack.c.bf16 %v2124_v5, %v2123_v58 }
 0x1b5   :  { %v1908_v1 = vpop.f32.mrf.mxu3  ;;  %v1115_v52 = vpop.f32.mrf.mxu1 }
 0x1b6   :  { %v2040_v18 = vadd.f32 %v1908_v1, %v1610_v53  ;;  %v1116_v25 = vadd.f32 %v1115_v52, %v5779_v4  ;;  %v2343_v11 = vpop.f32.mrf.mxu0  ;;  %v1694_v52 = vld [vmem:[#allocation2 + $0x218] sm:$0xff] }
 0x1b8   :  { %4761 = vmatmul.msk.bf16.gmra.mxu1 %vm348_vm1, %v1736_v30  ;;  %v1483_v60 = vpop.f32.mrf.mxu2  ;;  %v1611_v27 = vadd.f32 %v1481_v62, %v1116_v25  ;;  %v6019_v48 = vadd.f32 %v2338_v15, %v2040_v18  ;;  %v1693_v62 = vld [vmem:[#allocation2 + $0x210] sm:$0xff] }
 0x1b9   :  { %v1738_v58 = vpack.c.bf16 %v1694_v52, %v1693_v62 }
 0x1ba   :  { %4827 = vmatmul.msk.bf16.gmra.mxu3 %vm348_vm1, %v1737_v34 }
 0x1bd   :  { %v1911_v42 = vpop.f32.mrf.mxu3  ;;  %v1117_v53 = vpop.f32.mrf.mxu1  ;;  %4795 = vmatmul.msk.bf16.gmra.mxu2 %vm348_vm1, %v1308_v39  ;;  %v1265_v39 = vld [vmem:[#allocation2 + $0x212] sm:$0xff] }
 0x1be   :  { %v2041_v4 = vadd.f32 %v1911_v42, %v1611_v27  ;;  %v1118_v21 = vadd.f32 %v1117_v53, %v5789_v56  ;;  %v2346_v59 = vpop.f32.mrf.mxu0  ;;  %v1266_v27 = vld [vmem:[#allocation2 + $0x21a] sm:$0xff]  ;;  %v2126_v53 = vld [vmem:[#allocation2 + $0x231] sm:$0xff] }
 0x1c0   :  { %v1486_v1 = vpop.f32.mrf.mxu2  ;;  %v1612_v30 = vadd.f32 %v1483_v60, %v1118_v21  ;;  %4861 = vmatmul.msk.bf16.gmra.mxu0 %vm348_vm1, %v2168_v7  ;;  %v6025_v15 = vadd.f32 %v2341_v6, %v2041_v4  ;;  %v1309_v7 = vpack.c.bf16 %v1266_v27, %v1265_v39  ;;  %v2125_v6 = vld [vmem:[#allocation2 + $0x229] sm:$0xff] }
 0x1c1   :  { %v2169_v4 = vpack.c.bf16 %v2126_v53, %v2125_v6 }
 0x1c5   :  { %v1913_v18 = vpop.f32.mrf.mxu3  ;;  %v1120_v25 = vpop.f32.mrf.mxu1 }
 0x1c6   :  { %v2042_v3 = vadd.f32 %v1913_v18, %v1612_v30  ;;  %v1121_v41 = vadd.f32 %v1120_v25, %v5800_v22  ;;  %v2348_v5 = vpop.f32.mrf.mxu0  ;;  %v1696_v25 = vld [vmem:[#allocation2 + $0x230] sm:$0xff] }
 0x1c8   :  { %4762 = vmatmul.msk.bf16.gmra.mxu1 %vm348_vm1, %v1737_v34  ;;  %v1488_v56 = vpop.f32.mrf.mxu2  ;;  %v1613_v42 = vadd.f32 %v1486_v1, %v1121_v41  ;;  %v6029_v60 = vadd.f32 %v2343_v11, %v2042_v3  ;;  %v1695_v1 = vld [vmem:[#allocation2 + $0x228] sm:$0xff] }
 0x1c9   :  { %v1739_v6 = vpack.c.bf16 %v1696_v25, %v1695_v1 }
 0x1ca   :  { %4828 = vmatmul.msk.bf16.gmra.mxu3 %vm348_vm1, %v1738_v58 }
 0x1cd   :  { %v1916_v21 = vpop.f32.mrf.mxu3  ;;  %v1122_v30 = vpop.f32.mrf.mxu1  ;;  %4796 = vmatmul.msk.bf16.gmra.mxu2 %vm348_vm1, %v1309_v7  ;;  %v1267_v7 = vld [vmem:[#allocation2 + $0x22a] sm:$0xff] }
 0x1ce   :  { %v2043_v22 = vadd.f32 %v1916_v21, %v1613_v42  ;;  %v1123_v62 = vadd.f32 %v1122_v30, %v5810_v45  ;;  %v2351_v52 = vpop.f32.mrf.mxu0  ;;  %v1268_v42 = vld [vmem:[#allocation2 + $0x232] sm:$0xff]  ;;  %v2128_v30 = vld [vmem:[#allocation2 + $0x249] sm:$0xff] }
 0x1d0   :  { %v1491_v18 = vpop.f32.mrf.mxu2  ;;  %v1614_v34 = vadd.f32 %v1488_v56, %v1123_v62  ;;  %4862 = vmatmul.msk.bf16.gmra.mxu0 %vm348_vm1, %v2169_v4  ;;  %v6035_v11 = vadd.f32 %v2346_v59, %v2043_v22  ;;  %v1310_v4 = vpack.c.bf16 %v1268_v42, %v1267_v7  ;;  %v2127_v59 = vld [vmem:[#allocation2 + $0x241] sm:$0xff] }
 0x1d1   :  { %v2170_v22 = vpack.c.bf16 %v2128_v30, %v2127_v59 }
 0x1d5   :  { %v1918_v3 = vpop.f32.mrf.mxu3  ;;  %v1125_v41 = vpop.f32.mrf.mxu1 }
 0x1d6   :  { %v2044_v39 = vadd.f32 %v1918_v3, %v1614_v34  ;;  %v1126_v27 = vadd.f32 %v1125_v41, %v5821_v37  ;;  %v2353_v53 = vpop.f32.mrf.mxu0  ;;  %v1698_v41 = vld [vmem:[#allocation2 + $0x248] sm:$0xff] }
 0x1d8   :  { %4763 = vmatmul.msk.bf16.gmra.mxu1 %vm348_vm1, %v1738_v58  ;;  %v1493_v45 = vpop.f32.mrf.mxu2  ;;  %v1615_v21 = vadd.f32 %v1491_v18, %v1126_v27  ;;  %v6039_v56 = vadd.f32 %v2348_v5, %v2044_v39  ;;  %v1697_v18 = vld [vmem:[#allocation2 + $0x240] sm:$0xff] }
 0x1d9   :  { %v1740_v59 = vpack.c.bf16 %v1698_v41, %v1697_v18 }
 0x1da   :  { %4829 = vmatmul.msk.bf16.gmra.mxu3 %vm348_vm1, %v1739_v6 }
 0x1dd   :  { %v1921_v62 = vpop.f32.mrf.mxu3  ;;  %v1127_v34 = vpop.f32.mrf.mxu1  ;;  %4797 = vmatmul.msk.bf16.gmra.mxu2 %vm348_vm1, %v1310_v4  ;;  %v1269_v4 = vld [vmem:[#allocation2 + $0x242] sm:$0xff] }
 0x1de   :  { %v2045_v37 = vadd.f32 %v1921_v62, %v1615_v21  ;;  %v1128_v1 = vadd.f32 %v1127_v34, %v5831_v35  ;;  %v2356_v25 = vpop.f32.mrf.mxu0  ;;  %v1270_v21 = vld [vmem:[#allocation2 + $0x24a] sm:$0xff]  ;;  %v2130_v34 = vld [vmem:[#allocation2 + $0x261] sm:$0xff] }
 0x1e0   :  { %v1496_v3 = vpop.f32.mrf.mxu2  ;;  %v1616_v58 = vadd.f32 %v1493_v45, %v1128_v1  ;;  %4863 = vmatmul.msk.bf16.gmra.mxu0 %vm348_vm1, %v2170_v22  ;;  %v6045_v5 = vadd.f32 %v2351_v52, %v2045_v37  ;;  %v1311_v22 = vpack.c.bf16 %v1270_v21, %v1269_v4  ;;  %v2129_v52 = vld [vmem:[#allocation2 + $0x259] sm:$0xff] }
 0x1e1   :  { %v2171_v37 = vpack.c.bf16 %v2130_v34, %v2129_v52 }
 0x1e5   :  { %v1923_v39 = vpop.f32.mrf.mxu3  ;;  %v1130_v27 = vpop.f32.mrf.mxu1 }
 0x1e6   :  { %v2046_v7 = vadd.f32 %v1923_v39, %v1616_v58  ;;  %v1131_v42 = vadd.f32 %v1130_v27, %v5842_v2  ;;  %v2358_v30 = vpop.f32.mrf.mxu0  ;;  %v1700_v27 = vld [vmem:[#allocation2 + $0x260] sm:$0xff] }
 0x1e8   :  { %4764 = vmatmul.msk.bf16.gmra.mxu1 %vm348_vm1, %v1739_v6  ;;  %v1498_v35 = vpop.f32.mrf.mxu2  ;;  %v1617_v62 = vadd.f32 %v1496_v3, %v1131_v42  ;;  %v6049_v45 = vadd.f32 %v2353_v53, %v2046_v7  ;;  %v1699_v3 = vld [vmem:[#allocation2 + $0x258] sm:$0xff] }
 0x1e9   :  { %v1741_v52 = vpack.c.bf16 %v1700_v27, %v1699_v3 }
 0x1ea   :  { %4830 = vmatmul.msk.bf16.gmra.mxu3 %vm348_vm1, %v1740_v59 }
 0x1ed   :  { %v1926_v1 = vpop.f32.mrf.mxu3  ;;  %v1132_v58 = vpop.f32.mrf.mxu1  ;;  %4798 = vmatmul.msk.bf16.gmra.mxu2 %vm348_vm1, %v1311_v22  ;;  %v1271_v22 = vld [vmem:[#allocation2 + $0x25a] sm:$0xff] }
 0x1ee   :  { %v2047_v2 = vadd.f32 %v1926_v1, %v1617_v62  ;;  %v1133_v18 = vadd.f32 %v1132_v58, %v5852_v61  ;;  %v2361_v41 = vpop.f32.mrf.mxu0  ;;  %v1272_v62 = vld [vmem:[#allocation2 + $0x262] sm:$0xff]  ;;  %v2132_v58 = vld [vmem:[#allocation2 + $0x279] sm:$0xff] }
 0x1f0   :  { %v1501_v39 = vpop.f32.mrf.mxu2  ;;  %v1618_v6 = vadd.f32 %v1498_v35, %v1133_v18  ;;  %4864 = vmatmul.msk.bf16.gmra.mxu0 %vm348_vm1, %v2171_v37  ;;  %v6055_v53 = vadd.f32 %v2356_v25, %v2047_v2  ;;  %v1312_v37 = vpack.c.bf16 %v1272_v62, %v1271_v22  ;;  %v2131_v25 = vld [vmem:[#allocation2 + $0x271] sm:$0xff] }
 0x1f1   :  { %v2172_v2 = vpack.c.bf16 %v2132_v58, %v2131_v25 }
 0x1f5   :  { %v1928_v7 = vpop.f32.mrf.mxu3  ;;  %v1135_v42 = vpop.f32.mrf.mxu1 }
 0x1f6   :  { %v2048_v4 = vadd.f32 %v1928_v7, %v1618_v6  ;;  %v1136_v21 = vadd.f32 %v1135_v42, %v5863_v38  ;;  %v2363_v34 = vpop.f32.mrf.mxu0  ;;  %v1702_v42 = vld [vmem:[#allocation2 + $0x278] sm:$0xff] }
 0x1f8   :  { %4765 = vmatmul.msk.bf16.gmra.mxu1 %vm348_vm1, %v1740_v59  ;;  %v1503_v61 = vpop.f32.mrf.mxu2  ;;  %v1619_v1 = vadd.f32 %v1501_v39, %v1136_v21  ;;  %v6059_v35 = vadd.f32 %v2358_v30, %v2048_v4  ;;  %v1701_v39 = vld [vmem:[#allocation2 + $0x270] sm:$0xff] }
 0x1f9   :  { %v1742_v25 = vpack.c.bf16 %v1702_v42, %v1701_v39 }
 0x1fa   :  { %4831 = vmatmul.msk.bf16.gmra.mxu3 %vm348_vm1, %v1741_v52 }
 0x1fd   :  { %v1931_v18 = vpop.f32.mrf.mxu3  ;;  %v1137_v6 = vpop.f32.mrf.mxu1  ;;  %4799 = vmatmul.msk.bf16.gmra.mxu2 %vm348_vm1, %v1312_v37  ;;  %v1273_v37 = vld [vmem:[#allocation2 + $0x272] sm:$0xff] }
 0x1fe   :  { %v2049_v38 = vadd.f32 %v1931_v18, %v1619_v1  ;;  %v1138_v3 = vadd.f32 %v1137_v6, %v5873_v36  ;;  %v2366_v27 = vpop.f32.mrf.mxu0  ;;  %v1274_v1 = vld [vmem:[#allocation2 + $0x27a] sm:$0xff]  ;;  %v2134_v6 = vld [vmem:[#allocation2 + $0x291] sm:$0xff] }
 0x200   :  { %v1506_v7 = vpop.f32.mrf.mxu2  ;;  %v1620_v59 = vadd.f32 %v1503_v61, %v1138_v3  ;;  %4865 = vmatmul.msk.bf16.gmra.mxu0 %vm348_vm1, %v2172_v2  ;;  %v6065_v30 = vadd.f32 %v2361_v41, %v2049_v38  ;;  %v1313_v2 = vpack.c.bf16 %v1274_v1, %v1273_v37  ;;  %v2133_v41 = vld [vmem:[#allocation2 + $0x289] sm:$0xff] }
 0x201   :  { %v2173_v38 = vpack.c.bf16 %v2134_v6, %v2133_v41 }
 0x205   :  { %v1933_v4 = vpop.f32.mrf.mxu3  ;;  %v1140_v21 = vpop.f32.mrf.mxu1 }
 0x206   :  { %v2050_v22 = vadd.f32 %v1933_v4, %v1620_v59  ;;  %v1141_v62 = vadd.f32 %v1140_v21, %v5883_v55  ;;  %v2368_v58 = vpop.f32.mrf.mxu0  ;;  %v1704_v21 = vld [vmem:[#allocation2 + $0x290] sm:$0xff] }
 0x208   :  { %4766 = vmatmul.msk.bf16.gmra.mxu1 %vm348_vm1, %v1741_v52  ;;  %v1508_v36 = vpop.f32.mrf.mxu2  ;;  %v1621_v18 = vadd.f32 %v1506_v7, %v1141_v62  ;;  %v6069_v61 = vadd.f32 %v2363_v34, %v2050_v22  ;;  %v1703_v7 = vld [vmem:[#allocation2 + $0x288] sm:$0xff] }
 0x209   :  { %v1743_v41 = vpack.c.bf16 %v1704_v21, %v1703_v7 }
 0x20a   :  { %4832 = vmatmul.msk.bf16.gmra.mxu3 %vm348_vm1, %v1742_v25 }
 0x20d   :  { %v1936_v3 = vpop.f32.mrf.mxu3  ;;  %v1142_v59 = vpop.f32.mrf.mxu1  ;;  %4800 = vmatmul.msk.bf16.gmra.mxu2 %vm348_vm1, %v1313_v2  ;;  %v1275_v2 = vld [vmem:[#allocation2 + $0x28a] sm:$0xff] }
 0x20e   :  { %v2051_v55 = vadd.f32 %v1936_v3, %v1621_v18  ;;  %v1143_v39 = vadd.f32 %v1142_v59, %v5893_v50  ;;  %v2371_v42 = vpop.f32.mrf.mxu0  ;;  %v1276_v18 = vld [vmem:[#allocation2 + $0x292] sm:$0xff]  ;;  %v2136_v59 = vld [vmem:[#allocation2 + $0x2a9] sm:$0xff] }
 0x210   :  { %v1511_v4 = vpop.f32.mrf.mxu2  ;;  %v1622_v52 = vadd.f32 %v1508_v36, %v1143_v39  ;;  %4866 = vmatmul.msk.bf16.gmra.mxu0 %vm348_vm1, %v2173_v38  ;;  %v6075_v34 = vadd.f32 %v2366_v27, %v2051_v55  ;;  %v1314_v38 = vpack.c.bf16 %v1276_v18, %v1275_v2  ;;  %v2135_v27 = vld [vmem:[#allocation2 + $0x2a1] sm:$0xff] }
 0x211   :  { %v2174_v55 = vpack.c.bf16 %v2136_v59, %v2135_v27 }
 0x215   :  { %v1938_v22 = vpop.f32.mrf.mxu3  ;;  %v1145_v62 = vpop.f32.mrf.mxu1 }
 0x216   :  { %v2052_v37 = vadd.f32 %v1938_v22, %v1622_v52  ;;  %v1146_v1 = vadd.f32 %v1145_v62, %v5663_v29  ;;  %v2373_v6 = vpop.f32.mrf.mxu0  ;;  %v1706_v62 = vld [vmem:[#allocation2 + $0x2a8] sm:$0xff] }
 0x218   :  { %4767 = vmatmul.msk.bf16.gmra.mxu1 %vm348_vm1, %v1742_v25  ;;  %v1513_v50 = vpop.f32.mrf.mxu2  ;;  %v1623_v3 = vadd.f32 %v1511_v4, %v1146_v1  ;;  %v6079_v36 = vadd.f32 %v2368_v58, %v2052_v37  ;;  %v1705_v4 = vld [vmem:[#allocation2 + $0x2a0] sm:$0xff] }
 0x219   :  { %v1744_v27 = vpack.c.bf16 %v1706_v62, %v1705_v4 }
 0x21a   :  { %4833 = vmatmul.msk.bf16.gmra.mxu3 %vm348_vm1, %v1743_v41 }
 0x21d   :  { %v1941_v39 = vpop.f32.mrf.mxu3  ;;  %v1147_v52 = vpop.f32.mrf.mxu1  ;;  %4801 = vmatmul.msk.bf16.gmra.mxu2 %vm348_vm1, %v1314_v38  ;;  %v1277_v38 = vld [vmem:[#allocation2 + $0x2a2] sm:$0xff] }
 0x21e   :  { %v2053_v29 = vadd.f32 %v1941_v39, %v1623_v3  ;;  %v1148_v7 = vadd.f32 %v1147_v52, %v5696_v44  ;;  %v2376_v21 = vpop.f32.mrf.mxu0  ;;  %v1278_v3 = vld [vmem:[#allocation2 + $0x2aa] sm:$0xff]  ;;  %v2138_v52 = vld [vmem:[#allocation2 + $0x2c1] sm:$0xff] }
 0x220   :  { %v1516_v22 = vpop.f32.mrf.mxu2  ;;  %v1624_v25 = vadd.f32 %v1513_v50, %v1148_v7  ;;  %4867 = vmatmul.msk.bf16.gmra.mxu0 %vm348_vm1, %v2174_v55  ;;  %v6085_v58 = vadd.f32 %v2371_v42, %v2053_v29  ;;  %v1315_v55 = vpack.c.bf16 %v1278_v3, %v1277_v38  ;;  %v2137_v42 = vld [vmem:[#allocation2 + $0x2b9] sm:$0xff] }
 0x221   :  { %v2175_v29 = vpack.c.bf16 %v2138_v52, %v2137_v42 }
 0x225   :  { %v1943_v37 = vpop.f32.mrf.mxu3  ;;  %v1150_v1 = vpop.f32.mrf.mxu1 }
 0x226   :  { %v2054_v2 = vadd.f32 %v1943_v37, %v1624_v25  ;;  %v1151_v18 = vadd.f32 %v1150_v1, %v5722_v49  ;;  %v2378_v59 = vpop.f32.mrf.mxu0  ;;  %v1708_v1 = vld [vmem:[#allocation2 + $0x2c0] sm:$0xff] }
 0x228   :  { %4768 = vmatmul.msk.bf16.gmra.mxu1 %vm348_vm1, %v1743_v41  ;;  %v1518_v44 = vpop.f32.mrf.mxu2  ;;  %v1625_v39 = vadd.f32 %v1516_v22, %v1151_v18  ;;  %v6089_v50 = vadd.f32 %v2373_v6, %v2054_v2  ;;  %v1707_v22 = vld [vmem:[#allocation2 + $0x2b8] sm:$0xff] }
 0x229   :  { %v1745_v42 = vpack.c.bf16 %v1708_v1, %v1707_v22 }
 0x22a   :  { %4834 = vmatmul.msk.bf16.gmra.mxu3 %vm348_vm1, %v1744_v27 }
 0x22d   :  { %v1946_v7 = vpop.f32.mrf.mxu3  ;;  %v1152_v25 = vpop.f32.mrf.mxu1  ;;  %4802 = vmatmul.msk.bf16.gmra.mxu2 %vm348_vm1, %v1315_v55  ;;  %v1279_v55 = vld [vmem:[#allocation2 + $0x2ba] sm:$0xff] }
 0x22e   :  { %v2055_v49 = vadd.f32 %v1946_v7, %v1625_v39  ;;  %v1153_v4 = vadd.f32 %v1152_v25, %v5749_v57  ;;  %v2381_v62 = vpop.f32.mrf.mxu0  ;;  %v1280_v39 = vld [vmem:[#allocation2 + $0x2c2] sm:$0xff]  ;;  %v2140_v25 = vld [vmem:[#allocation2 + $0x2d9] sm:$0xff] }
 0x230   :  { %v1521_v37 = vpop.f32.mrf.mxu2  ;;  %v1626_v41 = vadd.f32 %v1518_v44, %v1153_v4  ;;  %4868 = vmatmul.msk.bf16.gmra.mxu0 %vm348_vm1, %v2175_v29  ;;  %v6095_v6 = vadd.f32 %v2376_v21, %v2055_v49  ;;  %v1316_v29 = vpack.c.bf16 %v1280_v39, %v1279_v55  ;;  %v2139_v21 = vld [vmem:[#allocation2 + $0x2d1] sm:$0xff] }
 0x231   :  { %v2176_v49 = vpack.c.bf16 %v2140_v25, %v2139_v21 }
 0x235   :  { %v1948_v2 = vpop.f32.mrf.mxu3  ;;  %v1155_v18 = vpop.f32.mrf.mxu1 }
 0x236   :  { %v2056_v38 = vadd.f32 %v1948_v2, %v1626_v41  ;;  %v1156_v3 = vadd.f32 %v1155_v18, %v5773_v63  ;;  %v2383_v52 = vpop.f32.mrf.mxu0  ;;  %v1710_v18 = vld [vmem:[#allocation2 + $0x2d8] sm:$0xff] }
 0x238   :  { %4769 = vmatmul.msk.bf16.gmra.mxu1 %vm348_vm1, %v1744_v27  ;;  %v1523_v57 = vpop.f32.mrf.mxu2  ;;  %v1627_v7 = vadd.f32 %v1521_v37, %v1156_v3  ;;  %v6099_v44 = vadd.f32 %v2378_v59, %v2056_v38  ;;  %v1709_v37 = vld [vmem:[#allocation2 + $0x2d0] sm:$0xff] }
 0x239   :  { %v1746_v21 = vpack.c.bf16 %v1710_v18, %v1709_v37 }
 0x23a   :  { %4835 = vmatmul.msk.bf16.gmra.mxu3 %vm348_vm1, %v1745_v42 }
 0x23d   :  { %v1951_v4 = vpop.f32.mrf.mxu3  ;;  %v1157_v41 = vpop.f32.mrf.mxu1  ;;  %4803 = vmatmul.msk.bf16.gmra.mxu2 %vm348_vm1, %v1316_v29  ;;  %v1281_v29 = vld [vmem:[#allocation2 + $0x2d2] sm:$0xff] }
 0x23e   :  { %v2057_v63 = vadd.f32 %v1951_v4, %v1627_v7  ;;  %v1158_v22 = vadd.f32 %v1157_v41, %v5784_v13  ;;  %v2386_v1 = vpop.f32.mrf.mxu0  ;;  %v1282_v7 = vld [vmem:[#allocation2 + $0x2da] sm:$0xff]  ;;  %v2142_v41 = vld [vmem:[#allocation2 + $0x2f1] sm:$0xff] }
 0x240   :  { %v1526_v2 = vpop.f32.mrf.mxu2  ;;  %v1628_v27 = vadd.f32 %v1523_v57, %v1158_v22  ;;  %4869 = vmatmul.msk.bf16.gmra.mxu0 %vm348_vm1, %v2176_v49  ;;  %v6105_v59 = vadd.f32 %v2381_v62, %v2057_v63  ;;  %v1317_v49 = vpack.c.bf16 %v1282_v7, %v1281_v29  ;;  %v2141_v62 = vld [vmem:[#allocation2 + $0x2e9] sm:$0xff] }
 0x241   :  { %v2177_v63 = vpack.c.bf16 %v2142_v41, %v2141_v62 }
 0x245   :  { %v1953_v38 = vpop.f32.mrf.mxu3  ;;  %v1160_v3 = vpop.f32.mrf.mxu1 }
 0x246   :  { %v2058_v55 = vadd.f32 %v1953_v38, %v1628_v27  ;;  %v1161_v39 = vadd.f32 %v1160_v3, %v5794_v17  ;;  %v2388_v25 = vpop.f32.mrf.mxu0  ;;  %v1712_v3 = vld [vmem:[#allocation2 + $0x2f0] sm:$0xff] }
 0x248   :  { %4770 = vmatmul.msk.bf16.gmra.mxu1 %vm348_vm1, %v1745_v42  ;;  %v1528_v13 = vpop.f32.mrf.mxu2  ;;  %v1629_v4 = vadd.f32 %v1526_v2, %v1161_v39  ;;  %v6109_v57 = vadd.f32 %v2383_v52, %v2058_v55  ;;  %v1711_v2 = vld [vmem:[#allocation2 + $0x2e8] sm:$0xff] }
 0x249   :  { %v1747_v62 = vpack.c.bf16 %v1712_v3, %v1711_v2 }
 0x24a   :  { %4836 = vmatmul.msk.bf16.gmra.mxu3 %vm348_vm1, %v1746_v21 }
 0x24d   :  { %v1956_v22 = vpop.f32.mrf.mxu3  ;;  %v1162_v27 = vpop.f32.mrf.mxu1  ;;  %4804 = vmatmul.msk.bf16.gmra.mxu2 %vm348_vm1, %v1317_v49  ;;  %v1283_v49 = vld [vmem:[#allocation2 + $0x2ea] sm:$0xff] }
 0x24e   :  { %v2059_v17 = vadd.f32 %v1956_v22, %v1629_v4  ;;  %v1163_v37 = vadd.f32 %v1162_v27, %v5805_v28  ;;  %v2391_v18 = vpop.f32.mrf.mxu0  ;;  %v1284_v4 = vld [vmem:[#allocation2 + $0x2f2] sm:$0xff]  ;;  %v2143_v27 = vld [vmem:[#allocation2 + $0x301] sm:$0xff] }
 0x250   :  { %v1531_v38 = vpop.f32.mrf.mxu2  ;;  %v1630_v42 = vadd.f32 %v1528_v13, %v1163_v37  ;;  %4870 = vmatmul.msk.bf16.gmra.mxu0 %vm348_vm1, %v2177_v63  ;;  %v6115_v52 = vadd.f32 %v2386_v1, %v2059_v17  ;;  %v5164_v1 = vld [vmem:[%s6879_s0 + $0xf8] sm:$0xff]   ;;  %v1318_v63 = vpack.c.bf16 %v1284_v4, %v1283_v49  ;;  %v2144_v17 = vld [vmem:[#allocation2 + $0x309] sm:$0xff] }
 0x251   :  { %v5132_v37 = vunpack.c.l.bf16 %v5164_v1 }
 0x252   :  { %6908 = vst [vmem:[#allocation27_spill] sm:$0xff] %v6115_v52 }
 0x255   :  { %v1958_v55 = vpop.f32.mrf.mxu3  ;;  %v1165_v39 = vpop.f32.mrf.mxu1 }
 0x256   :  { %v2060_v29 = vadd.f32 %v1958_v55, %v1630_v42  ;;  %v1166_v7 = vadd.f32 %v1165_v39, %v5815_v33  ;;  %v2393_v41 = vpop.f32.mrf.mxu0  ;;  %v5133_v42 = vunpack.c.h.bf16 %v5164_v1  ;;  %v214_v33 = vmul.f32 %v5948_v32, %v5132_v37  ;;  %v6911_v37 = vld [vmem:[#allocation13_spill] sm:$0xff] }
 0x258   :  { %4771 = vmatmul.msk.bf16.gmra.mxu1 %vm348_vm1, %v1746_v21  ;;  %v1533_v28 = vpop.f32.mrf.mxu2  ;;  %v1631_v22 = vadd.f32 %v1531_v38, %v1166_v7  ;;  %v6122_v13 = vadd.f32 %v2388_v25, %v2060_v29  ;;  %v215_v2 = vmul.f32 %v5948_v32, %v5133_v42  ;;  %v2178_v21 = vpack.c.bf16 %v2144_v17, %v2143_v27  ;;  %v6910_v29 = vld [vmem:[#allocation11_spill] sm:$0xff]  ;;  %v1714_v27 = vld [vmem:[#allocation2 + $0x308] sm:$0xff] }
 0x259   :  { %v282_v55 = vadd.f32 %v5955_v8, %v214_v33 }
 0x25a   :  { %6909 = vst [vmem:[#allocation28_spill] sm:$0xff] %v6122_v13  ;;  %4837 = vmatmul.msk.bf16.gmra.mxu3 %vm348_vm1, %v1747_v62  ;;  %v283_v25 = vadd.f32 %v5955_v8, %v215_v2 }
 0x25b   :  { %v346_v4 = vmax.f32 %v282_v55, 0.0 }
 0x25c   :  { %v347_v1 = vmax.f32 %v283_v25, 0.0  ;;  %v2145_v25 = vld [vmem:[#allocation2 + $0x319] sm:$0xff] }
 0x25d   :  { %v1961_v3 = vpop.f32.mrf.mxu3  ;;  %v1167_v38 = vpop.f32.mrf.mxu1  ;;  %4805 = vmatmul.msk.bf16.gmra.mxu2 %vm348_vm1, %v1318_v63  ;;  %491 = vst.msk [vmem:[#allocation2 + $0x331] sm:$0xff] %vm348_vm1, %v346_v4  ;;  %v1713_v63 = vld [vmem:[#allocation2 + $0x300] sm:$0xff] }
 0x25e   :  { %v2061_v39 = vadd.f32 %v1961_v3, %v1631_v22  ;;  %v1168_v7 = vadd.f32 %v1167_v38, %v6910_v29  ;;  %v2396_v49 = vpop.f32.mrf.mxu0  ;;  %492 = vst.msk [vmem:[#allocation2 + $0x339] sm:$0xff] %vm348_vm1, %v347_v1  ;;  %v1748_v33 = vpack.c.bf16 %v1714_v27, %v1713_v63  ;;  %v1285_v3 = vld [vmem:[#allocation2 + $0x302] sm:$0xff]  ;;  %v1286_v38 = vld [vmem:[#allocation2 + $0x30a] sm:$0xff] }
 0x25f   :  { %v1319_v55 = vpack.c.bf16 %v1286_v38, %v1285_v3  ;;  %v6912_v1 = vld [vmem:[#allocation15_spill] sm:$0xff]  ;;  %v6914_v3 = vld [vmem:[#allocation17_spill] sm:$0xff] }
 0x260   :  { %v1536_v13 = vpop.f32.mrf.mxu2  ;;  %v1632_v52 = vadd.f32 %v1533_v28, %v1168_v7  ;;  %4871 = vmatmul.msk.bf16.gmra.mxu0 %vm348_vm1, %v2178_v21  ;;  %v6132_v32 = vadd.f32 %v2391_v18, %v2061_v39  ;;  %v2146_v39 = vld [vmem:[#allocation2 + $0x321] sm:$0xff] }
 0x261   :  { %v2179_v29 = vpack.c.bf16 %v2146_v39, %v2145_v25 }
 0x265   :  { %v1963_v17 = vpop.f32.mrf.mxu3  ;;  %v1170_v8 = vpop.f32.mrf.mxu1 }
 0x266   :  { %v2062_v22 = vadd.f32 %v1963_v17, %v1632_v52  ;;  %v1171_v42 = vadd.f32 %v1170_v8, %v6911_v37  ;;  %v2398_v2 = vpop.f32.mrf.mxu0  ;;  %v1716_v8 = vld [vmem:[#allocation2 + $0x320] sm:$0xff] }
 0x268   :  { %4772 = vmatmul.msk.bf16.gmra.mxu1 %vm348_vm1, %v1747_v62  ;;  %v1538_v28 = vpop.f32.mrf.mxu2  ;;  %v1633_v18 = vadd.f32 %v1536_v13, %v1171_v42  ;;  %v6138_v21 = vadd.f32 %v2393_v41, %v2062_v22  ;;  %v1715_v13 = vld [vmem:[#allocation2 + $0x318] sm:$0xff] }
 0x269   :  { %v1749_v25 = vpack.c.bf16 %v1716_v8, %v1715_v13  ;;  %v6916_v8 = vld [vmem:[#allocation19_spill] sm:$0xff] }
 0x26a   :  { %4838 = vmatmul.msk.bf16.gmra.mxu3 %vm348_vm1, %v1748_v33 }
 0x26d   :  { %v1966_v7 = vpop.f32.mrf.mxu3  ;;  %v1172_v52 = vpop.f32.mrf.mxu1  ;;  %4806 = vmatmul.msk.bf16.gmra.mxu2 %vm348_vm1, %v1319_v55  ;;  %v1287_v55 = vld [vmem:[#allocation2 + $0x31a] sm:$0xff] }
 0x26e   :  { %v2063_v4 = vadd.f32 %v1966_v7, %v1633_v18  ;;  %v1173_v63 = vadd.f32 %v1172_v52, %v6912_v1  ;;  %v2401_v27 = vpop.f32.mrf.mxu0  ;;  %v1288_v18 = vld [vmem:[#allocation2 + $0x322] sm:$0xff] }
 0x270   :  { %v1541_v17 = vpop.f32.mrf.mxu2  ;;  %v1634_v62 = vadd.f32 %v1538_v28, %v1173_v63  ;;  %4872 = vmatmul.msk.bf16.gmra.mxu0 %vm348_vm1, %v2179_v29  ;;  %v6144_v41 = vadd.f32 %v2396_v49, %v2063_v4  ;;  %v1320_v29 = vpack.c.bf16 %v1288_v18, %v1287_v55  ;;  %v2147_v49 = vld [vmem:[#allocation2 + $0x331] sm:$0xff]  ;;  %v2148_v4 = vld [vmem:[#allocation2 + $0x339] sm:$0xff] }
 0x271   :  { %v2180_v1 = vpack.c.bf16 %v2148_v4, %v2147_v49  ;;  %v6918_v49 = vld [vmem:[#allocation21_spill] sm:$0xff] }
 0x272   :  { %6913 = vst [vmem:[#allocation11_spill] sm:$0xff] %v6144_v41 }
 0x275   :  { %v1968_v22 = vpop.f32.mrf.mxu3  ;;  %v1175_v37 = vpop.f32.mrf.mxu1 }
 0x276   :  { %v2064_v42 = vadd.f32 %v1968_v22, %v1634_v62  ;;  %v1176_v38 = vadd.f32 %v1175_v37, %v6914_v3  ;;  %v2403_v39 = vpop.f32.mrf.mxu0 }
 0x278   :  { %4773 = vmatmul.msk.bf16.gmra.mxu1 %vm348_vm1, %v1748_v33  ;;  %v1543_v7 = vpop.f32.mrf.mxu2  ;;  %v1635_v52 = vadd.f32 %v1541_v17, %v1176_v38  ;;  %v6148_v28 = vadd.f32 %v2398_v2, %v2064_v42  ;;  %v1717_v17 = vld [vmem:[#allocation2 + $0x330] sm:$0xff]  ;;  %v1718_v42 = vld [vmem:[#allocation2 + $0x338] sm:$0xff] }
 0x27a   :  { %6915 = vst [vmem:[#allocation13_spill] sm:$0xff] %v6148_v28  ;;  %4839 = vmatmul.msk.bf16.gmra.mxu3 %vm348_vm1, %v1749_v25  ;;  %v1750_v28 = vpack.c.bf16 %v1718_v42, %v1717_v17  ;;  %v6920_v42 = vld [vmem:[#allocation23_spill] sm:$0xff] }
 0x27d   :  { %v1971_v63 = vpop.f32.mrf.mxu3  ;;  %v1177_v62 = vpop.f32.mrf.mxu1  ;;  %4807 = vmatmul.msk.bf16.gmra.mxu2 %vm348_vm1, %v1320_v29  ;;  %v2946_v29 = vld [vmem:[#allocation2 + $0x30] sm:$0xff] }
 0x27e   :  { %v2065_v13 = vadd.f32 %v1971_v63, %v1635_v52  ;;  %v1178_v22 = vadd.f32 %v1177_v62, %v6916_v8  ;;  %v2406_v37 = vpop.f32.mrf.mxu0  ;;  %v2947_v52 = vld [vmem:[#allocation2 + $0x38] sm:$0xff] }
 0x280   :  { %v1546_v3 = vpop.f32.mrf.mxu2  ;;  %v1636_v33 = vadd.f32 %v1543_v7, %v1178_v22  ;;  %4873 = vmatmul.msk.bf16.gmra.mxu0 %vm348_vm1, %v2180_v1  ;;  %v6154_v2 = vadd.f32 %v2401_v27, %v2065_v13  ;;  %v3010_v1 = vpack.c.bf16 %v2947_v52, %v2946_v29  ;;  %v3806_v27 = vld [vmem:[#allocation2 + $0x32] sm:$0xff]  ;;  %v3807_v13 = vld [vmem:[#allocation2 + $0x3a] sm:$0xff] }
 0x281   :  { %v3870_v8 = vpack.c.bf16 %v3807_v13, %v3806_v27  ;;  %v3377_v29 = vld [vmem:[#allocation2 + $0x39] sm:$0xff] }
 0x282   :  { %6917 = vst [vmem:[#allocation15_spill] sm:$0xff] %v6154_v2  ;;  %v3809_v2 = vld [vmem:[#allocation2 + $0x52] sm:$0xff] }
 0x285   :  { %v1973_v38 = vpop.f32.mrf.mxu3  ;;  %v1180_v55 = vpop.f32.mrf.mxu1 }
 0x286   :  { %v2066_v18 = vadd.f32 %v1973_v38, %v1636_v33  ;;  %v1181_v4 = vadd.f32 %v1180_v55, %v6918_v49  ;;  %v2408_v41 = vpop.f32.mrf.mxu0 }
 0x288   :  { %4774 = vmatmul.msk.bf16.gmra.mxu1 %vm348_vm1, %v1749_v25  ;;  %v1548_v63 = vpop.f32.mrf.mxu2  ;;  %v1637_v62 = vadd.f32 %v1546_v3, %v1181_v4  ;;  %v6158_v7 = vadd.f32 %v2403_v39, %v2066_v18  ;;  %v2515_v3 = vld [vmem:[#allocation2 + $0x1a] sm:$0xff]  ;;  %v2516_v18 = vld [vmem:[#allocation2 + $0x22] sm:$0xff]  ;;  %v3376_v4 = vld [vmem:[#allocation2 + $0x31] sm:$0xff] }
 0x28a   :  { %6919 = vst [vmem:[#allocation17_spill] sm:$0xff] %v6158_v7  ;;  %4840 = vmatmul.msk.bf16.gmra.mxu3 %vm348_vm1, %v1750_v28  ;;  %v2579_v28 = vpack.c.bf16 %v2516_v18, %v2515_v3  ;;  %v6922_v7 = vld [vmem:[#allocation3_spill] sm:$0xff] }
 0x28d   :  { %v1976_v22 = vpop.f32.mrf.mxu3  ;;  %v1182_v33 = vpop.f32.mrf.mxu1  ;;  %4908 = vmatmul.msk.bf16.vlgmr.msra.gmra.mxu2 %vm348_vm1, %v3010_v1 }
 0x28e   :  { %v2067_v17 = vadd.f32 %v1976_v22, %v1637_v62  ;;  %v1183_v38 = vadd.f32 %v1182_v33, %v6920_v42  ;;  %v2411_v55 = vpop.f32.mrf.mxu0  ;;  %v3440_v62 = vpack.c.bf16 %v3377_v29, %v3376_v4  ;;  %v2948_v33 = vld [vmem:[#allocation2 + $0x48] sm:$0xff]  ;;  %v2949_v42 = vld [vmem:[#allocation2 + $0x50] sm:$0xff] }
 0x28f   :  { %v6924_v4 = vld [vmem:[#allocation4_spill] sm:$0xff] }
 0x290   :  { %v1551_v49 = vpop.f32.mrf.mxu2  ;;  %v1638_v25 = vadd.f32 %v1548_v63, %v1183_v38  ;;  %4974 = vmatmul.msk.bf16.vlgmr.msra.gmra.mxu0 %vm348_vm1, %v3870_v8  ;;  %v6164_v39 = vadd.f32 %v2406_v37, %v2067_v17  ;;  %v3011_v17 = vpack.c.bf16 %v2949_v42, %v2948_v33 }
 0x292   :  { %6921 = vst [vmem:[#allocation19_spill] sm:$0xff] %v6164_v39  ;;  %v3808_v39 = vld [vmem:[#allocation2 + $0x4a] sm:$0xff] }
 0x293   :  { %v3871_v3 = vpack.c.bf16 %v3809_v2, %v3808_v39  ;;  %v6926_v2 = vld [vmem:[#allocation5_spill] sm:$0xff] }
 0x295   :  { %v1978_v52 = vpop.f32.mrf.mxu3  ;;  %v1185_v27 = vpop.f32.mrf.mxu1 }
 0x296   :  { %v2068_v13 = vadd.f32 %v1978_v52, %v1638_v25  ;;  %v1186_v1 = vadd.f32 %v1185_v27, %v6922_v7  ;;  %v2413_v22 = vpop.f32.mrf.mxu0 }
 0x298   :  { %4875 = vmatmul.msk.bf16.vlgmr.msra.gmra.mxu1 %vm348_vm1, %v2579_v28  ;;  %v1553_v63 = vpop.f32.mrf.mxu2  ;;  %v1639_v38 = vadd.f32 %v1551_v49, %v1186_v1  ;;  %v6168_v37 = vadd.f32 %v2408_v41, %v2068_v13  ;;  %v3378_v49 = vld [vmem:[#allocation2 + $0x49] sm:$0xff]  ;;  %v3379_v13 = vld [vmem:[#allocation2 + $0x51] sm:$0xff] }
 0x299   :  { %v3441_v42 = vpack.c.bf16 %v3379_v13, %v3378_v49  ;;  %v6928_v13 = vld [vmem:[#allocation6_spill] sm:$0xff] }
 0x29a   :  { %6923 = vst [vmem:[#allocation21_spill] sm:$0xff] %v6168_v37  ;;  %4941 = vmatmul.msk.bf16.vlgmr.msra.gmra.mxu3 %vm348_vm1, %v3440_v62 }
 0x29d   :  { %v1981_v18 = vpop.f32.mrf.mxu3  ;;  %v1187_v25 = vpop.f32.mrf.mxu1  ;;  %4909 = vmatmul.msk.bf16.gmra.mxu2 %vm348_vm1, %v3011_v17  ;;  %v2950_v17 = vld [vmem:[#allocation2 + $0x60] sm:$0xff] }
 0x29e   :  { %v2069_v7 = vadd.f32 %v1981_v18, %v1639_v38  ;;  %v1188_v29 = vadd.f32 %v1187_v25, %v6924_v4  ;;  %v2416_v52 = vpop.f32.mrf.mxu0  ;;  %v2951_v38 = vld [vmem:[#allocation2 + $0x68] sm:$0xff] }
 0x29f   :  { %v3012_v4 = vpack.c.bf16 %v2951_v38, %v2950_v17  ;;  %v6930_v38 = vld [vmem:[#allocation7_spill] sm:$0xff] }
 0x2a0   :  { %v1556_v27 = vpop.f32.mrf.mxu2  ;;  %v1640_v28 = vadd.f32 %v1553_v63, %v1188_v29  ;;  %4975 = vmatmul.msk.bf16.gmra.mxu0 %vm348_vm1, %v3871_v3  ;;  %v6174_v41 = vadd.f32 %v2411_v55, %v2069_v7  ;;  %v3810_v55 = vld [vmem:[#allocation2 + $0x62] sm:$0xff]  ;;  %v3811_v7 = vld [vmem:[#allocation2 + $0x6a] sm:$0xff] }
 0x2a1   :  { %v3872_v29 = vpack.c.bf16 %v3811_v7, %v3810_v55 }
 0x2a2   :  { %6925 = vst [vmem:[#allocation23_spill] sm:$0xff] %v6174_v41 }
 0x2a5   :  { %v1983_v1 = vpop.f32.mrf.mxu3  ;;  %v1190_v33 = vpop.f32.mrf.mxu1 }
 0x2a6   :  { %v2070_v62 = vadd.f32 %v1983_v1, %v1640_v28  ;;  %v1191_v39 = vadd.f32 %v1190_v33, %v6926_v2  ;;  %v2418_v37 = vpop.f32.mrf.mxu0 }
 0x2a8   :  { %4876 = vmatmul.msk.bf16.gmra.mxu1 %vm348_vm1, %v3870_v8  ;;  %v1558_v18 = vpop.f32.mrf.mxu2  ;;  %v1641_v25 = vadd.f32 %v1556_v27, %v1191_v39  ;;  %v6178_v63 = vadd.f32 %v2413_v22, %v2070_v62  ;;  %v3380_v27 = vld [vmem:[#allocation2 + $0x61] sm:$0xff]  ;;  %v3381_v62 = vld [vmem:[#allocation2 + $0x69] sm:$0xff] }
 0x2a9   :  { %v3442_v7 = vpack.c.bf16 %v3381_v62, %v3380_v27  ;;  %v6932_v62 = vld [vmem:[#allocation8_spill] sm:$0xff] }
 0x2aa   :  { %6927 = vst [vmem:[#allocation3_spill] sm:$0xff] %v6178_v63  ;;  %4942 = vmatmul.msk.bf16.gmra.mxu3 %vm348_vm1, %v3441_v42 }
 0x2ad   :  { %v1986_v41 = vpop.f32.mrf.mxu3  ;;  %v1192_v28 = vpop.f32.mrf.mxu1  ;;  %4910 = vmatmul.msk.bf16.gmra.mxu2 %vm348_vm1, %v3012_v4  ;;  %v2952_v4 = vld [vmem:[#allocation2 + $0x78] sm:$0xff] }
 0x2ae   :  { %v2071_v49 = vadd.f32 %v1986_v41, %v1641_v25  ;;  %v1193_v1 = vadd.f32 %v1192_v28, %v6928_v13  ;;  %v2421_v33 = vpop.f32.mrf.mxu0  ;;  %v2953_v41 = vld [vmem:[#allocation2 + $0x80] sm:$0xff] }
 0x2af   :  { %v3013_v13 = vpack.c.bf16 %v2953_v41, %v2952_v4  ;;  %v6934_v41 = vld [vmem:[#allocation9_spill] sm:$0xff] }
 0x2b0   :  { %v1561_v2 = vpop.f32.mrf.mxu2  ;;  %v1642_v8 = vadd.f32 %v1558_v18, %v1193_v1  ;;  %4976 = vmatmul.msk.bf16.gmra.mxu0 %vm348_vm1, %v3872_v29  ;;  %v6184_v22 = vadd.f32 %v2416_v52, %v2071_v49  ;;  %v3812_v52 = vld [vmem:[#allocation2 + $0x7a] sm:$0xff]  ;;  %v3813_v49 = vld [vmem:[#allocation2 + $0x82] sm:$0xff] }
 0x2b1   :  { %v3873_v1 = vpack.c.bf16 %v3813_v49, %v3812_v52 }
 0x2b2   :  { %6929 = vst [vmem:[#allocation4_spill] sm:$0xff] %v6184_v22 }
 0x2b5   :  { %v1988_v39 = vpop.f32.mrf.mxu3  ;;  %v1195_v17 = vpop.f32.mrf.mxu1 }
 0x2b6   :  { %v2072_v42 = vadd.f32 %v1988_v39, %v1642_v8  ;;  %v1196_v55 = vadd.f32 %v1195_v17, %v6930_v38  ;;  %v2423_v63 = vpop.f32.mrf.mxu0 }
 0x2b8   :  { %4877 = vmatmul.msk.bf16.gmra.mxu1 %vm348_vm1, %v3871_v3  ;;  %v1563_v25 = vpop.f32.mrf.mxu2  ;;  %v1643_v28 = vadd.f32 %v1561_v2, %v1196_v55  ;;  %v6188_v18 = vadd.f32 %v2418_v37, %v2072_v42  ;;  %v3382_v2 = vld [vmem:[#allocation2 + $0x79] sm:$0xff]  ;;  %v3383_v42 = vld [vmem:[#allocation2 + $0x81] sm:$0xff] }
 0x2b9   :  { %v3443_v49 = vpack.c.bf16 %v3383_v42, %v3382_v2  ;;  %v6936_v42 = vld [vmem:[#allocation10_spill] sm:$0xff] }
 0x2ba   :  { %6931 = vst [vmem:[#allocation5_spill] sm:$0xff] %v6188_v18  ;;  %4943 = vmatmul.msk.bf16.gmra.mxu3 %vm348_vm1, %v3442_v7 }
 0x2bd   :  { %v1991_v22 = vpop.f32.mrf.mxu3  ;;  %v1197_v8 = vpop.f32.mrf.mxu1  ;;  %4911 = vmatmul.msk.bf16.gmra.mxu2 %vm348_vm1, %v3013_v13  ;;  %v2954_v13 = vld [vmem:[#allocation2 + $0x90] sm:$0xff] }
 0x2be   :  { %v2073_v27 = vadd.f32 %v1991_v22, %v1643_v28  ;;  %v1198_v39 = vadd.f32 %v1197_v8, %v6932_v62  ;;  %v2426_v17 = vpop.f32.mrf.mxu0  ;;  %v2955_v22 = vld [vmem:[#allocation2 + $0x98] sm:$0xff] }
 0x2bf   :  { %v3014_v62 = vpack.c.bf16 %v2955_v22, %v2954_v13  ;;  %v6938_v22 = vld [vmem:[#allocation12_spill] sm:$0xff] }
 0x2c0   :  { %v1566_v38 = vpop.f32.mrf.mxu2  ;;  %v1644_v3 = vadd.f32 %v1563_v25, %v1198_v39  ;;  %4977 = vmatmul.msk.bf16.gmra.mxu0 %vm348_vm1, %v3873_v1  ;;  %v6194_v37 = vadd.f32 %v2421_v33, %v2073_v27  ;;  %v3814_v33 = vld [vmem:[#allocation2 + $0x92] sm:$0xff]  ;;  %v3815_v27 = vld [vmem:[#allocation2 + $0x9a] sm:$0xff] }
 0x2c1   :  { %v3874_v39 = vpack.c.bf16 %v3815_v27, %v3814_v33 }
 0x2c2   :  { %6933 = vst [vmem:[#allocation6_spill] sm:$0xff] %v6194_v37 }
 0x2c5   :  { %v1993_v55 = vpop.f32.mrf.mxu3  ;;  %v1200_v4 = vpop.f32.mrf.mxu1 }
 0x2c6   :  { %v2074_v7 = vadd.f32 %v1993_v55, %v1644_v3  ;;  %v1201_v52 = vadd.f32 %v1200_v4, %v6934_v41  ;;  %v2428_v18 = vpop.f32.mrf.mxu0 }
 0x2c8   :  { %4878 = vmatmul.msk.bf16.gmra.mxu1 %vm348_vm1, %v3872_v29  ;;  %v1568_v28 = vpop.f32.mrf.mxu2  ;;  %v1645_v8 = vadd.f32 %v1566_v38, %v1201_v52  ;;  %v6198_v25 = vadd.f32 %v2423_v63, %v2074_v7  ;;  %v3384_v38 = vld [vmem:[#allocation2 + $0x91] sm:$0xff]  ;;  %v3385_v7 = vld [vmem:[#allocation2 + $0x99] sm:$0xff] }
 0x2c9   :  { %v3444_v27 = vpack.c.bf16 %v3385_v7, %v3384_v38  ;;  %v6940_v7 = vld [vmem:[#allocation14_spill] sm:$0xff] }
 0x2ca   :  { %6935 = vst [vmem:[#allocation7_spill] sm:$0xff] %v6198_v25  ;;  %4944 = vmatmul.msk.bf16.gmra.mxu3 %vm348_vm1, %v3443_v49 }
 0x2cd   :  { %v1996_v37 = vpop.f32.mrf.mxu3  ;;  %v1202_v3 = vpop.f32.mrf.mxu1  ;;  %4912 = vmatmul.msk.bf16.gmra.mxu2 %vm348_vm1, %v3014_v62  ;;  %v2956_v62 = vld [vmem:[#allocation2 + $0xa8] sm:$0xff] }
 0x2ce   :  { %v2075_v2 = vadd.f32 %v1996_v37, %v1645_v8  ;;  %v1203_v55 = vadd.f32 %v1202_v3, %v6936_v42  ;;  %v2431_v4 = vpop.f32.mrf.mxu0  ;;  %v2957_v37 = vld [vmem:[#allocation2 + $0xb0] sm:$0xff] }
 0x2cf   :  { %v3015_v42 = vpack.c.bf16 %v2957_v37, %v2956_v62  ;;  %v6942_v37 = vld [vmem:[#allocation16_spill] sm:$0xff] }
 0x2d0   :  { %v1571_v41 = vpop.f32.mrf.mxu2  ;;  %v1646_v29 = vadd.f32 %v1568_v28, %v1203_v55  ;;  %4978 = vmatmul.msk.bf16.gmra.mxu0 %vm348_vm1, %v3874_v39  ;;  %v6204_v63 = vadd.f32 %v2426_v17, %v2075_v2  ;;  %v3816_v17 = vld [vmem:[#allocation2 + $0xaa] sm:$0xff]  ;;  %v3817_v2 = vld [vmem:[#allocation2 + $0xb2] sm:$0xff] }
 0x2d1   :  { %v3875_v55 = vpack.c.bf16 %v3817_v2, %v3816_v17 }
 0x2d2   :  { %6937 = vst [vmem:[#allocation8_spill] sm:$0xff] %v6204_v63 }
 0x2d5   :  { %v1998_v52 = vpop.f32.mrf.mxu3  ;;  %v1205_v13 = vpop.f32.mrf.mxu1 }
 0x2d6   :  { %v2076_v49 = vadd.f32 %v1998_v52, %v1646_v29  ;;  %v1206_v33 = vadd.f32 %v1205_v13, %v6938_v22  ;;  %v2433_v25 = vpop.f32.mrf.mxu0 }
 0x2d8   :  { %4879 = vmatmul.msk.bf16.gmra.mxu1 %vm348_vm1, %v3873_v1  ;;  %v1573_v8 = vpop.f32.mrf.mxu2  ;;  %v1647_v3 = vadd.f32 %v1571_v41, %v1206_v33  ;;  %v6208_v28 = vadd.f32 %v2428_v18, %v2076_v49  ;;  %v3386_v41 = vld [vmem:[#allocation2 + $0xa9] sm:$0xff]  ;;  %v3387_v49 = vld [vmem:[#allocation2 + $0xb1] sm:$0xff] }
 0x2d9   :  { %v3445_v2 = vpack.c.bf16 %v3387_v49, %v3386_v41  ;;  %v6944_v49 = vld [vmem:[#allocation18_spill] sm:$0xff] }
 0x2da   :  { %6939 = vst [vmem:[#allocation9_spill] sm:$0xff] %v6208_v28  ;;  %4945 = vmatmul.msk.bf16.gmra.mxu3 %vm348_vm1, %v3444_v27 }
 0x2dd   :  { %v2001_v63 = vpop.f32.mrf.mxu3  ;;  %v1207_v29 = vpop.f32.mrf.mxu1  ;;  %4913 = vmatmul.msk.bf16.gmra.mxu2 %vm348_vm1, %v3015_v42  ;;  %v2958_v42 = vld [vmem:[#allocation2 + $0xc0] sm:$0xff] }
 0x2de   :  { %v2077_v38 = vadd.f32 %v2001_v63, %v1647_v3  ;;  %v1208_v52 = vadd.f32 %v1207_v29, %v6940_v7  ;;  %v2436_v13 = vpop.f32.mrf.mxu0  ;;  %v2959_v63 = vld [vmem:[#allocation2 + $0xc8] sm:$0xff] }
 0x2df   :  { %v3016_v7 = vpack.c.bf16 %v2959_v63, %v2958_v42  ;;  %v6946_v63 = vld [vmem:[#allocation20_spill] sm:$0xff] }
 0x2e0   :  { %v1576_v22 = vpop.f32.mrf.mxu2  ;;  %v1648_v1 = vadd.f32 %v1573_v8, %v1208_v52  ;;  %4979 = vmatmul.msk.bf16.gmra.mxu0 %vm348_vm1, %v3875_v55  ;;  %v6214_v18 = vadd.f32 %v2431_v4, %v2077_v38  ;;  %v3818_v4 = vld [vmem:[#allocation2 + $0xc2] sm:$0xff]  ;;  %v3819_v38 = vld [vmem:[#allocation2 + $0xca] sm:$0xff] }
 0x2e1   :  { %v3876_v52 = vpack.c.bf16 %v3819_v38, %v3818_v4 }
 0x2e2   :  { %6941 = vst [vmem:[#allocation10_spill] sm:$0xff] %v6214_v18 }
 0x2e5   :  { %v2003_v33 = vpop.f32.mrf.mxu3  ;;  %v1210_v62 = vpop.f32.mrf.mxu1 }
 0x2e6   :  { %v2078_v27 = vadd.f32 %v2003_v33, %v1648_v1  ;;  %v1211_v17 = vadd.f32 %v1210_v62, %v6942_v37  ;;  %v2438_v28 = vpop.f32.mrf.mxu0 }
 0x2e8   :  { %4880 = vmatmul.msk.bf16.gmra.mxu1 %vm348_vm1, %v3874_v39  ;;  %v1578_v3 = vpop.f32.mrf.mxu2  ;;  %v1649_v29 = vadd.f32 %v1576_v22, %v1211_v17  ;;  %v6218_v8 = vadd.f32 %v2433_v25, %v2078_v27  ;;  %v3388_v22 = vld [vmem:[#allocation2 + $0xc1] sm:$0xff]  ;;  %v3389_v27 = vld [vmem:[#allocation2 + $0xc9] sm:$0xff] }
 0x2e9   :  { %v3446_v38 = vpack.c.bf16 %v3389_v27, %v3388_v22  ;;  %v6948_v27 = vld [vmem:[#allocation22_spill] sm:$0xff] }
 0x2ea   :  { %6943 = vst [vmem:[#allocation12_spill] sm:$0xff] %v6218_v8  ;;  %4946 = vmatmul.msk.bf16.gmra.mxu3 %vm348_vm1, %v3445_v2 }
 0x2ed   :  { %v2006_v18 = vpop.f32.mrf.mxu3  ;;  %v1212_v1 = vpop.f32.mrf.mxu1  ;;  %4914 = vmatmul.msk.bf16.gmra.mxu2 %vm348_vm1, %v3016_v7  ;;  %v2960_v7 = vld [vmem:[#allocation2 + $0xd8] sm:$0xff] }
 0x2ee   :  { %v2079_v41 = vadd.f32 %v2006_v18, %v1649_v29  ;;  %v1213_v33 = vadd.f32 %v1212_v1, %v6944_v49  ;;  %v2441_v62 = vpop.f32.mrf.mxu0  ;;  %v2961_v18 = vld [vmem:[#allocation2 + $0xe0] sm:$0xff] }
 0x2ef   :  { %v3017_v49 = vpack.c.bf16 %v2961_v18, %v2960_v7  ;;  %v6950_v18 = vld [vmem:[#allocation24_spill] sm:$0xff] }
 0x2f0   :  { %v1581_v37 = vpop.f32.mrf.mxu2  ;;  %v1650_v39 = vadd.f32 %v1578_v3, %v1213_v33  ;;  %4980 = vmatmul.msk.bf16.gmra.mxu0 %vm348_vm1, %v3876_v52  ;;  %v6224_v25 = vadd.f32 %v2436_v13, %v2079_v41  ;;  %v3820_v13 = vld [vmem:[#allocation2 + $0xda] sm:$0xff]  ;;  %v3821_v41 = vld [vmem:[#allocation2 + $0xe2] sm:$0xff] }
 0x2f1   :  { %v3877_v33 = vpack.c.bf16 %v3821_v41, %v3820_v13 }
 0x2f2   :  { %6945 = vst [vmem:[#allocation14_spill] sm:$0xff] %v6224_v25 }
 0x2f5   :  { %v2008_v17 = vpop.f32.mrf.mxu3  ;;  %v1215_v42 = vpop.f32.mrf.mxu1 }
 0x2f6   :  { %v2080_v2 = vadd.f32 %v2008_v17, %v1650_v39  ;;  %v1216_v4 = vadd.f32 %v1215_v42, %v6946_v63  ;;  %v2443_v8 = vpop.f32.mrf.mxu0 }
 0x2f8   :  { %4881 = vmatmul.msk.bf16.gmra.mxu1 %vm348_vm1, %v3875_v55  ;;  %v1583_v29 = vpop.f32.mrf.mxu2  ;;  %v1651_v1 = vadd.f32 %v1581_v37, %v1216_v4  ;;  %v6228_v3 = vadd.f32 %v2438_v28, %v2080_v2  ;;  %v3390_v37 = vld [vmem:[#allocation2 + $0xd9] sm:$0xff]  ;;  %v3391_v2 = vld [vmem:[#allocation2 + $0xe1] sm:$0xff] }
 0x2f9   :  { %v3447_v41 = vpack.c.bf16 %v3391_v2, %v3390_v37  ;;  %v6952_v2 = vld [vmem:[#allocation25_spill] sm:$0xff] }
 0x2fa   :  { %6947 = vst [vmem:[#allocation16_spill] sm:$0xff] %v6228_v3  ;;  %4947 = vmatmul.msk.bf16.gmra.mxu3 %vm348_vm1, %v3446_v38 }
 0x2fd   :  { %v2011_v25 = vpop.f32.mrf.mxu3  ;;  %v1217_v39 = vpop.f32.mrf.mxu1  ;;  %4915 = vmatmul.msk.bf16.gmra.mxu2 %vm348_vm1, %v3017_v49  ;;  %v2962_v49 = vld [vmem:[#allocation2 + $0xf0] sm:$0xff] }
 0x2fe   :  { %v2081_v22 = vadd.f32 %v2011_v25, %v1651_v1  ;;  %v1218_v17 = vadd.f32 %v1217_v39, %v6948_v27  ;;  %v2446_v42 = vpop.f32.mrf.mxu0  ;;  %v2963_v25 = vld [vmem:[#allocation2 + $0xf8] sm:$0xff] }
 0x2ff   :  { %v3018_v27 = vpack.c.bf16 %v2963_v25, %v2962_v49 }
 0x300   :  { %v1586_v63 = vpop.f32.mrf.mxu2  ;;  %v1652_v55 = vadd.f32 %v1583_v29, %v1218_v17  ;;  %4981 = vmatmul.msk.bf16.gmra.mxu0 %vm348_vm1, %v3877_v33  ;;  %v6234_v28 = vadd.f32 %v2441_v62, %v2081_v22  ;;  %v3822_v62 = vld [vmem:[#allocation2 + $0xf2] sm:$0xff]  ;;  %v3823_v22 = vld [vmem:[#allocation2 + $0xfa] sm:$0xff] }
 0x301   :  { %v3878_v17 = vpack.c.bf16 %v3823_v22, %v3822_v62  ;;  %v2964_v22 = vld [vmem:[#allocation2 + $0x108] sm:$0xff] }
 0x302   :  { %6949 = vst [vmem:[#allocation18_spill] sm:$0xff] %v6234_v28 }
 0x305   :  { %v2013_v4 = vpop.f32.mrf.mxu3  ;;  %v1220_v7 = vpop.f32.mrf.mxu1 }
 0x306   :  { %v2082_v38 = vadd.f32 %v2013_v4, %v1652_v55  ;;  %v1221_v13 = vadd.f32 %v1220_v7, %v6950_v18  ;;  %v2448_v3 = vpop.f32.mrf.mxu0 }
 0x308   :  { %4882 = vmatmul.msk.bf16.gmra.mxu1 %vm348_vm1, %v3876_v52  ;;  %v1588_v1 = vpop.f32.mrf.mxu2  ;;  %v1653_v39 = vadd.f32 %v1586_v63, %v1221_v13  ;;  %v6238_v29 = vadd.f32 %v2443_v8, %v2082_v38  ;;  %v3392_v63 = vld [vmem:[#allocation2 + $0xf1] sm:$0xff]  ;;  %v3393_v38 = vld [vmem:[#allocation2 + $0xf9] sm:$0xff] }
 0x309   :  { %v3448_v25 = vpack.c.bf16 %v3393_v38, %v3392_v63 }
 0x30a   :  { %6951 = vst [vmem:[#allocation20_spill] sm:$0xff] %v6238_v29  ;;  %4948 = vmatmul.msk.bf16.gmra.mxu3 %vm348_vm1, %v3447_v41  ;;  %v2965_v29 = vld [vmem:[#allocation2 + $0x110] sm:$0xff] }
 0x30d   :  { %v2016_v28 = vpop.f32.mrf.mxu3  ;;  %v1222_v55 = vpop.f32.mrf.mxu1  ;;  %4916 = vmatmul.msk.bf16.gmra.mxu2 %vm348_vm1, %v3018_v27 }
 0x30e   :  { %v2083_v37 = vadd.f32 %v2016_v28, %v1653_v39  ;;  %v1223_v4 = vadd.f32 %v1222_v55, %v6952_v2  ;;  %v4012_v7 = vpop.f32.mrf.mxu0  ;;  %v3824_v55 = vld [vmem:[#allocation2 + $0x10a] sm:$0xff] }
 0x310   :  { %v3152_v18 = vpop.f32.mrf.mxu2  ;;  %v1654_v52 = vadd.f32 %v1588_v1, %v1223_v4  ;;  %4982 = vmatmul.msk.bf16.gmra.mxu0 %vm348_vm1, %v3878_v17  ;;  %v6244_v8 = vadd.f32 %v2446_v42, %v2083_v37  ;;  %v3019_v1 = vpack.c.bf16 %v2965_v29, %v2964_v22  ;;  %v3825_v42 = vld [vmem:[#allocation2 + $0x112] sm:$0xff]  ;;  %v3394_v29 = vld [vmem:[#allocation2 + $0x109] sm:$0xff] }
 0x311   :  { %v6251_v2 = vpack.c.bf16 %v3825_v42, %v3824_v55 }
 0x315   :  { %v2018_v13 = vpop.f32.mrf.mxu3  ;;  %v2721_v49 = vpop.f32.mrf.mxu1 }
 0x316   :  { %v2084_v41 = vadd.f32 %v2018_v13, %v1654_v52  ;;  %v4014_v62 = vpop.f32.mrf.mxu0  ;;  %v2881_v28 = vadd.f32 %v2721_v49, %v5905_v51  ;;  %v3395_v49 = vld [vmem:[#allocation2 + $0x111] sm:$0xff] }
 0x318   :  { %4883 = vmatmul.msk.bf16.gmra.mxu1 %vm348_vm1, %v3877_v33  ;;  %v3154_v39 = vpop.f32.mrf.mxu2  ;;  %v6248_v27 = vadd.f32 %v2448_v3, %v2084_v41  ;;  %v3312_v37 = vadd.f32 %v3152_v18, %v2881_v28 }
 0x31a   :  { %6953 = vst [vmem:[#allocation22_spill] sm:$0xff] %v6248_v27  ;;  %4949 = vmatmul.msk.bf16.gmra.mxu3 %vm348_vm1, %v3448_v25  ;;  %v3827_v27 = vld [vmem:[#allocation2 + $0x12a] sm:$0xff] }
 0x31d   :  { %v3582_v4 = vpop.f32.mrf.mxu3  ;;  %v2723_v52 = vpop.f32.mrf.mxu1  ;;  %4917 = vmatmul.msk.bf16.gmra.mxu2 %vm348_vm1, %v3019_v1  ;;  %v2967_v1 = vld [vmem:[#allocation2 + $0x128] sm:$0xff] }
 0x31e   :  { %v3742_v63 = vadd.f32 %v3582_v4, %v3312_v37  ;;  %v4017_v38 = vpop.f32.mrf.mxu0  ;;  %v2882_v33 = vadd.f32 %v2723_v52, %v5909_v14  ;;  %v2966_v14 = vld [vmem:[#allocation2 + $0x120] sm:$0xff] }
 0x31f   :  { %v3020_v52 = vpack.c.bf16 %v2967_v1, %v2966_v14 }
 0x320   :  { %v4172_v51 = vadd.f32 %v4012_v7, %v3742_v63  ;;  %v3157_v13 = vpop.f32.mrf.mxu2  ;;  %4983 = vmatmul.msk.bf16.gmra.mxu0 %vm348_vm1, %v6251_v2  ;;  %v3313_v18 = vadd.f32 %v3154_v39, %v2882_v33  ;;  %v3449_v7 = vpack.c.bf16 %v3395_v49, %v3394_v29  ;;  %v3826_v63 = vld [vmem:[#allocation2 + $0x122] sm:$0xff] }
 0x322   :  { %v4236_v3 = vpack.c.bf16 %v4172_v51, %v4172_v51  ;;  %v4498_v55 = vmul.f32 %v4172_v51, %v4172_v51 }
 0x324   :  { %4301 = vst.msk [vmem:[%s6882_s4] sm:$0xf] %vm4300_vm4, %v4236_v3  ;;  %v4365_v3 = vsel %vm348_vm1, %v4172_v51, 0.0  ;;  %v4562_v49 = vsel %vm348_vm1, %v4498_v55, 0.0 }
 0x325   :  { %v3584_v41 = vpop.f32.mrf.mxu3  ;;  %v2726_v25 = vpop.f32.mrf.mxu1 }
 0x326   :  { %v3743_v22 = vadd.f32 %v3584_v41, %v3313_v18  ;;  %v4019_v28 = vpop.f32.mrf.mxu0  ;;  %v2883_v37 = vadd.f32 %v2726_v25, %v5915_v47 }
 0x328   :  { %v4173_v42 = vadd.f32 %v4014_v62, %v3743_v22  ;;  %4884 = vmatmul.msk.bf16.gmra.mxu1 %vm348_vm1, %v3878_v17  ;;  %v3159_v4 = vpop.f32.mrf.mxu2  ;;  %v3314_v17 = vadd.f32 %v3157_v13, %v2883_v37  ;;  %v6272_v62 = vpack.c.bf16 %v3827_v27, %v3826_v63  ;;  %v3396_v37 = vld [vmem:[#allocation2 + $0x121] sm:$0xff]  ;;  %v3397_v63 = vld [vmem:[#allocation2 + $0x129] sm:$0xff] }
 0x32a   :  { %v4237_v39 = vpack.c.bf16 %v4173_v42, %v4173_v42  ;;  %v4366_v33 = vsel %vm348_vm1, %v4173_v42, 0.0  ;;  %v4499_v18 = vmul.f32 %v4173_v42, %v4173_v42  ;;  %4950 = vmatmul.msk.bf16.gmra.mxu3 %vm348_vm1, %v3449_v7 }
 0x32b   :  { %v4367_v29 = vadd.f32 %v4366_v33, %v4365_v3 }
 0x32c   :  { %4302 = vst.msk [vmem:[%s6882_s4 + $0x4] sm:$0xf] %vm4300_vm4, %v4237_v39  ;;  %v4563_v47 = vsel %vm348_vm1, %v4499_v18, 0.0 }
 0x32d   :  { %v4564_v51 = vadd.f32 %v4563_v47, %v4562_v49  ;;  %v3587_v41 = vpop.f32.mrf.mxu3  ;;  %v2728_v25 = vpop.f32.mrf.mxu1  ;;  %4918 = vmatmul.msk.bf16.gmra.mxu2 %vm348_vm1, %v3020_v52  ;;  %v3450_v49 = vpack.c.bf16 %v3397_v63, %v3396_v37 }
 0x32e   :  { %v3744_v22 = vadd.f32 %v3587_v41, %v3314_v17  ;;  %v4022_v7 = vpop.f32.mrf.mxu0  ;;  %v2884_v1 = vadd.f32 %v2728_v25, %v5919_v40  ;;  %v2968_v17 = vld [vmem:[#allocation2 + $0x138] sm:$0xff]  ;;  %v2969_v41 = vld [vmem:[#allocation2 + $0x140] sm:$0xff] }
 0x330   :  { %v4174_v14 = vadd.f32 %v4017_v38, %v3744_v22  ;;  %v3162_v55 = vpop.f32.mrf.mxu2  ;;  %4984 = vmatmul.msk.bf16.gmra.mxu0 %vm348_vm1, %v6272_v62  ;;  %v3315_v52 = vadd.f32 %v3159_v4, %v2884_v1 }
 0x332   :  { %v4238_v42 = vpack.c.bf16 %v4174_v14, %v4174_v14  ;;  %v4368_v3 = vsel %vm348_vm1, %v4174_v14, 0.0  ;;  %v4500_v13 = vmul.f32 %v4174_v14, %v4174_v14  ;;  %v3021_v14 = vpack.c.bf16 %v2969_v41, %v2968_v17 }
 0x333   :  { %v4369_v27 = vadd.f32 %v4368_v3, %v4367_v29  ;;  %v3829_v3 = vld [vmem:[#allocation2 + $0x142] sm:$0xff] }
 0x334   :  { %4303 = vst.msk [vmem:[%s6882_s4 + $0x8] sm:$0xf] %vm4300_vm4, %v4238_v42  ;;  %v4565_v38 = vsel %vm348_vm1, %v4500_v13, 0.0  ;;  %v3828_v42 = vld [vmem:[#allocation2 + $0x13a] sm:$0xff] }
 0x335   :  { %v4566_v40 = vadd.f32 %v4565_v38, %v4564_v51  ;;  %v3589_v39 = vpop.f32.mrf.mxu3  ;;  %v2731_v33 = vpop.f32.mrf.mxu1 }
 0x336   :  { %v3745_v18 = vadd.f32 %v3589_v39, %v3315_v52  ;;  %v4024_v47 = vpop.f32.mrf.mxu0  ;;  %v2885_v29 = vadd.f32 %v2731_v33, %v5925_v46 }
 0x338   :  { %v4175_v25 = vadd.f32 %v4019_v28, %v3745_v18  ;;  %4885 = vmatmul.msk.bf16.gmra.mxu1 %vm348_vm1, %v6251_v2  ;;  %v3164_v22 = vpop.f32.mrf.mxu2  ;;  %v3316_v28 = vadd.f32 %v3162_v55, %v2885_v29  ;;  %v6294_v2 = vpack.c.bf16 %v3829_v3, %v3828_v42 }
 0x33a   :  { %v4239_v13 = vpack.c.bf16 %v4175_v25, %v4175_v25  ;;  %v4370_v4 = vsel %vm348_vm1, %v4175_v25, 0.0  ;;  %v4501_v51 = vmul.f32 %v4175_v25, %v4175_v25  ;;  %4951 = vmatmul.msk.bf16.gmra.mxu3 %vm348_vm1, %v3450_v49  ;;  %v3398_v25 = vld [vmem:[#allocation2 + $0x139] sm:$0xff] }
 0x33b   :  { %v4371_v1 = vadd.f32 %v4370_v4, %v4369_v27 }
 0x33c   :  { %4304 = vst.msk [vmem:[%s6882_s4 + $0xc] sm:$0xf] %vm4300_vm4, %v4239_v13  ;;  %v4567_v46 = vsel %vm348_vm1, %v4501_v51, 0.0  ;;  %v2970_v51 = vld [vmem:[#allocation2 + $0x150] sm:$0xff] }
 0x33d   :  { %v4568_v37 = vadd.f32 %v4567_v46, %v4566_v40  ;;  %v3592_v63 = vpop.f32.mrf.mxu3  ;;  %v2733_v38 = vpop.f32.mrf.mxu1  ;;  %4919 = vmatmul.msk.bf16.gmra.mxu2 %vm348_vm1, %v3021_v14  ;;  %v3399_v40 = vld [vmem:[#allocation2 + $0x141] sm:$0xff]  ;;  %v2971_v46 = vld [vmem:[#allocation2 + $0x158] sm:$0xff] }
 0x33e   :  { %v3746_v52 = vadd.f32 %v3592_v63, %v3316_v28  ;;  %v4027_v39 = vpop.f32.mrf.mxu0  ;;  %v2886_v27 = vadd.f32 %v2733_v38, %v5929_v12  ;;  %v3451_v13 = vpack.c.bf16 %v3399_v40, %v3398_v25  ;;  %v3022_v38 = vpack.c.bf16 %v2971_v46, %v2970_v51  ;;  %v3400_v46 = vld [vmem:[#allocation2 + $0x151] sm:$0xff] }
 0x340   :  { %v4176_v33 = vadd.f32 %v4022_v7, %v3746_v52  ;;  %v3167_v18 = vpop.f32.mrf.mxu2  ;;  %4985 = vmatmul.msk.bf16.gmra.mxu0 %vm348_vm1, %v6294_v2  ;;  %v3317_v29 = vadd.f32 %v3164_v22, %v2886_v27  ;;  %v3830_v52 = vld [vmem:[#allocation2 + $0x152] sm:$0xff] }
 0x342   :  { %v4240_v49 = vpack.c.bf16 %v4176_v33, %v4176_v33  ;;  %v4372_v17 = vsel %vm348_vm1, %v4176_v33, 0.0  ;;  %v4502_v55 = vmul.f32 %v4176_v33, %v4176_v33  ;;  %v3831_v33 = vld [vmem:[#allocation2 + $0x15a] sm:$0xff] }
 0x343   :  { %v4373_v41 = vadd.f32 %v4372_v17, %v4371_v1 }
 0x344   :  { %4305 = vst.msk [vmem:[%s6882_s4 + $0x10] sm:$0xf] %vm4300_vm4, %v4240_v49  ;;  %v4569_v7 = vsel %vm348_vm1, %v4502_v55, 0.0 }
 0x345   :  { %v4570_v12 = vadd.f32 %v4569_v7, %v4568_v37  ;;  %v3594_v14 = vpop.f32.mrf.mxu3  ;;  %v2736_v42 = vpop.f32.mrf.mxu1 }
 0x346   :  { %v3747_v3 = vadd.f32 %v3594_v14, %v3317_v29  ;;  %v4029_v4 = vpop.f32.mrf.mxu0  ;;  %v2887_v1 = vadd.f32 %v2736_v42, %v5935_v0  ;;  %v6954_v14 = vld [vmem:[#allocation26_spill] sm:$0xff] }
 0x348   :  { %v4177_v28 = vadd.f32 %v4024_v47, %v3747_v3  ;;  %4886 = vmatmul.msk.bf16.gmra.mxu1 %vm348_vm1, %v6272_v62  ;;  %v3169_v63 = vpop.f32.mrf.mxu2  ;;  %v3318_v47 = vadd.f32 %v3167_v18, %v2887_v1  ;;  %v6316_v62 = vpack.c.bf16 %v3831_v33, %v3830_v52 }
 0x34a   :  { %v4241_v49 = vpack.c.bf16 %v4177_v28, %v4177_v28  ;;  %v4374_v22 = vsel %vm348_vm1, %v4177_v28, 0.0  ;;  %v4503_v37 = vmul.f32 %v4177_v28, %v4177_v28  ;;  %4952 = vmatmul.msk.bf16.gmra.mxu3 %vm348_vm1, %v3451_v13 }
 0x34b   :  { %v4375_v27 = vadd.f32 %v4374_v22, %v4373_v41 }
 0x34c   :  { %4306 = vst.msk [vmem:[%s6882_s4 + $0x14] sm:$0xf] %vm4300_vm4, %v4241_v49  ;;  %v4571_v0 = vsel %vm348_vm1, %v4503_v37, 0.0  ;;  %v2972_v37 = vld [vmem:[#allocation2 + $0x168] sm:$0xff] }
 0x34d   :  { %v4572_v17 = vadd.f32 %v4571_v0, %v4570_v12  ;;  %v3597_v55 = vpop.f32.mrf.mxu3  ;;  %v2738_v25 = vpop.f32.mrf.mxu1  ;;  %4920 = vmatmul.msk.bf16.gmra.mxu2 %vm348_vm1, %v3022_v38  ;;  %v3401_v12 = vld [vmem:[#allocation2 + $0x159] sm:$0xff]  ;;  %v2973_v0 = vld [vmem:[#allocation2 + $0x170] sm:$0xff] }
 0x34e   :  { %v3748_v40 = vadd.f32 %v3597_v55, %v3318_v47  ;;  %v4032_v7 = vpop.f32.mrf.mxu0  ;;  %v2888_v41 = vadd.f32 %v2738_v25, %v6954_v14  ;;  %v3452_v49 = vpack.c.bf16 %v3401_v12, %v3400_v46  ;;  %v3023_v25 = vpack.c.bf16 %v2973_v0, %v2972_v37 }
 0x350   :  { %v4178_v29 = vadd.f32 %v4027_v39, %v3748_v40  ;;  %v3172_v42 = vpop.f32.mrf.mxu2  ;;  %4986 = vmatmul.msk.bf16.gmra.mxu0 %vm348_vm1, %v6316_v62  ;;  %v3319_v28 = vadd.f32 %v3169_v63, %v2888_v41  ;;  %v3832_v40 = vld [vmem:[#allocation2 + $0x16a] sm:$0xff] }
 0x352   :  { %v4242_v3 = vpack.c.bf16 %v4178_v29, %v4178_v29  ;;  %v4376_v13 = vsel %vm348_vm1, %v4178_v29, 0.0  ;;  %v4504_v18 = vmul.f32 %v4178_v29, %v4178_v29  ;;  %v3833_v29 = vld [vmem:[#allocation2 + $0x172] sm:$0xff] }
 0x353   :  { %v4377_v51 = vadd.f32 %v4376_v13, %v4375_v27 }
 0x354   :  { %4307 = vst.msk [vmem:[%s6882_s4 + $0x18] sm:$0xf] %vm4300_vm4, %v4242_v3  ;;  %v4573_v39 = vsel %vm348_vm1, %v4504_v18, 0.0 }
 0x355   :  { %v4574_v1 = vadd.f32 %v4573_v39, %v4572_v17  ;;  %v3599_v38 = vpop.f32.mrf.mxu3  ;;  %v2741_v52 = vpop.f32.mrf.mxu1 }
 0x356   :  { %v3749_v33 = vadd.f32 %v3599_v38, %v3319_v28  ;;  %v4034_v22 = vpop.f32.mrf.mxu0  ;;  %v2889_v27 = vadd.f32 %v2741_v52, %v5963_v20 }
 0x358   :  { %v4179_v47 = vadd.f32 %v4029_v4, %v3749_v33  ;;  %4887 = vmatmul.msk.bf16.gmra.mxu1 %vm348_vm1, %v6294_v2  ;;  %v3174_v55 = vpop.f32.mrf.mxu2  ;;  %v3320_v4 = vadd.f32 %v3172_v42, %v2889_v27  ;;  %v6338_v2 = vpack.c.bf16 %v3833_v29, %v3832_v40  ;;  %v2974_v29 = vld [vmem:[#allocation2 + $0x180] sm:$0xff] }
 0x35a   :  { %v4243_v14 = vpack.c.bf16 %v4179_v47, %v4179_v47  ;;  %v4378_v63 = vsel %vm348_vm1, %v4179_v47, 0.0  ;;  %v4505_v17 = vmul.f32 %v4179_v47, %v4179_v47  ;;  %4953 = vmatmul.msk.bf16.gmra.mxu3 %vm348_vm1, %v3452_v49  ;;  %v3402_v49 = vld [vmem:[#allocation2 + $0x169] sm:$0xff] }
 0x35b   :  { %v4379_v41 = vadd.f32 %v4378_v63, %v4377_v51 }
 0x35c   :  { %4308 = vst.msk [vmem:[%s6882_s4 + $0x1c] sm:$0xf] %vm4300_vm4, %v4243_v14  ;;  %v4575_v20 = vsel %vm348_vm1, %v4505_v17, 0.0  ;;  %v2975_v14 = vld [vmem:[#allocation2 + $0x188] sm:$0xff] }
 0x35d   :  { %v4576_v3 = vadd.f32 %v4575_v20, %v4574_v1  ;;  %v3602_v13 = vpop.f32.mrf.mxu3  ;;  %v2743_v18 = vpop.f32.mrf.mxu1  ;;  %4921 = vmatmul.msk.bf16.gmra.mxu2 %vm348_vm1, %v3023_v25  ;;  %v3403_v1 = vld [vmem:[#allocation2 + $0x171] sm:$0xff]  ;;  %v3024_v20 = vpack.c.bf16 %v2975_v14, %v2974_v29 }
 0x35e   :  { %v3750_v46 = vadd.f32 %v3602_v13, %v3320_v4  ;;  %v4037_v12 = vpop.f32.mrf.mxu0  ;;  %v2890_v51 = vadd.f32 %v2743_v18, %v5968_v9  ;;  %v3453_v25 = vpack.c.bf16 %v3403_v1, %v3402_v49  ;;  %v3834_v4 = vld [vmem:[#allocation2 + $0x182] sm:$0xff]  ;;  %v3835_v13 = vld [vmem:[#allocation2 + $0x18a] sm:$0xff] }
 0x360   :  { %v4180_v39 = vadd.f32 %v4032_v7, %v3750_v46  ;;  %v3177_v28 = vpop.f32.mrf.mxu2  ;;  %4987 = vmatmul.msk.bf16.gmra.mxu0 %vm348_vm1, %v6338_v2  ;;  %v3321_v37 = vadd.f32 %v3174_v55, %v2890_v51 }
 0x362   :  { %v4244_v38 = vpack.c.bf16 %v4180_v39, %v4180_v39  ;;  %v4380_v52 = vsel %vm348_vm1, %v4180_v39, 0.0  ;;  %v4506_v42 = vmul.f32 %v4180_v39, %v4180_v39 }
 0x363   :  { %v4381_v33 = vadd.f32 %v4380_v52, %v4379_v41 }
 0x364   :  { %4309 = vst.msk [vmem:[%s6882_s4 + $0x20] sm:$0xf] %vm4300_vm4, %v4244_v38  ;;  %v4577_v7 = vsel %vm348_vm1, %v4506_v42, 0.0 }
 0x365   :  { %v4578_v9 = vadd.f32 %v4577_v7, %v4576_v3  ;;  %v3604_v0 = vpop.f32.mrf.mxu3  ;;  %v2746_v47 = vpop.f32.mrf.mxu1 }
 0x366   :  { %v3751_v27 = vadd.f32 %v3604_v0, %v3321_v37  ;;  %v4039_v40 = vpop.f32.mrf.mxu0  ;;  %v2891_v17 = vadd.f32 %v2746_v47, %v5975_v19  ;;  %v3404_v47 = vld [vmem:[#allocation2 + $0x181] sm:$0xff] }
 0x368   :  { %v4181_v63 = vadd.f32 %v4034_v22, %v3751_v27  ;;  %4888 = vmatmul.msk.bf16.gmra.mxu1 %vm348_vm1, %v6316_v62  ;;  %v3179_v41 = vpop.f32.mrf.mxu2  ;;  %v3322_v22 = vadd.f32 %v3177_v28, %v2891_v17  ;;  %v6360_v62 = vpack.c.bf16 %v3835_v13, %v3834_v4  ;;  %v2977_v4 = vld [vmem:[#allocation2 + $0x1a0] sm:$0xff] }
 0x36a   :  { %v4245_v18 = vpack.c.bf16 %v4181_v63, %v4181_v63  ;;  %v4382_v55 = vsel %vm348_vm1, %v4181_v63, 0.0  ;;  %v4507_v3 = vmul.f32 %v4181_v63, %v4181_v63  ;;  %4954 = vmatmul.msk.bf16.gmra.mxu3 %vm348_vm1, %v3453_v25 }
 0x36b   :  { %v4383_v46 = vadd.f32 %v4382_v55, %v4381_v33 }
 0x36c   :  { %4310 = vst.msk [vmem:[%s6882_s4 + $0x24] sm:$0xf] %vm4300_vm4, %v4245_v18  ;;  %v4579_v19 = vsel %vm348_vm1, %v4507_v3, 0.0 }
 0x36d   :  { %v4580_v39 = vadd.f32 %v4579_v19, %v4578_v9  ;;  %v3607_v51 = vpop.f32.mrf.mxu3  ;;  %v2748_v38 = vpop.f32.mrf.mxu1  ;;  %4922 = vmatmul.msk.bf16.gmra.mxu2 %vm348_vm1, %v3024_v20  ;;  %v3405_v9 = vld [vmem:[#allocation2 + $0x189] sm:$0xff]  ;;  %v2976_v20 = vld [vmem:[#allocation2 + $0x198] sm:$0xff] }
 0x36e   :  { %v3752_v52 = vadd.f32 %v3607_v51, %v3322_v22  ;;  %v4042_v42 = vpop.f32.mrf.mxu0  ;;  %v2892_v33 = vadd.f32 %v2748_v38, %v5979_v26  ;;  %v3454_v63 = vpack.c.bf16 %v3405_v9, %v3404_v47  ;;  %v3025_v3 = vpack.c.bf16 %v2977_v4, %v2976_v20  ;;  %v3837_v19 = vld [vmem:[#allocation2 + $0x1a2] sm:$0xff] }
 0x370   :  { %v4182_v49 = vadd.f32 %v4037_v12, %v3752_v52  ;;  %v3182_v1 = vpop.f32.mrf.mxu2  ;;  %4988 = vmatmul.msk.bf16.gmra.mxu0 %vm348_vm1, %v6360_v62  ;;  %v3323_v27 = vadd.f32 %v3179_v41, %v2892_v33 }
 0x372   :  { %v4246_v7 = vpack.c.bf16 %v4182_v49, %v4182_v49  ;;  %v4384_v37 = vsel %vm348_vm1, %v4182_v49, 0.0  ;;  %v4508_v28 = vmul.f32 %v4182_v49, %v4182_v49 }
 0x373   :  { %v4385_v0 = vadd.f32 %v4384_v37, %v4383_v46  ;;  %v3836_v46 = vld [vmem:[#allocation2 + $0x19a] sm:$0xff] }
 0x374   :  { %4311 = vst.msk [vmem:[%s6882_s4 + $0x28] sm:$0xf] %vm4300_vm4, %v4246_v7  ;;  %v4581_v12 = vsel %vm348_vm1, %v4508_v28, 0.0 }
 0x375   :  { %v4582_v26 = vadd.f32 %v4581_v12, %v4580_v39  ;;  %v3609_v25 = vpop.f32.mrf.mxu3  ;;  %v2751_v29 = vpop.f32.mrf.mxu1 }
 0x376   :  { %v3753_v14 = vadd.f32 %v3609_v25, %v3323_v27  ;;  %v4044_v17 = vpop.f32.mrf.mxu0  ;;  %v2893_v18 = vadd.f32 %v2751_v29, %v5985_v23  ;;  %v3407_v25 = vld [vmem:[#allocation2 + $0x1a1] sm:$0xff] }
 0x378   :  { %v4183_v13 = vadd.f32 %v4039_v40, %v3753_v14  ;;  %4889 = vmatmul.msk.bf16.gmra.mxu1 %vm348_vm1, %v6338_v2  ;;  %v3184_v55 = vpop.f32.mrf.mxu2  ;;  %v3324_v40 = vadd.f32 %v3182_v1, %v2893_v18  ;;  %v3885_v2 = vpack.c.bf16 %v3837_v19, %v3836_v46  ;;  %v3406_v1 = vld [vmem:[#allocation2 + $0x199] sm:$0xff]  ;;  %v2979_v18 = vld [vmem:[#allocation2 + $0x1e8] sm:$0xff] }
 0x379   :  { %v3455_v20 = vpack.c.bf16 %v3407_v25, %v3406_v1 }
 0x37a   :  { %v4247_v22 = vpack.c.bf16 %v4183_v13, %v4183_v13  ;;  %v4386_v41 = vsel %vm348_vm1, %v4183_v13, 0.0  ;;  %v4509_v39 = vmul.f32 %v4183_v13, %v4183_v13  ;;  %4955 = vmatmul.msk.bf16.gmra.mxu3 %vm348_vm1, %v3454_v63  ;;  %v2978_v13 = vld [vmem:[#allocation2 + $0x1e0] sm:$0xff] }
 0x37b   :  { %v4387_v51 = vadd.f32 %v4386_v41, %v4385_v0  ;;  %v3838_v41 = vld [vmem:[#allocation2 + $0x1e2] sm:$0xff] }
 0x37c   :  { %4312 = vst.msk [vmem:[%s6882_s4 + $0x2c] sm:$0xf] %vm4300_vm4, %v4247_v22  ;;  %v4583_v23 = vsel %vm348_vm1, %v4509_v39, 0.0  ;;  %v3026_v22 = vpack.c.bf16 %v2979_v18, %v2978_v13  ;;  %v3839_v39 = vld [vmem:[#allocation2 + $0x1ea] sm:$0xff] }
 0x37d   :  { %v4584_v38 = vadd.f32 %v4583_v23, %v4582_v26  ;;  %v3612_v52 = vpop.f32.mrf.mxu3  ;;  %v2753_v49 = vpop.f32.mrf.mxu1  ;;  %4923 = vmatmul.msk.bf16.gmra.mxu2 %vm348_vm1, %v3025_v3 }
 0x37e   :  { %v3754_v33 = vadd.f32 %v3612_v52, %v3324_v40  ;;  %v4047_v7 = vpop.f32.mrf.mxu0  ;;  %v2894_v28 = vadd.f32 %v2753_v49, %v5989_v10 }
 0x380   :  { %v4184_v37 = vadd.f32 %v4042_v42, %v3754_v33  ;;  %v3187_v0 = vpop.f32.mrf.mxu2  ;;  %4989 = vmatmul.msk.bf16.gmra.mxu0 %vm348_vm1, %v3885_v2  ;;  %v3325_v42 = vadd.f32 %v3184_v55, %v2894_v28 }
 0x382   :  { %v4248_v47 = vpack.c.bf16 %v4184_v37, %v4184_v37  ;;  %v4388_v9 = vsel %vm348_vm1, %v4184_v37, 0.0  ;;  %v4510_v12 = vmul.f32 %v4184_v37, %v4184_v37 }
 0x383   :  { %v4389_v27 = vadd.f32 %v4388_v9, %v4387_v51  ;;  %v2547_v9 = vld [vmem:[#allocation2 + $0x1ca] sm:$0xff] }
 0x384   :  { %4313 = vst.msk [vmem:[%s6882_s4 + $0x30] sm:$0xf] %vm4300_vm4, %v4248_v47  ;;  %v4585_v26 = vsel %vm348_vm1, %v4510_v12, 0.0  ;;  %v2548_v12 = vld [vmem:[#allocation2 + $0x1d2] sm:$0xff] }
 0x385   :  { %v4586_v29 = vadd.f32 %v4585_v26, %v4584_v38  ;;  %v3614_v10 = vpop.f32.mrf.mxu3  ;;  %v2756_v14 = vpop.f32.mrf.mxu1  ;;  %v3408_v26 = vld [vmem:[#allocation2 + $0x1e1] sm:$0xff] }
 0x386   :  { %v3755_v63 = vadd.f32 %v3614_v10, %v3325_v42  ;;  %v4049_v4 = vpop.f32.mrf.mxu0  ;;  %v2895_v46 = vadd.f32 %v2756_v14, %v5995_v16  ;;  %v3409_v42 = vld [vmem:[#allocation2 + $0x1e9] sm:$0xff] }
 0x387   :  { %v3456_v13 = vpack.c.bf16 %v3409_v42, %v3408_v26  ;;  %v3410_v26 = vld [vmem:[#allocation2 + $0x1f9] sm:$0xff]  ;;  %v3411_v42 = vld [vmem:[#allocation2 + $0x201] sm:$0xff] }
 0x388   :  { %v4185_v3 = vadd.f32 %v4044_v17, %v3755_v63  ;;  %4890 = vmatmul.msk.bf16.gmra.mxu1 %vm348_vm1, %v6360_v62  ;;  %v3189_v19 = vpop.f32.mrf.mxu2  ;;  %v3326_v17 = vadd.f32 %v3187_v0, %v2895_v46  ;;  %v6401_v62 = vpack.c.bf16 %v3839_v39, %v3838_v41  ;;  %v2981_v46 = vld [vmem:[#allocation2 + $0x200] sm:$0xff] }
 0x38a   :  { %v4249_v51 = vpack.c.bf16 %v4185_v3, %v4185_v3  ;;  %v4390_v55 = vsel %vm348_vm1, %v4185_v3, 0.0  ;;  %v4511_v23 = vmul.f32 %v4185_v3, %v4185_v3  ;;  %4956 = vmatmul.msk.bf16.gmra.mxu3 %vm348_vm1, %v3455_v20  ;;  %v2980_v3 = vld [vmem:[#allocation2 + $0x1f8] sm:$0xff] }
 0x38b   :  { %v4391_v40 = vadd.f32 %v4390_v55, %v4389_v27  ;;  %v3840_v55 = vld [vmem:[#allocation2 + $0x1fa] sm:$0xff] }
 0x38c   :  { %4314 = vst.msk [vmem:[%s6882_s4 + $0x34] sm:$0xf] %vm4300_vm4, %v4249_v51  ;;  %v4587_v16 = vsel %vm348_vm1, %v4511_v23, 0.0  ;;  %v3027_v51 = vpack.c.bf16 %v2981_v46, %v2980_v3  ;;  %v3841_v23 = vld [vmem:[#allocation2 + $0x202] sm:$0xff] }
 0x38d   :  { %v4588_v2 = vadd.f32 %v4587_v16, %v4586_v29  ;;  %v3617_v38 = vpop.f32.mrf.mxu3  ;;  %v2758_v52 = vpop.f32.mrf.mxu1  ;;  %4924 = vmatmul.msk.bf16.gmra.mxu2 %vm348_vm1, %v3026_v22  ;;  %v2595_v29 = vpack.c.bf16 %v2548_v12, %v2547_v9 }
 0x38e   :  { %v3756_v49 = vadd.f32 %v3617_v38, %v3326_v17  ;;  %v4052_v33 = vpop.f32.mrf.mxu0  ;;  %v2896_v28 = vadd.f32 %v2758_v52, %v5999_v54 }
 0x390   :  { %v4186_v37 = vadd.f32 %v4047_v7, %v3756_v49  ;;  %v3192_v47 = vpop.f32.mrf.mxu2  ;;  %4990 = vmatmul.msk.bf16.gmra.mxu0 %vm348_vm1, %v6401_v62  ;;  %v3327_v7 = vadd.f32 %v3189_v19, %v2896_v28 }
 0x392   :  { %v4250_v27 = vpack.c.bf16 %v4186_v37, %v4186_v37  ;;  %v4392_v0 = vsel %vm348_vm1, %v4186_v37, 0.0  ;;  %v4512_v1 = vmul.f32 %v4186_v37, %v4186_v37 }
 0x393   :  { %v4393_v25 = vadd.f32 %v4392_v0, %v4391_v40 }
 0x394   :  { %4315 = vst.msk [vmem:[%s6882_s4 + $0x38] sm:$0xf] %vm4300_vm4, %v4250_v27  ;;  %v4589_v54 = vsel %vm348_vm1, %v4512_v1, 0.0 }
 0x395   :  { %v4590_v10 = vadd.f32 %v4589_v54, %v4588_v2  ;;  %v3619_v14 = vpop.f32.mrf.mxu3  ;;  %v2761_v63 = vpop.f32.mrf.mxu1  ;;  %v6422_v2 = vpack.c.bf16 %v3841_v23, %v3840_v55  ;;  %v3843_v55 = vld [vmem:[#allocation2 + $0x21a] sm:$0xff] }
 0x396   :  { %v3757_v20 = vadd.f32 %v3619_v14, %v3327_v7  ;;  %v4054_v18 = vpop.f32.mrf.mxu0  ;;  %v2897_v41 = vadd.f32 %v2761_v63, %v6005_v24  ;;  %v3457_v14 = vpack.c.bf16 %v3411_v42, %v3410_v26 }
 0x398   :  { %v4187_v22 = vadd.f32 %v4049_v4, %v3757_v20  ;;  %4891 = vmatmul.msk.bf16.gmra.mxu1 %vm348_vm1, %v2595_v29  ;;  %v3194_v39 = vpop.f32.mrf.mxu2  ;;  %v3328_v4 = vadd.f32 %v3192_v47, %v2897_v41  ;;  %v2982_v20 = vld [vmem:[#allocation2 + $0x210] sm:$0xff] }
 0x39a   :  { %v4251_v40 = vpack.c.bf16 %v4187_v22, %v4187_v22  ;;  %v4394_v19 = vsel %vm348_vm1, %v4187_v22, 0.0  ;;  %v4513_v16 = vmul.f32 %v4187_v22, %v4187_v22  ;;  %4957 = vmatmul.msk.bf16.gmra.mxu3 %vm348_vm1, %v3456_v13  ;;  %v2983_v13 = vld [vmem:[#allocation2 + $0x218] sm:$0xff] }
 0x39b   :  { %v4395_v17 = vadd.f32 %v4394_v19, %v4393_v25  ;;  %v3028_v41 = vpack.c.bf16 %v2983_v13, %v2982_v20 }
 0x39c   :  { %4316 = vst.msk [vmem:[%s6882_s4 + $0x3c] sm:$0xf] %vm4300_vm4, %v4251_v40  ;;  %v4591_v24 = vsel %vm348_vm1, %v4513_v16, 0.0 }
 0x39d   :  { %v4592_v38 = vadd.f32 %v4591_v24, %v4590_v10  ;;  %v3622_v52 = vpop.f32.mrf.mxu3  ;;  %v2763_v49 = vpop.f32.mrf.mxu1  ;;  %4925 = vmatmul.msk.bf16.gmra.mxu2 %vm348_vm1, %v3027_v51  ;;  %v3842_v51 = vld [vmem:[#allocation2 + $0x212] sm:$0xff] }
 0x39e   :  { %v3758_v37 = vadd.f32 %v3622_v52, %v3328_v4  ;;  %v4057_v28 = vpop.f32.mrf.mxu0  ;;  %v2898_v12 = vadd.f32 %v2763_v49, %v6009_v43 }
 0x3a0   :  { %v4188_v9 = vadd.f32 %v4052_v33, %v3758_v37  ;;  %v3197_v27 = vpop.f32.mrf.mxu2  ;;  %4991 = vmatmul.msk.bf16.gmra.mxu0 %vm348_vm1, %v6422_v2  ;;  %v3329_v54 = vadd.f32 %v3194_v39, %v2898_v12 }
 0x3a2   :  { %v4252_v0 = vpack.c.bf16 %v4188_v9, %v4188_v9  ;;  %v4396_v1 = vsel %vm348_vm1, %v4188_v9, 0.0  ;;  %v4514_v47 = vmul.f32 %v4188_v9, %v4188_v9 }
 0x3a3   :  { %v4397_v25 = vadd.f32 %v4396_v1, %v4395_v17  ;;  %v3412_v1 = vld [vmem:[#allocation2 + $0x211] sm:$0xff] }
 0x3a4   :  { %4317 = vst.msk [vmem:[%s6882_s4 + $0x40] sm:$0xf] %vm4300_vm4, %v4252_v0  ;;  %v4593_v33 = vsel %vm348_vm1, %v4514_v47, 0.0  ;;  %v3413_v47 = vld [vmem:[#allocation2 + $0x219] sm:$0xff] }
 0x3a5   :  { %v4594_v43 = vadd.f32 %v4593_v33, %v4592_v38  ;;  %v3624_v7 = vpop.f32.mrf.mxu3  ;;  %v2766_v29 = vpop.f32.mrf.mxu1 }
 0x3a6   :  { %v3759_v10 = vadd.f32 %v3624_v7, %v3329_v54  ;;  %v4059_v63 = vpop.f32.mrf.mxu0  ;;  %v2899_v46 = vadd.f32 %v2766_v29, %v6015_v31  ;;  %v3458_v54 = vpack.c.bf16 %v3413_v47, %v3412_v1  ;;  %v2984_v7 = vld [vmem:[#allocation2 + $0x228] sm:$0xff]  ;;  %v2985_v29 = vld [vmem:[#allocation2 + $0x230] sm:$0xff] }
 0x3a7   :  { %v3029_v13 = vpack.c.bf16 %v2985_v29, %v2984_v7  ;;  %v3846_v7 = vld [vmem:[#allocation2 + $0x242] sm:$0xff]  ;;  %v3847_v29 = vld [vmem:[#allocation2 + $0x24a] sm:$0xff] }
 0x3a8   :  { %v4189_v3 = vadd.f32 %v4054_v18, %v3759_v10  ;;  %4892 = vmatmul.msk.bf16.gmra.mxu1 %vm348_vm1, %v6401_v62  ;;  %v3199_v22 = vpop.f32.mrf.mxu2  ;;  %v3330_v18 = vadd.f32 %v3197_v27, %v2899_v46  ;;  %v6444_v62 = vpack.c.bf16 %v3843_v55, %v3842_v51  ;;  %v3845_v46 = vld [vmem:[#allocation2 + $0x232] sm:$0xff] }
 0x3aa   :  { %v4253_v23 = vpack.c.bf16 %v4189_v3, %v4189_v3  ;;  %v4398_v39 = vsel %vm348_vm1, %v4189_v3, 0.0  ;;  %v4515_v40 = vmul.f32 %v4189_v3, %v4189_v3  ;;  %4958 = vmatmul.msk.bf16.gmra.mxu3 %vm348_vm1, %v3457_v14  ;;  %v3844_v3 = vld [vmem:[#allocation2 + $0x22a] sm:$0xff] }
 0x3ab   :  { %v4399_v19 = vadd.f32 %v4398_v39, %v4397_v25 }
 0x3ac   :  { %4318 = vst.msk [vmem:[%s6882_s4 + $0x44] sm:$0xf] %vm4300_vm4, %v4253_v23  ;;  %v4595_v31 = vsel %vm348_vm1, %v4515_v40, 0.0 }
 0x3ad   :  { %v4596_v16 = vadd.f32 %v4595_v31, %v4594_v43  ;;  %v3627_v17 = vpop.f32.mrf.mxu3  ;;  %v2768_v24 = vpop.f32.mrf.mxu1  ;;  %4926 = vmatmul.msk.bf16.gmra.mxu2 %vm348_vm1, %v3028_v41 }
 0x3ae   :  { %v3760_v4 = vadd.f32 %v3627_v17, %v3330_v18  ;;  %v4062_v38 = vpop.f32.mrf.mxu0  ;;  %v2900_v49 = vadd.f32 %v2768_v24, %v6019_v48 }
 0x3b0   :  { %v4190_v52 = vadd.f32 %v4057_v28, %v3760_v4  ;;  %v3202_v37 = vpop.f32.mrf.mxu2  ;;  %4992 = vmatmul.msk.bf16.gmra.mxu0 %vm348_vm1, %v6444_v62  ;;  %v3331_v25 = vadd.f32 %v3199_v22, %v2900_v49 }
 0x3b2   :  { %v4254_v9 = vpack.c.bf16 %v4190_v52, %v4190_v52  ;;  %v4400_v12 = vsel %vm348_vm1, %v4190_v52, 0.0  ;;  %v4516_v27 = vmul.f32 %v4190_v52, %v4190_v52 }
 0x3b3   :  { %v4401_v0 = vadd.f32 %v4400_v12, %v4399_v19 }
 0x3b4   :  { %4319 = vst.msk [vmem:[%s6882_s4 + $0x48] sm:$0xf] %vm4300_vm4, %v4254_v9  ;;  %v4597_v28 = vsel %vm348_vm1, %v4516_v27, 0.0  ;;  %v3415_v9 = vld [vmem:[#allocation2 + $0x231] sm:$0xff] }
 0x3b5   :  { %v4598_v48 = vadd.f32 %v4597_v28, %v4596_v16  ;;  %v3629_v26 = vpop.f32.mrf.mxu3  ;;  %v2771_v42 = vpop.f32.mrf.mxu1 }
 0x3b6   :  { %v3761_v33 = vadd.f32 %v3629_v26, %v3331_v25  ;;  %v4064_v43 = vpop.f32.mrf.mxu0  ;;  %v2901_v14 = vadd.f32 %v2771_v42, %v6025_v15  ;;  %v2986_v25 = vld [vmem:[#allocation2 + $0x240] sm:$0xff] }
 0x3b8   :  { %v4191_v10 = vadd.f32 %v4059_v63, %v3761_v33  ;;  %4893 = vmatmul.msk.bf16.gmra.mxu1 %vm348_vm1, %v6422_v2  ;;  %v3204_v20 = vpop.f32.mrf.mxu2  ;;  %v3332_v63 = vadd.f32 %v3202_v37, %v2901_v14  ;;  %v6466_v2 = vpack.c.bf16 %v3845_v46, %v3844_v3  ;;  %v3414_v37 = vld [vmem:[#allocation2 + $0x229] sm:$0xff] }
 0x3b9   :  { %v3459_v47 = vpack.c.bf16 %v3415_v9, %v3414_v37  ;;  %v2988_v9 = vld [vmem:[#allocation2 + $0x258] sm:$0xff] }
 0x3ba   :  { %v4255_v41 = vpack.c.bf16 %v4191_v10, %v4191_v10  ;;  %v4402_v22 = vsel %vm348_vm1, %v4191_v10, 0.0  ;;  %v4517_v51 = vmul.f32 %v4191_v10, %v4191_v10  ;;  %4959 = vmatmul.msk.bf16.gmra.mxu3 %vm348_vm1, %v3458_v54 }
 0x3bb   :  { %v4403_v55 = vadd.f32 %v4402_v22, %v4401_v0 }
 0x3bc   :  { %4320 = vst.msk [vmem:[%s6882_s4 + $0x4c] sm:$0xf] %vm4300_vm4, %v4255_v41  ;;  %v4599_v15 = vsel %vm348_vm1, %v4517_v51, 0.0 }
 0x3bd   :  { %v4600_v23 = vadd.f32 %v4599_v15, %v4598_v48  ;;  %v3632_v39 = vpop.f32.mrf.mxu3  ;;  %v2773_v40 = vpop.f32.mrf.mxu1  ;;  %4927 = vmatmul.msk.bf16.gmra.mxu2 %vm348_vm1, %v3029_v13  ;;  %v2987_v48 = vld [vmem:[#allocation2 + $0x248] sm:$0xff] }
 0x3be   :  { %v3762_v19 = vadd.f32 %v3632_v39, %v3332_v63  ;;  %v4067_v31 = vpop.f32.mrf.mxu0  ;;  %v2902_v16 = vadd.f32 %v2773_v40, %v6029_v60  ;;  %v3030_v54 = vpack.c.bf16 %v2987_v48, %v2986_v25 }
 0x3c0   :  { %v4192_v18 = vadd.f32 %v4062_v38, %v3762_v19  ;;  %v3207_v17 = vpop.f32.mrf.mxu2  ;;  %4993 = vmatmul.msk.bf16.gmra.mxu0 %vm348_vm1, %v6466_v2  ;;  %v3333_v12 = vadd.f32 %v3204_v20, %v2902_v16  ;;  %v3417_v16 = vld [vmem:[#allocation2 + $0x249] sm:$0xff] }
 0x3c2   :  { %v4256_v24 = vpack.c.bf16 %v4192_v18, %v4192_v18  ;;  %v4404_v4 = vsel %vm348_vm1, %v4192_v18, 0.0  ;;  %v4518_v52 = vmul.f32 %v4192_v18, %v4192_v18  ;;  %v3416_v18 = vld [vmem:[#allocation2 + $0x241] sm:$0xff] }
 0x3c3   :  { %v4405_v49 = vadd.f32 %v4404_v4, %v4403_v55 }
 0x3c4   :  { %4321 = vst.msk [vmem:[%s6882_s4 + $0x50] sm:$0xf] %vm4300_vm4, %v4256_v24  ;;  %v4601_v38 = vsel %vm348_vm1, %v4518_v52, 0.0 }
 0x3c5   :  { %v4602_v60 = vadd.f32 %v4601_v38, %v4600_v23  ;;  %v3634_v27 = vpop.f32.mrf.mxu3  ;;  %v2776_v0 = vpop.f32.mrf.mxu1  ;;  %v2989_v38 = vld [vmem:[#allocation2 + $0x260] sm:$0xff] }
 0x3c6   :  { %v3763_v1 = vadd.f32 %v3634_v27, %v3333_v12  ;;  %v4069_v28 = vpop.f32.mrf.mxu0  ;;  %v2903_v42 = vadd.f32 %v2776_v0, %v6035_v11  ;;  %v3031_v0 = vpack.c.bf16 %v2989_v38, %v2988_v9 }
 0x3c8   :  { %v4193_v26 = vadd.f32 %v4064_v43, %v3763_v1  ;;  %4894 = vmatmul.msk.bf16.gmra.mxu1 %vm348_vm1, %v6444_v62  ;;  %v3209_v33 = vpop.f32.mrf.mxu2  ;;  %v3334_v43 = vadd.f32 %v3207_v17, %v2903_v42  ;;  %v6488_v62 = vpack.c.bf16 %v3847_v29, %v3846_v7  ;;  %v3848_v1 = vld [vmem:[#allocation2 + $0x25a] sm:$0xff] }
 0x3ca   :  { %v4257_v10 = vpack.c.bf16 %v4193_v26, %v4193_v26  ;;  %v4406_v14 = vsel %vm348_vm1, %v4193_v26, 0.0  ;;  %v4519_v20 = vmul.f32 %v4193_v26, %v4193_v26  ;;  %4960 = vmatmul.msk.bf16.gmra.mxu3 %vm348_vm1, %v3459_v47  ;;  %v3849_v47 = vld [vmem:[#allocation2 + $0x262] sm:$0xff] }
 0x3cb   :  { %v4407_v13 = vadd.f32 %v4406_v14, %v4405_v49  ;;  %v3460_v49 = vpack.c.bf16 %v3417_v16, %v3416_v18  ;;  %v2991_v18 = vld [vmem:[#allocation2 + $0x278] sm:$0xff] }
 0x3cc   :  { %4322 = vst.msk [vmem:[%s6882_s4 + $0x54] sm:$0xf] %vm4300_vm4, %v4257_v10  ;;  %v4603_v11 = vsel %vm348_vm1, %v4519_v20, 0.0 }
 0x3cd   :  { %v4604_v3 = vadd.f32 %v4603_v11, %v4602_v60  ;;  %v3637_v46 = vpop.f32.mrf.mxu3  ;;  %v2778_v41 = vpop.f32.mrf.mxu1  ;;  %4928 = vmatmul.msk.bf16.gmra.mxu2 %vm348_vm1, %v3030_v54 }
 0x3ce   :  { %v3764_v22 = vadd.f32 %v3637_v46, %v3334_v43  ;;  %v4072_v51 = vpop.f32.mrf.mxu0  ;;  %v2904_v15 = vadd.f32 %v2778_v41, %v6039_v56  ;;  %v3418_v41 = vld [vmem:[#allocation2 + $0x259] sm:$0xff] }
 0x3d0   :  { %v4194_v55 = vadd.f32 %v4067_v31, %v3764_v22  ;;  %v3212_v63 = vpop.f32.mrf.mxu2  ;;  %4994 = vmatmul.msk.bf16.gmra.mxu0 %vm348_vm1, %v6488_v62  ;;  %v3335_v17 = vadd.f32 %v3209_v33, %v2904_v15  ;;  %v3419_v22 = vld [vmem:[#allocation2 + $0x261] sm:$0xff] }
 0x3d2   :  { %v4258_v23 = vpack.c.bf16 %v4194_v55, %v4194_v55  ;;  %v4408_v39 = vsel %vm348_vm1, %v4194_v55, 0.0  ;;  %v4520_v40 = vmul.f32 %v4194_v55, %v4194_v55 }
 0x3d3   :  { %v4409_v19 = vadd.f32 %v4408_v39, %v4407_v13  ;;  %v3461_v39 = vpack.c.bf16 %v3419_v22, %v3418_v41 }
 0x3d4   :  { %4323 = vst.msk [vmem:[%s6882_s4 + $0x58] sm:$0xf] %vm4300_vm4, %v4258_v23  ;;  %v4605_v31 = vsel %vm348_vm1, %v4520_v40, 0.0 }
 0x3d5   :  { %v4606_v56 = vadd.f32 %v4605_v31, %v4604_v3  ;;  %v3639_v24 = vpop.f32.mrf.mxu3  ;;  %v2781_v4 = vpop.f32.mrf.mxu1 }
 0x3d6   :  { %v3765_v52 = vadd.f32 %v3639_v24, %v3335_v17  ;;  %v4074_v37 = vpop.f32.mrf.mxu0  ;;  %v2905_v60 = vadd.f32 %v2781_v4, %v6045_v5  ;;  %v3850_v24 = vld [vmem:[#allocation2 + $0x272] sm:$0xff]  ;;  %v3851_v4 = vld [vmem:[#allocation2 + $0x27a] sm:$0xff] }
 0x3d8   :  { %v4195_v12 = vadd.f32 %v4069_v28, %v3765_v52  ;;  %4895 = vmatmul.msk.bf16.gmra.mxu1 %vm348_vm1, %v6466_v2  ;;  %v3214_v27 = vpop.f32.mrf.mxu2  ;;  %v3336_v28 = vadd.f32 %v3212_v63, %v2905_v60  ;;  %v6510_v2 = vpack.c.bf16 %v3849_v47, %v3848_v1 }
 0x3da   :  { %v4259_v25 = vpack.c.bf16 %v4195_v12, %v4195_v12  ;;  %v4410_v48 = vsel %vm348_vm1, %v4195_v12, 0.0  ;;  %v4521_v26 = vmul.f32 %v4195_v12, %v4195_v12  ;;  %4961 = vmatmul.msk.bf16.gmra.mxu3 %vm348_vm1, %v3460_v49 }
 0x3db   :  { %v4411_v42 = vadd.f32 %v4410_v48, %v4409_v19  ;;  %v2990_v19 = vld [vmem:[#allocation2 + $0x270] sm:$0xff] }
 0x3dc   :  { %4324 = vst.msk [vmem:[%s6882_s4 + $0x5c] sm:$0xf] %vm4300_vm4, %v4259_v25  ;;  %v4607_v5 = vsel %vm348_vm1, %v4521_v26, 0.0 }
 0x3dd   :  { %v4608_v33 = vadd.f32 %v4607_v5, %v4606_v56  ;;  %v3642_v54 = vpop.f32.mrf.mxu3  ;;  %v2783_v7 = vpop.f32.mrf.mxu1  ;;  %4929 = vmatmul.msk.bf16.gmra.mxu2 %vm348_vm1, %v3031_v0  ;;  %v3032_v56 = vpack.c.bf16 %v2991_v18, %v2990_v19 }
 0x3de   :  { %v3766_v29 = vadd.f32 %v3642_v54, %v3336_v28  ;;  %v4077_v10 = vpop.f32.mrf.mxu0  ;;  %v2906_v20 = vadd.f32 %v2783_v7, %v6049_v45  ;;  %v3421_v54 = vld [vmem:[#allocation2 + $0x279] sm:$0xff] }
 0x3e0   :  { %v4196_v14 = vadd.f32 %v4072_v51, %v3766_v29  ;;  %v3217_v13 = vpop.f32.mrf.mxu2  ;;  %4995 = vmatmul.msk.bf16.gmra.mxu0 %vm348_vm1, %v6510_v2  ;;  %v3337_v55 = vadd.f32 %v3214_v27, %v2906_v20 }
 0x3e2   :  { %v4260_v11 = vpack.c.bf16 %v4196_v14, %v4196_v14  ;;  %v4412_v43 = vsel %vm348_vm1, %v4196_v14, 0.0  ;;  %v4522_v3 = vmul.f32 %v4196_v14, %v4196_v14 }
 0x3e3   :  { %v4413_v46 = vadd.f32 %v4412_v43, %v4411_v42  ;;  %v2992_v43 = vld [vmem:[#allocation2 + $0x288] sm:$0xff] }
 0x3e4   :  { %4325 = vst.msk [vmem:[%s6882_s4 + $0x60] sm:$0xf] %vm4300_vm4, %v4260_v11  ;;  %v4609_v51 = vsel %vm348_vm1, %v4522_v3, 0.0  ;;  %v2993_v3 = vld [vmem:[#allocation2 + $0x290] sm:$0xff] }
 0x3e5   :  { %v4610_v45 = vadd.f32 %v4609_v51, %v4608_v33  ;;  %v3644_v15 = vpop.f32.mrf.mxu3  ;;  %v2786_v63 = vpop.f32.mrf.mxu1  ;;  %v3420_v33 = vld [vmem:[#allocation2 + $0x271] sm:$0xff]  ;;  %v3033_v51 = vpack.c.bf16 %v2993_v3, %v2992_v43 }
 0x3e6   :  { %v3767_v23 = vadd.f32 %v3644_v15, %v3337_v55  ;;  %v4079_v40 = vpop.f32.mrf.mxu0  ;;  %v2907_v31 = vadd.f32 %v2786_v63, %v6055_v53  ;;  %v3852_v55 = vld [vmem:[#allocation2 + $0x28a] sm:$0xff] }
 0x3e8   :  { %v4197_v16 = vadd.f32 %v4074_v37, %v3767_v23  ;;  %4896 = vmatmul.msk.bf16.gmra.mxu1 %vm348_vm1, %v6488_v62  ;;  %v3219_v17 = vpop.f32.mrf.mxu2  ;;  %v3338_v37 = vadd.f32 %v3217_v13, %v2907_v31  ;;  %v6532_v62 = vpack.c.bf16 %v3851_v4, %v3850_v24  ;;  %v3462_v13 = vpack.c.bf16 %v3421_v54, %v3420_v33  ;;  %v3854_v54 = vld [vmem:[#allocation2 + $0x2a2] sm:$0xff] }
 0x3ea   :  { %v4261_v52 = vpack.c.bf16 %v4197_v16, %v4197_v16  ;;  %v4414_v49 = vsel %vm348_vm1, %v4197_v16, 0.0  ;;  %v4523_v9 = vmul.f32 %v4197_v16, %v4197_v16  ;;  %4962 = vmatmul.msk.bf16.gmra.mxu3 %vm348_vm1, %v3461_v39 }
 0x3eb   :  { %v4415_v38 = vadd.f32 %v4414_v49, %v4413_v46 }
 0x3ec   :  { %4326 = vst.msk [vmem:[%s6882_s4 + $0x64] sm:$0xf] %vm4300_vm4, %v4261_v52  ;;  %v4611_v53 = vsel %vm348_vm1, %v4523_v9, 0.0 }
 0x3ed   :  { %v4612_v12 = vadd.f32 %v4611_v53, %v4610_v45  ;;  %v3647_v60 = vpop.f32.mrf.mxu3  ;;  %v2788_v27 = vpop.f32.mrf.mxu1  ;;  %4930 = vmatmul.msk.bf16.gmra.mxu2 %vm348_vm1, %v3032_v56  ;;  %v3853_v45 = vld [vmem:[#allocation2 + $0x292] sm:$0xff]  ;;  %v3422_v53 = vld [vmem:[#allocation2 + $0x289] sm:$0xff] }
 0x3ee   :  { %v3768_v0 = vadd.f32 %v3647_v60, %v3338_v37  ;;  %v4082_v1 = vpop.f32.mrf.mxu0  ;;  %v2908_v25 = vadd.f32 %v2788_v27, %v6059_v35  ;;  %v3423_v37 = vld [vmem:[#allocation2 + $0x291] sm:$0xff] }
 0x3f0   :  { %v4198_v47 = vadd.f32 %v4077_v10, %v3768_v0  ;;  %v3222_v48 = vpop.f32.mrf.mxu2  ;;  %4996 = vmatmul.msk.bf16.gmra.mxu0 %vm348_vm1, %v6532_v62  ;;  %v3339_v29 = vadd.f32 %v3219_v17, %v2908_v25 }
 0x3f2   :  { %v4262_v26 = vpack.c.bf16 %v4198_v47, %v4198_v47  ;;  %v4416_v42 = vsel %vm348_vm1, %v4198_v47, 0.0  ;;  %v4524_v5 = vmul.f32 %v4198_v47, %v4198_v47  ;;  %v3463_v47 = vpack.c.bf16 %v3423_v37, %v3422_v53  ;;  %v3857_v53 = vld [vmem:[#allocation2 + $0x2c2] sm:$0xff] }
 0x3f3   :  { %v4417_v28 = vadd.f32 %v4416_v42, %v4415_v38 }
 0x3f4   :  { %4327 = vst.msk [vmem:[%s6882_s4 + $0x68] sm:$0xf] %vm4300_vm4, %v4262_v26  ;;  %v4613_v7 = vsel %vm348_vm1, %v4524_v5, 0.0  ;;  %v2995_v26 = vld [vmem:[#allocation2 + $0x2a8] sm:$0xff] }
 0x3f5   :  { %v4614_v35 = vadd.f32 %v4613_v7, %v4612_v12  ;;  %v3649_v10 = vpop.f32.mrf.mxu3  ;;  %v2791_v14 = vpop.f32.mrf.mxu1  ;;  %v3855_v7 = vld [vmem:[#allocation2 + $0x2aa] sm:$0xff] }
 0x3f6   :  { %v3769_v20 = vadd.f32 %v3649_v10, %v3339_v29  ;;  %v4084_v11 = vpop.f32.mrf.mxu0  ;;  %v2909_v41 = vadd.f32 %v2791_v14, %v6065_v30 }
 0x3f8   :  { %v4199_v46 = vadd.f32 %v4079_v40, %v3769_v20  ;;  %4897 = vmatmul.msk.bf16.gmra.mxu1 %vm348_vm1, %v6510_v2  ;;  %v3224_v22 = vpop.f32.mrf.mxu2  ;;  %v3340_v40 = vadd.f32 %v3222_v48, %v2909_v41  ;;  %v6554_v2 = vpack.c.bf16 %v3853_v45, %v3852_v55  ;;  %v2994_v48 = vld [vmem:[#allocation2 + $0x2a0] sm:$0xff] }
 0x3f9   :  { %v3034_v33 = vpack.c.bf16 %v2995_v26, %v2994_v48 }
 0x3fa   :  { %v4263_v15 = vpack.c.bf16 %v4199_v46, %v4199_v46  ;;  %v4418_v63 = vsel %vm348_vm1, %v4199_v46, 0.0  ;;  %v4525_v23 = vmul.f32 %v4199_v46, %v4199_v46  ;;  %4963 = vmatmul.msk.bf16.gmra.mxu3 %vm348_vm1, %v3462_v13 }
 0x3fb   :  { %v4419_v39 = vadd.f32 %v4418_v63, %v4417_v28 }
 0x3fc   :  { %4328 = vst.msk [vmem:[%s6882_s4 + $0x6c] sm:$0xf] %vm4300_vm4, %v4263_v15  ;;  %v4615_v30 = vsel %vm348_vm1, %v4525_v23, 0.0  ;;  %v3424_v23 = vld [vmem:[#allocation2 + $0x2a1] sm:$0xff] }
 0x3fd   :  { %v4616_v19 = vadd.f32 %v4615_v30, %v4614_v35  ;;  %v3652_v18 = vpop.f32.mrf.mxu3  ;;  %v2793_v16 = vpop.f32.mrf.mxu1  ;;  %4931 = vmatmul.msk.bf16.gmra.mxu2 %vm348_vm1, %v3033_v51 }
 0x3fe   :  { %v3770_v31 = vadd.f32 %v3652_v18, %v3340_v40  ;;  %v4087_v17 = vpop.f32.mrf.mxu0  ;;  %v2910_v24 = vadd.f32 %v2793_v16, %v6069_v61 }
 0x400   :  { %v4200_v56 = vadd.f32 %v4082_v1, %v3770_v31  ;;  %v3227_v4 = vpop.f32.mrf.mxu2  ;;  %4997 = vmatmul.msk.bf16.gmra.mxu0 %vm348_vm1, %v6554_v2  ;;  %v3341_v60 = vadd.f32 %v3224_v22, %v2910_v24  ;;  %v2997_v24 = vld [vmem:[#allocation2 + $0x2c0] sm:$0xff] }
 0x402   :  { %v4264_v52 = vpack.c.bf16 %v4200_v56, %v4200_v56  ;;  %v4420_v49 = vsel %vm348_vm1, %v4200_v56, 0.0  ;;  %v4526_v9 = vmul.f32 %v4200_v56, %v4200_v56  ;;  %v2996_v56 = vld [vmem:[#allocation2 + $0x2b8] sm:$0xff] }
 0x403   :  { %v4421_v38 = vadd.f32 %v4420_v49, %v4419_v39  ;;  %v3425_v39 = vld [vmem:[#allocation2 + $0x2a9] sm:$0xff] }
 0x404   :  { %4329 = vst.msk [vmem:[%s6882_s4 + $0x70] sm:$0xf] %vm4300_vm4, %v4264_v52  ;;  %v4617_v12 = vsel %vm348_vm1, %v4526_v9, 0.0  ;;  %v3464_v31 = vpack.c.bf16 %v3425_v39, %v3424_v23  ;;  %v3035_v9 = vpack.c.bf16 %v2997_v24, %v2996_v56 }
 0x405   :  { %v4618_v61 = vadd.f32 %v4617_v12, %v4616_v19  ;;  %v3654_v27 = vpop.f32.mrf.mxu3  ;;  %v2796_v0 = vpop.f32.mrf.mxu1 }
 0x406   :  { %v3771_v1 = vadd.f32 %v3654_v27, %v3341_v60  ;;  %v4089_v25 = vpop.f32.mrf.mxu0  ;;  %v2911_v5 = vadd.f32 %v2796_v0, %v6075_v34 }
 0x408   :  { %v4201_v42 = vadd.f32 %v4084_v11, %v3771_v1  ;;  %4898 = vmatmul.msk.bf16.gmra.mxu1 %vm348_vm1, %v6532_v62  ;;  %v3229_v28 = vpop.f32.mrf.mxu2  ;;  %v3342_v20 = vadd.f32 %v3227_v4, %v2911_v5  ;;  %v6576_v62 = vpack.c.bf16 %v3855_v7, %v3854_v54 }
 0x40a   :  { %v4265_v29 = vpack.c.bf16 %v4201_v42, %v4201_v42  ;;  %v4422_v35 = vsel %vm348_vm1, %v4201_v42, 0.0  ;;  %v4527_v10 = vmul.f32 %v4201_v42, %v4201_v42  ;;  %4964 = vmatmul.msk.bf16.gmra.mxu3 %vm348_vm1, %v3463_v47 }
 0x40b   :  { %v4423_v14 = vadd.f32 %v4422_v35, %v4421_v38  ;;  %v3856_v38 = vld [vmem:[#allocation2 + $0x2ba] sm:$0xff] }
 0x40c   :  { %4330 = vst.msk [vmem:[%s6882_s4 + $0x74] sm:$0xf] %vm4300_vm4, %v4265_v29  ;;  %v4619_v34 = vsel %vm348_vm1, %v4527_v10, 0.0  ;;  %v3426_v29 = vld [vmem:[#allocation2 + $0x2b9] sm:$0xff]  ;;  %v3427_v35 = vld [vmem:[#allocation2 + $0x2c1] sm:$0xff] }
 0x40d   :  { %v4620_v13 = vadd.f32 %v4619_v34, %v4618_v61  ;;  %v3657_v11 = vpop.f32.mrf.mxu3  ;;  %v2798_v43 = vpop.f32.mrf.mxu1  ;;  %4932 = vmatmul.msk.bf16.gmra.mxu2 %vm348_vm1, %v3034_v33 }
 0x40e   :  { %v3772_v3 = vadd.f32 %v3657_v11, %v3342_v20  ;;  %v4092_v46 = vpop.f32.mrf.mxu0  ;;  %v2912_v22 = vadd.f32 %v2798_v43, %v6079_v36  ;;  %v3465_v11 = vpack.c.bf16 %v3427_v35, %v3426_v29 }
 0x410   :  { %v4202_v41 = vadd.f32 %v4087_v17, %v3772_v3  ;;  %v3232_v51 = vpop.f32.mrf.mxu2  ;;  %4998 = vmatmul.msk.bf16.gmra.mxu0 %vm348_vm1, %v6576_v62  ;;  %v3343_v40 = vadd.f32 %v3229_v28, %v2912_v22  ;;  %v2998_v3 = vld [vmem:[#allocation2 + $0x2d0] sm:$0xff] }
 0x412   :  { %v4266_v55 = vpack.c.bf16 %v4202_v41, %v4202_v41  ;;  %v4424_v45 = vsel %vm348_vm1, %v4202_v41, 0.0  ;;  %v4528_v15 = vmul.f32 %v4202_v41, %v4202_v41 }
 0x413   :  { %v4425_v63 = vadd.f32 %v4424_v45, %v4423_v14  ;;  %v3858_v45 = vld [vmem:[#allocation2 + $0x2d2] sm:$0xff] }
 0x414   :  { %4331 = vst.msk [vmem:[%s6882_s4 + $0x78] sm:$0xf] %vm4300_vm4, %v4266_v55  ;;  %v4621_v30 = vsel %vm348_vm1, %v4528_v15, 0.0  ;;  %v3859_v15 = vld [vmem:[#allocation2 + $0x2da] sm:$0xff] }
 0x415   :  { %v4622_v36 = vadd.f32 %v4621_v30, %v4620_v13  ;;  %v3659_v19 = vpop.f32.mrf.mxu3  ;;  %v2801_v18 = vpop.f32.mrf.mxu1 }
 0x416   :  { %v3773_v16 = vadd.f32 %v3659_v19, %v3343_v40  ;;  %v4094_v17 = vpop.f32.mrf.mxu0  ;;  %v2913_v52 = vadd.f32 %v2801_v18, %v6085_v58 }
 0x418   :  { %v4203_v4 = vadd.f32 %v4089_v25, %v3773_v16  ;;  %4899 = vmatmul.msk.bf16.gmra.mxu1 %vm348_vm1, %v6554_v2  ;;  %v3234_v49 = vpop.f32.mrf.mxu2  ;;  %v3344_v27 = vadd.f32 %v3232_v51, %v2913_v52  ;;  %v6598_v2 = vpack.c.bf16 %v3857_v53, %v3856_v38  ;;  %v3428_v38 = vld [vmem:[#allocation2 + $0x2d1] sm:$0xff]  ;;  %v3429_v53 = vld [vmem:[#allocation2 + $0x2d9] sm:$0xff] }
 0x41a   :  { %v4267_v37 = vpack.c.bf16 %v4203_v4, %v4203_v4  ;;  %v4426_v12 = vsel %vm348_vm1, %v4203_v4, 0.0  ;;  %v4529_v60 = vmul.f32 %v4203_v4, %v4203_v4  ;;  %4965 = vmatmul.msk.bf16.gmra.mxu3 %vm348_vm1, %v3464_v31 }
 0x41b   :  { %v4427_v61 = vadd.f32 %v4426_v12, %v4425_v63 }
 0x41c   :  { %4332 = vst.msk [vmem:[%s6882_s4 + $0x7c] sm:$0xf] %vm4300_vm4, %v4267_v37  ;;  %v4623_v58 = vsel %vm348_vm1, %v4529_v60, 0.0 }
 0x41d   :  { %v4624_v0 = vadd.f32 %v4623_v58, %v4622_v36  ;;  %v3662_v1 = vpop.f32.mrf.mxu3  ;;  %v2803_v47 = vpop.f32.mrf.mxu1  ;;  %4933 = vmatmul.msk.bf16.gmra.mxu2 %vm348_vm1, %v3035_v9 }
 0x41e   :  { %v3774_v25 = vadd.f32 %v3662_v1, %v3344_v27  ;;  %v4097_v48 = vpop.f32.mrf.mxu0  ;;  %v2914_v42 = vadd.f32 %v2803_v47, %v6089_v50  ;;  %v3466_v27 = vpack.c.bf16 %v3429_v53, %v3428_v38  ;;  %v3000_v1 = vld [vmem:[#allocation2 + $0x2e8] sm:$0xff]  ;;  %v3001_v47 = vld [vmem:[#allocation2 + $0x2f0] sm:$0xff] }
 0x420   :  { %v4204_v26 = vadd.f32 %v4092_v46, %v3774_v25  ;;  %v3237_v5 = vpop.f32.mrf.mxu2  ;;  %4999 = vmatmul.msk.bf16.gmra.mxu0 %vm348_vm1, %v6598_v2  ;;  %v3345_v14 = vadd.f32 %v3234_v49, %v2914_v42  ;;  %v2999_v46 = vld [vmem:[#allocation2 + $0x2d8] sm:$0xff]  ;;  %v3037_v42 = vpack.c.bf16 %v3001_v47, %v3000_v1 }
 0x421   :  { %v3036_v55 = vpack.c.bf16 %v2999_v46, %v2998_v3 }
 0x422   :  { %v4268_v28 = vpack.c.bf16 %v4204_v26, %v4204_v26  ;;  %v4428_v33 = vsel %vm348_vm1, %v4204_v26, 0.0  ;;  %v4530_v54 = vmul.f32 %v4204_v26, %v4204_v26 }
 0x423   :  { %v4429_v7 = vadd.f32 %v4428_v33, %v4427_v61 }
 0x424   :  { %4333 = vst.msk [vmem:[%s6882_s4 + $0x80] sm:$0xf] %vm4300_vm4, %v4268_v28  ;;  %v4625_v10 = vsel %vm348_vm1, %v4530_v54, 0.0  ;;  %v3861_v28 = vld [vmem:[#allocation2 + $0x2f2] sm:$0xff] }
 0x425   :  { %v4626_v50 = vadd.f32 %v4625_v10, %v4624_v0  ;;  %v3664_v34 = vpop.f32.mrf.mxu3  ;;  %v2806_v20 = vpop.f32.mrf.mxu1 }
 0x426   :  { %v3775_v13 = vadd.f32 %v3664_v34, %v3345_v14  ;;  %v4099_v43 = vpop.f32.mrf.mxu0  ;;  %v2915_v22 = vadd.f32 %v2806_v20, %v6095_v6 }
 0x428   :  { %v4205_v41 = vadd.f32 %v4094_v17, %v3775_v13  ;;  %4900 = vmatmul.msk.bf16.gmra.mxu1 %vm348_vm1, %v6576_v62  ;;  %v3239_v51 = vpop.f32.mrf.mxu2  ;;  %v3346_v40 = vadd.f32 %v3237_v5, %v2915_v22  ;;  %v6620_v62 = vpack.c.bf16 %v3859_v15, %v3858_v45  ;;  %v3860_v5 = vld [vmem:[#allocation2 + $0x2ea] sm:$0xff] }
 0x42a   :  { %v4269_v63 = vpack.c.bf16 %v4205_v41, %v4205_v41  ;;  %v4430_v23 = vsel %vm348_vm1, %v4205_v41, 0.0  ;;  %v4531_v39 = vmul.f32 %v4205_v41, %v4205_v41  ;;  %4966 = vmatmul.msk.bf16.gmra.mxu3 %vm348_vm1, %v3465_v11 }
 0x42b   :  { %v4431_v30 = vadd.f32 %v4430_v23, %v4429_v7 }
 0x42c   :  { %4334 = vst.msk [vmem:[%s6882_s4 + $0x84] sm:$0xf] %vm4300_vm4, %v4269_v63  ;;  %v4627_v6 = vsel %vm348_vm1, %v4531_v39, 0.0 }
 0x42d   :  { %v4628_v36 = vadd.f32 %v4627_v6, %v4626_v50  ;;  %v3667_v19 = vpop.f32.mrf.mxu3  ;;  %v2808_v18 = vpop.f32.mrf.mxu1  ;;  %4934 = vmatmul.msk.bf16.gmra.mxu2 %vm348_vm1, %v3036_v55  ;;  %v3431_v55 = vld [vmem:[#allocation2 + $0x2f1] sm:$0xff] }
 0x42e   :  { %v3776_v16 = vadd.f32 %v3667_v19, %v3346_v40  ;;  %v4102_v31 = vpop.f32.mrf.mxu0  ;;  %v2916_v56 = vadd.f32 %v2808_v18, %v6099_v44  ;;  %v3002_v40 = vld [vmem:[#allocation2 + $0x300] sm:$0xff] }
 0x42f   :  { %v6955_v18 = vld [vmem:[#allocation27_spill] sm:$0xff] }
 0x430   :  { %v4206_v17 = vadd.f32 %v4097_v48, %v3776_v16  ;;  %v3242_v24 = vpop.f32.mrf.mxu2  ;;  %5000 = vmatmul.msk.bf16.gmra.mxu0 %vm348_vm1, %v6620_v62  ;;  %v3347_v12 = vadd.f32 %v3239_v51, %v2916_v56  ;;  %v3430_v51 = vld [vmem:[#allocation2 + $0x2e9] sm:$0xff] }
 0x431   :  { %v3862_v56 = vld [vmem:[#allocation2 + $0x302] sm:$0xff] }
 0x432   :  { %v4270_v4 = vpack.c.bf16 %v4206_v17, %v4206_v17  ;;  %v4432_v52 = vsel %vm348_vm1, %v4206_v17, 0.0  ;;  %v4532_v49 = vmul.f32 %v4206_v17, %v4206_v17 }
 0x433   :  { %v4433_v9 = vadd.f32 %v4432_v52, %v4431_v30  ;;  %v3467_v30 = vpack.c.bf16 %v3431_v55, %v3430_v51 }
 0x434   :  { %4335 = vst.msk [vmem:[%s6882_s4 + $0x88] sm:$0xf] %vm4300_vm4, %v4270_v4  ;;  %v4629_v37 = vsel %vm348_vm1, %v4532_v49, 0.0 }
 0x435   :  { %v4630_v44 = vadd.f32 %v4629_v37, %v4628_v36  ;;  %v3669_v60 = vpop.f32.mrf.mxu3  ;;  %v2811_v61 = vpop.f32.mrf.mxu1  ;;  %v3003_v36 = vld [vmem:[#allocation2 + $0x308] sm:$0xff] }
 0x436   :  { %v3777_v58 = vadd.f32 %v3669_v60, %v3347_v12  ;;  %v4104_v0 = vpop.f32.mrf.mxu0  ;;  %v2917_v48 = vadd.f32 %v2811_v61, %v6105_v59  ;;  %v3038_v17 = vpack.c.bf16 %v3003_v36, %v3002_v40 }
 0x438   :  { %v4207_v25 = vadd.f32 %v4099_v43, %v3777_v58  ;;  %4901 = vmatmul.msk.bf16.gmra.mxu1 %vm348_vm1, %v6598_v2  ;;  %v3244_v26 = vpop.f32.mrf.mxu2  ;;  %v3348_v35 = vadd.f32 %v3242_v24, %v2917_v48  ;;  %v6642_v2 = vpack.c.bf16 %v3861_v28, %v3860_v5  ;;  %v3863_v24 = vld [vmem:[#allocation2 + $0x30a] sm:$0xff] }
 0x439   :  { %v3433_v5 = vld [vmem:[#allocation2 + $0x309] sm:$0xff] }
 0x43a   :  { %v4271_v33 = vpack.c.bf16 %v4207_v25, %v4207_v25  ;;  %v4434_v54 = vsel %vm348_vm1, %v4207_v25, 0.0  ;;  %v4533_v7 = vmul.f32 %v4207_v25, %v4207_v25  ;;  %4967 = vmatmul.msk.bf16.gmra.mxu3 %vm348_vm1, %v3466_v27  ;;  %v6956_v27 = vld [vmem:[#allocation28_spill] sm:$0xff] }
 0x43b   :  { %v4435_v29 = vadd.f32 %v4434_v54, %v4433_v9 }
 0x43c   :  { %4336 = vst.msk [vmem:[%s6882_s4 + $0x8c] sm:$0xf] %vm4300_vm4, %v4271_v33  ;;  %v4631_v59 = vsel %vm348_vm1, %v4533_v7, 0.0 }
 0x43d   :  { %v4632_v10 = vadd.f32 %v4631_v59, %v4630_v44  ;;  %v3672_v14 = vpop.f32.mrf.mxu3  ;;  %v2813_v50 = vpop.f32.mrf.mxu1  ;;  %4935 = vmatmul.msk.bf16.gmra.mxu2 %vm348_vm1, %v3037_v42  ;;  %v3432_v42 = vld [vmem:[#allocation2 + $0x301] sm:$0xff] }
 0x43e   :  { %v3778_v34 = vadd.f32 %v3672_v14, %v3348_v35  ;;  %v4107_v20 = vpop.f32.mrf.mxu0  ;;  %v2918_v11 = vadd.f32 %v2813_v50, %v6109_v57  ;;  %v3468_v35 = vpack.c.bf16 %v3433_v5, %v3432_v42  ;;  %v3004_v14 = vld [vmem:[#allocation2 + $0x318] sm:$0xff]  ;;  %v3005_v50 = vld [vmem:[#allocation2 + $0x320] sm:$0xff] }
 0x440   :  { %v4208_v13 = vadd.f32 %v4102_v31, %v3778_v34  ;;  %v3247_v43 = vpop.f32.mrf.mxu2  ;;  %5001 = vmatmul.msk.bf16.gmra.mxu0 %vm348_vm1, %v6642_v2  ;;  %v3349_v15 = vadd.f32 %v3244_v26, %v2918_v11  ;;  %v3039_v11 = vpack.c.bf16 %v3005_v50, %v3004_v14 }
 0x442   :  { %v4272_v3 = vpack.c.bf16 %v4208_v13, %v4208_v13  ;;  %v4436_v46 = vsel %vm348_vm1, %v4208_v13, 0.0  ;;  %v4534_v41 = vmul.f32 %v4208_v13, %v4208_v13 }
 0x443   :  { %v4437_v22 = vadd.f32 %v4436_v46, %v4435_v29 }
 0x444   :  { %4337 = vst.msk [vmem:[%s6882_s4 + $0x90] sm:$0xf] %vm4300_vm4, %v4272_v3  ;;  %v4633_v45 = vsel %vm348_vm1, %v4534_v41, 0.0  ;;  %v3865_v3 = vld [vmem:[#allocation2 + $0x322] sm:$0xff] }
 0x445   :  { %v4634_v57 = vadd.f32 %v4633_v45, %v4632_v10  ;;  %v3674_v63 = vpop.f32.mrf.mxu3  ;;  %v2816_v23 = vpop.f32.mrf.mxu1 }
 0x446   :  { %v3779_v39 = vadd.f32 %v3674_v63, %v3349_v15  ;;  %v4109_v6 = vpop.f32.mrf.mxu0  ;;  %v2919_v16 = vadd.f32 %v2816_v23, %v6955_v18 }
 0x448   :  { %v4209_v19 = vadd.f32 %v4104_v0, %v3779_v39  ;;  %4902 = vmatmul.msk.bf16.gmra.mxu1 %vm348_vm1, %v6620_v62  ;;  %v3249_v31 = vpop.f32.mrf.mxu2  ;;  %v3350_v53 = vadd.f32 %v3247_v43, %v2919_v16  ;;  %v6664_v62 = vpack.c.bf16 %v3863_v24, %v3862_v56  ;;  %v3864_v43 = vld [vmem:[#allocation2 + $0x31a] sm:$0xff] }
 0x449   :  { %v3434_v16 = vld [vmem:[#allocation2 + $0x319] sm:$0xff] }
 0x44a   :  { %v4273_v4 = vpack.c.bf16 %v4209_v19, %v4209_v19  ;;  %v4438_v52 = vsel %vm348_vm1, %v4209_v19, 0.0  ;;  %v4535_v49 = vmul.f32 %v4209_v19, %v4209_v19  ;;  %4968 = vmatmul.msk.bf16.gmra.mxu3 %vm348_vm1, %v3467_v30 }
 0x44b   :  { %v4439_v9 = vadd.f32 %v4438_v52, %v4437_v22 }
 0x44c   :  { %4338 = vst.msk [vmem:[%s6882_s4 + $0x94] sm:$0xf] %vm4300_vm4, %v4273_v4  ;;  %v4635_v38 = vsel %vm348_vm1, %v4535_v49, 0.0 }
 0x44d   :  { %v4636_v37 = vadd.f32 %v4635_v38, %v4634_v57  ;;  %v3677_v12 = vpop.f32.mrf.mxu3  ;;  %v2818_v44 = vpop.f32.mrf.mxu1  ;;  %4936 = vmatmul.msk.bf16.gmra.mxu2 %vm348_vm1, %v3038_v17  ;;  %v3006_v38 = vld [vmem:[#allocation2 + $0x330] sm:$0xff] }
 0x44e   :  { %v3780_v60 = vadd.f32 %v3677_v12, %v3350_v53  ;;  %v4112_v61 = vpop.f32.mrf.mxu0  ;;  %v2920_v0 = vadd.f32 %v2818_v44, %v6956_v27  ;;  %v3007_v53 = vld [vmem:[#allocation2 + $0x338] sm:$0xff]  ;;  %v6957_v12 = vld [vmem:[#allocation11_spill] sm:$0xff] }
 0x44f   :  { %v3867_v27 = vld [vmem:[#allocation2 + $0x33a] sm:$0xff] }
 0x450   :  { %v4210_v58 = vadd.f32 %v4107_v20, %v3780_v60  ;;  %v3252_v1 = vpop.f32.mrf.mxu2  ;;  %5002 = vmatmul.msk.bf16.gmra.mxu0 %vm348_vm1, %v6664_v62  ;;  %v3351_v33 = vadd.f32 %v3249_v31, %v2920_v0  ;;  %v3435_v31 = vld [vmem:[#allocation2 + $0x321] sm:$0xff] }
 0x451   :  { %v3469_v49 = vpack.c.bf16 %v3435_v31, %v3434_v16 }
 0x452   :  { %v4274_v47 = vpack.c.bf16 %v4210_v58, %v4210_v58  ;;  %v4440_v25 = vsel %vm348_vm1, %v4210_v58, 0.0  ;;  %v4536_v48 = vmul.f32 %v4210_v58, %v4210_v58  ;;  %v3866_v58 = vld [vmem:[#allocation2 + $0x332] sm:$0xff] }
 0x453   :  { %v4441_v26 = vadd.f32 %v4440_v25, %v4439_v9 }
 0x454   :  { %4339 = vst.msk [vmem:[%s6882_s4 + $0x98] sm:$0xf] %vm4300_vm4, %v4274_v47  ;;  %v4637_v28 = vsel %vm348_vm1, %v4536_v48, 0.0 }
 0x455   :  { %v4638_v54 = vadd.f32 %v4637_v28, %v4636_v37  ;;  %v3679_v7 = vpop.f32.mrf.mxu3  ;;  %v2821_v29 = vpop.f32.mrf.mxu1 }
 0x456   :  { %v3781_v59 = vadd.f32 %v3679_v7, %v3351_v33  ;;  %v4114_v10 = vpop.f32.mrf.mxu0  ;;  %v2921_v20 = vadd.f32 %v2821_v29, %v6132_v32  ;;  %v6958_v29 = vld [vmem:[#allocation13_spill] sm:$0xff] }
 0x458   :  { %v4211_v34 = vadd.f32 %v4109_v6, %v3781_v59  ;;  %4903 = vmatmul.msk.bf16.gmra.mxu1 %vm348_vm1, %v6642_v2  ;;  %v3254_v13 = vpop.f32.mrf.mxu2  ;;  %v3352_v55 = vadd.f32 %v3252_v1, %v2921_v20  ;;  %v6686_v2 = vpack.c.bf16 %v3865_v3, %v3864_v43  ;;  %v3436_v20 = vld [vmem:[#allocation2 + $0x331] sm:$0xff] }
 0x45a   :  { %v4275_v46 = vpack.c.bf16 %v4211_v34, %v4211_v34  ;;  %v4442_v41 = vsel %vm348_vm1, %v4211_v34, 0.0  ;;  %v4537_v22 = vmul.f32 %v4211_v34, %v4211_v34  ;;  %4969 = vmatmul.msk.bf16.gmra.mxu3 %vm348_vm1, %v3468_v35 }
 0x45b   :  { %v4443_v51 = vadd.f32 %v4442_v41, %v4441_v26 }
 0x45c   :  { %4340 = vst.msk [vmem:[%s6882_s4 + $0x9c] sm:$0xf] %vm4300_vm4, %v4275_v46  ;;  %v4639_v32 = vsel %vm348_vm1, %v4537_v22, 0.0 }
 0x45d   :  { %v4640_v45 = vadd.f32 %v4639_v32, %v4638_v54  ;;  %v3682_v15 = vpop.f32.mrf.mxu3  ;;  %v2823_v57 = vpop.f32.mrf.mxu1  ;;  %4937 = vmatmul.msk.bf16.gmra.mxu2 %vm348_vm1, %v3039_v11 }
 0x45e   :  { %v3782_v63 = vadd.f32 %v3682_v15, %v3352_v55  ;;  %v4117_v23 = vpop.f32.mrf.mxu0  ;;  %v2922_v30 = vadd.f32 %v2823_v57, %v6138_v21  ;;  %v3008_v55 = vld [vmem:[#allocation2 + $0x348] sm:$0xff]  ;;  %v6959_v57 = vld [vmem:[#allocation15_spill] sm:$0xff] }
 0x460   :  { %v4212_v39 = vadd.f32 %v4112_v61, %v3782_v63  ;;  %v3257_v6 = vpop.f32.mrf.mxu2  ;;  %5003 = vmatmul.msk.bf16.gmra.mxu0 %vm348_vm1, %v6686_v2  ;;  %v3353_v56 = vadd.f32 %v3254_v13, %v2922_v30  ;;  %v3040_v61 = vpack.c.bf16 %v3007_v53, %v3006_v38  ;;  %v3437_v13 = vld [vmem:[#allocation2 + $0x339] sm:$0xff]  ;;  %v3868_v30 = vld [vmem:[#allocation2 + $0x34a] sm:$0xff] }
 0x462   :  { %v4276_v40 = vpack.c.bf16 %v4212_v39, %v4212_v39  ;;  %v4444_v36 = vsel %vm348_vm1, %v4212_v39, 0.0  ;;  %v4538_v19 = vmul.f32 %v4212_v39, %v4212_v39 }
 0x463   :  { %v4445_v18 = vadd.f32 %v4444_v36, %v4443_v51  ;;  %v3470_v51 = vpack.c.bf16 %v3437_v13, %v3436_v20 }
 0x464   :  { %4341 = vst.msk [vmem:[%s6882_s4 + $0xa0] sm:$0xf] %vm4300_vm4, %v4276_v40  ;;  %v4641_v17 = vsel %vm348_vm1, %v4538_v19, 0.0 }
 0x465   :  { %v4642_v21 = vadd.f32 %v4641_v17, %v4640_v45  ;;  %v3684_v24 = vpop.f32.mrf.mxu3  ;;  %v2826_v4 = vpop.f32.mrf.mxu1  ;;  %v3009_v45 = vld [vmem:[#allocation2 + $0x350] sm:$0xff] }
 0x466   :  { %v3783_v52 = vadd.f32 %v3684_v24, %v3353_v56  ;;  %v4119_v9 = vpop.f32.mrf.mxu0  ;;  %v2923_v44 = vadd.f32 %v2826_v4, %v6957_v12  ;;  %v3041_v39 = vpack.c.bf16 %v3009_v45, %v3008_v55 }
 0x468   :  { %v4213_v37 = vadd.f32 %v4114_v10, %v3783_v52  ;;  %4904 = vmatmul.msk.bf16.gmra.mxu1 %vm348_vm1, %v6664_v62  ;;  %v3259_v60 = vpop.f32.mrf.mxu2  ;;  %v3354_v26 = vadd.f32 %v3257_v6, %v2923_v44  ;;  %v6708_v62 = vpack.c.bf16 %v3867_v27, %v3866_v58  ;;  %v3869_v6 = vld [vmem:[#allocation2 + $0x352] sm:$0xff] }
 0x46a   :  { %v4277_v0 = vpack.c.bf16 %v4213_v37, %v4213_v37  ;;  %v4446_v1 = vsel %vm348_vm1, %v4213_v37, 0.0  ;;  %v4539_v47 = vmul.f32 %v4213_v37, %v4213_v37  ;;  %4970 = vmatmul.msk.bf16.gmra.mxu3 %vm348_vm1, %v3469_v49  ;;  %v6960_v49 = vld [vmem:[#allocation17_spill] sm:$0xff] }
 0x46b   :  { %v4447_v25 = vadd.f32 %v4446_v1, %v4445_v18 }
 0x46c   :  { %4342 = vst.msk [vmem:[%s6882_s4 + $0xa4] sm:$0xf] %vm4300_vm4, %v4277_v0  ;;  %v4643_v48 = vsel %vm348_vm1, %v4539_v47, 0.0 }
 0x46d   :  { %v4644_v42 = vadd.f32 %v4643_v48, %v4642_v21  ;;  %v3687_v5 = vpop.f32.mrf.mxu3  ;;  %v2828_v28 = vpop.f32.mrf.mxu1  ;;  %4938 = vmatmul.msk.bf16.gmra.mxu2 %vm348_vm1, %v3040_v61  ;;  %v3439_v61 = vld [vmem:[#allocation2 + $0x351] sm:$0xff] }
 0x46e   :  { %v3784_v33 = vadd.f32 %v3687_v5, %v3354_v26  ;;  %v4122_v54 = vpop.f32.mrf.mxu0  ;;  %v2924_v59 = vadd.f32 %v2828_v28, %v6958_v29  ;;  %v6961_v5 = vld [vmem:[#allocation19_spill] sm:$0xff] }
 0x470   :  { %v4214_v7 = vadd.f32 %v4117_v23, %v3784_v33  ;;  %v3262_v35 = vpop.f32.mrf.mxu2  ;;  %5004 = vmatmul.msk.bf16.gmra.mxu0 %vm348_vm1, %v6708_v62  ;;  %v3355_v43 = vadd.f32 %v3259_v60, %v2924_v59  ;;  %v3438_v60 = vld [vmem:[#allocation2 + $0x349] sm:$0xff] }
 0x471   :  { %v3471_v48 = vpack.c.bf16 %v3439_v61, %v3438_v60 }
 0x472   :  { %v4278_v10 = vpack.c.bf16 %v4214_v7, %v4214_v7  ;;  %v4448_v14 = vsel %vm348_vm1, %v4214_v7, 0.0  ;;  %v4540_v50 = vmul.f32 %v4214_v7, %v4214_v7 }
 0x473   :  { %v4449_v34 = vadd.f32 %v4448_v14, %v4447_v25 }
 0x474   :  { %4343 = vst.msk [vmem:[%s6882_s4 + $0xa8] sm:$0xf] %vm4300_vm4, %v4278_v10  ;;  %v4645_v11 = vsel %vm348_vm1, %v4540_v50, 0.0 }
 0x475   :  { %v4646_v3 = vadd.f32 %v4645_v11, %v4644_v42  ;;  %v3689_v46 = vpop.f32.mrf.mxu3  ;;  %v2831_v41 = vpop.f32.mrf.mxu1  ;;  %v6962_v11 = vld [vmem:[#allocation21_spill] sm:$0xff] }
 0x476   :  { %v3785_v22 = vadd.f32 %v3689_v46, %v3355_v43  ;;  %v4124_v32 = vpop.f32.mrf.mxu0  ;;  %v2925_v63 = vadd.f32 %v2831_v41, %v6959_v57 }
 0x478   :  { %v4215_v15 = vadd.f32 %v4119_v9, %v3785_v22  ;;  %4905 = vmatmul.msk.bf16.gmra.mxu1 %vm348_vm1, %v6686_v2  ;;  %v3264_v23 = vpop.f32.mrf.mxu2  ;;  %v3356_v31 = vadd.f32 %v3262_v35, %v2925_v63  ;;  %v3901_v2 = vpack.c.bf16 %v3869_v6, %v3868_v30  ;;  %v6963_v30 = vld [vmem:[#allocation23_spill] sm:$0xff] }
 0x47a   :  { %v4279_v40 = vpack.c.bf16 %v4215_v15, %v4215_v15  ;;  %v4450_v36 = vsel %vm348_vm1, %v4215_v15, 0.0  ;;  %v4541_v19 = vmul.f32 %v4215_v15, %v4215_v15  ;;  %4971 = vmatmul.msk.bf16.gmra.mxu3 %vm348_vm1, %v3470_v51 }
 0x47b   :  { %v4451_v18 = vadd.f32 %v4450_v36, %v4449_v34 }
 0x47c   :  { %4344 = vst.msk [vmem:[%s6882_s4 + $0xac] sm:$0xf] %vm4300_vm4, %v4279_v40  ;;  %v4647_v16 = vsel %vm348_vm1, %v4541_v19, 0.0 }
 0x47d   :  { %v4648_v17 = vadd.f32 %v4647_v16, %v4646_v3  ;;  %v3692_v56 = vpop.f32.mrf.mxu3  ;;  %v2833_v21 = vpop.f32.mrf.mxu1  ;;  %4939 = vmatmul.msk.bf16.gmra.mxu2 %vm348_vm1, %v3041_v39 }
 0x47e   :  { %v3786_v24 = vadd.f32 %v3692_v56, %v3356_v31  ;;  %v4127_v4 = vpop.f32.mrf.mxu0  ;;  %v2926_v9 = vadd.f32 %v2833_v21, %v6960_v49  ;;  %v6964_v49 = vld [vmem:[#allocation3_spill] sm:$0xff] }
 0x480   :  { %v4216_v52 = vadd.f32 %v4122_v54, %v3786_v24  ;;  %v3267_v38 = vpop.f32.mrf.mxu2  ;;  %5005 = vmatmul.msk.bf16.gmra.mxu0 %vm348_vm1, %v3901_v2  ;;  %v3357_v27 = vadd.f32 %v3264_v23, %v2926_v9 }
 0x482   :  { %v4280_v53 = vpack.c.bf16 %v4216_v52, %v4216_v52  ;;  %v4452_v37 = vsel %vm348_vm1, %v4216_v52, 0.0  ;;  %v4542_v12 = vmul.f32 %v4216_v52, %v4216_v52 }
 0x483   :  { %v4453_v44 = vadd.f32 %v4452_v37, %v4451_v18 }
 0x484   :  { %4345 = vst.msk [vmem:[%s6882_s4 + $0xb0] sm:$0xf] %vm4300_vm4, %v4280_v53  ;;  %v4649_v58 = vsel %vm348_vm1, %v4542_v12, 0.0 }
 0x485   :  { %v4650_v0 = vadd.f32 %v4649_v58, %v4648_v17  ;;  %v3694_v1 = vpop.f32.mrf.mxu3  ;;  %v2836_v47 = vpop.f32.mrf.mxu1 }
 0x486   :  { %v3787_v25 = vadd.f32 %v3694_v1, %v3357_v27  ;;  %v4129_v26 = vpop.f32.mrf.mxu0  ;;  %v2927_v28 = vadd.f32 %v2836_v47, %v6961_v5 }
 0x488   :  { %v4217_v42 = vadd.f32 %v4124_v32, %v3787_v25  ;;  %4906 = vmatmul.msk.bf16.gmra.mxu1 %vm348_vm1, %v6708_v62  ;;  %v3269_v33 = vpop.f32.mrf.mxu2  ;;  %v3358_v10 = vadd.f32 %v3267_v38, %v2927_v28 }
 0x48a   :  { %v4281_v54 = vpack.c.bf16 %v4217_v42, %v4217_v42  ;;  %v4454_v7 = vsel %vm348_vm1, %v4217_v42, 0.0  ;;  %v4543_v29 = vmul.f32 %v4217_v42, %v4217_v42  ;;  %4972 = vmatmul.msk.bf16.gmra.mxu3 %vm348_vm1, %v3471_v48  ;;  %v6965_v48 = vld [vmem:[#allocation4_spill] sm:$0xff] }
 0x48b   :  { %v4455_v59 = vadd.f32 %v4454_v7, %v4453_v44 }
 0x48c   :  { %4346 = vst.msk [vmem:[%s6882_s4 + $0xb4] sm:$0xf] %vm4300_vm4, %v4281_v54  ;;  %v4651_v35 = vsel %vm348_vm1, %v4543_v29, 0.0 }
 0x48d   :  { %v4652_v14 = vadd.f32 %v4651_v35, %v4650_v0  ;;  %v3697_v50 = vpop.f32.mrf.mxu3  ;;  %v2838_v34 = vpop.f32.mrf.mxu1 }
 0x48e   :  { %v3788_v62 = vadd.f32 %v3697_v50, %v3358_v10  ;;  %v4132_v20 = vpop.f32.mrf.mxu0  ;;  %v2928_v43 = vadd.f32 %v2838_v34, %v6962_v11 }
 0x490   :  { %v4218_v13 = vadd.f32 %v4127_v4, %v3788_v62  ;;  %v3272_v3 = vpop.f32.mrf.mxu2  ;;  %v3359_v55 = vadd.f32 %v3269_v33, %v2928_v43  ;;  %v6966_v62 = vld [vmem:[#allocation5_spill] sm:$0xff] }
 0x492   :  { %v4282_v46 = vpack.c.bf16 %v4218_v13, %v4218_v13  ;;  %v4456_v41 = vsel %vm348_vm1, %v4218_v13, 0.0  ;;  %v4544_v22 = vmul.f32 %v4218_v13, %v4218_v13 }
 0x493   :  { %v4457_v51 = vadd.f32 %v4456_v41, %v4455_v59 }
 0x494   :  { %4347 = vst.msk [vmem:[%s6882_s4 + $0xb8] sm:$0xf] %vm4300_vm4, %v4282_v46  ;;  %v4653_v32 = vsel %vm348_vm1, %v4544_v22, 0.0 }
 0x495   :  { %v4654_v45 = vadd.f32 %v4653_v32, %v4652_v14  ;;  %v3699_v15 = vpop.f32.mrf.mxu3  ;;  %v2841_v57 = vpop.f32.mrf.mxu1 }
 0x496   :  { %v3789_v63 = vadd.f32 %v3699_v15, %v3359_v55  ;;  %v4134_v23 = vpop.f32.mrf.mxu0  ;;  %v2929_v6 = vadd.f32 %v2841_v57, %v6963_v30 }
 0x498   :  { %v4219_v39 = vadd.f32 %v4129_v26, %v3789_v63  ;;  %v3274_v40 = vpop.f32.mrf.mxu2  ;;  %v3360_v2 = vadd.f32 %v3272_v3, %v2929_v6  ;;  %v6967_v63 = vld [vmem:[#allocation6_spill] sm:$0xff] }
 0x49a   :  { %v4283_v36 = vpack.c.bf16 %v4219_v39, %v4219_v39  ;;  %v4458_v19 = vsel %vm348_vm1, %v4219_v39, 0.0  ;;  %v4545_v18 = vmul.f32 %v4219_v39, %v4219_v39 }
 0x49b   :  { %v4459_v16 = vadd.f32 %v4458_v19, %v4457_v51 }
 0x49c   :  { %4348 = vst.msk [vmem:[%s6882_s4 + $0xbc] sm:$0xf] %vm4300_vm4, %v4283_v36  ;;  %v4655_v31 = vsel %vm348_vm1, %v4545_v18, 0.0 }
 0x49d   :  { %v4656_v17 = vadd.f32 %v4655_v31, %v4654_v45  ;;  %v3702_v56 = vpop.f32.mrf.mxu3  ;;  %v2843_v21 = vpop.f32.mrf.mxu1 }
 0x49e   :  { %v3790_v24 = vadd.f32 %v3702_v56, %v3360_v2  ;;  %v4137_v4 = vpop.f32.mrf.mxu0  ;;  %v2930_v9 = vadd.f32 %v2843_v21, %v6964_v49 }
 0x4a0   :  { %v4220_v52 = vadd.f32 %v4132_v20, %v3790_v24  ;;  %v3277_v38 = vpop.f32.mrf.mxu2  ;;  %v3361_v61 = vadd.f32 %v3274_v40, %v2930_v9  ;;  %v6968_v24 = vld [vmem:[#allocation7_spill] sm:$0xff] }
 0x4a2   :  { %v4284_v53 = vpack.c.bf16 %v4220_v52, %v4220_v52  ;;  %v4460_v37 = vsel %vm348_vm1, %v4220_v52, 0.0  ;;  %v4546_v12 = vmul.f32 %v4220_v52, %v4220_v52 }
 0x4a3   :  { %v4461_v44 = vadd.f32 %v4460_v37, %v4459_v16 }
 0x4a4   :  { %4349 = vst.msk [vmem:[%s6882_s4 + $0xc0] sm:$0xf] %vm4300_vm4, %v4284_v53  ;;  %v4657_v60 = vsel %vm348_vm1, %v4546_v12, 0.0 }
 0x4a5   :  { %v4658_v58 = vadd.f32 %v4657_v60, %v4656_v17  ;;  %v3704_v27 = vpop.f32.mrf.mxu3  ;;  %v2846_v0 = vpop.f32.mrf.mxu1 }
 0x4a6   :  { %v3791_v1 = vadd.f32 %v3704_v27, %v3361_v61  ;;  %v4139_v47 = vpop.f32.mrf.mxu0  ;;  %v2931_v26 = vadd.f32 %v2846_v0, %v6965_v48 }
 0x4a8   :  { %v4221_v25 = vadd.f32 %v4134_v23, %v3791_v1  ;;  %v3279_v42 = vpop.f32.mrf.mxu2  ;;  %v3362_v29 = vadd.f32 %v3277_v38, %v2931_v26  ;;  %v6969_v1 = vld [vmem:[#allocation8_spill] sm:$0xff] }
 0x4aa   :  { %v4285_v5 = vpack.c.bf16 %v4221_v25, %v4221_v25  ;;  %v4462_v28 = vsel %vm348_vm1, %v4221_v25, 0.0  ;;  %v4547_v33 = vmul.f32 %v4221_v25, %v4221_v25 }
 0x4ab   :  { %v4463_v54 = vadd.f32 %v4462_v28, %v4461_v44 }
 0x4ac   :  { %4350 = vst.msk [vmem:[%s6882_s4 + $0xc4] sm:$0xf] %vm4300_vm4, %v4285_v5  ;;  %v4659_v7 = vsel %vm348_vm1, %v4547_v33, 0.0 }
 0x4ad   :  { %v4660_v59 = vadd.f32 %v4659_v7, %v4658_v58  ;;  %v3707_v35 = vpop.f32.mrf.mxu3  ;;  %v2848_v10 = vpop.f32.mrf.mxu1 }
 0x4ae   :  { %v3792_v14 = vadd.f32 %v3707_v35, %v3362_v29  ;;  %v4142_v50 = vpop.f32.mrf.mxu0  ;;  %v2932_v20 = vadd.f32 %v2848_v10, %v6966_v62  ;;  %v6970_v10 = vld [vmem:[#allocation9_spill] sm:$0xff] }
 0x4b0   :  { %v4222_v34 = vadd.f32 %v4137_v4, %v3792_v14  ;;  %v3282_v13 = vpop.f32.mrf.mxu2  ;;  %v3363_v22 = vadd.f32 %v3279_v42, %v2932_v20 }
 0x4b2   :  { %v4286_v11 = vpack.c.bf16 %v4222_v34, %v4222_v34  ;;  %v4464_v43 = vsel %vm348_vm1, %v4222_v34, 0.0  ;;  %v4548_v3 = vmul.f32 %v4222_v34, %v4222_v34 }
 0x4b3   :  { %v4465_v46 = vadd.f32 %v4464_v43, %v4463_v54 }
 0x4b4   :  { %4351 = vst.msk [vmem:[%s6882_s4 + $0xc8] sm:$0xf] %vm4300_vm4, %v4286_v11  ;;  %v4661_v41 = vsel %vm348_vm1, %v4548_v3, 0.0 }
 0x4b5   :  { %v4662_v51 = vadd.f32 %v4661_v41, %v4660_v59  ;;  %v3709_v32 = vpop.f32.mrf.mxu3  ;;  %v2851_v55 = vpop.f32.mrf.mxu1 }
 0x4b6   :  { %v3793_v45 = vadd.f32 %v3709_v32, %v3363_v22  ;;  %v4144_v15 = vpop.f32.mrf.mxu0  ;;  %v2933_v23 = vadd.f32 %v2851_v55, %v6967_v63  ;;  %v6971_v55 = vld [vmem:[#allocation10_spill] sm:$0xff] }
 0x4b8   :  { %v4223_v57 = vadd.f32 %v4139_v47, %v3793_v45  ;;  %v3284_v39 = vpop.f32.mrf.mxu2  ;;  %v3364_v18 = vadd.f32 %v3282_v13, %v2933_v23 }
 0x4ba   :  { %v4287_v30 = vpack.c.bf16 %v4223_v57, %v4223_v57  ;;  %v4466_v6 = vsel %vm348_vm1, %v4223_v57, 0.0  ;;  %v4549_v40 = vmul.f32 %v4223_v57, %v4223_v57 }
 0x4bb   :  { %v4467_v36 = vadd.f32 %v4466_v6, %v4465_v46 }
 0x4bc   :  { %4352 = vst.msk [vmem:[%s6882_s4 + $0xcc] sm:$0xf] %vm4300_vm4, %v4287_v30  ;;  %v4663_v19 = vsel %vm348_vm1, %v4549_v40, 0.0 }
 0x4bd   :  { %v4664_v16 = vadd.f32 %v4663_v19, %v4662_v51  ;;  %v3712_v31 = vpop.f32.mrf.mxu3  ;;  %v2853_v2 = vpop.f32.mrf.mxu1 }
 0x4be   :  { %v3794_v17 = vadd.f32 %v3712_v31, %v3364_v18  ;;  %v4147_v56 = vpop.f32.mrf.mxu0  ;;  %v2934_v4 = vadd.f32 %v2853_v2, %v6968_v24  ;;  %v6972_v2 = vld [vmem:[#allocation12_spill] sm:$0xff] }
 0x4c0   :  { %v4224_v21 = vadd.f32 %v4142_v50, %v3794_v17  ;;  %v3287_v52 = vpop.f32.mrf.mxu2  ;;  %v3365_v12 = vadd.f32 %v3284_v39, %v2934_v4 }
 0x4c2   :  { %v4288_v49 = vpack.c.bf16 %v4224_v21, %v4224_v21  ;;  %v4468_v9 = vsel %vm348_vm1, %v4224_v21, 0.0  ;;  %v4550_v38 = vmul.f32 %v4224_v21, %v4224_v21 }
 0x4c3   :  { %v4469_v53 = vadd.f32 %v4468_v9, %v4467_v36 }
 0x4c4   :  { %4353 = vst.msk [vmem:[%s6882_s4 + $0xd0] sm:$0xf] %vm4300_vm4, %v4288_v49  ;;  %v4665_v37 = vsel %vm348_vm1, %v4550_v38, 0.0 }
 0x4c5   :  { %v4666_v44 = vadd.f32 %v4665_v37, %v4664_v16  ;;  %v3714_v60 = vpop.f32.mrf.mxu3  ;;  %v2856_v61 = vpop.f32.mrf.mxu1 }
 0x4c6   :  { %v3795_v58 = vadd.f32 %v3714_v60, %v3365_v12  ;;  %v4149_v27 = vpop.f32.mrf.mxu0  ;;  %v2935_v47 = vadd.f32 %v2856_v61, %v6969_v1  ;;  %v6973_v61 = vld [vmem:[#allocation14_spill] sm:$0xff] }
 0x4c8   :  { %v4225_v0 = vadd.f32 %v4144_v15, %v3795_v58  ;;  %v3289_v25 = vpop.f32.mrf.mxu2  ;;  %v3366_v33 = vadd.f32 %v3287_v52, %v2935_v47 }
 0x4ca   :  { %v4289_v48 = vpack.c.bf16 %v4225_v0, %v4225_v0  ;;  %v4470_v26 = vsel %vm348_vm1, %v4225_v0, 0.0  ;;  %v4551_v42 = vmul.f32 %v4225_v0, %v4225_v0 }
 0x4cb   :  { %v4471_v5 = vadd.f32 %v4470_v26, %v4469_v53 }
 0x4cc   :  { %4354 = vst.msk [vmem:[%s6882_s4 + $0xd4] sm:$0xf] %vm4300_vm4, %v4289_v48  ;;  %v4667_v28 = vsel %vm348_vm1, %v4551_v42, 0.0 }
 0x4cd   :  { %v4668_v54 = vadd.f32 %v4667_v28, %v4666_v44  ;;  %v3717_v7 = vpop.f32.mrf.mxu3  ;;  %v2858_v29 = vpop.f32.mrf.mxu1 }
 0x4ce   :  { %v3796_v59 = vadd.f32 %v3717_v7, %v3366_v33  ;;  %v2936_v14 = vadd.f32 %v2858_v29, %v6970_v10  ;;  %v4152_v34 = vpop.f32.mrf.mxu0  ;;  %v6974_v29 = vld [vmem:[#allocation16_spill] sm:$0xff] }
 0x4d0   :  { %v4226_v35 = vadd.f32 %v4147_v56, %v3796_v59  ;;  %v3292_v50 = vpop.f32.mrf.mxu2  ;;  %v3367_v3 = vadd.f32 %v3289_v25, %v2936_v14 }
 0x4d2   :  { %v4290_v62 = vpack.c.bf16 %v4226_v35, %v4226_v35  ;;  %v4472_v20 = vsel %vm348_vm1, %v4226_v35, 0.0  ;;  %v4552_v13 = vmul.f32 %v4226_v35, %v4226_v35 }
 0x4d3   :  { %v4473_v11 = vadd.f32 %v4472_v20, %v4471_v5 }
 0x4d4   :  { %4355 = vst.msk [vmem:[%s6882_s4 + $0xd8] sm:$0xf] %vm4300_vm4, %v4290_v62  ;;  %v4669_v43 = vsel %vm348_vm1, %v4552_v13, 0.0 }
 0x4d5   :  { %v4670_v46 = vadd.f32 %v4669_v43, %v4668_v54  ;;  %v3719_v41 = vpop.f32.mrf.mxu3  ;;  %v2861_v22 = vpop.f32.mrf.mxu1 }
 0x4d6   :  { %v3797_v51 = vadd.f32 %v3719_v41, %v3367_v3  ;;  %v2937_v45 = vadd.f32 %v2861_v22, %v6971_v55  ;;  %v4154_v39 = vpop.f32.mrf.mxu0  ;;  %v6975_v41 = vld [vmem:[#allocation18_spill] sm:$0xff] }
 0x4d8   :  { %v4227_v32 = vadd.f32 %v4149_v27, %v3797_v51  ;;  %v3294_v15 = vpop.f32.mrf.mxu2  ;;  %v3368_v40 = vadd.f32 %v3292_v50, %v2937_v45 }
 0x4da   :  { %v4291_v57 = vpack.c.bf16 %v4227_v32, %v4227_v32  ;;  %v4474_v63 = vsel %vm348_vm1, %v4227_v32, 0.0  ;;  %v4553_v23 = vmul.f32 %v4227_v32, %v4227_v32 }
 0x4db   :  { %v4475_v30 = vadd.f32 %v4474_v63, %v4473_v11 }
 0x4dc   :  { %4356 = vst.msk [vmem:[%s6882_s4 + $0xdc] sm:$0xf] %vm4300_vm4, %v4291_v57  ;;  %v4671_v6 = vsel %vm348_vm1, %v4553_v23, 0.0 }
 0x4dd   :  { %v4672_v36 = vadd.f32 %v4671_v6, %v4670_v46  ;;  %v3722_v19 = vpop.f32.mrf.mxu3  ;;  %v2863_v18 = vpop.f32.mrf.mxu1 }
 0x4de   :  { %v3798_v16 = vadd.f32 %v3722_v19, %v3368_v40  ;;  %v2938_v17 = vadd.f32 %v2863_v18, %v6972_v2  ;;  %v4157_v38 = vpop.f32.mrf.mxu0  ;;  %v6976_v19 = vld [vmem:[#allocation20_spill] sm:$0xff] }
 0x4e0   :  { %v4228_v31 = vadd.f32 %v4152_v34, %v3798_v16  ;;  %v3297_v56 = vpop.f32.mrf.mxu2  ;;  %v3369_v9 = vadd.f32 %v3294_v15, %v2938_v17 }
 0x4e2   :  { %v4292_v21 = vpack.c.bf16 %v4228_v31, %v4228_v31  ;;  %v4476_v24 = vsel %vm348_vm1, %v4228_v31, 0.0  ;;  %v4554_v4 = vmul.f32 %v4228_v31, %v4228_v31 }
 0x4e3   :  { %v4477_v52 = vadd.f32 %v4476_v24, %v4475_v30 }
 0x4e4   :  { %4357 = vst.msk [vmem:[%s6882_s4 + $0xe0] sm:$0xf] %vm4300_vm4, %v4292_v21  ;;  %v4673_v49 = vsel %vm348_vm1, %v4554_v4, 0.0 }
 0x4e5   :  { %v4674_v53 = vadd.f32 %v4673_v49, %v4672_v36  ;;  %v3724_v37 = vpop.f32.mrf.mxu3  ;;  %v2866_v12 = vpop.f32.mrf.mxu1 }
 0x4e6   :  { %v3799_v44 = vadd.f32 %v3724_v37, %v3369_v9  ;;  %v2939_v58 = vadd.f32 %v2866_v12, %v6973_v61  ;;  %v4159_v54 = vpop.f32.mrf.mxu0 }
 0x4e8   :  { %v4229_v60 = vadd.f32 %v4154_v39, %v3799_v44  ;;  %v3299_v47 = vpop.f32.mrf.mxu2  ;;  %v3370_v26 = vadd.f32 %v3297_v56, %v2939_v58 }
 0x4ea   :  { %v4293_v27 = vpack.c.bf16 %v4229_v60, %v4229_v60  ;;  %v4478_v0 = vsel %vm348_vm1, %v4229_v60, 0.0  ;;  %v4555_v1 = vmul.f32 %v4229_v60, %v4229_v60 }
 0x4eb   :  { %v4479_v25 = vadd.f32 %v4478_v0, %v4477_v52 }
 0x4ec   :  { %4358 = vst.msk [vmem:[%s6882_s4 + $0xe4] sm:$0xf] %vm4300_vm4, %v4293_v27  ;;  %v4675_v48 = vsel %vm348_vm1, %v4555_v1, 0.0 }
 0x4ed   :  { %v4676_v42 = vadd.f32 %v4675_v48, %v4674_v53  ;;  %v3727_v5 = vpop.f32.mrf.mxu3  ;;  %v2868_v28 = vpop.f32.mrf.mxu1 }
 0x4ee   :  { %v3800_v33 = vadd.f32 %v3727_v5, %v3370_v26  ;;  %v2940_v59 = vadd.f32 %v2868_v28, %v6974_v29  ;;  %v4162_v51 = vpop.f32.mrf.mxu0  ;;  %v6977_v26 = vld [vmem:[#allocation22_spill] sm:$0xff] }
 0x4f0   :  { %v4230_v7 = vadd.f32 %v4157_v38, %v3800_v33  ;;  %v3302_v62 = vpop.f32.mrf.mxu2  ;;  %v3371_v20 = vadd.f32 %v3299_v47, %v2940_v59 }
 0x4f2   :  { %v4294_v35 = vpack.c.bf16 %v4230_v7, %v4230_v7  ;;  %v4480_v10 = vsel %vm348_vm1, %v4230_v7, 0.0  ;;  %v4556_v14 = vmul.f32 %v4230_v7, %v4230_v7 }
 0x4f3   :  { %v4481_v50 = vadd.f32 %v4480_v10, %v4479_v25 }
 0x4f4   :  { %4359 = vst.msk [vmem:[%s6882_s4 + $0xe8] sm:$0xf] %vm4300_vm4, %v4294_v35  ;;  %v4677_v34 = vsel %vm348_vm1, %v4556_v14, 0.0 }
 0x4f5   :  { %v4678_v13 = vadd.f32 %v4677_v34, %v4676_v42  ;;  %v3729_v11 = vpop.f32.mrf.mxu3  ;;  %v2871_v43 = vpop.f32.mrf.mxu1 }
 0x4f6   :  { %v3801_v3 = vadd.f32 %v3729_v11, %v3371_v20  ;;  %v2941_v22 = vadd.f32 %v2871_v43, %v6975_v41  ;;  %v4164_v17 = vpop.f32.mrf.mxu0 }
 0x4f8   :  { %v4231_v46 = vadd.f32 %v4159_v54, %v3801_v3  ;;  %v3372_v63 = vadd.f32 %v3302_v62, %v2941_v22  ;;  %v3304_v40 = vpop.f32.mrf.mxu2 }
 0x4fa   :  { %v4295_v32 = vpack.c.bf16 %v4231_v46, %v4231_v46  ;;  %v4482_v55 = vsel %vm348_vm1, %v4231_v46, 0.0  ;;  %v4557_v45 = vmul.f32 %v4231_v46, %v4231_v46 }
 0x4fb   :  { %v4483_v15 = vadd.f32 %v4482_v55, %v4481_v50 }
 0x4fc   :  { %4360 = vst.msk [vmem:[%s6882_s4 + $0xec] sm:$0xf] %vm4300_vm4, %v4295_v32  ;;  %v4679_v57 = vsel %vm348_vm1, %v4557_v45, 0.0 }
 0x4fd   :  { %v4680_v23 = vadd.f32 %v4679_v57, %v4678_v13  ;;  %v3732_v39 = vpop.f32.mrf.mxu3  ;;  %v2873_v30 = vpop.f32.mrf.mxu1 }
 0x4fe   :  { %v3802_v6 = vadd.f32 %v3732_v39, %v3372_v63  ;;  %v2942_v18 = vadd.f32 %v2873_v30, %v6976_v19  ;;  %v4167_v27 = vpop.f32.mrf.mxu0 }
 0x500   :  { %v4232_v36 = vadd.f32 %v4162_v51, %v3802_v6  ;;  %v3373_v24 = vadd.f32 %v3304_v40, %v2942_v18  ;;  %v3307_v37 = vpop.f32.mrf.mxu2 }
 0x502   :  { %v4296_v16 = vpack.c.bf16 %v4232_v36, %v4232_v36  ;;  %v4484_v31 = vsel %vm348_vm1, %v4232_v36, 0.0  ;;  %v4558_v2 = vmul.f32 %v4232_v36, %v4232_v36 }
 0x503   :  { %v4485_v56 = vadd.f32 %v4484_v31, %v4483_v15 }
 0x504   :  { %4361 = vst.msk [vmem:[%s6882_s4 + $0xf0] sm:$0xf] %vm4300_vm4, %v4296_v16  ;;  %v4681_v21 = vsel %vm348_vm1, %v4558_v2, 0.0 }
 0x505   :  { %v4682_v4 = vadd.f32 %v4681_v21, %v4680_v23  ;;  %v3734_v52 = vpop.f32.mrf.mxu3  ;;  %v2876_v49 = vpop.f32.mrf.mxu1 }
 0x506   :  { %v3803_v9 = vadd.f32 %v3734_v52, %v3373_v24  ;;  %v2943_v53 = vadd.f32 %v2876_v49, %v6244_v8  ;;  %v4169_v50 = vpop.f32.mrf.mxu0 }
 0x508   :  { %v4233_v38 = vadd.f32 %v4164_v17, %v3803_v9  ;;  %v3374_v0 = vadd.f32 %v3307_v37, %v2943_v53  ;;  %v3309_v54 = vpop.f32.mrf.mxu2 }
 0x50a   :  { %v4297_v12 = vpack.c.bf16 %v4233_v38, %v4233_v38  ;;  %v4486_v44 = vsel %vm348_vm1, %v4233_v38, 0.0  ;;  %v4559_v60 = vmul.f32 %v4233_v38, %v4233_v38 }
 0x50b   :  { %v4487_v61 = vadd.f32 %v4486_v44, %v4485_v56 }
 0x50c   :  { %4362 = vst.msk [vmem:[%s6882_s4 + $0xf4] sm:$0xf] %vm4300_vm4, %v4297_v12  ;;  %v4683_v58 = vsel %vm348_vm1, %v4559_v60, 0.0 }
 0x50d   :  { %v4684_v1 = vadd.f32 %v4683_v58, %v4682_v4  ;;  %v3737_v47 = vpop.f32.mrf.mxu3  ;;  %v2878_v25 = vpop.f32.mrf.mxu1 }
 0x50e   :  { %v3804_v48 = vadd.f32 %v3737_v47, %v3374_v0  ;;  %v2944_v42 = vadd.f32 %v2878_v25, %v6977_v26 }
 0x510   :  { %v4234_v8 = vadd.f32 %v4167_v27, %v3804_v48  ;;  %v3375_v59 = vadd.f32 %v3309_v54, %v2944_v42 }
 0x512   :  { %v4298_v5 = vpack.c.bf16 %v4234_v8, %v4234_v8  ;;  %v4488_v28 = vsel %vm348_vm1, %v4234_v8, 0.0  ;;  %v4560_v33 = vmul.f32 %v4234_v8, %v4234_v8 }
 0x513   :  { %v4489_v7 = vadd.f32 %v4488_v28, %v4487_v61 }
 0x514   :  { %4363 = vst.msk [vmem:[%s6882_s4 + $0xf8] sm:$0xf] %vm4300_vm4, %v4298_v5  ;;  %v4685_v29 = vsel %vm348_vm1, %v4560_v33, 0.0 }
 0x515   :  { %v3739_v35 = vpop.f32.mrf.mxu3  ;;  %v4686_v10 = vadd.f32 %v4685_v29, %v4684_v1 }
 0x516   :  { %v3805_v14 = vadd.f32 %v3739_v35, %v3375_v59 }
 0x518   :  { %v4235_v34 = vadd.f32 %v4169_v50, %v3805_v14 }
 0x51a   :  { %v4299_v62 = vpack.c.bf16 %v4235_v34, %v4235_v34  ;;  %v4490_v20 = vsel %vm348_vm1, %v4235_v34, 0.0  ;;  %v4561_v13 = vmul.f32 %v4235_v34, %v4235_v34 }
 0x51b   :  { %v4491_v11 = vadd.f32 %v4490_v20, %v4489_v7 }
 0x51c   :  { %4364 = vst.msk [vmem:[%s6882_s4 + $0xfc] sm:$0xf] %vm4300_vm4, %v4299_v62  ;;  %v4687_v43 = vsel %vm348_vm1, %v4561_v13, 0.0 }
 0x51d   :  { %v4688_v3 = vadd.f32 %v4687_v43, %v4686_v10  ;;  %v4492_v45 = vrot.slane %v4491_v11, 4 }
 0x51f   :  { %v4689_v46 = vrot.slane %v4688_v3, 4  ;;  %v4493_v15 = vadd.f32 %v4492_v45, %v4491_v11 }
 0x521   :  { %v4690_v41 = vadd.f32 %v4689_v46, %v4688_v3  ;;  %v4494_v57 = vrot.slane %v4493_v15, 2 }
 0x523   :  { %v4691_v22 = vrot.slane %v4690_v41, 2  ;;  %v4495_v63 = vadd.f32 %v4494_v57, %v4493_v15 }
 0x525   :  { %v4692_v51 = vadd.f32 %v4691_v22, %v4690_v41  ;;  %v4496_v23 = vrot.slane %v4495_v63, 1 }
 0x527   :  { %v4693_v32 = vrot.slane %v4692_v51, 1  ;;  %v4497_v39 = vadd.f32 %v4496_v23, %v4495_v63 }
 0x529   :  { %v4694_v55 = vadd.f32 %v4693_v32, %v4692_v51 }
 0x52b   :  { %4696 = vrot.lane.b32.xlu0 %v4694_v55, %s5175_s16 }
 0x59d   :  { %v4697_v30 = vpop.permute.xlu0 %4696 }
 0x59e   :  { %v4699_v6 = vsel %vm348_vm1, %v4497_v39, %v4697_v30 }
 0x59f   :  { %4701 = vst.msk [vmem:[%s6883_s5] sm:$0x1] %vm4700_vm5, %v4699_v6 }

</bundles_post_ra>
